<compile_context>
chip_gen: v5e
topology: v5e:2x2
jax: 0.10.0
libtpu: 0.0.40
codegen_flags: <defaults>
</compile_context>

<pallas_src>
import jax
import jax.numpy as jnp
from jax.experimental import pallas as pl
from jax.experimental.pallas import tpu as pltpu

# ---- module hyper-params (small stand-ins; miipher uses hidden_dim=1024) ----
B      = 2            # batch
T      = 16           # cleaning-feature time steps
S      = 8            # speaker/phone-feature time steps
D      = 128          # hidden_dim (stand-in for 1024 so shapes stay small)
H      = 4            # num_heads
DH     = D // H
FFN    = 4 * D        # conformer feed-forward dim
KSIZE  = 31           # depthwise conv kernel size
LN_EPS = 1e-5
BN_EPS = 1e-5
_SCALE = 1.0 / (DH ** 0.5)


# --------------------------- in-kernel helpers -------------------------------

def _sigmoid(x):
    """Numerically stable logistic; exp + approx reciprocal run on the EUP."""
    z = jnp.exp(-jnp.abs(x))
    r = pl.reciprocal(1.0 + z, approx=True)
    return jnp.where(x >= 0.0, r, z * r)


def _ln(x, g, b):
    mu = jnp.mean(x, axis=-1, keepdims=True)
    xc = x - mu
    var = jnp.mean(xc * xc, axis=-1, keepdims=True)
    return xc * jax.lax.rsqrt(var + LN_EPS) * g + b


def _matmul(a_f32, w_bf16, bias_f32):
    """bf16 MXU matmul with f32 accumulation + f32 bias."""
    return jnp.dot(a_f32.astype(jnp.bfloat16), w_bf16,
                   preferred_element_type=jnp.float32) + bias_f32


def _cross_attention(xq2, xkv2, n_b, lq, lk, wq, bq, wkv, bkv, wo, bo):
    """nn.MultiheadAttention(batch_first) — batch = n_b, query len lq, key len lk."""
    q = _matmul(xq2, wq, bq)                      # (n_b*lq, D)
    kv = _matmul(xkv2, wkv, bkv)                  # (n_b*lk, 2D)
    q3 = (q * _SCALE).reshape(n_b, lq, D)
    k3 = kv[:, :D].reshape(n_b, lk, D)
    v3 = kv[:, D:].reshape(n_b, lk, D)
    heads = []
    for h in range(H):
        sl = slice(h * DH, (h + 1) * DH)
        qh = q3[:, :, sl].astype(jnp.bfloat16)
        kh = k3[:, :, sl].astype(jnp.bfloat16)
        vh = v3[:, :, sl].astype(jnp.bfloat16)
        s = jnp.einsum('bqd,bkd->bqk', qh, kh,
                       preferred_element_type=jnp.float32)       # (n_b, lq, lk)
        s = s - jnp.max(s, axis=-1, keepdims=True)
        e = jnp.exp(s)
        p = e * pl.reciprocal(jnp.sum(e, axis=-1, keepdims=True), approx=True)
        heads.append(jnp.einsum('bqk,bkd->bqd', p.astype(jnp.bfloat16), vh,
                                preferred_element_type=jnp.float32))
    ctx = jnp.concatenate(heads, axis=-1).reshape(n_b * lq, D)
    return _matmul(ctx, wo, bo)                   # single full-K output proj


def _self_attention_seq_axis0(c3, wqkv, bqkv, wo, bo, n_seq, n_batch):
    """MHA where the *sequence* axis is axis 0 (length n_seq = outer batch B)
    and the batch axis is axis 1 — reproduces the ConformerLayer layout
    mismatch.  n_seq is tiny, so scores are computed as elementwise
    multiply + lane reductions (no transposes, no relayouts)."""
    qkv = _matmul(c3.reshape(n_seq * n_batch, D), wqkv, bqkv)
    qkv = qkv.reshape(n_seq, n_batch, 3 * D)
    q3 = qkv[:, :, 0 * D:1 * D] * _SCALE
    k3 = qkv[:, :, 1 * D:2 * D]
    v3 = qkv[:, :, 2 * D:3 * D]
    # Hoist all per-head / per-position slices out of the (i, j) loops so each
    # lane slice is traced exactly once.
    per_head = []
    for h in range(H):
        sl = slice(h * DH, (h + 1) * DH)
        per_head.append(([q3[i, :, sl] for i in range(n_seq)],
                         [k3[j, :, sl] for j in range(n_seq)],
                         [v3[j, :, sl] for j in range(n_seq)]))
    rows = []
    for i in range(n_seq):
        head_ctx = []
        for h in range(H):
            qh, kh, vh = per_head[h]
            s_cols = [jnp.sum(qh[i] * kh[j], axis=-1, keepdims=True)
                      for j in range(n_seq)]                     # n_seq x (n_batch, 1)
            m = s_cols[0]
            for j in range(1, n_seq):
                m = jnp.maximum(m, s_cols[j])
            e_cols = [jnp.exp(s_cols[j] - m) for j in range(n_seq)]
            denom = e_cols[0]
            for j in range(1, n_seq):
                denom = denom + e_cols[j]
            inv = pl.reciprocal(denom, approx=True)
            ctx_h = (e_cols[0] * inv) * vh[0]
            for j in range(1, n_seq):
                ctx_h = ctx_h + (e_cols[j] * inv) * vh[j]
            head_ctx.append(ctx_h)                               # (n_batch, DH)
        rows.append(jnp.concatenate(head_ctx, axis=-1).reshape(1, n_batch, D))
    ctx = jnp.concatenate(rows, axis=0).reshape(n_seq * n_batch, D)
    return _matmul(ctx, wo, bo)


def _ffn(x2, g, b, w1, b1, w2, b2):
    """torchaudio _FeedForwardModule (LN -> Linear -> SiLU -> Linear)."""
    y = _ln(x2, g, b)
    h = _matmul(y, w1, b1)
    h = h * _sigmoid(h)                                          # SiLU
    return _matmul(h, w2, b2)


def _conv_module(c2, n_seq, n_batch, g, b, w1, b1, wdw, bdw, bns, bnsh, w2, b2):
    """torchaudio _ConvolutionModule; depthwise conv runs along axis 0 (len n_seq)."""
    y = _ln(c2, g, b)
    y = _matmul(y, w1, b1)                                       # (rows, 2D)
    glu = y[:, :D] * _sigmoid(y[:, D:])                          # GLU over channels
    glu3 = glu.reshape(n_seq, n_batch, D)
    pad = (KSIZE - 1) // 2
    taps = {}                      # memoize tap rows shared between outputs
    def _tap(j):
        if j not in taps:
            taps[j] = wdw[j:j + 1, :]
        return taps[j]
    outs = []
    for i in range(n_seq):
        acc = None
        for j in range(KSIZE):                # only in-range taps are evaluated
            src = i + j - pad
            if 0 <= src < n_seq:
                term = glu3[src] * _tap(j)
                acc = term if acc is None else acc + term
        outs.append((acc + bdw).reshape(1, n_batch, D))
    z = jnp.concatenate(outs, axis=0).reshape(n_seq * n_batch, D)
    # BatchNorm1d folded to scale/shift (eval mode), then SiLU.
    # TODO(synk): training-mode BatchNorm batch statistics not reproduced.
    z = z * bns + bnsh
    z = z * _sigmoid(z)
    return _matmul(z, w2, b2)


# --------------------------- fused Pallas kernel -----------------------------

def _fused_kernel(
    x_ref, spk_ref,
    cx_wq, cx_bq, cx_wkv, cx_bkv, cx_wo, cx_bo,
    ln_g, ln_b,
    f1_g, f1_b, f1_w1, f1_b1, f1_w2, f1_b2,
    sa_g, sa_b, sa_wqkv, sa_bqkv, sa_wo, sa_bo,
    cv_g, cv_b, cv_w1, cv_b1, cv_wdw, cv_bdw, cv_bns, cv_bnsh, cv_w2, cv_b2,
    f2_g, f2_b, f2_w1, f2_b1, f2_w2, f2_b2,
    fl_g, fl_b,
    out_ref,
):
    x2 = x_ref[...].reshape(B * T, D)          # (B*T, D)
    spk2 = spk_ref[...].reshape(B * S, D)      # (B*S, D)

    # cleaning_feature += cross_attention(cleaning, spk, spk)
    x2 = x2 + _cross_attention(x2, spk2, B, T, S,
                               cx_wq[...], cx_bq[...], cx_wkv[...], cx_bkv[...],
                               cx_wo[...], cx_bo[...])
    # cleaning_feature = layer_norm(cleaning_feature)
    x2 = _ln(x2, ln_g[...], ln_b[...])

    # --- ConformerLayer (axis 0 = its "time", axis 1 = its "batch") ---
    c2 = x2 + 0.5 * _ffn(x2, f1_g[...], f1_b[...], f1_w1[...], f1_b1[...],
                         f1_w2[...], f1_b2[...])
    c_ln = _ln(c2, sa_g[...], sa_b[...])
    c2 = c2 + _self_attention_seq_axis0(c_ln.reshape(B, T, D),
                                        sa_wqkv[...], sa_bqkv[...],
                                        sa_wo[...], sa_bo[...], B, T)
    c2 = c2 + _conv_module(c2, B, T,
                           cv_g[...], cv_b[...], cv_w1[...], cv_b1[...],
                           cv_wdw[...], cv_bdw[...], cv_bns[...], cv_bnsh[...],
                           cv_w2[...], cv_b2[...])
    c2 = c2 + 0.5 * _ffn(c2, f2_g[...], f2_b[...], f2_w1[...], f2_b1[...],
                         f2_w2[...], f2_b2[...])
    c2 = _ln(c2, fl_g[...], fl_b[...])

    # cleaning_feature += conformer_block(cleaning_feature)
    out_ref[...] = (x2 + c2).reshape(B, T, D)


# --------------------------- wrapper -----------------------------------------

def feature_cleaner_block(cleaning, speaker_phone, params, cleaning_lengths=None):
    """Pallas version of FeatureCleanerBlock.forward (lengths=None path)."""
    # TODO(synk): key_padding_mask built from cleaning_feature_lengths is not
    # applied (the example uses lengths=None, matching the reference None path).
    assert cleaning.shape == (B, T, D) and speaker_phone.shape == (B, S, D)
    vmem = pl.BlockSpec(memory_space=pltpu.MemorySpace.VMEM)
    return pl.pallas_call(
        _fused_kernel,
        out_shape=jax.ShapeDtypeStruct((B, T, D), jnp.float32),
        in_specs=[vmem] * (2 + len(params)),
        out_specs=vmem,
    )(cleaning, speaker_phone, *params)


# --------------------------- parameter init ----------------------------------

def init_params(key):
    keys = iter(jax.random.split(key, 24))

    def w(shape, scale=0.05):          # matmul weights stored in bf16
        return (scale * jax.random.normal(next(keys), shape, jnp.float32)
                ).astype(jnp.bfloat16)

    def f32(shape, scale=0.05):        # biases / depthwise weights in f32
        return scale * jax.random.normal(next(keys), shape, jnp.float32)

    ones = lambda s: jnp.ones(s, jnp.float32)
    zeros = lambda s: jnp.zeros(s, jnp.float32)

    bn_scale = ones((1, D)) / jnp.sqrt(1.0 + BN_EPS)   # BN eval: mean=0, var=1
    bn_shift = zeros((1, D))

    return (
        # cross-attention: q-proj, kv-proj (packed), out-proj  (biases zero like torch)
        w((D, D)), zeros((1, D)),
        w((D, 2 * D)), zeros((1, 2 * D)),
        w((D, D)), zeros((1, D)),
        # outer LayerNorm (nn.LayerNorm(1024) -> LayerNorm(D) at stand-in size)
        ones((1, D)), zeros((1, D)),
        # conformer ffn1: LN, W1, b1, W2, b2
        ones((1, D)), zeros((1, D)),
        w((D, FFN)), f32((1, FFN)),
        w((FFN, D)), f32((1, D)),
        # self-attn LayerNorm + MHA (packed qkv in-proj, out-proj)
        ones((1, D)), zeros((1, D)),
        w((D, 3 * D)), zeros((1, 3 * D)),
        w((D, D)), zeros((1, D)),
        # conv module: LN, pointwise1 (GLU), depthwise, folded BN, pointwise2
        ones((1, D)), zeros((1, D)),
        w((D, 2 * D)), f32((1, 2 * D)),
        f32((KSIZE, D)), f32((1, D)),
        bn_scale, bn_shift,
        w((D, D)), f32((1, D)),
        # conformer ffn2
        ones((1, D)), zeros((1, D)),
        w((D, FFN)), f32((1, FFN)),
        w((FFN, D)), f32((1, D)),
        # final LayerNorm
        ones((1, D)), zeros((1, D)),
    )


if __name__ == "__main__":
    key = jax.random.PRNGKey(0)
    kp, kc, ks = jax.random.split(key, 3)
    params = init_params(kp)

    cleaning_feature = jax.random.normal(kc, (B, T, D), jnp.float32)
    speaker_phone_feature = jax.random.normal(ks, (B, S, D), jnp.float32)

    out = feature_cleaner_block(cleaning_feature, speaker_phone_feature, params)
    out = jax.block_until_ready(out)
    assert out.shape == (B, T, D) and out.dtype == jnp.float32
    assert bool(jnp.all(jnp.isfinite(out)))
    print("KERNEL_OK")
</pallas_src>

<mosaic_0001>
module attributes {stable_mosaic.version = 11 : i64} {
  func.func @_fused_kernel(%arg0: memref<2x16x128xf32, #tpu.memory_space<vmem>>, %arg1: memref<2x8x128xf32, #tpu.memory_space<vmem>>, %arg2: memref<128x128xbf16, #tpu.memory_space<vmem>>, %arg3: memref<1x128xf32, #tpu.memory_space<vmem>>, %arg4: memref<128x256xbf16, #tpu.memory_space<vmem>>, %arg5: memref<1x256xf32, #tpu.memory_space<vmem>>, %arg6: memref<128x128xbf16, #tpu.memory_space<vmem>>, %arg7: memref<1x128xf32, #tpu.memory_space<vmem>>, %arg8: memref<1x128xf32, #tpu.memory_space<vmem>>, %arg9: memref<1x128xf32, #tpu.memory_space<vmem>>, %arg10: memref<1x128xf32, #tpu.memory_space<vmem>>, %arg11: memref<1x128xf32, #tpu.memory_space<vmem>>, %arg12: memref<128x512xbf16, #tpu.memory_space<vmem>>, %arg13: memref<1x512xf32, #tpu.memory_space<vmem>>, %arg14: memref<512x128xbf16, #tpu.memory_space<vmem>>, %arg15: memref<1x128xf32, #tpu.memory_space<vmem>>, %arg16: memref<1x128xf32, #tpu.memory_space<vmem>>, %arg17: memref<1x128xf32, #tpu.memory_space<vmem>>, %arg18: memref<128x384xbf16, #tpu.memory_space<vmem>>, %arg19: memref<1x384xf32, #tpu.memory_space<vmem>>, %arg20: memref<128x128xbf16, #tpu.memory_space<vmem>>, %arg21: memref<1x128xf32, #tpu.memory_space<vmem>>, %arg22: memref<1x128xf32, #tpu.memory_space<vmem>>, %arg23: memref<1x128xf32, #tpu.memory_space<vmem>>, %arg24: memref<128x256xbf16, #tpu.memory_space<vmem>>, %arg25: memref<1x256xf32, #tpu.memory_space<vmem>>, %arg26: memref<31x128xf32, #tpu.memory_space<vmem>>, %arg27: memref<1x128xf32, #tpu.memory_space<vmem>>, %arg28: memref<1x128xf32, #tpu.memory_space<vmem>>, %arg29: memref<1x128xf32, #tpu.memory_space<vmem>>, %arg30: memref<128x128xbf16, #tpu.memory_space<vmem>>, %arg31: memref<1x128xf32, #tpu.memory_space<vmem>>, %arg32: memref<1x128xf32, #tpu.memory_space<vmem>>, %arg33: memref<1x128xf32, #tpu.memory_space<vmem>>, %arg34: memref<128x512xbf16, #tpu.memory_space<vmem>>, %arg35: memref<1x512xf32, #tpu.memory_space<vmem>>, %arg36: memref<512x128xbf16, #tpu.memory_space<vmem>>, %arg37: memref<1x128xf32, #tpu.memory_space<vmem>>, %arg38: memref<1x128xf32, #tpu.memory_space<vmem>>, %arg39: memref<1x128xf32, #tpu.memory_space<vmem>>, %arg40: memref<2x16x128xf32, #tpu.memory_space<vmem>>) attributes {dimension_semantics = [], scalar_prefetch = 0 : i64, scratch_operands = 0 : i64, tpu.core_type = #tpu.core_type<tc>} {
    %c0 = arith.constant 0 : index
    %c0_0 = arith.constant 0 : index
    %c0_1 = arith.constant 0 : index
    %0 = vector.load %arg0[%c0, %c0_0, %c0_1] : memref<2x16x128xf32, #tpu.memory_space<vmem>>, vector<2x16x128xf32>
    %1 = vector.shape_cast %0 : vector<2x16x128xf32> to vector<32x128xf32>
    %c0_2 = arith.constant 0 : index
    %c0_3 = arith.constant 0 : index
    %c0_4 = arith.constant 0 : index
    %2 = vector.load %arg1[%c0_2, %c0_3, %c0_4] : memref<2x8x128xf32, #tpu.memory_space<vmem>>, vector<2x8x128xf32>
    %3 = vector.shape_cast %2 : vector<2x8x128xf32> to vector<16x128xf32>
    %c0_5 = arith.constant 0 : index
    %c0_6 = arith.constant 0 : index
    %4 = vector.load %arg2[%c0_5, %c0_6] : memref<128x128xbf16, #tpu.memory_space<vmem>>, vector<128x128xbf16>
    %c0_7 = arith.constant 0 : index
    %c0_8 = arith.constant 0 : index
    %5 = vector.load %arg3[%c0_7, %c0_8] : memref<1x128xf32, #tpu.memory_space<vmem>>, vector<1x128xf32>
    %c0_9 = arith.constant 0 : index
    %c0_10 = arith.constant 0 : index
    %6 = vector.load %arg4[%c0_9, %c0_10] : memref<128x256xbf16, #tpu.memory_space<vmem>>, vector<128x256xbf16>
    %c0_11 = arith.constant 0 : index
    %c0_12 = arith.constant 0 : index
    %7 = vector.load %arg5[%c0_11, %c0_12] : memref<1x256xf32, #tpu.memory_space<vmem>>, vector<1x256xf32>
    %c0_13 = arith.constant 0 : index
    %c0_14 = arith.constant 0 : index
    %8 = vector.load %arg6[%c0_13, %c0_14] : memref<128x128xbf16, #tpu.memory_space<vmem>>, vector<128x128xbf16>
    %c0_15 = arith.constant 0 : index
    %c0_16 = arith.constant 0 : index
    %9 = vector.load %arg7[%c0_15, %c0_16] : memref<1x128xf32, #tpu.memory_space<vmem>>, vector<1x128xf32>
    %10 = arith.truncf %1 : vector<32x128xf32> to vector<32x128xbf16>
    %cst = arith.constant dense<0.000000e+00> : vector<32x128xf32>
    %11 = tpu.matmul %10, %4, %cst {dimension_numbers = #tpu.dot_dimension_numbers<[1], [0], [0], [1], [0, 0, 1, 1], [], []>} : vector<32x128xbf16>, vector<128x128xbf16>, vector<32x128xf32> -> vector<32x128xf32>
    %12 = vector.broadcast %5 : vector<1x128xf32> to vector<32x128xf32>
    %13 = arith.addf %11, %12 : vector<32x128xf32>
    %14 = arith.truncf %3 : vector<16x128xf32> to vector<16x128xbf16>
    %cst_17 = arith.constant dense<0.000000e+00> : vector<16x256xf32>
    %15 = tpu.matmul %14, %6, %cst_17 {dimension_numbers = #tpu.dot_dimension_numbers<[1], [0], [0], [1], [0, 0, 1, 1], [], []>} : vector<16x128xbf16>, vector<128x256xbf16>, vector<16x256xf32> -> vector<16x256xf32>
    %16 = vector.broadcast %7 : vector<1x256xf32> to vector<16x256xf32>
    %17 = arith.addf %15, %16 : vector<16x256xf32>
    %cst_18 = arith.constant 0.176776692 : f32
    %18 = vector.broadcast %cst_18 : f32 to vector<32x128xf32>
    %19 = arith.mulf %13, %18 : vector<32x128xf32>
    %20 = vector.shape_cast %19 : vector<32x128xf32> to vector<2x16x128xf32>
    %21 = vector.extract_strided_slice %17 {offsets = [0, 0], sizes = [16, 128], strides = [1, 1]} : vector<16x256xf32> to vector<16x128xf32>
    %22 = vector.shape_cast %21 : vector<16x128xf32> to vector<2x8x128xf32>
    %23 = vector.extract_strided_slice %17 {offsets = [0, 128], sizes = [16, 128], strides = [1, 1]} : vector<16x256xf32> to vector<16x128xf32>
    %24 = vector.shape_cast %23 : vector<16x128xf32> to vector<2x8x128xf32>
    %25 = vector.extract_strided_slice %20 {offsets = [0, 0, 0], sizes = [2, 16, 32], strides = [1, 1, 1]} : vector<2x16x128xf32> to vector<2x16x32xf32>
    %26 = arith.truncf %25 : vector<2x16x32xf32> to vector<2x16x32xbf16>
    %27 = vector.extract_strided_slice %22 {offsets = [0, 0, 0], sizes = [2, 8, 32], strides = [1, 1, 1]} : vector<2x8x128xf32> to vector<2x8x32xf32>
    %28 = arith.truncf %27 : vector<2x8x32xf32> to vector<2x8x32xbf16>
    %29 = vector.extract_strided_slice %24 {offsets = [0, 0, 0], sizes = [2, 8, 32], strides = [1, 1, 1]} : vector<2x8x128xf32> to vector<2x8x32xf32>
    %30 = arith.truncf %29 : vector<2x8x32xf32> to vector<2x8x32xbf16>
    "tpu.trace_start"() <{level = 10 : i32, message = "bqd,bkd->bqk"}> : () -> ()
    %cst_19 = arith.constant dense<0.000000e+00> : vector<2x16x8xf32>
    %31 = tpu.matmul %26, %28, %cst_19 {dimension_numbers = #tpu.dot_dimension_numbers<[2], [2], [1], [1], [0, 0, 0, 1, 1, 1], [0], [0]>} : vector<2x16x32xbf16>, vector<2x8x32xbf16>, vector<2x16x8xf32> -> vector<2x16x8xf32>
    "tpu.trace_stop"() : () -> ()
    %cst_20 = arith.constant dense<0xFF800000> : vector<2x16xf32>
    %32 = vector.multi_reduction <maximumf>, %31, %cst_20 [2] : vector<2x16x8xf32> to vector<2x16xf32>
    %33 = vector.shape_cast %32 : vector<2x16xf32> to vector<2x16x1xf32>
    %34 = vector.broadcast %33 : vector<2x16x1xf32> to vector<2x16x8xf32>
    %35 = arith.subf %31, %34 : vector<2x16x8xf32>
    %36 = math.exp %35 : vector<2x16x8xf32>
    %cst_21 = arith.constant dense<0.000000e+00> : vector<2x16xf32>
    %37 = vector.multi_reduction <add>, %36, %cst_21 [2] : vector<2x16x8xf32> to vector<2x16xf32>
    %38 = vector.shape_cast %37 : vector<2x16xf32> to vector<2x16x1xf32>
    %39 = tpu.reciprocal %38 {approx = true} : vector<2x16x1xf32> -> vector<2x16x1xf32>
    %40 = vector.broadcast %39 : vector<2x16x1xf32> to vector<2x16x8xf32>
    %41 = arith.mulf %36, %40 : vector<2x16x8xf32>
    %42 = arith.truncf %41 : vector<2x16x8xf32> to vector<2x16x8xbf16>
    "tpu.trace_start"() <{level = 10 : i32, message = "bqk,bkd->bqd"}> : () -> ()
    %cst_22 = arith.constant dense<0.000000e+00> : vector<2x16x32xf32>
    %43 = tpu.matmul %42, %30, %cst_22 {dimension_numbers = #tpu.dot_dimension_numbers<[2], [1], [1], [2], [0, 0, 0, 1, 1, 2], [0], [0]>} : vector<2x16x8xbf16>, vector<2x8x32xbf16>, vector<2x16x32xf32> -> vector<2x16x32xf32>
    "tpu.trace_stop"() : () -> ()
    %44 = vector.extract_strided_slice %20 {offsets = [0, 0, 32], sizes = [2, 16, 32], strides = [1, 1, 1]} : vector<2x16x128xf32> to vector<2x16x32xf32>
    %45 = arith.truncf %44 : vector<2x16x32xf32> to vector<2x16x32xbf16>
    %46 = vector.extract_strided_slice %22 {offsets = [0, 0, 32], sizes = [2, 8, 32], strides = [1, 1, 1]} : vector<2x8x128xf32> to vector<2x8x32xf32>
    %47 = arith.truncf %46 : vector<2x8x32xf32> to vector<2x8x32xbf16>
    %48 = vector.extract_strided_slice %24 {offsets = [0, 0, 32], sizes = [2, 8, 32], strides = [1, 1, 1]} : vector<2x8x128xf32> to vector<2x8x32xf32>
    %49 = arith.truncf %48 : vector<2x8x32xf32> to vector<2x8x32xbf16>
    "tpu.trace_start"() <{level = 10 : i32, message = "bqd,bkd->bqk"}> : () -> ()
    %cst_23 = arith.constant dense<0.000000e+00> : vector<2x16x8xf32>
    %50 = tpu.matmul %45, %47, %cst_23 {dimension_numbers = #tpu.dot_dimension_numbers<[2], [2], [1], [1], [0, 0, 0, 1, 1, 1], [0], [0]>} : vector<2x16x32xbf16>, vector<2x8x32xbf16>, vector<2x16x8xf32> -> vector<2x16x8xf32>
    "tpu.trace_stop"() : () -> ()
    %cst_24 = arith.constant dense<0xFF800000> : vector<2x16xf32>
    %51 = vector.multi_reduction <maximumf>, %50, %cst_24 [2] : vector<2x16x8xf32> to vector<2x16xf32>
    %52 = vector.shape_cast %51 : vector<2x16xf32> to vector<2x16x1xf32>
    %53 = vector.broadcast %52 : vector<2x16x1xf32> to vector<2x16x8xf32>
    %54 = arith.subf %50, %53 : vector<2x16x8xf32>
    %55 = math.exp %54 : vector<2x16x8xf32>
    %cst_25 = arith.constant dense<0.000000e+00> : vector<2x16xf32>
    %56 = vector.multi_reduction <add>, %55, %cst_25 [2] : vector<2x16x8xf32> to vector<2x16xf32>
    %57 = vector.shape_cast %56 : vector<2x16xf32> to vector<2x16x1xf32>
    %58 = tpu.reciprocal %57 {approx = true} : vector<2x16x1xf32> -> vector<2x16x1xf32>
    %59 = vector.broadcast %58 : vector<2x16x1xf32> to vector<2x16x8xf32>
    %60 = arith.mulf %55, %59 : vector<2x16x8xf32>
    %61 = arith.truncf %60 : vector<2x16x8xf32> to vector<2x16x8xbf16>
    "tpu.trace_start"() <{level = 10 : i32, message = "bqk,bkd->bqd"}> : () -> ()
    %cst_26 = arith.constant dense<0.000000e+00> : vector<2x16x32xf32>
    %62 = tpu.matmul %61, %49, %cst_26 {dimension_numbers = #tpu.dot_dimension_numbers<[2], [1], [1], [2], [0, 0, 0, 1, 1, 2], [0], [0]>} : vector<2x16x8xbf16>, vector<2x8x32xbf16>, vector<2x16x32xf32> -> vector<2x16x32xf32>
    "tpu.trace_stop"() : () -> ()
    %63 = vector.extract_strided_slice %20 {offsets = [0, 0, 64], sizes = [2, 16, 32], strides = [1, 1, 1]} : vector<2x16x128xf32> to vector<2x16x32xf32>
    %64 = arith.truncf %63 : vector<2x16x32xf32> to vector<2x16x32xbf16>
    %65 = vector.extract_strided_slice %22 {offsets = [0, 0, 64], sizes = [2, 8, 32], strides = [1, 1, 1]} : vector<2x8x128xf32> to vector<2x8x32xf32>
    %66 = arith.truncf %65 : vector<2x8x32xf32> to vector<2x8x32xbf16>
    %67 = vector.extract_strided_slice %24 {offsets = [0, 0, 64], sizes = [2, 8, 32], strides = [1, 1, 1]} : vector<2x8x128xf32> to vector<2x8x32xf32>
    %68 = arith.truncf %67 : vector<2x8x32xf32> to vector<2x8x32xbf16>
    "tpu.trace_start"() <{level = 10 : i32, message = "bqd,bkd->bqk"}> : () -> ()
    %cst_27 = arith.constant dense<0.000000e+00> : vector<2x16x8xf32>
    %69 = tpu.matmul %64, %66, %cst_27 {dimension_numbers = #tpu.dot_dimension_numbers<[2], [2], [1], [1], [0, 0, 0, 1, 1, 1], [0], [0]>} : vector<2x16x32xbf16>, vector<2x8x32xbf16>, vector<2x16x8xf32> -> vector<2x16x8xf32>
    "tpu.trace_stop"() : () -> ()
    %cst_28 = arith.constant dense<0xFF800000> : vector<2x16xf32>
    %70 = vector.multi_reduction <maximumf>, %69, %cst_28 [2] : vector<2x16x8xf32> to vector<2x16xf32>
    %71 = vector.shape_cast %70 : vector<2x16xf32> to vector<2x16x1xf32>
    %72 = vector.broadcast %71 : vector<2x16x1xf32> to vector<2x16x8xf32>
    %73 = arith.subf %69, %72 : vector<2x16x8xf32>
    %74 = math.exp %73 : vector<2x16x8xf32>
    %cst_29 = arith.constant dense<0.000000e+00> : vector<2x16xf32>
    %75 = vector.multi_reduction <add>, %74, %cst_29 [2] : vector<2x16x8xf32> to vector<2x16xf32>
    %76 = vector.shape_cast %75 : vector<2x16xf32> to vector<2x16x1xf32>
    %77 = tpu.reciprocal %76 {approx = true} : vector<2x16x1xf32> -> vector<2x16x1xf32>
    %78 = vector.broadcast %77 : vector<2x16x1xf32> to vector<2x16x8xf32>
    %79 = arith.mulf %74, %78 : vector<2x16x8xf32>
    %80 = arith.truncf %79 : vector<2x16x8xf32> to vector<2x16x8xbf16>
    "tpu.trace_start"() <{level = 10 : i32, message = "bqk,bkd->bqd"}> : () -> ()
    %cst_30 = arith.constant dense<0.000000e+00> : vector<2x16x32xf32>
    %81 = tpu.matmul %80, %68, %cst_30 {dimension_numbers = #tpu.dot_dimension_numbers<[2], [1], [1], [2], [0, 0, 0, 1, 1, 2], [0], [0]>} : vector<2x16x8xbf16>, vector<2x8x32xbf16>, vector<2x16x32xf32> -> vector<2x16x32xf32>
    "tpu.trace_stop"() : () -> ()
    %82 = vector.extract_strided_slice %20 {offsets = [0, 0, 96], sizes = [2, 16, 32], strides = [1, 1, 1]} : vector<2x16x128xf32> to vector<2x16x32xf32>
    %83 = arith.truncf %82 : vector<2x16x32xf32> to vector<2x16x32xbf16>
    %84 = vector.extract_strided_slice %22 {offsets = [0, 0, 96], sizes = [2, 8, 32], strides = [1, 1, 1]} : vector<2x8x128xf32> to vector<2x8x32xf32>
    %85 = arith.truncf %84 : vector<2x8x32xf32> to vector<2x8x32xbf16>
    %86 = vector.extract_strided_slice %24 {offsets = [0, 0, 96], sizes = [2, 8, 32], strides = [1, 1, 1]} : vector<2x8x128xf32> to vector<2x8x32xf32>
    %87 = arith.truncf %86 : vector<2x8x32xf32> to vector<2x8x32xbf16>
    "tpu.trace_start"() <{level = 10 : i32, message = "bqd,bkd->bqk"}> : () -> ()
    %cst_31 = arith.constant dense<0.000000e+00> : vector<2x16x8xf32>
    %88 = tpu.matmul %83, %85, %cst_31 {dimension_numbers = #tpu.dot_dimension_numbers<[2], [2], [1], [1], [0, 0, 0, 1, 1, 1], [0], [0]>} : vector<2x16x32xbf16>, vector<2x8x32xbf16>, vector<2x16x8xf32> -> vector<2x16x8xf32>
    "tpu.trace_stop"() : () -> ()
    %cst_32 = arith.constant dense<0xFF800000> : vector<2x16xf32>
    %89 = vector.multi_reduction <maximumf>, %88, %cst_32 [2] : vector<2x16x8xf32> to vector<2x16xf32>
    %90 = vector.shape_cast %89 : vector<2x16xf32> to vector<2x16x1xf32>
    %91 = vector.broadcast %90 : vector<2x16x1xf32> to vector<2x16x8xf32>
    %92 = arith.subf %88, %91 : vector<2x16x8xf32>
    %93 = math.exp %92 : vector<2x16x8xf32>
    %cst_33 = arith.constant dense<0.000000e+00> : vector<2x16xf32>
    %94 = vector.multi_reduction <add>, %93, %cst_33 [2] : vector<2x16x8xf32> to vector<2x16xf32>
    %95 = vector.shape_cast %94 : vector<2x16xf32> to vector<2x16x1xf32>
    %96 = tpu.reciprocal %95 {approx = true} : vector<2x16x1xf32> -> vector<2x16x1xf32>
    %97 = vector.broadcast %96 : vector<2x16x1xf32> to vector<2x16x8xf32>
    %98 = arith.mulf %93, %97 : vector<2x16x8xf32>
    %99 = arith.truncf %98 : vector<2x16x8xf32> to vector<2x16x8xbf16>
    "tpu.trace_start"() <{level = 10 : i32, message = "bqk,bkd->bqd"}> : () -> ()
    %cst_34 = arith.constant dense<0.000000e+00> : vector<2x16x32xf32>
    %100 = tpu.matmul %99, %87, %cst_34 {dimension_numbers = #tpu.dot_dimension_numbers<[2], [1], [1], [2], [0, 0, 0, 1, 1, 2], [0], [0]>} : vector<2x16x8xbf16>, vector<2x8x32xbf16>, vector<2x16x32xf32> -> vector<2x16x32xf32>
    "tpu.trace_stop"() : () -> ()
    %101 = tpu.concatenate %43, %62, %81, %100 in 2 : vector<2x16x32xf32>, vector<2x16x32xf32>, vector<2x16x32xf32>, vector<2x16x32xf32> -> vector<2x16x128xf32>
    %102 = vector.shape_cast %101 : vector<2x16x128xf32> to vector<32x128xf32>
    %103 = arith.truncf %102 : vector<32x128xf32> to vector<32x128xbf16>
    %cst_35 = arith.constant dense<0.000000e+00> : vector<32x128xf32>
    %104 = tpu.matmul %103, %8, %cst_35 {dimension_numbers = #tpu.dot_dimension_numbers<[1], [0], [0], [1], [0, 0, 1, 1], [], []>} : vector<32x128xbf16>, vector<128x128xbf16>, vector<32x128xf32> -> vector<32x128xf32>
    %105 = vector.broadcast %9 : vector<1x128xf32> to vector<32x128xf32>
    %106 = arith.addf %104, %105 : vector<32x128xf32>
    %107 = arith.addf %1, %106 : vector<32x128xf32>
    %c0_36 = arith.constant 0 : index
    %c0_37 = arith.constant 0 : index
    %108 = vector.load %arg8[%c0_36, %c0_37] : memref<1x128xf32, #tpu.memory_space<vmem>>, vector<1x128xf32>
    %c0_38 = arith.constant 0 : index
    %c0_39 = arith.constant 0 : index
    %109 = vector.load %arg9[%c0_38, %c0_39] : memref<1x128xf32, #tpu.memory_space<vmem>>, vector<1x128xf32>
    %cst_40 = arith.constant dense<0.000000e+00> : vector<32xf32>
    %110 = vector.multi_reduction <add>, %107, %cst_40 [1] : vector<32x128xf32> to vector<32xf32>
    %111 = vector.shape_cast %110 : vector<32xf32> to vector<32x1xf32>
    %cst_41 = arith.constant 1.280000e+02 : f32
    %112 = vector.broadcast %cst_41 : f32 to vector<32x1xf32>
    %113 = arith.divf %111, %112 : vector<32x1xf32>
    %114 = vector.broadcast %113 : vector<32x1xf32> to vector<32x128xf32>
    %115 = arith.subf %107, %114 : vector<32x128xf32>
    %116 = arith.mulf %115, %115 : vector<32x128xf32>
    %cst_42 = arith.constant dense<0.000000e+00> : vector<32xf32>
    %117 = vector.multi_reduction <add>, %116, %cst_42 [1] : vector<32x128xf32> to vector<32xf32>
    %118 = vector.shape_cast %117 : vector<32xf32> to vector<32x1xf32>
    %cst_43 = arith.constant 1.280000e+02 : f32
    %119 = vector.broadcast %cst_43 : f32 to vector<32x1xf32>
    %120 = arith.divf %118, %119 : vector<32x1xf32>
    %cst_44 = arith.constant 9.99999974E-6 : f32
    %121 = vector.broadcast %cst_44 : f32 to vector<32x1xf32>
    %122 = arith.addf %120, %121 : vector<32x1xf32>
    %123 = math.rsqrt %122 : vector<32x1xf32>
    %124 = vector.broadcast %123 : vector<32x1xf32> to vector<32x128xf32>
    %125 = arith.mulf %115, %124 : vector<32x128xf32>
    %126 = vector.broadcast %108 : vector<1x128xf32> to vector<32x128xf32>
    %127 = arith.mulf %125, %126 : vector<32x128xf32>
    %128 = vector.broadcast %109 : vector<1x128xf32> to vector<32x128xf32>
    %129 = arith.addf %127, %128 : vector<32x128xf32>
    %c0_45 = arith.constant 0 : index
    %c0_46 = arith.constant 0 : index
    %130 = vector.load %arg10[%c0_45, %c0_46] : memref<1x128xf32, #tpu.memory_space<vmem>>, vector<1x128xf32>
    %c0_47 = arith.constant 0 : index
    %c0_48 = arith.constant 0 : index
    %131 = vector.load %arg11[%c0_47, %c0_48] : memref<1x128xf32, #tpu.memory_space<vmem>>, vector<1x128xf32>
    %c0_49 = arith.constant 0 : index
    %c0_50 = arith.constant 0 : index
    %132 = vector.load %arg12[%c0_49, %c0_50] : memref<128x512xbf16, #tpu.memory_space<vmem>>, vector<128x512xbf16>
    %c0_51 = arith.constant 0 : index
    %c0_52 = arith.constant 0 : index
    %133 = vector.load %arg13[%c0_51, %c0_52] : memref<1x512xf32, #tpu.memory_space<vmem>>, vector<1x512xf32>
    %c0_53 = arith.constant 0 : index
    %c0_54 = arith.constant 0 : index
    %134 = vector.load %arg14[%c0_53, %c0_54] : memref<512x128xbf16, #tpu.memory_space<vmem>>, vector<512x128xbf16>
    %c0_55 = arith.constant 0 : index
    %c0_56 = arith.constant 0 : index
    %135 = vector.load %arg15[%c0_55, %c0_56] : memref<1x128xf32, #tpu.memory_space<vmem>>, vector<1x128xf32>
    %cst_57 = arith.constant dense<0.000000e+00> : vector<32xf32>
    %136 = vector.multi_reduction <add>, %129, %cst_57 [1] : vector<32x128xf32> to vector<32xf32>
    %137 = vector.shape_cast %136 : vector<32xf32> to vector<32x1xf32>
    %cst_58 = arith.constant 1.280000e+02 : f32
    %138 = vector.broadcast %cst_58 : f32 to vector<32x1xf32>
    %139 = arith.divf %137, %138 : vector<32x1xf32>
    %140 = vector.broadcast %139 : vector<32x1xf32> to vector<32x128xf32>
    %141 = arith.subf %129, %140 : vector<32x128xf32>
    %142 = arith.mulf %141, %141 : vector<32x128xf32>
    %cst_59 = arith.constant dense<0.000000e+00> : vector<32xf32>
    %143 = vector.multi_reduction <add>, %142, %cst_59 [1] : vector<32x128xf32> to vector<32xf32>
    %144 = vector.shape_cast %143 : vector<32xf32> to vector<32x1xf32>
    %cst_60 = arith.constant 1.280000e+02 : f32
    %145 = vector.broadcast %cst_60 : f32 to vector<32x1xf32>
    %146 = arith.divf %144, %145 : vector<32x1xf32>
    %cst_61 = arith.constant 9.99999974E-6 : f32
    %147 = vector.broadcast %cst_61 : f32 to vector<32x1xf32>
    %148 = arith.addf %146, %147 : vector<32x1xf32>
    %149 = math.rsqrt %148 : vector<32x1xf32>
    %150 = vector.broadcast %149 : vector<32x1xf32> to vector<32x128xf32>
    %151 = arith.mulf %141, %150 : vector<32x128xf32>
    %152 = vector.broadcast %130 : vector<1x128xf32> to vector<32x128xf32>
    %153 = arith.mulf %151, %152 : vector<32x128xf32>
    %154 = vector.broadcast %131 : vector<1x128xf32> to vector<32x128xf32>
    %155 = arith.addf %153, %154 : vector<32x128xf32>
    %156 = arith.truncf %155 : vector<32x128xf32> to vector<32x128xbf16>
    %cst_62 = arith.constant dense<0.000000e+00> : vector<32x512xf32>
    %157 = tpu.matmul %156, %132, %cst_62 {dimension_numbers = #tpu.dot_dimension_numbers<[1], [0], [0], [1], [0, 0, 1, 1], [], []>} : vector<32x128xbf16>, vector<128x512xbf16>, vector<32x512xf32> -> vector<32x512xf32>
    %158 = vector.broadcast %133 : vector<1x512xf32> to vector<32x512xf32>
    %159 = arith.addf %157, %158 : vector<32x512xf32>
    %160 = math.absf %159 : vector<32x512xf32>
    %cst_63 = arith.constant 0.000000e+00 : f32
    %161 = vector.broadcast %cst_63 : f32 to vector<32x512xf32>
    %162 = arith.subf %161, %160 : vector<32x512xf32>
    %163 = math.exp %162 : vector<32x512xf32>
    %cst_64 = arith.constant 1.000000e+00 : f32
    %164 = vector.broadcast %cst_64 : f32 to vector<32x512xf32>
    %165 = arith.addf %164, %163 : vector<32x512xf32>
    %166 = tpu.reciprocal %165 {approx = true} : vector<32x512xf32> -> vector<32x512xf32>
    %cst_65 = arith.constant 0.000000e+00 : f32
    %167 = vector.broadcast %cst_65 : f32 to vector<32x512xf32>
    %168 = arith.cmpf oge, %159, %167 : vector<32x512xf32>
    %169 = arith.mulf %163, %166 : vector<32x512xf32>
    %170 = arith.select %168, %166, %169 : vector<32x512xi1>, vector<32x512xf32>
    %171 = arith.mulf %159, %170 : vector<32x512xf32>
    %172 = arith.truncf %171 : vector<32x512xf32> to vector<32x512xbf16>
    %cst_66 = arith.constant dense<0.000000e+00> : vector<32x128xf32>
    %173 = tpu.matmul %172, %134, %cst_66 {dimension_numbers = #tpu.dot_dimension_numbers<[1], [0], [0], [1], [0, 0, 1, 1], [], []>} : vector<32x512xbf16>, vector<512x128xbf16>, vector<32x128xf32> -> vector<32x128xf32>
    %174 = vector.broadcast %135 : vector<1x128xf32> to vector<32x128xf32>
    %175 = arith.addf %173, %174 : vector<32x128xf32>
    %cst_67 = arith.constant 5.000000e-01 : f32
    %176 = vector.broadcast %cst_67 : f32 to vector<32x128xf32>
    %177 = arith.mulf %176, %175 : vector<32x128xf32>
    %178 = arith.addf %129, %177 : vector<32x128xf32>
    %c0_68 = arith.constant 0 : index
    %c0_69 = arith.constant 0 : index
    %179 = vector.load %arg16[%c0_68, %c0_69] : memref<1x128xf32, #tpu.memory_space<vmem>>, vector<1x128xf32>
    %c0_70 = arith.constant 0 : index
    %c0_71 = arith.constant 0 : index
    %180 = vector.load %arg17[%c0_70, %c0_71] : memref<1x128xf32, #tpu.memory_space<vmem>>, vector<1x128xf32>
    %cst_72 = arith.constant dense<0.000000e+00> : vector<32xf32>
    %181 = vector.multi_reduction <add>, %178, %cst_72 [1] : vector<32x128xf32> to vector<32xf32>
    %182 = vector.shape_cast %181 : vector<32xf32> to vector<32x1xf32>
    %cst_73 = arith.constant 1.280000e+02 : f32
    %183 = vector.broadcast %cst_73 : f32 to vector<32x1xf32>
    %184 = arith.divf %182, %183 : vector<32x1xf32>
    %185 = vector.broadcast %184 : vector<32x1xf32> to vector<32x128xf32>
    %186 = arith.subf %178, %185 : vector<32x128xf32>
    %187 = arith.mulf %186, %186 : vector<32x128xf32>
    %cst_74 = arith.constant dense<0.000000e+00> : vector<32xf32>
    %188 = vector.multi_reduction <add>, %187, %cst_74 [1] : vector<32x128xf32> to vector<32xf32>
    %189 = vector.shape_cast %188 : vector<32xf32> to vector<32x1xf32>
    %cst_75 = arith.constant 1.280000e+02 : f32
    %190 = vector.broadcast %cst_75 : f32 to vector<32x1xf32>
    %191 = arith.divf %189, %190 : vector<32x1xf32>
    %cst_76 = arith.constant 9.99999974E-6 : f32
    %192 = vector.broadcast %cst_76 : f32 to vector<32x1xf32>
    %193 = arith.addf %191, %192 : vector<32x1xf32>
    %194 = math.rsqrt %193 : vector<32x1xf32>
    %195 = vector.broadcast %194 : vector<32x1xf32> to vector<32x128xf32>
    %196 = arith.mulf %186, %195 : vector<32x128xf32>
    %197 = vector.broadcast %179 : vector<1x128xf32> to vector<32x128xf32>
    %198 = arith.mulf %196, %197 : vector<32x128xf32>
    %199 = vector.broadcast %180 : vector<1x128xf32> to vector<32x128xf32>
    %200 = arith.addf %198, %199 : vector<32x128xf32>
    %201 = vector.shape_cast %200 : vector<32x128xf32> to vector<2x16x128xf32>
    %c0_77 = arith.constant 0 : index
    %c0_78 = arith.constant 0 : index
    %202 = vector.load %arg18[%c0_77, %c0_78] : memref<128x384xbf16, #tpu.memory_space<vmem>>, vector<128x384xbf16>
    %c0_79 = arith.constant 0 : index
    %c0_80 = arith.constant 0 : index
    %203 = vector.load %arg19[%c0_79, %c0_80] : memref<1x384xf32, #tpu.memory_space<vmem>>, vector<1x384xf32>
    %c0_81 = arith.constant 0 : index
    %c0_82 = arith.constant 0 : index
    %204 = vector.load %arg20[%c0_81, %c0_82] : memref<128x128xbf16, #tpu.memory_space<vmem>>, vector<128x128xbf16>
    %c0_83 = arith.constant 0 : index
    %c0_84 = arith.constant 0 : index
    %205 = vector.load %arg21[%c0_83, %c0_84] : memref<1x128xf32, #tpu.memory_space<vmem>>, vector<1x128xf32>
    %206 = vector.shape_cast %201 : vector<2x16x128xf32> to vector<32x128xf32>
    %207 = arith.truncf %206 : vector<32x128xf32> to vector<32x128xbf16>
    %cst_85 = arith.constant dense<0.000000e+00> : vector<32x384xf32>
    %208 = tpu.matmul %207, %202, %cst_85 {dimension_numbers = #tpu.dot_dimension_numbers<[1], [0], [0], [1], [0, 0, 1, 1], [], []>} : vector<32x128xbf16>, vector<128x384xbf16>, vector<32x384xf32> -> vector<32x384xf32>
    %209 = vector.broadcast %203 : vector<1x384xf32> to vector<32x384xf32>
    %210 = arith.addf %208, %209 : vector<32x384xf32>
    %211 = vector.shape_cast %210 : vector<32x384xf32> to vector<2x16x384xf32>
    %212 = vector.extract_strided_slice %211 {offsets = [0, 0, 0], sizes = [2, 16, 128], strides = [1, 1, 1]} : vector<2x16x384xf32> to vector<2x16x128xf32>
    %cst_86 = arith.constant 0.176776692 : f32
    %213 = vector.broadcast %cst_86 : f32 to vector<2x16x128xf32>
    %214 = arith.mulf %212, %213 : vector<2x16x128xf32>
    %215 = vector.extract_strided_slice %211 {offsets = [0, 0, 128], sizes = [2, 16, 128], strides = [1, 1, 1]} : vector<2x16x384xf32> to vector<2x16x128xf32>
    %216 = vector.extract_strided_slice %211 {offsets = [0, 0, 256], sizes = [2, 16, 128], strides = [1, 1, 1]} : vector<2x16x384xf32> to vector<2x16x128xf32>
    %217 = vector.extract_strided_slice %214 {offsets = [0, 0, 0], sizes = [1, 16, 32], strides = [1, 1, 1]} : vector<2x16x128xf32> to vector<1x16x32xf32>
    %218 = vector.shape_cast %217 : vector<1x16x32xf32> to vector<16x32xf32>
    %219 = vector.extract_strided_slice %214 {offsets = [1, 0, 0], sizes = [1, 16, 32], strides = [1, 1, 1]} : vector<2x16x128xf32> to vector<1x16x32xf32>
    %220 = vector.shape_cast %219 : vector<1x16x32xf32> to vector<16x32xf32>
    %221 = vector.extract_strided_slice %215 {offsets = [0, 0, 0], sizes = [1, 16, 32], strides = [1, 1, 1]} : vector<2x16x128xf32> to vector<1x16x32xf32>
    %222 = vector.shape_cast %221 : vector<1x16x32xf32> to vector<16x32xf32>
    %223 = vector.extract_strided_slice %215 {offsets = [1, 0, 0], sizes = [1, 16, 32], strides = [1, 1, 1]} : vector<2x16x128xf32> to vector<1x16x32xf32>
    %224 = vector.shape_cast %223 : vector<1x16x32xf32> to vector<16x32xf32>
    %225 = vector.extract_strided_slice %216 {offsets = [0, 0, 0], sizes = [1, 16, 32], strides = [1, 1, 1]} : vector<2x16x128xf32> to vector<1x16x32xf32>
    %226 = vector.shape_cast %225 : vector<1x16x32xf32> to vector<16x32xf32>
    %227 = vector.extract_strided_slice %216 {offsets = [1, 0, 0], sizes = [1, 16, 32], strides = [1, 1, 1]} : vector<2x16x128xf32> to vector<1x16x32xf32>
    %228 = vector.shape_cast %227 : vector<1x16x32xf32> to vector<16x32xf32>
    %229 = vector.extract_strided_slice %214 {offsets = [0, 0, 32], sizes = [1, 16, 32], strides = [1, 1, 1]} : vector<2x16x128xf32> to vector<1x16x32xf32>
    %230 = vector.shape_cast %229 : vector<1x16x32xf32> to vector<16x32xf32>
    %231 = vector.extract_strided_slice %214 {offsets = [1, 0, 32], sizes = [1, 16, 32], strides = [1, 1, 1]} : vector<2x16x128xf32> to vector<1x16x32xf32>
    %232 = vector.shape_cast %231 : vector<1x16x32xf32> to vector<16x32xf32>
    %233 = vector.extract_strided_slice %215 {offsets = [0, 0, 32], sizes = [1, 16, 32], strides = [1, 1, 1]} : vector<2x16x128xf32> to vector<1x16x32xf32>
    %234 = vector.shape_cast %233 : vector<1x16x32xf32> to vector<16x32xf32>
    %235 = vector.extract_strided_slice %215 {offsets = [1, 0, 32], sizes = [1, 16, 32], strides = [1, 1, 1]} : vector<2x16x128xf32> to vector<1x16x32xf32>
    %236 = vector.shape_cast %235 : vector<1x16x32xf32> to vector<16x32xf32>
    %237 = vector.extract_strided_slice %216 {offsets = [0, 0, 32], sizes = [1, 16, 32], strides = [1, 1, 1]} : vector<2x16x128xf32> to vector<1x16x32xf32>
    %238 = vector.shape_cast %237 : vector<1x16x32xf32> to vector<16x32xf32>
    %239 = vector.extract_strided_slice %216 {offsets = [1, 0, 32], sizes = [1, 16, 32], strides = [1, 1, 1]} : vector<2x16x128xf32> to vector<1x16x32xf32>
    %240 = vector.shape_cast %239 : vector<1x16x32xf32> to vector<16x32xf32>
    %241 = vector.extract_strided_slice %214 {offsets = [0, 0, 64], sizes = [1, 16, 32], strides = [1, 1, 1]} : vector<2x16x128xf32> to vector<1x16x32xf32>
    %242 = vector.shape_cast %241 : vector<1x16x32xf32> to vector<16x32xf32>
    %243 = vector.extract_strided_slice %214 {offsets = [1, 0, 64], sizes = [1, 16, 32], strides = [1, 1, 1]} : vector<2x16x128xf32> to vector<1x16x32xf32>
    %244 = vector.shape_cast %243 : vector<1x16x32xf32> to vector<16x32xf32>
    %245 = vector.extract_strided_slice %215 {offsets = [0, 0, 64], sizes = [1, 16, 32], strides = [1, 1, 1]} : vector<2x16x128xf32> to vector<1x16x32xf32>
    %246 = vector.shape_cast %245 : vector<1x16x32xf32> to vector<16x32xf32>
    %247 = vector.extract_strided_slice %215 {offsets = [1, 0, 64], sizes = [1, 16, 32], strides = [1, 1, 1]} : vector<2x16x128xf32> to vector<1x16x32xf32>
    %248 = vector.shape_cast %247 : vector<1x16x32xf32> to vector<16x32xf32>
    %249 = vector.extract_strided_slice %216 {offsets = [0, 0, 64], sizes = [1, 16, 32], strides = [1, 1, 1]} : vector<2x16x128xf32> to vector<1x16x32xf32>
    %250 = vector.shape_cast %249 : vector<1x16x32xf32> to vector<16x32xf32>
    %251 = vector.extract_strided_slice %216 {offsets = [1, 0, 64], sizes = [1, 16, 32], strides = [1, 1, 1]} : vector<2x16x128xf32> to vector<1x16x32xf32>
    %252 = vector.shape_cast %251 : vector<1x16x32xf32> to vector<16x32xf32>
    %253 = vector.extract_strided_slice %214 {offsets = [0, 0, 96], sizes = [1, 16, 32], strides = [1, 1, 1]} : vector<2x16x128xf32> to vector<1x16x32xf32>
    %254 = vector.shape_cast %253 : vector<1x16x32xf32> to vector<16x32xf32>
    %255 = vector.extract_strided_slice %214 {offsets = [1, 0, 96], sizes = [1, 16, 32], strides = [1, 1, 1]} : vector<2x16x128xf32> to vector<1x16x32xf32>
    %256 = vector.shape_cast %255 : vector<1x16x32xf32> to vector<16x32xf32>
    %257 = vector.extract_strided_slice %215 {offsets = [0, 0, 96], sizes = [1, 16, 32], strides = [1, 1, 1]} : vector<2x16x128xf32> to vector<1x16x32xf32>
    %258 = vector.shape_cast %257 : vector<1x16x32xf32> to vector<16x32xf32>
    %259 = vector.extract_strided_slice %215 {offsets = [1, 0, 96], sizes = [1, 16, 32], strides = [1, 1, 1]} : vector<2x16x128xf32> to vector<1x16x32xf32>
    %260 = vector.shape_cast %259 : vector<1x16x32xf32> to vector<16x32xf32>
    %261 = vector.extract_strided_slice %216 {offsets = [0, 0, 96], sizes = [1, 16, 32], strides = [1, 1, 1]} : vector<2x16x128xf32> to vector<1x16x32xf32>
    %262 = vector.shape_cast %261 : vector<1x16x32xf32> to vector<16x32xf32>
    %263 = vector.extract_strided_slice %216 {offsets = [1, 0, 96], sizes = [1, 16, 32], strides = [1, 1, 1]} : vector<2x16x128xf32> to vector<1x16x32xf32>
    %264 = vector.shape_cast %263 : vector<1x16x32xf32> to vector<16x32xf32>
    %265 = arith.mulf %218, %222 : vector<16x32xf32>
    %cst_87 = arith.constant dense<0.000000e+00> : vector<16xf32>
    %266 = vector.multi_reduction <add>, %265, %cst_87 [1] : vector<16x32xf32> to vector<16xf32>
    %267 = vector.shape_cast %266 : vector<16xf32> to vector<16x1xf32>
    %268 = arith.mulf %218, %224 : vector<16x32xf32>
    %cst_88 = arith.constant dense<0.000000e+00> : vector<16xf32>
    %269 = vector.multi_reduction <add>, %268, %cst_88 [1] : vector<16x32xf32> to vector<16xf32>
    %270 = vector.shape_cast %269 : vector<16xf32> to vector<16x1xf32>
    %271 = arith.maximumf %267, %270 : vector<16x1xf32>
    %272 = arith.subf %267, %271 : vector<16x1xf32>
    %273 = math.exp %272 : vector<16x1xf32>
    %274 = arith.subf %270, %271 : vector<16x1xf32>
    %275 = math.exp %274 : vector<16x1xf32>
    %276 = arith.addf %273, %275 : vector<16x1xf32>
    %277 = tpu.reciprocal %276 {approx = true} : vector<16x1xf32> -> vector<16x1xf32>
    %278 = arith.mulf %273, %277 : vector<16x1xf32>
    %279 = vector.broadcast %278 : vector<16x1xf32> to vector<16x32xf32>
    %280 = arith.mulf %279, %226 : vector<16x32xf32>
    %281 = arith.mulf %275, %277 : vector<16x1xf32>
    %282 = vector.broadcast %281 : vector<16x1xf32> to vector<16x32xf32>
    %283 = arith.mulf %282, %228 : vector<16x32xf32>
    %284 = arith.addf %280, %283 : vector<16x32xf32>
    %285 = arith.mulf %230, %234 : vector<16x32xf32>
    %cst_89 = arith.constant dense<0.000000e+00> : vector<16xf32>
    %286 = vector.multi_reduction <add>, %285, %cst_89 [1] : vector<16x32xf32> to vector<16xf32>
    %287 = vector.shape_cast %286 : vector<16xf32> to vector<16x1xf32>
    %288 = arith.mulf %230, %236 : vector<16x32xf32>
    %cst_90 = arith.constant dense<0.000000e+00> : vector<16xf32>
    %289 = vector.multi_reduction <add>, %288, %cst_90 [1] : vector<16x32xf32> to vector<16xf32>
    %290 = vector.shape_cast %289 : vector<16xf32> to vector<16x1xf32>
    %291 = arith.maximumf %287, %290 : vector<16x1xf32>
    %292 = arith.subf %287, %291 : vector<16x1xf32>
    %293 = math.exp %292 : vector<16x1xf32>
    %294 = arith.subf %290, %291 : vector<16x1xf32>
    %295 = math.exp %294 : vector<16x1xf32>
    %296 = arith.addf %293, %295 : vector<16x1xf32>
    %297 = tpu.reciprocal %296 {approx = true} : vector<16x1xf32> -> vector<16x1xf32>
    %298 = arith.mulf %293, %297 : vector<16x1xf32>
    %299 = vector.broadcast %298 : vector<16x1xf32> to vector<16x32xf32>
    %300 = arith.mulf %299, %238 : vector<16x32xf32>
    %301 = arith.mulf %295, %297 : vector<16x1xf32>
    %302 = vector.broadcast %301 : vector<16x1xf32> to vector<16x32xf32>
    %303 = arith.mulf %302, %240 : vector<16x32xf32>
    %304 = arith.addf %300, %303 : vector<16x32xf32>
    %305 = arith.mulf %242, %246 : vector<16x32xf32>
    %cst_91 = arith.constant dense<0.000000e+00> : vector<16xf32>
    %306 = vector.multi_reduction <add>, %305, %cst_91 [1] : vector<16x32xf32> to vector<16xf32>
    %307 = vector.shape_cast %306 : vector<16xf32> to vector<16x1xf32>
    %308 = arith.mulf %242, %248 : vector<16x32xf32>
    %cst_92 = arith.constant dense<0.000000e+00> : vector<16xf32>
    %309 = vector.multi_reduction <add>, %308, %cst_92 [1] : vector<16x32xf32> to vector<16xf32>
    %310 = vector.shape_cast %309 : vector<16xf32> to vector<16x1xf32>
    %311 = arith.maximumf %307, %310 : vector<16x1xf32>
    %312 = arith.subf %307, %311 : vector<16x1xf32>
    %313 = math.exp %312 : vector<16x1xf32>
    %314 = arith.subf %310, %311 : vector<16x1xf32>
    %315 = math.exp %314 : vector<16x1xf32>
    %316 = arith.addf %313, %315 : vector<16x1xf32>
    %317 = tpu.reciprocal %316 {approx = true} : vector<16x1xf32> -> vector<16x1xf32>
    %318 = arith.mulf %313, %317 : vector<16x1xf32>
    %319 = vector.broadcast %318 : vector<16x1xf32> to vector<16x32xf32>
    %320 = arith.mulf %319, %250 : vector<16x32xf32>
    %321 = arith.mulf %315, %317 : vector<16x1xf32>
    %322 = vector.broadcast %321 : vector<16x1xf32> to vector<16x32xf32>
    %323 = arith.mulf %322, %252 : vector<16x32xf32>
    %324 = arith.addf %320, %323 : vector<16x32xf32>
    %325 = arith.mulf %254, %258 : vector<16x32xf32>
    %cst_93 = arith.constant dense<0.000000e+00> : vector<16xf32>
    %326 = vector.multi_reduction <add>, %325, %cst_93 [1] : vector<16x32xf32> to vector<16xf32>
    %327 = vector.shape_cast %326 : vector<16xf32> to vector<16x1xf32>
    %328 = arith.mulf %254, %260 : vector<16x32xf32>
    %cst_94 = arith.constant dense<0.000000e+00> : vector<16xf32>
    %329 = vector.multi_reduction <add>, %328, %cst_94 [1] : vector<16x32xf32> to vector<16xf32>
    %330 = vector.shape_cast %329 : vector<16xf32> to vector<16x1xf32>
    %331 = arith.maximumf %327, %330 : vector<16x1xf32>
    %332 = arith.subf %327, %331 : vector<16x1xf32>
    %333 = math.exp %332 : vector<16x1xf32>
    %334 = arith.subf %330, %331 : vector<16x1xf32>
    %335 = math.exp %334 : vector<16x1xf32>
    %336 = arith.addf %333, %335 : vector<16x1xf32>
    %337 = tpu.reciprocal %336 {approx = true} : vector<16x1xf32> -> vector<16x1xf32>
    %338 = arith.mulf %333, %337 : vector<16x1xf32>
    %339 = vector.broadcast %338 : vector<16x1xf32> to vector<16x32xf32>
    %340 = arith.mulf %339, %262 : vector<16x32xf32>
    %341 = arith.mulf %335, %337 : vector<16x1xf32>
    %342 = vector.broadcast %341 : vector<16x1xf32> to vector<16x32xf32>
    %343 = arith.mulf %342, %264 : vector<16x32xf32>
    %344 = arith.addf %340, %343 : vector<16x32xf32>
    %345 = tpu.concatenate %284, %304, %324, %344 in 1 : vector<16x32xf32>, vector<16x32xf32>, vector<16x32xf32>, vector<16x32xf32> -> vector<16x128xf32>
    %346 = vector.shape_cast %345 : vector<16x128xf32> to vector<1x16x128xf32>
    %347 = arith.mulf %220, %222 : vector<16x32xf32>
    %cst_95 = arith.constant dense<0.000000e+00> : vector<16xf32>
    %348 = vector.multi_reduction <add>, %347, %cst_95 [1] : vector<16x32xf32> to vector<16xf32>
    %349 = vector.shape_cast %348 : vector<16xf32> to vector<16x1xf32>
    %350 = arith.mulf %220, %224 : vector<16x32xf32>
    %cst_96 = arith.constant dense<0.000000e+00> : vector<16xf32>
    %351 = vector.multi_reduction <add>, %350, %cst_96 [1] : vector<16x32xf32> to vector<16xf32>
    %352 = vector.shape_cast %351 : vector<16xf32> to vector<16x1xf32>
    %353 = arith.maximumf %349, %352 : vector<16x1xf32>
    %354 = arith.subf %349, %353 : vector<16x1xf32>
    %355 = math.exp %354 : vector<16x1xf32>
    %356 = arith.subf %352, %353 : vector<16x1xf32>
    %357 = math.exp %356 : vector<16x1xf32>
    %358 = arith.addf %355, %357 : vector<16x1xf32>
    %359 = tpu.reciprocal %358 {approx = true} : vector<16x1xf32> -> vector<16x1xf32>
    %360 = arith.mulf %355, %359 : vector<16x1xf32>
    %361 = vector.broadcast %360 : vector<16x1xf32> to vector<16x32xf32>
    %362 = arith.mulf %361, %226 : vector<16x32xf32>
    %363 = arith.mulf %357, %359 : vector<16x1xf32>
    %364 = vector.broadcast %363 : vector<16x1xf32> to vector<16x32xf32>
    %365 = arith.mulf %364, %228 : vector<16x32xf32>
    %366 = arith.addf %362, %365 : vector<16x32xf32>
    %367 = arith.mulf %232, %234 : vector<16x32xf32>
    %cst_97 = arith.constant dense<0.000000e+00> : vector<16xf32>
    %368 = vector.multi_reduction <add>, %367, %cst_97 [1] : vector<16x32xf32> to vector<16xf32>
    %369 = vector.shape_cast %368 : vector<16xf32> to vector<16x1xf32>
    %370 = arith.mulf %232, %236 : vector<16x32xf32>
    %cst_98 = arith.constant dense<0.000000e+00> : vector<16xf32>
    %371 = vector.multi_reduction <add>, %370, %cst_98 [1] : vector<16x32xf32> to vector<16xf32>
    %372 = vector.shape_cast %371 : vector<16xf32> to vector<16x1xf32>
    %373 = arith.maximumf %369, %372 : vector<16x1xf32>
    %374 = arith.subf %369, %373 : vector<16x1xf32>
    %375 = math.exp %374 : vector<16x1xf32>
    %376 = arith.subf %372, %373 : vector<16x1xf32>
    %377 = math.exp %376 : vector<16x1xf32>
    %378 = arith.addf %375, %377 : vector<16x1xf32>
    %379 = tpu.reciprocal %378 {approx = true} : vector<16x1xf32> -> vector<16x1xf32>
    %380 = arith.mulf %375, %379 : vector<16x1xf32>
    %381 = vector.broadcast %380 : vector<16x1xf32> to vector<16x32xf32>
    %382 = arith.mulf %381, %238 : vector<16x32xf32>
    %383 = arith.mulf %377, %379 : vector<16x1xf32>
    %384 = vector.broadcast %383 : vector<16x1xf32> to vector<16x32xf32>
    %385 = arith.mulf %384, %240 : vector<16x32xf32>
    %386 = arith.addf %382, %385 : vector<16x32xf32>
    %387 = arith.mulf %244, %246 : vector<16x32xf32>
    %cst_99 = arith.constant dense<0.000000e+00> : vector<16xf32>
    %388 = vector.multi_reduction <add>, %387, %cst_99 [1] : vector<16x32xf32> to vector<16xf32>
    %389 = vector.shape_cast %388 : vector<16xf32> to vector<16x1xf32>
    %390 = arith.mulf %244, %248 : vector<16x32xf32>
    %cst_100 = arith.constant dense<0.000000e+00> : vector<16xf32>
    %391 = vector.multi_reduction <add>, %390, %cst_100 [1] : vector<16x32xf32> to vector<16xf32>
    %392 = vector.shape_cast %391 : vector<16xf32> to vector<16x1xf32>
    %393 = arith.maximumf %389, %392 : vector<16x1xf32>
    %394 = arith.subf %389, %393 : vector<16x1xf32>
    %395 = math.exp %394 : vector<16x1xf32>
    %396 = arith.subf %392, %393 : vector<16x1xf32>
    %397 = math.exp %396 : vector<16x1xf32>
    %398 = arith.addf %395, %397 : vector<16x1xf32>
    %399 = tpu.reciprocal %398 {approx = true} : vector<16x1xf32> -> vector<16x1xf32>
    %400 = arith.mulf %395, %399 : vector<16x1xf32>
    %401 = vector.broadcast %400 : vector<16x1xf32> to vector<16x32xf32>
    %402 = arith.mulf %401, %250 : vector<16x32xf32>
    %403 = arith.mulf %397, %399 : vector<16x1xf32>
    %404 = vector.broadcast %403 : vector<16x1xf32> to vector<16x32xf32>
    %405 = arith.mulf %404, %252 : vector<16x32xf32>
    %406 = arith.addf %402, %405 : vector<16x32xf32>
    %407 = arith.mulf %256, %258 : vector<16x32xf32>
    %cst_101 = arith.constant dense<0.000000e+00> : vector<16xf32>
    %408 = vector.multi_reduction <add>, %407, %cst_101 [1] : vector<16x32xf32> to vector<16xf32>
    %409 = vector.shape_cast %408 : vector<16xf32> to vector<16x1xf32>
    %410 = arith.mulf %256, %260 : vector<16x32xf32>
    %cst_102 = arith.constant dense<0.000000e+00> : vector<16xf32>
    %411 = vector.multi_reduction <add>, %410, %cst_102 [1] : vector<16x32xf32> to vector<16xf32>
    %412 = vector.shape_cast %411 : vector<16xf32> to vector<16x1xf32>
    %413 = arith.maximumf %409, %412 : vector<16x1xf32>
    %414 = arith.subf %409, %413 : vector<16x1xf32>
    %415 = math.exp %414 : vector<16x1xf32>
    %416 = arith.subf %412, %413 : vector<16x1xf32>
    %417 = math.exp %416 : vector<16x1xf32>
    %418 = arith.addf %415, %417 : vector<16x1xf32>
    %419 = tpu.reciprocal %418 {approx = true} : vector<16x1xf32> -> vector<16x1xf32>
    %420 = arith.mulf %415, %419 : vector<16x1xf32>
    %421 = vector.broadcast %420 : vector<16x1xf32> to vector<16x32xf32>
    %422 = arith.mulf %421, %262 : vector<16x32xf32>
    %423 = arith.mulf %417, %419 : vector<16x1xf32>
    %424 = vector.broadcast %423 : vector<16x1xf32> to vector<16x32xf32>
    %425 = arith.mulf %424, %264 : vector<16x32xf32>
    %426 = arith.addf %422, %425 : vector<16x32xf32>
    %427 = tpu.concatenate %366, %386, %406, %426 in 1 : vector<16x32xf32>, vector<16x32xf32>, vector<16x32xf32>, vector<16x32xf32> -> vector<16x128xf32>
    %428 = vector.shape_cast %427 : vector<16x128xf32> to vector<1x16x128xf32>
    %429 = tpu.concatenate %346, %428 in 0 : vector<1x16x128xf32>, vector<1x16x128xf32> -> vector<2x16x128xf32>
    %430 = vector.shape_cast %429 : vector<2x16x128xf32> to vector<32x128xf32>
    %431 = arith.truncf %430 : vector<32x128xf32> to vector<32x128xbf16>
    %cst_103 = arith.constant dense<0.000000e+00> : vector<32x128xf32>
    %432 = tpu.matmul %431, %204, %cst_103 {dimension_numbers = #tpu.dot_dimension_numbers<[1], [0], [0], [1], [0, 0, 1, 1], [], []>} : vector<32x128xbf16>, vector<128x128xbf16>, vector<32x128xf32> -> vector<32x128xf32>
    %433 = vector.broadcast %205 : vector<1x128xf32> to vector<32x128xf32>
    %434 = arith.addf %432, %433 : vector<32x128xf32>
    %435 = arith.addf %178, %434 : vector<32x128xf32>
    %c0_104 = arith.constant 0 : index
    %c0_105 = arith.constant 0 : index
    %436 = vector.load %arg22[%c0_104, %c0_105] : memref<1x128xf32, #tpu.memory_space<vmem>>, vector<1x128xf32>
    %c0_106 = arith.constant 0 : index
    %c0_107 = arith.constant 0 : index
    %437 = vector.load %arg23[%c0_106, %c0_107] : memref<1x128xf32, #tpu.memory_space<vmem>>, vector<1x128xf32>
    %c0_108 = arith.constant 0 : index
    %c0_109 = arith.constant 0 : index
    %438 = vector.load %arg24[%c0_108, %c0_109] : memref<128x256xbf16, #tpu.memory_space<vmem>>, vector<128x256xbf16>
    %c0_110 = arith.constant 0 : index
    %c0_111 = arith.constant 0 : index
    %439 = vector.load %arg25[%c0_110, %c0_111] : memref<1x256xf32, #tpu.memory_space<vmem>>, vector<1x256xf32>
    %c0_112 = arith.constant 0 : index
    %c0_113 = arith.constant 0 : index
    %440 = vector.load %arg26[%c0_112, %c0_113] : memref<31x128xf32, #tpu.memory_space<vmem>>, vector<31x128xf32>
    %c0_114 = arith.constant 0 : index
    %c0_115 = arith.constant 0 : index
    %441 = vector.load %arg27[%c0_114, %c0_115] : memref<1x128xf32, #tpu.memory_space<vmem>>, vector<1x128xf32>
    %c0_116 = arith.constant 0 : index
    %c0_117 = arith.constant 0 : index
    %442 = vector.load %arg28[%c0_116, %c0_117] : memref<1x128xf32, #tpu.memory_space<vmem>>, vector<1x128xf32>
    %c0_118 = arith.constant 0 : index
    %c0_119 = arith.constant 0 : index
    %443 = vector.load %arg29[%c0_118, %c0_119] : memref<1x128xf32, #tpu.memory_space<vmem>>, vector<1x128xf32>
    %c0_120 = arith.constant 0 : index
    %c0_121 = arith.constant 0 : index
    %444 = vector.load %arg30[%c0_120, %c0_121] : memref<128x128xbf16, #tpu.memory_space<vmem>>, vector<128x128xbf16>
    %c0_122 = arith.constant 0 : index
    %c0_123 = arith.constant 0 : index
    %445 = vector.load %arg31[%c0_122, %c0_123] : memref<1x128xf32, #tpu.memory_space<vmem>>, vector<1x128xf32>
    %cst_124 = arith.constant dense<0.000000e+00> : vector<32xf32>
    %446 = vector.multi_reduction <add>, %435, %cst_124 [1] : vector<32x128xf32> to vector<32xf32>
    %447 = vector.shape_cast %446 : vector<32xf32> to vector<32x1xf32>
    %cst_125 = arith.constant 1.280000e+02 : f32
    %448 = vector.broadcast %cst_125 : f32 to vector<32x1xf32>
    %449 = arith.divf %447, %448 : vector<32x1xf32>
    %450 = vector.broadcast %449 : vector<32x1xf32> to vector<32x128xf32>
    %451 = arith.subf %435, %450 : vector<32x128xf32>
    %452 = arith.mulf %451, %451 : vector<32x128xf32>
    %cst_126 = arith.constant dense<0.000000e+00> : vector<32xf32>
    %453 = vector.multi_reduction <add>, %452, %cst_126 [1] : vector<32x128xf32> to vector<32xf32>
    %454 = vector.shape_cast %453 : vector<32xf32> to vector<32x1xf32>
    %cst_127 = arith.constant 1.280000e+02 : f32
    %455 = vector.broadcast %cst_127 : f32 to vector<32x1xf32>
    %456 = arith.divf %454, %455 : vector<32x1xf32>
    %cst_128 = arith.constant 9.99999974E-6 : f32
    %457 = vector.broadcast %cst_128 : f32 to vector<32x1xf32>
    %458 = arith.addf %456, %457 : vector<32x1xf32>
    %459 = math.rsqrt %458 : vector<32x1xf32>
    %460 = vector.broadcast %459 : vector<32x1xf32> to vector<32x128xf32>
    %461 = arith.mulf %451, %460 : vector<32x128xf32>
    %462 = vector.broadcast %436 : vector<1x128xf32> to vector<32x128xf32>
    %463 = arith.mulf %461, %462 : vector<32x128xf32>
    %464 = vector.broadcast %437 : vector<1x128xf32> to vector<32x128xf32>
    %465 = arith.addf %463, %464 : vector<32x128xf32>
    %466 = arith.truncf %465 : vector<32x128xf32> to vector<32x128xbf16>
    %cst_129 = arith.constant dense<0.000000e+00> : vector<32x256xf32>
    %467 = tpu.matmul %466, %438, %cst_129 {dimension_numbers = #tpu.dot_dimension_numbers<[1], [0], [0], [1], [0, 0, 1, 1], [], []>} : vector<32x128xbf16>, vector<128x256xbf16>, vector<32x256xf32> -> vector<32x256xf32>
    %468 = vector.broadcast %439 : vector<1x256xf32> to vector<32x256xf32>
    %469 = arith.addf %467, %468 : vector<32x256xf32>
    %470 = vector.extract_strided_slice %469 {offsets = [0, 0], sizes = [32, 128], strides = [1, 1]} : vector<32x256xf32> to vector<32x128xf32>
    %471 = vector.extract_strided_slice %469 {offsets = [0, 128], sizes = [32, 128], strides = [1, 1]} : vector<32x256xf32> to vector<32x128xf32>
    %472 = math.absf %471 : vector<32x128xf32>
    %cst_130 = arith.constant 0.000000e+00 : f32
    %473 = vector.broadcast %cst_130 : f32 to vector<32x128xf32>
    %474 = arith.subf %473, %472 : vector<32x128xf32>
    %475 = math.exp %474 : vector<32x128xf32>
    %cst_131 = arith.constant 1.000000e+00 : f32
    %476 = vector.broadcast %cst_131 : f32 to vector<32x128xf32>
    %477 = arith.addf %476, %475 : vector<32x128xf32>
    %478 = tpu.reciprocal %477 {approx = true} : vector<32x128xf32> -> vector<32x128xf32>
    %cst_132 = arith.constant 0.000000e+00 : f32
    %479 = vector.broadcast %cst_132 : f32 to vector<32x128xf32>
    %480 = arith.cmpf oge, %471, %479 : vector<32x128xf32>
    %481 = arith.mulf %475, %478 : vector<32x128xf32>
    %482 = arith.select %480, %478, %481 : vector<32x128xi1>, vector<32x128xf32>
    %483 = arith.mulf %470, %482 : vector<32x128xf32>
    %484 = vector.shape_cast %483 : vector<32x128xf32> to vector<2x16x128xf32>
    %485 = vector.extract_strided_slice %484 {offsets = [0, 0, 0], sizes = [1, 16, 128], strides = [1, 1, 1]} : vector<2x16x128xf32> to vector<1x16x128xf32>
    %486 = vector.shape_cast %485 : vector<1x16x128xf32> to vector<16x128xf32>
    %487 = vector.extract_strided_slice %440 {offsets = [15, 0], sizes = [1, 128], strides = [1, 1]} : vector<31x128xf32> to vector<1x128xf32>
    %488 = vector.broadcast %487 : vector<1x128xf32> to vector<16x128xf32>
    %489 = arith.mulf %486, %488 : vector<16x128xf32>
    %490 = vector.extract_strided_slice %484 {offsets = [1, 0, 0], sizes = [1, 16, 128], strides = [1, 1, 1]} : vector<2x16x128xf32> to vector<1x16x128xf32>
    %491 = vector.shape_cast %490 : vector<1x16x128xf32> to vector<16x128xf32>
    %492 = vector.extract_strided_slice %440 {offsets = [16, 0], sizes = [1, 128], strides = [1, 1]} : vector<31x128xf32> to vector<1x128xf32>
    %493 = vector.broadcast %492 : vector<1x128xf32> to vector<16x128xf32>
    %494 = arith.mulf %491, %493 : vector<16x128xf32>
    %495 = arith.addf %489, %494 : vector<16x128xf32>
    %496 = vector.broadcast %441 : vector<1x128xf32> to vector<16x128xf32>
    %497 = arith.addf %495, %496 : vector<16x128xf32>
    %498 = vector.shape_cast %497 : vector<16x128xf32> to vector<1x16x128xf32>
    %499 = vector.extract_strided_slice %484 {offsets = [0, 0, 0], sizes = [1, 16, 128], strides = [1, 1, 1]} : vector<2x16x128xf32> to vector<1x16x128xf32>
    %500 = vector.shape_cast %499 : vector<1x16x128xf32> to vector<16x128xf32>
    %501 = vector.extract_strided_slice %440 {offsets = [14, 0], sizes = [1, 128], strides = [1, 1]} : vector<31x128xf32> to vector<1x128xf32>
    %502 = vector.broadcast %501 : vector<1x128xf32> to vector<16x128xf32>
    %503 = arith.mulf %500, %502 : vector<16x128xf32>
    %504 = vector.extract_strided_slice %484 {offsets = [1, 0, 0], sizes = [1, 16, 128], strides = [1, 1, 1]} : vector<2x16x128xf32> to vector<1x16x128xf32>
    %505 = vector.shape_cast %504 : vector<1x16x128xf32> to vector<16x128xf32>
    %506 = vector.broadcast %487 : vector<1x128xf32> to vector<16x128xf32>
    %507 = arith.mulf %505, %506 : vector<16x128xf32>
    %508 = arith.addf %503, %507 : vector<16x128xf32>
    %509 = vector.broadcast %441 : vector<1x128xf32> to vector<16x128xf32>
    %510 = arith.addf %508, %509 : vector<16x128xf32>
    %511 = vector.shape_cast %510 : vector<16x128xf32> to vector<1x16x128xf32>
    %512 = tpu.concatenate %498, %511 in 0 : vector<1x16x128xf32>, vector<1x16x128xf32> -> vector<2x16x128xf32>
    %513 = vector.shape_cast %512 : vector<2x16x128xf32> to vector<32x128xf32>
    %514 = vector.broadcast %442 : vector<1x128xf32> to vector<32x128xf32>
    %515 = arith.mulf %513, %514 : vector<32x128xf32>
    %516 = vector.broadcast %443 : vector<1x128xf32> to vector<32x128xf32>
    %517 = arith.addf %515, %516 : vector<32x128xf32>
    %518 = math.absf %517 : vector<32x128xf32>
    %cst_133 = arith.constant 0.000000e+00 : f32
    %519 = vector.broadcast %cst_133 : f32 to vector<32x128xf32>
    %520 = arith.subf %519, %518 : vector<32x128xf32>
    %521 = math.exp %520 : vector<32x128xf32>
    %cst_134 = arith.constant 1.000000e+00 : f32
    %522 = vector.broadcast %cst_134 : f32 to vector<32x128xf32>
    %523 = arith.addf %522, %521 : vector<32x128xf32>
    %524 = tpu.reciprocal %523 {approx = true} : vector<32x128xf32> -> vector<32x128xf32>
    %cst_135 = arith.constant 0.000000e+00 : f32
    %525 = vector.broadcast %cst_135 : f32 to vector<32x128xf32>
    %526 = arith.cmpf oge, %517, %525 : vector<32x128xf32>
    %527 = arith.mulf %521, %524 : vector<32x128xf32>
    %528 = arith.select %526, %524, %527 : vector<32x128xi1>, vector<32x128xf32>
    %529 = arith.mulf %517, %528 : vector<32x128xf32>
    %530 = arith.truncf %529 : vector<32x128xf32> to vector<32x128xbf16>
    %cst_136 = arith.constant dense<0.000000e+00> : vector<32x128xf32>
    %531 = tpu.matmul %530, %444, %cst_136 {dimension_numbers = #tpu.dot_dimension_numbers<[1], [0], [0], [1], [0, 0, 1, 1], [], []>} : vector<32x128xbf16>, vector<128x128xbf16>, vector<32x128xf32> -> vector<32x128xf32>
    %532 = vector.broadcast %445 : vector<1x128xf32> to vector<32x128xf32>
    %533 = arith.addf %531, %532 : vector<32x128xf32>
    %534 = arith.addf %435, %533 : vector<32x128xf32>
    %c0_137 = arith.constant 0 : index
    %c0_138 = arith.constant 0 : index
    %535 = vector.load %arg32[%c0_137, %c0_138] : memref<1x128xf32, #tpu.memory_space<vmem>>, vector<1x128xf32>
    %c0_139 = arith.constant 0 : index
    %c0_140 = arith.constant 0 : index
    %536 = vector.load %arg33[%c0_139, %c0_140] : memref<1x128xf32, #tpu.memory_space<vmem>>, vector<1x128xf32>
    %c0_141 = arith.constant 0 : index
    %c0_142 = arith.constant 0 : index
    %537 = vector.load %arg34[%c0_141, %c0_142] : memref<128x512xbf16, #tpu.memory_space<vmem>>, vector<128x512xbf16>
    %c0_143 = arith.constant 0 : index
    %c0_144 = arith.constant 0 : index
    %538 = vector.load %arg35[%c0_143, %c0_144] : memref<1x512xf32, #tpu.memory_space<vmem>>, vector<1x512xf32>
    %c0_145 = arith.constant 0 : index
    %c0_146 = arith.constant 0 : index
    %539 = vector.load %arg36[%c0_145, %c0_146] : memref<512x128xbf16, #tpu.memory_space<vmem>>, vector<512x128xbf16>
    %c0_147 = arith.constant 0 : index
    %c0_148 = arith.constant 0 : index
    %540 = vector.load %arg37[%c0_147, %c0_148] : memref<1x128xf32, #tpu.memory_space<vmem>>, vector<1x128xf32>
    %cst_149 = arith.constant dense<0.000000e+00> : vector<32xf32>
    %541 = vector.multi_reduction <add>, %534, %cst_149 [1] : vector<32x128xf32> to vector<32xf32>
    %542 = vector.shape_cast %541 : vector<32xf32> to vector<32x1xf32>
    %cst_150 = arith.constant 1.280000e+02 : f32
    %543 = vector.broadcast %cst_150 : f32 to vector<32x1xf32>
    %544 = arith.divf %542, %543 : vector<32x1xf32>
    %545 = vector.broadcast %544 : vector<32x1xf32> to vector<32x128xf32>
    %546 = arith.subf %534, %545 : vector<32x128xf32>
    %547 = arith.mulf %546, %546 : vector<32x128xf32>
    %cst_151 = arith.constant dense<0.000000e+00> : vector<32xf32>
    %548 = vector.multi_reduction <add>, %547, %cst_151 [1] : vector<32x128xf32> to vector<32xf32>
    %549 = vector.shape_cast %548 : vector<32xf32> to vector<32x1xf32>
    %cst_152 = arith.constant 1.280000e+02 : f32
    %550 = vector.broadcast %cst_152 : f32 to vector<32x1xf32>
    %551 = arith.divf %549, %550 : vector<32x1xf32>
    %cst_153 = arith.constant 9.99999974E-6 : f32
    %552 = vector.broadcast %cst_153 : f32 to vector<32x1xf32>
    %553 = arith.addf %551, %552 : vector<32x1xf32>
    %554 = math.rsqrt %553 : vector<32x1xf32>
    %555 = vector.broadcast %554 : vector<32x1xf32> to vector<32x128xf32>
    %556 = arith.mulf %546, %555 : vector<32x128xf32>
    %557 = vector.broadcast %535 : vector<1x128xf32> to vector<32x128xf32>
    %558 = arith.mulf %556, %557 : vector<32x128xf32>
    %559 = vector.broadcast %536 : vector<1x128xf32> to vector<32x128xf32>
    %560 = arith.addf %558, %559 : vector<32x128xf32>
    %561 = arith.truncf %560 : vector<32x128xf32> to vector<32x128xbf16>
    %cst_154 = arith.constant dense<0.000000e+00> : vector<32x512xf32>
    %562 = tpu.matmul %561, %537, %cst_154 {dimension_numbers = #tpu.dot_dimension_numbers<[1], [0], [0], [1], [0, 0, 1, 1], [], []>} : vector<32x128xbf16>, vector<128x512xbf16>, vector<32x512xf32> -> vector<32x512xf32>
    %563 = vector.broadcast %538 : vector<1x512xf32> to vector<32x512xf32>
    %564 = arith.addf %562, %563 : vector<32x512xf32>
    %565 = math.absf %564 : vector<32x512xf32>
    %cst_155 = arith.constant 0.000000e+00 : f32
    %566 = vector.broadcast %cst_155 : f32 to vector<32x512xf32>
    %567 = arith.subf %566, %565 : vector<32x512xf32>
    %568 = math.exp %567 : vector<32x512xf32>
    %cst_156 = arith.constant 1.000000e+00 : f32
    %569 = vector.broadcast %cst_156 : f32 to vector<32x512xf32>
    %570 = arith.addf %569, %568 : vector<32x512xf32>
    %571 = tpu.reciprocal %570 {approx = true} : vector<32x512xf32> -> vector<32x512xf32>
    %cst_157 = arith.constant 0.000000e+00 : f32
    %572 = vector.broadcast %cst_157 : f32 to vector<32x512xf32>
    %573 = arith.cmpf oge, %564, %572 : vector<32x512xf32>
    %574 = arith.mulf %568, %571 : vector<32x512xf32>
    %575 = arith.select %573, %571, %574 : vector<32x512xi1>, vector<32x512xf32>
    %576 = arith.mulf %564, %575 : vector<32x512xf32>
    %577 = arith.truncf %576 : vector<32x512xf32> to vector<32x512xbf16>
    %cst_158 = arith.constant dense<0.000000e+00> : vector<32x128xf32>
    %578 = tpu.matmul %577, %539, %cst_158 {dimension_numbers = #tpu.dot_dimension_numbers<[1], [0], [0], [1], [0, 0, 1, 1], [], []>} : vector<32x512xbf16>, vector<512x128xbf16>, vector<32x128xf32> -> vector<32x128xf32>
    %579 = vector.broadcast %540 : vector<1x128xf32> to vector<32x128xf32>
    %580 = arith.addf %578, %579 : vector<32x128xf32>
    %cst_159 = arith.constant 5.000000e-01 : f32
    %581 = vector.broadcast %cst_159 : f32 to vector<32x128xf32>
    %582 = arith.mulf %581, %580 : vector<32x128xf32>
    %583 = arith.addf %534, %582 : vector<32x128xf32>
    %c0_160 = arith.constant 0 : index
    %c0_161 = arith.constant 0 : index
    %584 = vector.load %arg38[%c0_160, %c0_161] : memref<1x128xf32, #tpu.memory_space<vmem>>, vector<1x128xf32>
    %c0_162 = arith.constant 0 : index
    %c0_163 = arith.constant 0 : index
    %585 = vector.load %arg39[%c0_162, %c0_163] : memref<1x128xf32, #tpu.memory_space<vmem>>, vector<1x128xf32>
    %cst_164 = arith.constant dense<0.000000e+00> : vector<32xf32>
    %586 = vector.multi_reduction <add>, %583, %cst_164 [1] : vector<32x128xf32> to vector<32xf32>
    %587 = vector.shape_cast %586 : vector<32xf32> to vector<32x1xf32>
    %cst_165 = arith.constant 1.280000e+02 : f32
    %588 = vector.broadcast %cst_165 : f32 to vector<32x1xf32>
    %589 = arith.divf %587, %588 : vector<32x1xf32>
    %590 = vector.broadcast %589 : vector<32x1xf32> to vector<32x128xf32>
    %591 = arith.subf %583, %590 : vector<32x128xf32>
    %592 = arith.mulf %591, %591 : vector<32x128xf32>
    %cst_166 = arith.constant dense<0.000000e+00> : vector<32xf32>
    %593 = vector.multi_reduction <add>, %592, %cst_166 [1] : vector<32x128xf32> to vector<32xf32>
    %594 = vector.shape_cast %593 : vector<32xf32> to vector<32x1xf32>
    %cst_167 = arith.constant 1.280000e+02 : f32
    %595 = vector.broadcast %cst_167 : f32 to vector<32x1xf32>
    %596 = arith.divf %594, %595 : vector<32x1xf32>
    %cst_168 = arith.constant 9.99999974E-6 : f32
    %597 = vector.broadcast %cst_168 : f32 to vector<32x1xf32>
    %598 = arith.addf %596, %597 : vector<32x1xf32>
    %599 = math.rsqrt %598 : vector<32x1xf32>
    %600 = vector.broadcast %599 : vector<32x1xf32> to vector<32x128xf32>
    %601 = arith.mulf %591, %600 : vector<32x128xf32>
    %602 = vector.broadcast %584 : vector<1x128xf32> to vector<32x128xf32>
    %603 = arith.mulf %601, %602 : vector<32x128xf32>
    %604 = vector.broadcast %585 : vector<1x128xf32> to vector<32x128xf32>
    %605 = arith.addf %603, %604 : vector<32x128xf32>
    %606 = arith.addf %129, %605 : vector<32x128xf32>
    %607 = vector.shape_cast %606 : vector<32x128xf32> to vector<2x16x128xf32>
    %c0_169 = arith.constant 0 : index
    %c0_170 = arith.constant 0 : index
    %c0_171 = arith.constant 0 : index
    %608 = vector.load %arg40[%c0_169, %c0_170, %c0_171] : memref<2x16x128xf32, #tpu.memory_space<vmem>>, vector<2x16x128xf32>
    tpu.vector_store %arg40[%c0_169, %c0_170, %c0_171], %607 {strides = array<i32>} : memref<2x16x128xf32, #tpu.memory_space<vmem>>, vector<2x16x128xf32>,
    return
  }
}

</mosaic_0001>

<bundles_post_ra>
// kernel: tpu_custom_call.1
= control target key start
LH: loop header
LB: loop body
LE: loop exit
PB: predicated region body
PF: predicated region fallthrough
CT: control target
= control target key end

     0   :  { %s6976_s6 = smov 1   ;;  %s6977_s10 = smov 2   ;;  %s8400_s0 = inlined_call_operand.smem [shape: u32[41], index: -1, kind: input, shape index: {}] }
   0x1   :  { %s7057_s5 = sld [smem:[%s8400_s0]]   ;;  %s6978_s14 = smov 3  }
   0x2   :  { %s7062_s9 = sld [smem:[%s8400_s0 + %s6976_s6]]   ;;  %s6979_s18 = smov 4  }
   0x3   :  { %s7067_s13 = sld [smem:[%s8400_s0 + %s6977_s10]]   ;;  %s6980_s22 = smov 5  }
   0x4   :  { %s7072_s17 = sld [smem:[%s8400_s0 + %s6978_s14]]   ;;  %s6981_s26 = smov 6  }
   0x5   :  { %s7077_s21 = sld [smem:[%s8400_s0 + %s6979_s18]]   ;;  %s6982_s30 = smov 7  }
   0x6   :  { %s7082_s25 = sld [smem:[%s8400_s0 + %s6980_s22]]   ;;  %s6983_s4 = smov 8  }
   0x7   :  { %s7087_s29 = sld [smem:[%s8400_s0 + %s6981_s26]]   ;;  %s6984_s10 = smov 9  }
   0x8   :  { %s7092_s3 = sld [smem:[%s8400_s0 + %s6982_s30]]   ;;  %s6985_s15 = smov 10  }
   0x9   :  { %s7097_s8 = sld [smem:[%s8400_s0 + %s6983_s4]]   ;;  %s6986_s20 = smov 11  }
   0xa   :  { %s7102_s14 = sld [smem:[%s8400_s0 + %s6984_s10]]   ;;  %s6987_s26 = smov 12  }
   0xb   :  { %s7107_s19 = sld [smem:[%s8400_s0 + %s6985_s15]]   ;;  %s6988_s1 = smov 13  }
   0xc   :  { %s7112_s24 = sld [smem:[%s8400_s0 + %s6986_s20]]   ;;  %s6989_s7 = smov 14  }
   0xd   :  { %s7117_s30 = sld [smem:[%s8400_s0 + %s6987_s26]]   ;;  %s6990_s15 = smov 15  }
   0xe   :  { %s7122_s6 = sld [smem:[%s8400_s0 + %s6988_s1]]   ;;  %s6991_s22 = smov 16  }
   0xf   :  { %8408 = sst [smem:[#allocation48_spill]] %s7097_s8  ;;  %s6992_s28 = smov 17  }
  0x10   :  { %s7127_s12 = sld [smem:[%s8400_s0 + %s6989_s7]]   ;;  %s6993_s7 = smov 18  }
  0x11   :  { %8409 = sst [smem:[#allocation49_spill]] %s7107_s19 }
  0x12   :  { %s7132_s20 = sld [smem:[%s8400_s0 + %s6990_s15]]   ;;  %s6994_s15 = smov 19  }
  0x13   :  { %8410 = sst [smem:[#allocation50_spill]] %s7117_s30 }
  0x14   :  { %8411 = sst [smem:[#allocation51_spill]] %s7122_s6 }
  0x15   :  { %s7137_s27 = sld [smem:[%s8400_s0 + %s6991_s22]]   ;;  %s6995_s22 = smov 20  }
  0x16   :  { %s7142_s4 = sld [smem:[%s8400_s0 + %s6992_s28]]   ;;  %s6996_s28 = smov 21  }
  0x17   :  { %s7147_s6 = sld [smem:[%s8400_s0 + %s6993_s7]]   ;;  %s6997_s7 = smov 22  }
  0x18   :  { %8412 = sst [smem:[#allocation52_spill]] %s7132_s20 }
  0x19   :  { %s7152_s20 = sld [smem:[%s8400_s0 + %s6994_s15]]   ;;  %s6998_s15 = smov 23  }
  0x1b   :  { %8413 = sst [smem:[#allocation53_spill]] %s7137_s27 }
  0x1c   :  { %8414 = sst [smem:[#allocation54_spill]] %s7142_s4 }
  0x1d   :  { %8415 = sst [smem:[#allocation55_spill]] %s7147_s6 }
  0x1e   :  { %s7157_s27 = sld [smem:[%s8400_s0 + %s6995_s22]]   ;;  %s6999_s22 = smov 24  }
  0x1f   :  { %8416 = sst [smem:[#allocation56_spill]] %s7152_s20 }
  0x20   :  { %s7162_s4 = sld [smem:[%s8400_s0 + %s6996_s28]]   ;;  %s7000_s28 = smov 25  }
  0x21   :  { %s7167_s6 = sld [smem:[%s8400_s0 + %s6997_s7]]   ;;  %s7001_s7 = smov 26  }
  0x22   :  { %s7172_s20 = sld [smem:[%s8400_s0 + %s6998_s15]]   ;;  %s7002_s15 = smov 27  }
  0x23   :  { %s7177_s30 = sld [smem:[%s8400_s0 + %s6999_s22]]   ;;  %s7003_s22 = smov 28  }
  0x26   :  { %8417 = sst [smem:[#allocation57_spill]] %s7162_s4 }
  0x27   :  { %8418 = sst [smem:[#allocation58_spill]] %s7167_s6 }
  0x28   :  { %8419 = sst [smem:[#allocation59_spill]] %s7172_s20 }
  0x29   :  { %8420 = sst [smem:[#allocation60_spill]] %s7177_s30 }
  0x2a   :  { %s7182_s4 = sld [smem:[%s8400_s0 + %s7000_s28]]   ;;  %s7004_s28 = smov 29  }
  0x2b   :  { %s7187_s6 = sld [smem:[%s8400_s0 + %s7001_s7]]   ;;  %s7005_s7 = smov 30  }
  0x2c   :  { %s7192_s20 = sld [smem:[%s8400_s0 + %s7002_s15]]   ;;  %s7006_s15 = smov 31  }
  0x2d   :  { %s7197_s30 = sld [smem:[%s8400_s0 + %s7003_s22]]   ;;  %s7007_s22 = smov 32  }
  0x2e   :  { %s7207_s19 = sld [smem:[%s8400_s0 + %s7005_s7]]   ;;  %s7009_s7 = smov 34  }
  0x30   :  { %8421 = sst [smem:[#allocation61_spill]] %s7182_s4 }
  0x31   :  { %s7202_s4 = sld [smem:[%s8400_s0 + %s7004_s28]]   ;;  %s7008_s28 = smov 33  }
  0x32   :  { %8422 = sst [smem:[#allocation62_spill]] %s7192_s20 }
  0x33   :  { %8423 = sst [smem:[#allocation63_spill]] %s7197_s30 }
  0x34   :  { %8425 = sst [smem:[#allocation65_spill]] %s7207_s19 }
  0x35   :  { %s7212_s20 = sld [smem:[%s8400_s0 + %s7006_s15]]   ;;  %s7010_s15 = smov 35  }
  0x36   :  { %s7217_s30 = sld [smem:[%s8400_s0 + %s7007_s22]]   ;;  %s7011_s22 = smov 36  }
  0x37   :  { %8424 = sst [smem:[#allocation64_spill]] %s7202_s4 }
  0x38   :  { %s7222_s4 = sld [smem:[%s8400_s0 + %s7008_s28]]   ;;  %s7012_s28 = smov 37  }
  0x39   :  { %s7227_s19 = sld [smem:[%s8400_s0 + %s7009_s7]]   ;;  %s7013_s7 = smov 38  }
  0x3a   :  { %s7247_s8 = sld [smem:[%s8400_s0 + %s7013_s7]]  }
  0x3b   :  { %8426 = sst [smem:[#allocation66_spill]] %s7212_s20 }
  0x3c   :  { %8427 = sst [smem:[#allocation67_spill]] %s7217_s30 }
  0x3d   :  { %s7232_s20 = sld [smem:[%s8400_s0 + %s7010_s15]]   ;;  %s7014_s15 = smov 39  }
  0x3e   :  { %8428 = sst [smem:[#allocation68_spill]] %s7222_s4 }
  0x3f   :  { %s7237_s30 = sld [smem:[%s8400_s0 + %s7011_s22]]   ;;  %s7015_s22 = smov 40  }
  0x40   :  { %s7242_s4 = sld [smem:[%s8400_s0 + %s7012_s28]]  }
  0x43   :  { %8429 = sst [smem:[#allocation69_spill]] %s7232_s20 }
  0x44   :  { %s7252_s20 = sld [smem:[%s8400_s0 + %s7014_s15]]  }
  0x45   :  { %8430 = sst [smem:[#allocation70_spill]] %s7237_s30 }
  0x46   :  { %s7257_s30 = sld [smem:[%s8400_s0 + %s7015_s22]]  }
  0x47   :  { %86 = vsyncpa [#allocation3], 0 }
  0x48   :  { %87 = vsyncpa [#allocation6], 0 }
  0x49   :  { %88 = vsyncpa [#allocation9], 0 }
  0x4a   :  { %89 = vsyncpa [#allocation12], 0 }
  0x4b   :  { %90 = vsyncpa [#allocation15], 0 }
  0x4c   :  { %91 = vsyncpa [#allocation18], 0 }
  0x4d   :  { %92 = vsyncpa [#allocation21], 0 }
  0x4e   :  { %93 = vsyncpa [#allocation24], 0 }
  0x4f   :  { %94 = vsyncpa [#allocation27], 0 }
  0x50   :  { %95 = vsyncpa [#allocation30], 0 }
  0x51   :  { %96 = vsyncpa [#allocation33], 0 }
  0x52   :  { %97 = vsyncpa [#allocation4], 0  ;;  %s115_s28 = sshll.u32 %s7062_s9, 4  ;;  %s7016_s0 = smov [#allocation5]   ;;  %s116_s28 = int_to_ptr.hbm [resolvable:$true] %s115_s28 }
  0x53   :  { %s117_s1 = sshll.u32 %s7016_s0, 4  ;;  %s142_s2 = sshll.u32 %s7072_s17, 4  ;;  %s118_s1 = int_to_ptr.vmem [resolvable:$true] %s117_s1  ;;  %s143_s2 = int_to_ptr.hbm [resolvable:$true] %s142_s2 }
  0x54   :  { %s6424_s7 = sshra.s32 %s116_s28, 4  ;;  %s6428_s11 = scalar_lea.hbm %s7062_s9, 16  ;;  %s6425_s7 = int_to_ptr.hbm [resolvable:$true] %s6424_s7 }
  0x55   :  { %s6426_s10 = scalar_lea.hbm %s6425_s7, 16  ;;  %p6429_p1 = scmp.lt.s32.totalorder %s6425_s7, %s7062_s9 }
  0x56   :  { %p6427_p0 = scmp.ne.s32.totalorder %s6425_s7, %s6426_s10  ;;  %p6430_p2 = scmp.lt.s32.totalorder %s6428_s11, %s6426_s10 }
  0x58   :  { %p6431_p3 = por %p6430_p2, %p6429_p1 }
  0x5a   :  { %p6432_p4 = pnand %p6431_p3, %p6427_p0 }
  0x5c   :  { %6435 = shalt.err (!%p6432_p4)
}
  0x5d   :  { %s7017_s15 = smov 128   ;;  %s7018_s16 = smov 8  }
  0x5e   :  { %123 = dma.hbm_to_vmem [thread:$0]  %s116_s28, 256, %s118_s1, [#allocation6], %s7017_s15, %s7017_s15, %s7018_s16  }
  0x5f   :  { %s7019_s18 = smov [#allocation8]   ;;  %s166_s23 = sshll.u32 %s7082_s25, 4  ;;  %s167_s23 = int_to_ptr.hbm [resolvable:$true] %s166_s23 }
  0x60   :  { %s144_s22 = sshll.u32 %s7019_s18, 4  ;;  %s6448_s9 = sshra.s32 %s143_s2, 4  ;;  %s145_s22 = int_to_ptr.vmem [resolvable:$true] %s144_s22  ;;  %s6449_s9 = int_to_ptr.hbm [resolvable:$true] %s6448_s9 }
  0x61   :  { %s6450_s26 = scalar_lea.hbm %s6449_s9, 1  ;;  %s6452_s0 = scalar_lea.hbm %s7072_s17, 1 }
  0x62   :  { %p6451_p5 = scmp.ne.s32.totalorder %s6449_s9, %s6450_s26  ;;  %p6453_p6 = scmp.lt.s32.totalorder %s6449_s9, %s7072_s17 }
  0x63   :  { %p6454_p7 = scmp.lt.s32.totalorder %s6452_s0, %s6450_s26 }
  0x65   :  { %p6455_p8 = por %p6454_p7, %p6453_p6 }
  0x67   :  { %p6456_p9 = pnand %p6455_p8, %p6451_p5 }
  0x69   :  { %6459 = shalt.err (!%p6456_p9)
}
  0x6a   :  { %147 = dma.hbm_to_vmem [thread:$0]  %s143_s2, 16, %s145_s22, [#allocation9]  }
  0x6b   :  { %s190_s28 = sshll.u32 %s7092_s3, 4  ;;  %s7020_s1 = smov [#allocation11]   ;;  %s191_s28 = int_to_ptr.hbm [resolvable:$true] %s190_s28 }
  0x6c   :  { %s168_s7 = sshll.u32 %s7020_s1, 4  ;;  %s6472_s10 = sshra.s32 %s167_s23, 4  ;;  %s169_s7 = int_to_ptr.vmem [resolvable:$true] %s168_s7  ;;  %s6473_s10 = int_to_ptr.hbm [resolvable:$true] %s6472_s10 }
  0x6d   :  { %s6474_s11 = scalar_lea.hbm %s6473_s10, 2  ;;  %s6476_s18 = scalar_lea.hbm %s7082_s25, 2 }
  0x6e   :  { %p6475_p10 = scmp.ne.s32.totalorder %s6473_s10, %s6474_s11  ;;  %p6477_p11 = scmp.lt.s32.totalorder %s6473_s10, %s7082_s25 }
  0x6f   :  { %p6478_p12 = scmp.lt.s32.totalorder %s6476_s18, %s6474_s11 }
  0x71   :  { %p6479_p13 = por %p6478_p12, %p6477_p11 }
  0x73   :  { %p6480_p0 = pnand %p6479_p13, %p6475_p10 }
  0x75   :  { %6483 = shalt.err (!%p6480_p0)
}
  0x76   :  { %171 = dma.hbm_to_vmem [thread:$0]  %s167_s23, 32, %s169_s7, [#allocation12]  }
  0x77   :  { %s7021_s17 = smov [#allocation14]   ;;  %s212_s22 = sshll.u32 %s7102_s14, 4  ;;  %s213_s22 = int_to_ptr.hbm [resolvable:$true] %s212_s22 }
  0x78   :  { %s192_s2 = sshll.u32 %s7021_s17, 4  ;;  %s6496_s9 = sshra.s32 %s191_s28, 4  ;;  %s193_s2 = int_to_ptr.vmem [resolvable:$true] %s192_s2  ;;  %s6497_s9 = int_to_ptr.hbm [resolvable:$true] %s6496_s9 }
  0x79   :  { %s6498_s26 = scalar_lea.hbm %s6497_s9, 1  ;;  %s6500_s0 = scalar_lea.hbm %s7092_s3, 1 }
  0x7a   :  { %p6499_p1 = scmp.ne.s32.totalorder %s6497_s9, %s6498_s26  ;;  %p6501_p2 = scmp.lt.s32.totalorder %s6497_s9, %s7092_s3 }
  0x7b   :  { %p6502_p3 = scmp.lt.s32.totalorder %s6500_s0, %s6498_s26 }
  0x7d   :  { %p6503_p4 = por %p6502_p3, %p6501_p2 }
  0x7f   :  { %p6504_p5 = pnand %p6503_p4, %p6499_p1 }
  0x81   :  { %6507 = shalt.err (!%p6504_p5)
}
  0x82   :  { %195 = dma.hbm_to_vmem [thread:$0]  %s191_s28, 16, %s193_s2, [#allocation15]  }
  0x83   :  { %s234_s25 = sshll.u32 %s7112_s24, 4  ;;  %s7022_s23 = smov [#allocation17]   ;;  %s235_s25 = int_to_ptr.hbm [resolvable:$true] %s234_s25 }
  0x84   :  { %s214_s1 = sshll.u32 %s7022_s23, 4  ;;  %s6520_s7 = sshra.s32 %s213_s22, 4  ;;  %s215_s1 = int_to_ptr.vmem [resolvable:$true] %s214_s1  ;;  %s6521_s7 = int_to_ptr.hbm [resolvable:$true] %s6520_s7 }
  0x85   :  { %s6522_s10 = scalar_lea.hbm %s6521_s7, 1  ;;  %s6524_s11 = scalar_lea.hbm %s7102_s14, 1 }
  0x86   :  { %p6523_p6 = scmp.ne.s32.totalorder %s6521_s7, %s6522_s10  ;;  %p6525_p7 = scmp.lt.s32.totalorder %s6521_s7, %s7102_s14 }
  0x87   :  { %p6526_p8 = scmp.lt.s32.totalorder %s6524_s11, %s6522_s10 }
  0x89   :  { %p6527_p9 = por %p6526_p8, %p6525_p7 }
  0x8b   :  { %p6528_p10 = pnand %p6527_p9, %p6523_p6 }
  0x8d   :  { %6531 = shalt.err (!%p6528_p10)
}
  0x8e   :  { %217 = dma.hbm_to_vmem [thread:$0]  %s213_s22, 16, %s215_s1, [#allocation18]  }
  0x8f   :  { %s7023_s3 = smov [#allocation20]   ;;  %s6544_s18 = sshra.s32 %s235_s25, 4  ;;  %s6545_s18 = int_to_ptr.hbm [resolvable:$true] %s6544_s18 }
  0x90   :  { %s236_s28 = sshll.u32 %s7023_s3, 4  ;;  %s6546_s17 = scalar_lea.hbm %s6545_s18, 1  ;;  %s237_s28 = int_to_ptr.vmem [resolvable:$true] %s236_s28 }
  0x91   :  { %p6547_p11 = scmp.ne.s32.totalorder %s6545_s18, %s6546_s17  ;;  %s6548_s2 = scalar_lea.hbm %s7112_s24, 1 }
  0x92   :  { %p6549_p12 = scmp.lt.s32.totalorder %s6545_s18, %s7112_s24  ;;  %p6550_p13 = scmp.lt.s32.totalorder %s6548_s2, %s6546_s17 }
  0x94   :  { %p6551_p0 = por %p6550_p13, %p6549_p12 }
  0x96   :  { %p6552_p1 = pnand %p6551_p0, %p6547_p11 }
  0x98   :  { %6555 = shalt.err (!%p6552_p1)
}
  0x99   :  { %239 = dma.hbm_to_vmem [thread:$0]  %s235_s25, 16, %s237_s28, [#allocation21]  }
  0x9a   :  { %s259_s14 = sshll.u32 %s7127_s12, 4  ;;  %s7024_s22 = smov [#allocation23]   ;;  %s260_s14 = int_to_ptr.hbm [resolvable:$true] %s259_s14 }
  0x9b   :  { %s261_s9 = sshll.u32 %s7024_s22, 4  ;;  %s293_s26 = sshll.u32 %s7157_s27, 4  ;;  %s262_s9 = int_to_ptr.vmem [resolvable:$true] %s261_s9  ;;  %s294_s26 = int_to_ptr.hbm [resolvable:$true] %s293_s26 }
  0x9c   :  { %s6568_s0 = sshra.s32 %s260_s14, 4  ;;  %s6572_s24 = scalar_lea.hbm %s7127_s12, 256  ;;  %s6569_s0 = int_to_ptr.hbm [resolvable:$true] %s6568_s0 }
  0x9d   :  { %s6570_s23 = scalar_lea.hbm %s6569_s0, 256  ;;  %p6573_p3 = scmp.lt.s32.totalorder %s6569_s0, %s7127_s12 }
  0x9e   :  { %p6571_p2 = scmp.ne.s32.totalorder %s6569_s0, %s6570_s23  ;;  %p6574_p4 = scmp.lt.s32.totalorder %s6572_s24, %s6570_s23 }
  0xa0   :  { %p6575_p5 = por %p6574_p4, %p6573_p3 }
  0xa2   :  { %p6576_p6 = pnand %p6575_p5, %p6571_p2 }
  0xa4   :  { %6579 = shalt.err (!%p6576_p6)
}
  0xa5   :  { %s7025_s25 = smov 64   ;;  %s7026_s1 = smov 4  }
  0xa6   :  { %267 = dma.hbm_to_vmem [thread:$0]  %s260_s14, 4096, %s262_s9, [#allocation24], %s7025_s25, %s7025_s25, %s7026_s1  }
  0xa7   :  { %s7027_s7 = smov [#allocation26]   ;;  %s327_s11 = sshll.u32 %s7187_s6, 4  ;;  %s7288_s11 = int_to_ptr.hbm [resolvable:$true] %s327_s11 }
  0xa8   :  { %s295_s10 = sshll.u32 %s7027_s7, 4  ;;  %s6592_s12 = sshra.s32 %s294_s26, 4  ;;  %s296_s10 = int_to_ptr.vmem [resolvable:$true] %s295_s10  ;;  %s6593_s12 = int_to_ptr.hbm [resolvable:$true] %s6592_s12 }
  0xa9   :  { %s6594_s3 = scalar_lea.hbm %s6593_s12, 64  ;;  %s6596_s28 = scalar_lea.hbm %s7157_s27, 64 }
  0xaa   :  { %p6595_p7 = scmp.ne.s32.totalorder %s6593_s12, %s6594_s3  ;;  %p6597_p8 = scmp.lt.s32.totalorder %s6593_s12, %s7157_s27 }
  0xab   :  { %p6598_p9 = scmp.lt.s32.totalorder %s6596_s28, %s6594_s3 }
  0xad   :  { %p6599_p10 = por %p6598_p9, %p6597_p8 }
  0xaf   :  { %p6600_p11 = pnand %p6599_p10, %p6595_p7 }
  0xb1   :  { %6603 = shalt.err (!%p6600_p11)
}
  0xb2   :  { %301 = dma.hbm_to_vmem [thread:$0]  %s294_s26, 1024, %s296_s10, [#allocation27], %s7025_s25, %s7025_s25, %s7026_s1  }
  0xb3   :  { %s7028_s18 = smov [#allocation29]   ;;  %s365_s2 = sshll.u32 %s7227_s19, 4  ;;  %s366_s2 = int_to_ptr.hbm [resolvable:$true] %s365_s2 }
  0xb4   :  { %s329_s17 = sshll.u32 %s7028_s18, 4  ;;  %s6616_s14 = sshra.s32 %s7288_s11, 4  ;;  %s330_s17 = int_to_ptr.vmem [resolvable:$true] %s329_s17  ;;  %s6617_s14 = int_to_ptr.hbm [resolvable:$true] %s6616_s14 }
  0xb5   :  { %s6618_s22 = scalar_lea.hbm %s6617_s14, 32  ;;  %s6620_s27 = scalar_lea.hbm %s7187_s6, 32 }
  0xb6   :  { %p6619_p12 = scmp.ne.s32.totalorder %s6617_s14, %s6618_s22  ;;  %p6621_p13 = scmp.lt.s32.totalorder %s6617_s14, %s7187_s6 }
  0xb7   :  { %p6622_p0 = scmp.lt.s32.totalorder %s6620_s27, %s6618_s22 }
  0xb9   :  { %p6623_p1 = por %p6622_p0, %p6621_p13 }
  0xbb   :  { %p6624_p2 = pnand %p6623_p1, %p6619_p12 }
  0xbd   :  { %6627 = shalt.err (!%p6624_p2)
}
  0xbe   :  { %335 = dma.hbm_to_vmem [thread:$0]  %s7288_s11, 512, %s330_s17, [#allocation30], %s7017_s15, %s7017_s15, %s7018_s16  }
  0xbf   :  { %s7029_s9 = smov [#allocation32]   ;;  %s102_s0 = sshll.u32 %s7057_s5, 4  ;;  %s7304_s0 = int_to_ptr.hbm [resolvable:$true] %s102_s0 }
  0xc0   :  { %s367_s26 = sshll.u32 %s7029_s9, 4  ;;  %s6640_s6 = sshra.s32 %s366_s2, 4  ;;  %s368_s26 = int_to_ptr.vmem [resolvable:$true] %s367_s26  ;;  %s6641_s6 = int_to_ptr.hbm [resolvable:$true] %s6640_s6 }
  0xc1   :  { %s6642_s23 = scalar_lea.hbm %s6641_s6, 256  ;;  %s6644_s24 = scalar_lea.hbm %s7227_s19, 256 }
  0xc2   :  { %p6643_p3 = scmp.ne.s32.totalorder %s6641_s6, %s6642_s23  ;;  %p6645_p4 = scmp.lt.s32.totalorder %s6641_s6, %s7227_s19 }
  0xc3   :  { %p6646_p5 = scmp.lt.s32.totalorder %s6644_s24, %s6642_s23 }
  0xc5   :  { %p6647_p6 = por %p6646_p5, %p6645_p4 }
  0xc7   :  { %p6648_p7 = pnand %p6647_p6, %p6643_p3 }
  0xc9   :  { %6651 = shalt.err (!%p6648_p7)
}
  0xca   :  { %s7030_s7 = smov 256   ;;  %s7031_s10 = smov 16  }
  0xcb   :  { %373 = dma.hbm_to_vmem [thread:$0]  %s366_s2, 4096, %s368_s26, [#allocation33], %s7030_s7, %s7030_s7, %s7031_s10  }
  0xcc   :  { %s128_s11 = sshll.u32 %s7067_s13, 4  ;;  %s7032_s12 = smov [#allocation2]   ;;  %s7312_s11 = int_to_ptr.hbm [resolvable:$true] %s128_s11 }
  0xcd   :  { %s104_s3 = sshll.u32 %s7032_s12, 4  ;;  %s6664_s19 = sshra.s32 %s7304_s0, 4  ;;  %s105_s3 = int_to_ptr.vmem [resolvable:$true] %s104_s3  ;;  %s6665_s19 = int_to_ptr.hbm [resolvable:$true] %s6664_s19 }
  0xce   :  { %s6666_s28 = scalar_lea.hbm %s6665_s19, 32  ;;  %s6668_s18 = scalar_lea.hbm %s7057_s5, 32 }
  0xcf   :  { %p6667_p8 = scmp.ne.s32.totalorder %s6665_s19, %s6666_s28  ;;  %p6669_p9 = scmp.lt.s32.totalorder %s6665_s19, %s7057_s5 }
  0xd0   :  { %p6670_p10 = scmp.lt.s32.totalorder %s6668_s18, %s6666_s28 }
  0xd2   :  { %p6671_p11 = por %p6670_p10, %p6669_p9 }
  0xd4   :  { %p6672_p12 = pnand %p6671_p11, %p6667_p8 }
  0xd6   :  { %6675 = shalt.err (!%p6672_p12)
}
  0xd7   :  { %110 = dma.hbm_to_vmem [thread:$0]  %s7304_s0, 512, %s105_s3, [#allocation3], %s7017_s15, %s7017_s15, %s7018_s16  }
  0xd8   :  { %s7033_s17 = smov [#allocation7]   ;;  %s152_s14 = sshll.u32 %s7077_s21, 4  ;;  %s7322_s14 = int_to_ptr.hbm [resolvable:$true] %s152_s14 }
  0xd9   :  { %s130_s2 = sshll.u32 %s7033_s17, 4  ;;  %s6688_s5 = sshra.s32 %s7312_s11, 4  ;;  %s131_s2 = int_to_ptr.vmem [resolvable:$true] %s130_s2  ;;  %s6689_s5 = int_to_ptr.hbm [resolvable:$true] %s6688_s5 }
  0xda   :  { %s6690_s22 = scalar_lea.hbm %s6689_s5, 64  ;;  %s6692_s27 = scalar_lea.hbm %s7067_s13, 64 }
  0xdb   :  { %p6691_p13 = scmp.ne.s32.totalorder %s6689_s5, %s6690_s22  ;;  %p6693_p0 = scmp.lt.s32.totalorder %s6689_s5, %s7067_s13 }
  0xdc   :  { %p6694_p1 = scmp.lt.s32.totalorder %s6692_s27, %s6690_s22 }
  0xde   :  { %p6695_p2 = por %p6694_p1, %p6693_p0 }
  0xe0   :  { %p6696_p3 = pnand %p6695_p2, %p6691_p13 }
  0xe2   :  { %6699 = shalt.err (!%p6696_p3)
}
  0xe3   :  { %136 = dma.hbm_to_vmem [thread:$0]  %s7312_s11, 1024, %s131_s2, [#allocation6], %s7025_s25, %s7025_s25, %s7026_s1  }
  0xe4   :  { %s176_s9 = sshll.u32 %s7087_s29, 4  ;;  %s7034_s26 = smov [#allocation10]   ;;  %s7332_s9 = int_to_ptr.hbm [resolvable:$true] %s176_s9 }
  0xe5   :  { %s154_s0 = sshll.u32 %s7034_s26, 4  ;;  %s6712_s13 = sshra.s32 %s7322_s14, 4  ;;  %s155_s0 = int_to_ptr.vmem [resolvable:$true] %s154_s0  ;;  %s6713_s13 = int_to_ptr.hbm [resolvable:$true] %s6712_s13 }
  0xe6   :  { %s6714_s6 = scalar_lea.hbm %s6713_s13, 128  ;;  %s6716_s23 = scalar_lea.hbm %s7077_s21, 128 }
  0xe7   :  { %p6715_p4 = scmp.ne.s32.totalorder %s6713_s13, %s6714_s6  ;;  %p6717_p5 = scmp.lt.s32.totalorder %s6713_s13, %s7077_s21 }
  0xe8   :  { %p6718_p6 = scmp.lt.s32.totalorder %s6716_s23, %s6714_s6 }
  0xea   :  { %p6719_p7 = por %p6718_p6, %p6717_p5 }
  0xec   :  { %p6720_p8 = pnand %p6719_p7, %p6715_p4 }
  0xee   :  { %6723 = shalt.err (!%p6720_p8)
}
  0xef   :  { %s8431_s24 = sld [smem:[#allocation48_spill]]  ;;  %s7035_s11 = smov [#allocation13]  }
  0xf0   :  { %160 = dma.hbm_to_vmem [thread:$0]  %s7322_s14, 2048, %s155_s0, [#allocation9], %s7017_s15, %s7017_s15, %s7018_s16  }
  0xf1   :  { %s178_s12 = sshll.u32 %s7035_s11, 4  ;;  %s6736_s19 = sshra.s32 %s7332_s9, 4  ;;  %s179_s12 = int_to_ptr.vmem [resolvable:$true] %s178_s12  ;;  %s6737_s19 = int_to_ptr.hbm [resolvable:$true] %s6736_s19 }
  0xf2   :  { %s6738_s21 = scalar_lea.hbm %s6737_s19, 64  ;;  %s6740_s28 = scalar_lea.hbm %s7087_s29, 64 }
  0xf3   :  { %p6739_p9 = scmp.ne.s32.totalorder %s6737_s19, %s6738_s21  ;;  %p6741_p10 = scmp.lt.s32.totalorder %s6737_s19, %s7087_s29 }
  0xf4   :  { %p6742_p11 = scmp.lt.s32.totalorder %s6740_s28, %s6738_s21 }
  0xf5   :  { %s201_s3 = sshll.u32 %s8431_s24, 4  ;;  %s202_s3 = int_to_ptr.hbm [resolvable:$true] %s201_s3 }
  0xf6   :  { %p6743_p12 = por %p6742_p11, %p6741_p10 }
  0xf8   :  { %p6744_p13 = pnand %p6743_p12, %p6739_p9 }
  0xfa   :  { %6747 = shalt.err (!%p6744_p13)
}
  0xfb   :  { %s8432_s18 = sld [smem:[#allocation49_spill]]  ;;  %s7036_s2 = smov [#allocation16]  }
  0xfc   :  { %184 = dma.hbm_to_vmem [thread:$0]  %s7332_s9, 1024, %s179_s12, [#allocation12], %s7025_s25, %s7025_s25, %s7026_s1  }
  0xfd   :  { %s203_s14 = sshll.u32 %s7036_s2, 4  ;;  %s6760_s5 = sshra.s32 %s202_s3, 4  ;;  %s204_s14 = int_to_ptr.vmem [resolvable:$true] %s203_s14  ;;  %s6761_s5 = int_to_ptr.hbm [resolvable:$true] %s6760_s5 }
  0xfe   :  { %s6762_s29 = scalar_lea.hbm %s6761_s5, 1  ;;  %s6764_s22 = scalar_lea.hbm %s8431_s24, 1 }
  0xff   :  { %p6763_p0 = scmp.ne.s32.totalorder %s6761_s5, %s6762_s29  ;;  %p6765_p1 = scmp.lt.s32.totalorder %s6761_s5, %s8431_s24 }
 0x100   :  { %p6766_p2 = scmp.lt.s32.totalorder %s6764_s22, %s6762_s29 }
 0x101   :  { %s223_s17 = sshll.u32 %s8432_s18, 4  ;;  %s224_s17 = int_to_ptr.hbm [resolvable:$true] %s223_s17 }
 0x102   :  { %p6767_p3 = por %p6766_p2, %p6765_p1 }
 0x104   :  { %p6768_p4 = pnand %p6767_p3, %p6763_p0 }
 0x106   :  { %6771 = shalt.err (!%p6768_p4)
}
 0x107   :  { %206 = dma.hbm_to_vmem [thread:$0]  %s202_s3, 16, %s204_s14, [#allocation15]  }
 0x108   :  { %s8433_s27 = sld [smem:[#allocation50_spill]]  ;;  %s7037_s9 = smov [#allocation19]  }
 0x109   :  { %s225_s26 = sshll.u32 %s7037_s9, 4  ;;  %s6784_s13 = sshra.s32 %s224_s17, 4  ;;  %s226_s26 = int_to_ptr.vmem [resolvable:$true] %s225_s26  ;;  %s6785_s13 = int_to_ptr.hbm [resolvable:$true] %s6784_s13 }
 0x10a   :  { %s6786_s6 = scalar_lea.hbm %s6785_s13, 1  ;;  %s6788_s23 = scalar_lea.hbm %s8432_s18, 1 }
 0x10b   :  { %p6787_p5 = scmp.ne.s32.totalorder %s6785_s13, %s6786_s6  ;;  %p6789_p6 = scmp.lt.s32.totalorder %s6785_s13, %s8432_s18 }
 0x10c   :  { %p6790_p7 = scmp.lt.s32.totalorder %s6788_s23, %s6786_s6 }
 0x10e   :  { %s244_s0 = sshll.u32 %s8433_s27, 4  ;;  %p6791_p8 = por %p6790_p7, %p6789_p6  ;;  %s7353_s0 = int_to_ptr.hbm [resolvable:$true] %s244_s0 }
 0x110   :  { %p6792_p9 = pnand %p6791_p8, %p6787_p5 }
 0x112   :  { %6795 = shalt.err (!%p6792_p9)
}
 0x113   :  { %228 = dma.hbm_to_vmem [thread:$0]  %s224_s17, 16, %s226_s26, [#allocation18]  }
 0x114   :  { %s8434_s24 = sld [smem:[#allocation55_spill]]  ;;  %s7038_s12 = smov [#allocation22]  }
 0x115   :  { %s246_s3 = sshll.u32 %s7038_s12, 4  ;;  %s6808_s19 = sshra.s32 %s7353_s0, 4  ;;  %s247_s3 = int_to_ptr.vmem [resolvable:$true] %s246_s3  ;;  %s6809_s19 = int_to_ptr.hbm [resolvable:$true] %s6808_s19 }
 0x116   :  { %s6810_s21 = scalar_lea.hbm %s6809_s19, 256  ;;  %s6812_s28 = scalar_lea.hbm %s8433_s27, 256 }
 0x117   :  { %p6811_p10 = scmp.ne.s32.totalorder %s6809_s19, %s6810_s21  ;;  %p6813_p11 = scmp.lt.s32.totalorder %s6809_s19, %s8433_s27 }
 0x118   :  { %p6814_p12 = scmp.lt.s32.totalorder %s6812_s28, %s6810_s21 }
 0x11a   :  { %s278_s11 = sshll.u32 %s8434_s24, 4  ;;  %p6815_p13 = por %p6814_p12, %p6813_p11  ;;  %s7358_s11 = int_to_ptr.hbm [resolvable:$true] %s278_s11 }
 0x11c   :  { %p6816_p0 = pnand %p6815_p13, %p6811_p10 }
 0x11e   :  { %6819 = shalt.err (!%p6816_p0)
}
 0x11f   :  { %252 = dma.hbm_to_vmem [thread:$0]  %s7353_s0, 4096, %s247_s3, [#allocation21], %s7030_s7, %s7030_s7, %s7031_s10  }
 0x120   :  { %s7039_s18 = smov [#allocation25]   ;;  %s6832_s2 = sshra.s32 %s7358_s11, 4  ;;  %s6833_s2 = int_to_ptr.hbm [resolvable:$true] %s6832_s2 }
 0x121   :  { %s280_s17 = sshll.u32 %s7039_s18, 4  ;;  %s6834_s14 = scalar_lea.hbm %s6833_s2, 192  ;;  %s281_s17 = int_to_ptr.vmem [resolvable:$true] %s280_s17 }
 0x122   :  { %p6835_p1 = scmp.ne.s32.totalorder %s6833_s2, %s6834_s14  ;;  %s6836_s5 = scalar_lea.hbm %s8434_s24, 192 }
 0x123   :  { %p6837_p2 = scmp.lt.s32.totalorder %s6833_s2, %s8434_s24  ;;  %p6838_p3 = scmp.lt.s32.totalorder %s6836_s5, %s6834_s14 }
 0x125   :  { %p6839_p4 = por %p6838_p3, %p6837_p2 }
 0x127   :  { %p6840_p5 = pnand %p6839_p4, %p6835_p1 }
 0x129   :  { %6843 = shalt.err (!%p6840_p5)
}
 0x12a   :  { %s7040_s29 = smov 192   ;;  %s8435_s22 = sld [smem:[#allocation60_spill]] }
 0x12b   :  { %s8436_s27 = sld [smem:[#allocation65_spill]]  ;;  %s7041_s7 = smov 12  }
 0x12c   :  { %286 = dma.hbm_to_vmem [thread:$0]  %s7358_s11, 3072, %s281_s17, [#allocation24], %s7040_s29, %s7040_s29, %s7041_s7  }
 0x12d   :  { %s7042_s9 = smov [#allocation28]  }
 0x12e   :  { %s314_s26 = sshll.u32 %s7042_s9, 4  ;;  %s315_s26 = int_to_ptr.vmem [resolvable:$true] %s314_s26 }
 0x130   :  { %s312_s10 = sshll.u32 %s8435_s22, 4  ;;  %s6860_s23 = scalar_lea.hbm %s8435_s22, 128  ;;  %s313_s10 = int_to_ptr.hbm [resolvable:$true] %s312_s10 }
 0x131   :  { %s346_s0 = sshll.u32 %s8436_s27, 4  ;;  %s6856_s13 = sshra.s32 %s313_s10, 4  ;;  %s6857_s13 = int_to_ptr.hbm [resolvable:$true] %s6856_s13  ;;  %s347_s0 = int_to_ptr.hbm [resolvable:$true] %s346_s0 }
 0x132   :  { %s6858_s6 = scalar_lea.hbm %s6857_s13, 128  ;;  %p6861_p7 = scmp.lt.s32.totalorder %s6857_s13, %s8435_s22 }
 0x133   :  { %p6859_p6 = scmp.ne.s32.totalorder %s6857_s13, %s6858_s6  ;;  %p6862_p8 = scmp.lt.s32.totalorder %s6860_s23, %s6858_s6 }
 0x135   :  { %p6863_p9 = por %p6862_p8, %p6861_p7 }
 0x137   :  { %p6864_p10 = pnand %p6863_p9, %p6859_p6 }
 0x139   :  { %6867 = shalt.err (!%p6864_p10)
}
 0x13a   :  { %s8437_s24 = sld [smem:[#allocation70_spill]]  ;;  %s7043_s11 = smov [#allocation31]  }
 0x13b   :  { %320 = dma.hbm_to_vmem [thread:$0]  %s313_s10, 2048, %s315_s26, [#allocation27], %s7017_s15, %s7017_s15, %s7018_s16  }
 0x13c   :  { %s348_s12 = sshll.u32 %s7043_s11, 4  ;;  %s6880_s19 = sshra.s32 %s347_s0, 4  ;;  %s349_s12 = int_to_ptr.vmem [resolvable:$true] %s348_s12  ;;  %s6881_s19 = int_to_ptr.hbm [resolvable:$true] %s6880_s19 }
 0x13d   :  { %s6882_s21 = scalar_lea.hbm %s6881_s19, 64  ;;  %s6884_s28 = scalar_lea.hbm %s8436_s27, 64 }
 0x13e   :  { %p6883_p11 = scmp.ne.s32.totalorder %s6881_s19, %s6882_s21  ;;  %p6885_p12 = scmp.lt.s32.totalorder %s6881_s19, %s8436_s27 }
 0x13f   :  { %p6886_p13 = scmp.lt.s32.totalorder %s6884_s28, %s6882_s21 }
 0x140   :  { %s380_s3 = sshll.u32 %s8437_s24, 4  ;;  %s381_s3 = int_to_ptr.hbm [resolvable:$true] %s380_s3 }
 0x141   :  { %p6887_p0 = por %p6886_p13, %p6885_p12 }
 0x143   :  { %p6888_p1 = pnand %p6887_p0, %p6883_p11 }
 0x145   :  { %6891 = shalt.err (!%p6888_p1)
}
 0x146   :  { %354 = dma.hbm_to_vmem [thread:$0]  %s347_s0, 1024, %s349_s12, [#allocation30], %s7025_s25, %s7025_s25, %s7026_s1  }
 0x147   :  { %s7044_s18 = smov [#allocation34]   ;;  %s6904_s2 = sshra.s32 %s381_s3, 4  ;;  %s6905_s2 = int_to_ptr.hbm [resolvable:$true] %s6904_s2 }
 0x148   :  { %s382_s17 = sshll.u32 %s7044_s18, 4  ;;  %s6906_s14 = scalar_lea.hbm %s6905_s2, 256  ;;  %s383_s17 = int_to_ptr.vmem [resolvable:$true] %s382_s17 }
 0x149   :  { %p6907_p2 = scmp.ne.s32.totalorder %s6905_s2, %s6906_s14  ;;  %s6908_s5 = scalar_lea.hbm %s8437_s24, 256 }
 0x14a   :  { %p6909_p3 = scmp.lt.s32.totalorder %s6905_s2, %s8437_s24  ;;  %p6910_p4 = scmp.lt.s32.totalorder %s6908_s5, %s6906_s14 }
 0x14c   :  { %p6911_p5 = por %p6910_p4, %p6909_p3 }
 0x14e   :  { %p6912_p6 = pnand %p6911_p5, %p6907_p2 }
 0x150   :  { %6915 = shalt.err (!%p6912_p6)
}
 0x151   :  { %388 = dma.hbm_to_vmem [thread:$0]  %s381_s3, 4096, %s383_s17, [#allocation33], %s7025_s25, %s7025_s25, %s7026_s1  }
 0x152   :  { %6952 = dma.done.wait [#allocation3], 512  }
 0x153   :  { %6953 = vsyncadd [#allocation3], 4294966784 }
 0x154   :  { %6954 = dma.done.wait [#allocation6], 1280  }
 0x155   :  { %6955 = vsyncadd [#allocation6], 4294966016 }
 0x156   :  { %6956 = dma.done.wait [#allocation9], 2064  }
 0x157   :  { %6957 = vsyncadd [#allocation9], 4294965232 }
 0x158   :  { %6958 = dma.done.wait [#allocation12], 1056  }
 0x159   :  { %6959 = vsyncadd [#allocation12], 4294966240 }
 0x15a   :  { %6960 = dma.done.wait [#allocation15], 32  }
 0x15b   :  { %6961 = vsyncadd [#allocation15], 4294967264 }
 0x15c   :  { %6962 = dma.done.wait [#allocation18], 32  }
 0x15d   :  { %6963 = vsyncadd [#allocation18], 4294967264 }
 0x15e   :  { %6964 = dma.done.wait [#allocation21], 4112  }
 0x15f   :  { %6965 = vsyncadd [#allocation21], 4294963184 }
 0x160   :  { %6966 = dma.done.wait [#allocation24], 7168  }
 0x161   :  { %6967 = vsyncadd [#allocation24], 4294960128 }
 0x162   :  { %6968 = dma.done.wait [#allocation27], 3072  }
 0x163   :  { %6969 = vsyncadd [#allocation27], 4294964224 }
 0x164   :  { %6970 = dma.done.wait [#allocation30], 1536  }
 0x165   :  { %6971 = vsyncadd [#allocation30], 4294965760 }
 0x166   :  { %6972 = dma.done.wait [#allocation33], 8192  }
 0x167   :  { %6973 = vsyncadd [#allocation33], 4294959104  ;;  %v5717_v0 = vld [vmem:[#allocation7 + $0x38] sm:$0xff]  ;;  %v4920_v1 = vld [vmem:[#allocation10 + $0x70] sm:$0xf]  ;;  %vm740_vm0 = vcmask 261120  }
 0x168   :  { %v5733_v2 = vld [vmem:[#allocation10 + $0x74] sm:$0xf0]  ;;  %v4912_v4 = vld [vmem:[#allocation10 + $0x60] sm:$0xf]  ;;  %v5731_v5 = vld [vmem:[#allocation10 + $0x64] sm:$0xf0]  ;;  %590 = vmatpush.bf16.msra.mxu0 %v5717_v0 }
 0x169   :  { %v4921_v3 = vor.u32 %v5733_v2, %v4920_v1  ;;  %v5716_v6 = vld [vmem:[#allocation7 + $0x30] sm:$0xff]  ;;  %v4913_v7 = vor.u32 %v5731_v5, %v4912_v4  ;;  %v5729_v9 = vld [vmem:[#allocation10 + $0x54] sm:$0xf0]  ;;  %v5715_v10 = vld [vmem:[#allocation7 + $0x28] sm:$0xff]  ;;  %s7045_s1 = smov 96   ;;  %s7046_s29 = smov 32  }
 0x16a   :  { %v4904_v8 = vld [vmem:[#allocation10 + $0x50] sm:$0xf]  ;;  %v4896_v12 = vld [vmem:[#allocation10 + $0x40] sm:$0xf]  ;;  %v5727_v13 = vld [vmem:[#allocation10 + $0x44] sm:$0xf0] }
 0x16b   :  { %695 = vmatpush.bf16.msra.mxu1 %v4921_v3  ;;  %v4905_v11 = vor.u32 %v5729_v9, %v4904_v8  ;;  %v5714_v14 = vld [vmem:[#allocation7 + $0x20] sm:$0xff]  ;;  %v4888_v15 = vld [vmem:[#allocation10 + $0x30] sm:$0xf]  ;;  %v5725_v16 = vld [vmem:[#allocation10 + $0x34] sm:$0xf0]  ;;  %v4897_v17 = vor.u32 %v5727_v13, %v4896_v12  ;;  %vm786_vm1 = vcmask 64512  }
 0x16c   :  { %591 = vmatpush.bf16.msra.mxu0 %v5716_v6  ;;  %v5713_v18 = vld [vmem:[#allocation7 + $0x18] sm:$0xff]  ;;  %v4880_v19 = vld [vmem:[#allocation10 + $0x20] sm:$0xf]  ;;  %v5723_v20 = vld [vmem:[#allocation10 + $0x24] sm:$0xf0]  ;;  %v4889_v21 = vor.u32 %v5725_v16, %v4888_v15  ;;  %vm843_vm2 = vcmask 1043456  }
 0x16d   :  { %v5712_v22 = vld [vmem:[#allocation7 + $0x10] sm:$0xff]  ;;  %v4881_v23 = vor.u32 %v5723_v20, %v4880_v19  ;;  %v5721_v25 = vld [vmem:[#allocation10 + $0x14] sm:$0xf0]  ;;  %v5711_v26 = vld [vmem:[#allocation7 + $0x8] sm:$0xff]  ;;  %vm1400_vm3 = vcmask 523264   ;;  %vm1405_vm4 = vcmask 785408  }
 0x16e   :  { %v4872_v24 = vld [vmem:[#allocation10 + $0x10] sm:$0xf]  ;;  %v4864_v28 = vld [vmem:[#allocation10] sm:$0xf]  ;;  %v5719_v29 = vld [vmem:[#allocation10 + $0x4] sm:$0xf0] }
 0x16f   :  { %696 = vmatpush.bf16.msra.mxu1 %v4913_v7  ;;  %v4873_v27 = vor.u32 %v5721_v25, %v4872_v24  ;;  %v5710_v30 = vld [vmem:[#allocation7] sm:$0xff]  ;;  %v480_v31 = vld [vmem:[#allocation2] sm:$0xff]  ;;  %v481_v32 = vld [vmem:[#allocation2 + $0x8] sm:$0xff]  ;;  %v4865_v33 = vor.u32 %v5719_v29, %v4864_v28  ;;  %s8438_s22 = sld [smem:[#allocation51_spill]]  ;;  %s6944_s18 = scalar_lea.hbm %s7257_s30, 32 }
 0x170   :  { %592 = vmatpush.bf16.msra.mxu0 %v5715_v10  ;;  %v484_v34 = vld [vmem:[#allocation5] sm:$0xff]  ;;  %v485_v35 = vld [vmem:[#allocation5 + $0x8] sm:$0xff]  ;;  %v537_v36 = vpack.c.bf16 %v481_v32, %v480_v31  ;;  %v482_v38 = vld [vmem:[#allocation2 + $0x10] sm:$0xff]  ;;  %s8439_s27 = sld [smem:[#allocation52_spill]] }
 0x171   :  { %v7389_v37 = vpack.c.bf16 %v485_v35, %v484_v34  ;;  %v483_v39 = vld [vmem:[#allocation2 + $0x18] sm:$0xff]  ;;  %v7392_v41 = vld [vmem:[#allocation11] sm:$0x3]  ;;  %v6029_v43 = vld [vmem:[#allocation8] ss:$0 sm:$0xff]  ;;  %s8440_s7 = sld [smem:[#allocation53_spill]] }
 0x172   :  { %v538_v40 = vpack.c.bf16 %v483_v39, %v482_v38  ;;  %v611_v42 = vperm.slane %v7392_v41, 0  ;;  %v5732_v3 = vld [vmem:[#allocation10 + $0x74] sm:$0xf]  ;;  %v4922_v4 = vld [vmem:[#allocation10 + $0x78] sm:$0xf0]  ;;  %s8441_s10 = sld [smem:[#allocation54_spill]] }
 0x173   :  { %697 = vmatpush.bf16.msra.mxu1 %v4905_v11  ;;  %v4925_v5 = vor.u32 %v5732_v3, %v4922_v4  ;;  %v5730_v6 = vld [vmem:[#allocation10 + $0x64] sm:$0xf]  ;;  %v4914_v7 = vld [vmem:[#allocation10 + $0x68] sm:$0xf0]  ;;  %v5728_v10 = vld [vmem:[#allocation10 + $0x54] sm:$0xf] }
 0x174   :  { %593 = vmatpush.bf16.msra.mxu0 %v5714_v14  ;;  %v4917_v9 = vor.u32 %v5730_v6, %v4914_v7  ;;  %v4906_v11 = vld [vmem:[#allocation10 + $0x58] sm:$0xf0]  ;;  %v4882_v28 = vld [vmem:[#allocation10 + $0x28] sm:$0xf0]  ;;  %s8442_s9 = sld [smem:[#allocation56_spill]] }
 0x175   :  { %709 = vmatpush.bf16.msra.mxu2 %v4925_v5  ;;  %v4909_v15 = vor.u32 %v5728_v10, %v4906_v11  ;;  %v4890_v24 = vld [vmem:[#allocation10 + $0x38] sm:$0xf0]  ;;  %v4866_v34 = vld [vmem:[#allocation10 + $0x8] sm:$0xf0]  ;;  %s8444_s26 = sld [smem:[#allocation58_spill]] }
 0x176   :  { %v4874_v31 = vld [vmem:[#allocation10 + $0x18] sm:$0xf0]  ;;  %s8445_s0 = sld [smem:[#allocation59_spill]] }
 0x177   :  { %698 = vmatpush.bf16.msra.mxu1 %v4897_v17  ;;  %v5726_v17 = vld [vmem:[#allocation10 + $0x44] sm:$0xf]  ;;  %s8446_s13 = sld [smem:[#allocation61_spill]] }
 0x178   :  { %594 = vmatpush.bf16.msra.mxu0 %v5713_v18  ;;  %v4898_v18 = vld [vmem:[#allocation10 + $0x48] sm:$0xf0]  ;;  %s8447_s6 = sld [smem:[#allocation62_spill]] }
 0x179   :  { %710 = vmatpush.bf16.msra.mxu2 %v4917_v9  ;;  %s8448_s23 = sld [smem:[#allocation63_spill]] }
 0x17a   :  { %s8449_s24 = sld [smem:[#allocation64_spill]] }
 0x17b   :  { %699 = vmatpush.bf16.msra.mxu1 %v4889_v21  ;;  %v4901_v21 = vor.u32 %v5726_v17, %v4898_v18  ;;  %s8450_s11 = sld [smem:[#allocation66_spill]] }
 0x17c   :  { %595 = vmatpush.bf16.msra.mxu0 %v5712_v22  ;;  %s8451_s12 = sld [smem:[#allocation67_spill]] }
 0x17d   :  { %711 = vmatpush.bf16.msra.mxu2 %v4909_v15  ;;  %s8452_s3 = sld [smem:[#allocation68_spill]] }
 0x17e   :  { %s8453_s19 = sld [smem:[#allocation69_spill]] }
 0x17f   :  { %700 = vmatpush.bf16.msra.mxu1 %v4881_v23  ;;  %v5724_v23 = vld [vmem:[#allocation10 + $0x34] sm:$0xf] }
 0x180   :  { %596 = vmatpush.bf16.msra.mxu0 %v5711_v26  ;;  %v4893_v26 = vor.u32 %v5724_v23, %v4890_v24 }
 0x181   :  { %712 = vmatpush.bf16.msra.mxu2 %v4901_v21 }
 0x183   :  { %701 = vmatpush.bf16.msra.mxu1 %v4873_v27  ;;  %v5722_v27 = vld [vmem:[#allocation10 + $0x24] sm:$0xf] }
 0x184   :  { %597 = vmatpush.bf16.msra.mxu0 %v5710_v30  ;;  %v4885_v29 = vor.u32 %v5722_v27, %v4882_v28  ;;  %v5720_v30 = vld [vmem:[#allocation10 + $0x14] sm:$0xf] }
 0x185   :  { %713 = vmatpush.bf16.msra.mxu2 %v4893_v26  ;;  %v4877_v32 = vor.u32 %v5720_v30, %v4874_v31 }
 0x187   :  { %702 = vmatpush.bf16.msra.mxu1 %v4865_v33  ;;  %598 = vmatmul.bf16.vlgmr.msra.gmra.mxu0 %v537_v36  ;;  %v5718_v33 = vld [vmem:[#allocation10 + $0x4] sm:$0xf] }
 0x188   :  { %v4869_v36 = vor.u32 %v5718_v33, %v4866_v34 }
 0x189   :  { %714 = vmatpush.bf16.msra.mxu2 %v4885_v29 }
 0x18a   :  { %703 = vmatmul.bf16.vlgmr.msra.gmra.mxu1 %v7389_v37 }
 0x18d   :  { %715 = vmatpush.bf16.msra.mxu2 %v4877_v32 }
 0x191   :  { %716 = vmatpush.bf16.msra.mxu2 %v4869_v36 }
 0x194   :  { %717 = vmatmul.bf16.vlgmr.msra.gmra.mxu2 %v7389_v37 }
 0x197   :  { %603 = vmatmul.bf16.gmra.mxu0 %v538_v40 }
 0x204   :  { %v599_v44 = vpop.f32.mrf.mxu0 }
 0x205   :  { %v600_v47 = vadd.f32 %v6029_v43, %v599_v44 }
 0x207   :  { %v704_v45 = vpop.f32.mrf.mxu1  ;;  %v723_v51 = vmul.f32 0.17677669, %v600_v47 }
 0x208   :  { %v705_v46 = vadd.f32 %v704_v45, %v611_v42 }
 0x209   :  { %v727_v57 = vpack.c.bf16 %v723_v51, %v723_v51 }
 0x20a   :  { %v731_v48 = vpack.c.bf16 %v705_v46, %v705_v46  ;;  %v612_v46 = vperm.slane %v7392_v41, 1 }
 0x20b   :  { %v737_v62 = vunpack.c.l.b16 %v727_v57 }
 0x20c   :  { %v889_v49 = vunpack.c.l.b16 %v731_v48  ;;  %v745_v50 = vsel %vm740_vm0, %v731_v48, 0  ;;  %v601_v53 = vpop.f32.mrf.mxu0 }
 0x20d   :  { %754 = vmatpush.bf16.xpose.msra.mxu3 %v745_v50  ;;  %v602_v54 = vadd.f32 %v6029_v43, %v601_v53 }
 0x20e   :  { %v7396_v52 = vpack.c.b16 %v889_v49, %v889_v49 }
 0x20f   :  { %v706_v55 = vpop.f32.mrf.mxu1  ;;  %v724_v58 = vmul.f32 0.17677669, %v602_v54 }
 0x210   :  { %v707_v56 = vadd.f32 %v706_v55, %v611_v42  ;;  %891 = vrot.lane.b32.xlu2 %v7396_v52, %s7045_s1 }
 0x211   :  { %v728_v60 = vpack.c.bf16 %v724_v58, %v724_v58 }
 0x212   :  { %v732_v59 = vpack.c.bf16 %v707_v56, %v707_v56 }
 0x213   :  { %v738_v63 = vunpack.c.l.b16 %v728_v60 }
 0x214   :  { %v770_v61 = vsel %vm740_vm0, %v732_v59, 0  ;;  %v604_v0 = vpop.f32.mrf.mxu0  ;;  %v916_v35 = vunpack.c.l.b16 %v732_v59 }
 0x215   :  { %779 = vmatpush.bf16.xpose.msrb.mxu3 %v770_v61  ;;  %v7401_v1 = vpack.c.b16 %v738_v63, %v737_v62  ;;  %v605_v2 = vadd.f32 %v6029_v43, %v604_v0 }
 0x216   :  { %v917_v38 = vpack.c.b16 %v916_v35, %v916_v35 }
 0x217   :  { %4926 = vmatmul.msk.bf16.vlgmr.msra.gmra.mxu3 %vm740_vm0, %v7401_v1  ;;  %v725_v8 = vmul.f32 0.17677669, %v605_v2  ;;  %v718_v47 = vpop.f32.mrf.mxu2 }
 0x218   :  { %886 = vrot.lane.b32.xlu2 %v7401_v1, %s7045_s1  ;;  %v719_v48 = vadd.f32 %v718_v47, %v612_v46 }
 0x219   :  { %v729_v13 = vpack.c.bf16 %v725_v8, %v725_v8 }
 0x21a   :  { %v7423_v49 = vpack.c.bf16 %v719_v48, %v719_v48 }
 0x21b   :  { %v763_v19 = vunpack.c.l.b16 %v729_v13 }
 0x21c   :  { %v606_v12 = vpop.f32.mrf.mxu0  ;;  %v845_v50 = vsel %vm843_vm2, %v7423_v49, 0 }
 0x21d   :  { %v607_v14 = vadd.f32 %v6029_v43, %v606_v12  ;;  %854 = vmatpush.bf16.msra.mxu3 %v845_v50 }
 0x21f   :  { %v726_v16 = vmul.f32 0.17677669, %v607_v14  ;;  %v7430_v51 = vpop.f32.mrf.mxu2 }
 0x220   :  { %v721_v30 = vadd.f32 %v7430_v51, %v612_v46 }
 0x221   :  { %v730_v20 = vpack.c.bf16 %v726_v16, %v726_v16 }
 0x222   :  { %v7464_v32 = vpack.c.bf16 %v721_v30, %v721_v30 }
 0x223   :  { %v764_v22 = vunpack.c.l.b16 %v730_v20 }
 0x224   :  { %v870_v33 = vsel %vm843_vm2, %v7464_v32, 0 }
 0x225   :  { %v765_v25 = vpack.c.b16 %v764_v22, %v763_v19  ;;  %879 = vmatpush.bf16.msrb.mxu1 %v870_v33 }
 0x227   :  { %913 = vrot.lane.b32.xlu2 %v765_v25, %s7045_s1  ;;  %4927 = vmatmul.msk.bf16.vlgmr.msrb.gmra.mxu3 %vm740_vm0, %v765_v25 }
 0x22f   :  { %1048 = vrot.lane.b32.xlu2 %v7401_v1, %s7025_s25 }
 0x237   :  { %1074 = vrot.lane.b32.xlu2 %v917_v38, %s7025_s25 }
 0x23f   :  { %1072 = vrot.lane.b32.xlu2 %v765_v25, %s7025_s25 }
 0x247   :  { %1222 = vrot.lane.b32.xlu2 %v765_v25, %s7046_s29 }
 0x26a   :  { %v892_v39 = vpop.permute.xlu2 %891 }
 0x26b   :  { %v897_v40 = vsel %vm740_vm0, %v892_v39, 0 }
 0x26c   :  { %906 = vmatpush.bf16.xpose.msrb.mxu2 %v897_v40 }
 0x272   :  { %v887_v42 = vpop.permute.xlu2 %886 }
 0x273   :  { %4930 = vmatmul.msk.bf16.vlgmr.msrb.gmra.mxu2 %vm740_vm0, %v887_v42 }
 0x281   :  { %v914_v11 = vpop.permute.xlu2 %913 }
 0x289   :  { %v1049_v14 = vpop.permute.xlu2 %1048 }
 0x291   :  { %v1075_v20 = vpop.permute.xlu2 %1074 }
 0x292   :  { %v1080_v22 = vsel %vm740_vm0, %v1075_v20, 0 }
 0x299   :  { %v1073_v29 = vpop.permute.xlu2 %1072 }
 0x29a   :  { %v756_v43 = vpop.f32.mrf.mxu3 }
 0x29b   :  { %v787_v44 = vsel %vm786_vm1, %v756_v43, -inf }
 0x29c   :  { %788 = vmax.xlane.f32.xlu0 %v787_v44 }
 0x2a1   :  { %v1223_v34 = vpop.permute.xlu2 %1222 }
 0x2a2   :  { %v758_v45 = vpop.f32.mrf.mxu3 }
 0x2a3   :  { %v790_v37 = vsel %vm786_vm1, %v758_v45, -inf }
 0x2a4   :  { %791 = vmax.xlane.f32.xlu0 %v790_v37 }
 0x2aa   :  { %v781_v2 = vpop.f32.mrf.mxu3 }
 0x2ab   :  { %v793_v7 = vsel %vm786_vm1, %v781_v2, -inf }
 0x2b2   :  { %v7439_v5 = vpop.f32.mrf.mxu3 }
 0x2b3   :  { %v796_v6 = vsel %vm786_vm1, %v7439_v5, -inf }
 0x2b8   :  { %918 = vrot.lane.b32.xlu0 %v917_v38, %s7045_s1 }
 0x2c0   :  { %1200 = vrot.lane.b32.xlu0 %v7396_v52, %s7046_s29 }
 0x2c8   :  { %1224 = vrot.lane.b32.xlu0 %v917_v38, %s7046_s29 }
 0x2f2   :  { %797 = vmax.xlane.f32.xlu0 %v796_v6 }
 0x2f6   :  { %v7432_v53 = vpop.f32.mrf.mxu2 }
 0x2f7   :  { %v940_v54 = vsel %vm786_vm1, %v7432_v53, -inf }
 0x2f8   :  { %941 = vmax.xlane.f32.xlu2 %v940_v54 }
 0x2fe   :  { %v7448_v8 = vpop.f32.mrf.mxu2 }
 0x2ff   :  { %v943_v9 = vsel %vm786_vm1, %v7448_v8, -inf }
 0x30f   :  { %v789_v55 = vpop.xlane.xlu0 %788 }
 0x310   :  { %v799_v56 = vsub.f32 %v756_v43, %v789_v55  ;;  %v994_v55 = vunpack.c.l.b16 %v7423_v49 }
 0x312   :  { %v803_v57 = vmul.f32 1.442695, %v799_v56 }
 0x314   :  { %6050 = vpow2.f32 %v803_v57 }
 0x317   :  { %v792_v58 = vpop.xlane.xlu0 %791 }
 0x318   :  { %v800_v59 = vsub.f32 %v758_v45, %v792_v58  ;;  %v7486_v58 = vpack.c.b16 %v994_v55, %v994_v55 }
 0x31a   :  { %v6051_v60 = vpop.eup %6050  ;;  %v805_v61 = vmul.f32 1.442695, %v800_v59 }
 0x31b   :  { %v811_v62 = vsel %vm786_vm1, %v6051_v60, 0.0 }
 0x31c   :  { %6052 = vpow2.f32 %v805_v61  ;;  %812 = vadd.xlane.f32.xlu1 %v811_v62 }
 0x322   :  { %v6053_v63 = vpop.eup %6052 }
 0x323   :  { %v814_v0 = vsel %vm786_vm1, %v6053_v63, 0.0 }
 0x324   :  { %815 = vadd.xlane.f32.xlu1 %v814_v0 }
 0x32a   :  { %v919_v3 = vpop.permute.xlu0 %918 }
 0x32b   :  { %v924_v4 = vsel %vm740_vm0, %v919_v3, 0 }
 0x32c   :  { %933 = vmatpush.bf16.xpose.msrb.mxu3 %v924_v4 }
 0x332   :  { %v1201_v23 = vpop.permute.xlu0 %1200 }
 0x333   :  { %v1206_v26 = vsel %vm740_vm0, %v1201_v23, 0 }
 0x33a   :  { %v1225_v27 = vpop.permute.xlu0 %1224 }
 0x33b   :  { %v1230_v28 = vsel %vm740_vm0, %v1225_v27, 0 }
 0x33d   :  { %1050 = vrot.lane.b32.xlu1 %v7396_v52, %s7025_s25 }
 0x345   :  { %1198 = vrot.lane.b32.xlu1 %v7401_v1, %s7046_s29 }
 0x365   :  { %v798_v0 = vpop.xlane.xlu0 %797 }
 0x36b   :  { %v942_v43 = vpop.xlane.xlu2 %941 }
 0x36c   :  { %v952_v44 = vsub.f32 %v7432_v53, %v942_v43 }
 0x36e   :  { %v956_v46 = vmul.f32 1.442695, %v952_v44 }
 0x36f   :  { %794 = vmax.xlane.f32.xlu1 %v793_v7 }
 0x377   :  { %944 = vmax.xlane.f32.xlu1 %v943_v9 }
 0x38f   :  { %v813_v10 = vpop.xlane.xlu1 %812 }
 0x390   :  { %6054 = vrcp.f32 %v813_v10 }
 0x396   :  { %v6055_v13 = vpop.eup %6054 }
 0x397   :  { %v816_v12 = vpop.xlane.xlu1 %815  ;;  %v827_v52 = vmul.f32 %v6055_v13, %v6051_v60 }
 0x398   :  { %6056 = vrcp.f32 %v816_v12 }
 0x399   :  { %v831_v16 = vpack.c.bf16 %v827_v52, %v827_v52 }
 0x39b   :  { %v837_v18 = vunpack.c.l.b16 %v831_v16 }
 0x39e   :  { %v6057_v15 = vpop.eup %6056 }
 0x39f   :  { %v828_v1 = vmul.f32 %v6057_v15, %v6053_v63 }
 0x3a1   :  { %v832_v17 = vpack.c.bf16 %v828_v1, %v828_v1 }
 0x3a3   :  { %v838_v19 = vunpack.c.l.b16 %v832_v17 }
 0x3a5   :  { %v839_v21 = vpack.c.b16 %v838_v19, %v837_v18 }
 0x3a7   :  { %4928 = vmatmul.msk.bf16.vlgmr.msra.gmra.mxu3 %vm786_vm1, %v839_v21 }
 0x3a8   :  { %1089 = vmatpush.bf16.xpose.msra.mxu3 %v1080_v22 }
 0x3af   :  { %v1051_v24 = vpop.permute.xlu1 %1050 }
 0x3b0   :  { %v1056_v25 = vsel %vm740_vm0, %v1051_v24, 0 }
 0x3b1   :  { %1065 = vmatpush.bf16.xpose.msra.mxu2 %v1056_v25 }
 0x3b7   :  { %4931 = vmatmul.msk.bf16.vlgmr.msrb.gmra.mxu3 %vm740_vm0, %v914_v11  ;;  %v1199_v31 = vpop.permute.xlu1 %1198 }
 0x3b8   :  { %1239 = vmatpush.bf16.xpose.msrb.mxu3 %v1230_v28  ;;  %4934 = vmatmul.msk.bf16.vlgmr.msra.gmra.mxu2 %vm740_vm0, %v1049_v14 }
 0x3b9   :  { %1215 = vmatpush.bf16.xpose.msrb.mxu2 %v1206_v26 }
 0x3c7   :  { %4935 = vmatmul.msk.bf16.vlgmr.msra.gmra.mxu3 %vm740_vm0, %v1073_v29 }
 0x3c8   :  { %4938 = vmatmul.msk.bf16.vlgmr.msrb.gmra.mxu2 %vm740_vm0, %v1199_v31 }
 0x3d7   :  { %4939 = vmatmul.msk.bf16.vlgmr.msrb.gmra.mxu3 %vm740_vm0, %v1223_v34  ;;  %v1024_v34 = vunpack.c.l.b16 %v7464_v32 }
 0x3e2   :  { %v795_v35 = vpop.xlane.xlu1 %794 }
 0x3e3   :  { %v801_v36 = vsub.f32 %v781_v2, %v795_v35  ;;  %v802_v2 = vsub.f32 %v7439_v5, %v798_v0 }
 0x3e5   :  { %v807_v38 = vmul.f32 1.442695, %v801_v36  ;;  %v809_v4 = vmul.f32 1.442695, %v802_v2 }
 0x3e7   :  { %6058 = vpow2.f32 %v807_v38 }
 0x3e8   :  { %6060 = vpow2.f32 %v956_v46 }
 0x3ea   :  { %v945_v47 = vpop.xlane.xlu1 %944 }
 0x3eb   :  { %v953_v48 = vsub.f32 %v7448_v8, %v945_v47 }
 0x3ed   :  { %v7469_v41 = vpop.eup %6058  ;;  %v958_v54 = vmul.f32 1.442695, %v953_v48 }
 0x3ee   :  { %v817_v39 = vsel %vm786_vm1, %v7469_v41, 0.0  ;;  %v7484_v53 = vpop.eup %6060 }
 0x3ef   :  { %818 = vadd.xlane.f32.xlu2 %v817_v39  ;;  %6062 = vpow2.f32 %v958_v54  ;;  %v964_v60 = vsel %vm786_vm1, %v7484_v53, 0.0 }
 0x3f0   :  { %6064 = vpow2.f32 %v809_v4 }
 0x3f5   :  { %v6063_v61 = vpop.eup %6062 }
 0x3f6   :  { %v967_v62 = vsel %vm786_vm1, %v6063_v61, 0.0  ;;  %v7503_v7 = vpop.eup %6064 }
 0x3f7   :  { %v820_v8 = vsel %vm786_vm1, %v7503_v7, 0.0 }
 0x42a   :  { %v7482_v56 = vpop.f32.mrf.mxu3 }
 0x432   :  { %v7493_v49 = vpop.f32.mrf.mxu3 }
 0x43a   :  { %v7496_v63 = vpop.f32.mrf.mxu3 }
 0x43b   :  { %v1067_v40 = vpop.f32.mrf.mxu2  ;;  %v946_v21 = vsel %vm786_vm1, %v7496_v63, -inf }
 0x43c   :  { %v1096_v42 = vsel %vm786_vm1, %v1067_v40, -inf }
 0x43d   :  { %1097 = vmax.xlane.f32.xlu1 %v1096_v42 }
 0x442   :  { %v7499_v3 = vpop.f32.mrf.mxu3 }
 0x443   :  { %v1069_v45 = vpop.f32.mrf.mxu2  ;;  %v949_v29 = vsel %vm786_vm1, %v7499_v3, -inf }
 0x444   :  { %v1099_v37 = vsel %vm786_vm1, %v1069_v45, -inf }
 0x445   :  { %1100 = vmax.xlane.f32.xlu0 %v1099_v37 }
 0x44a   :  { %v7501_v6 = vpop.f32.mrf.mxu3 }
 0x44b   :  { %v7477_v50 = vpop.f32.mrf.mxu2  ;;  %v1102_v38 = vsel %vm786_vm1, %v7501_v6, -inf }
 0x44c   :  { %v1246_v51 = vsel %vm786_vm1, %v7477_v50, -inf }
 0x44d   :  { %1247 = vmax.xlane.f32.xlu0 %v1246_v51 }
 0x452   :  { %v7507_v9 = vpop.f32.mrf.mxu3 }
 0x453   :  { %v1219_v57 = vpop.f32.mrf.mxu2  ;;  %v1105_v10 = vsel %vm786_vm1, %v7507_v9, -inf }
 0x454   :  { %v1249_v59 = vsel %vm786_vm1, %v1219_v57, -inf }
 0x455   :  { %1250 = vmax.xlane.f32.xlu2 %v1249_v59  ;;  %965 = vadd.xlane.f32.xlu0 %v964_v60 }
 0x456   :  { %996 = vrot.lane.b32.xlu1 %v7486_v58, %s7045_s1 }
 0x45a   :  { %v7511_v11 = vpop.f32.mrf.mxu3 }
 0x45b   :  { %v1252_v5 = vsel %vm786_vm1, %v7511_v11, -inf }
 0x45d   :  { %968 = vadd.xlane.f32.xlu2 %v967_v62 }
 0x462   :  { %v819_v18 = vpop.xlane.xlu2 %818  ;;  %v7547_v59 = vpop.f32.mrf.mxu3 }
 0x463   :  { %v1255_v62 = vsel %vm786_vm1, %v7547_v59, -inf }
 0x480   :  { %821 = vadd.xlane.f32.xlu1 %v820_v8 }
 0x488   :  { %1106 = vmax.xlane.f32.xlu1 %v1105_v10 }
 0x490   :  { %1253 = vmax.xlane.f32.xlu1 %v1252_v5 }
 0x4b0   :  { %v1098_v12 = vpop.xlane.xlu1 %1097 }
 0x4b1   :  { %v1108_v13 = vsub.f32 %v1067_v40, %v1098_v12  ;;  %v7538_v40 = vpack.c.b16 %v1024_v34, %v1024_v34 }
 0x4b3   :  { %v1112_v14 = vmul.f32 1.442695, %v1108_v13 }
 0x4b5   :  { %6066 = vpow2.f32 %v1112_v14 }
 0x4b8   :  { %v1101_v52 = vpop.xlane.xlu0 %1100 }
 0x4b9   :  { %v1109_v15 = vsub.f32 %v1069_v45, %v1101_v52 }
 0x4bb   :  { %v7515_v16 = vpop.eup %6066  ;;  %v1114_v1 = vmul.f32 1.442695, %v1109_v15 }
 0x4bc   :  { %v1120_v17 = vsel %vm786_vm1, %v7515_v16, 0.0 }
 0x4bd   :  { %6068 = vpow2.f32 %v1114_v1  ;;  %1121 = vadd.xlane.f32.xlu0 %v1120_v17 }
 0x4c0   :  { %v7519_v19 = vpop.xlane.xlu0 %1247 }
 0x4c3   :  { %v7521_v20 = vpop.eup %6068 }
 0x4c4   :  { %v1123_v22 = vsel %vm786_vm1, %v7521_v20, 0.0 }
 0x4c5   :  { %947 = vmax.xlane.f32.xlu0 %v946_v21  ;;  %1124 = vadd.xlane.f32.xlu2 %v1123_v22 }
 0x4c8   :  { %v1251_v23 = vpop.xlane.xlu2 %1250  ;;  %v997_v24 = vpop.permute.xlu1 %996 }
 0x4c9   :  { %v1259_v25 = vsub.f32 %v1219_v57, %v1251_v23  ;;  %v966_v26 = vpop.xlane.xlu0 %965  ;;  %v1002_v27 = vsel %vm843_vm2, %v997_v24, 0 }
 0x4ca   :  { %1011 = vmatpush.bf16.msrb.mxu0 %v1002_v27  ;;  %6070 = vrcp.f32 %v966_v26 }
 0x4cb   :  { %v1264_v28 = vmul.f32 1.442695, %v1259_v25 }
 0x4cd   :  { %6072 = vpow2.f32 %v1264_v28  ;;  %950 = vmax.xlane.f32.xlu2 %v949_v29 }
 0x4d0   :  { %v969_v30 = vpop.xlane.xlu2 %968  ;;  %v6071_v31 = vpop.eup %6070 }
 0x4d1   :  { %6074 = vrcp.f32 %v969_v30  ;;  %v980_v35 = vmul.f32 %v6071_v31, %v7484_v53 }
 0x4d2   :  { %6076 = vrcp.f32 %v819_v18 }
 0x4d3   :  { %v7530_v33 = vpop.eup %6072  ;;  %v984_v42 = vpack.c.bf16 %v980_v35, %v980_v35 }
 0x4d4   :  { %v1273_v36 = vsel %vm786_vm1, %v7530_v33, 0.0 }
 0x4d5   :  { %1274 = vadd.xlane.f32.xlu1 %v1273_v36  ;;  %1103 = vmax.xlane.f32.xlu2 %v1102_v38  ;;  %v990_v32 = vunpack.c.l.b16 %v984_v42 }
 0x4d7   :  { %v6075_v39 = vpop.eup %6074 }
 0x4d8   :  { %v981_v43 = vmul.f32 %v6075_v39, %v6063_v61  ;;  %v6077_v47 = vpop.eup %6076 }
 0x4d9   :  { %1026 = vrot.lane.b32.xlu0 %v7538_v40, %s7045_s1  ;;  %v829_v48 = vmul.f32 %v6077_v47, %v7469_v41 }
 0x4da   :  { %v985_v44 = vpack.c.bf16 %v981_v43, %v981_v43 }
 0x4db   :  { %v833_v54 = vpack.c.bf16 %v829_v48, %v829_v48 }
 0x4dc   :  { %v991_v45 = vunpack.c.l.b16 %v985_v44  ;;  %v1258_v44 = vsub.f32 %v7477_v50, %v7519_v19 }
 0x4dd   :  { %v863_v57 = vunpack.c.l.b16 %v833_v54 }
 0x4de   :  { %v992_v37 = vpack.c.b16 %v991_v45, %v990_v32  ;;  %v1262_v32 = vmul.f32 1.442695, %v1258_v44 }
 0x4e0   :  { %4932 = vmatmul.msk.bf16.vlgmr.msrb.gmra.mxu0 %vm786_vm1, %v992_v37 }
 0x4ee   :  { %1176 = vrot.lane.b32.xlu1 %v7538_v40, %s7025_s25 }
 0x4f3   :  { %v822_v46 = vpop.xlane.xlu1 %821 }
 0x4f4   :  { %6078 = vrcp.f32 %v822_v46 }
 0x4fa   :  { %v6079_v51 = vpop.eup %6078 }
 0x4fb   :  { %v830_v55 = vmul.f32 %v6079_v51, %v7503_v7  ;;  %v1107_v2 = vpop.xlane.xlu1 %1106 }
 0x4fc   :  { %v1111_v10 = vsub.f32 %v7507_v9, %v1107_v2 }
 0x4fd   :  { %v834_v53 = vpack.c.bf16 %v830_v55, %v830_v55 }
 0x4fe   :  { %v1118_v14 = vmul.f32 1.442695, %v1111_v10 }
 0x4ff   :  { %v864_v60 = vunpack.c.l.b16 %v834_v53 }
 0x501   :  { %v865_v61 = vpack.c.b16 %v864_v60, %v863_v57 }
 0x503   :  { %1256 = vmax.xlane.f32.xlu0 %v1255_v62  ;;  %4929 = vmatmul.msk.bf16.vlgmr.msrb.gmra.mxu1 %vm786_vm1, %v865_v61  ;;  %v1254_v31 = vpop.xlane.xlu1 %1253 }
 0x504   :  { %v1260_v45 = vsub.f32 %v7511_v11, %v1254_v31 }
 0x506   :  { %v1266_v37 = vmul.f32 1.442695, %v1260_v45 }
 0x530   :  { %v1122_v0 = vpop.xlane.xlu0 %1121 }
 0x531   :  { %6080 = vrcp.f32 %v1122_v0 }
 0x537   :  { %v6081_v8 = vpop.eup %6080 }
 0x538   :  { %v1125_v41 = vpop.xlane.xlu2 %1124  ;;  %v948_v4 = vpop.xlane.xlu0 %947  ;;  %v1136_v12 = vmul.f32 %v6081_v8, %v7515_v16 }
 0x539   :  { %6082 = vrcp.f32 %v1125_v41  ;;  %v954_v7 = vsub.f32 %v7496_v63, %v948_v4 }
 0x53a   :  { %v1140_v52 = vpack.c.bf16 %v1136_v12, %v1136_v12 }
 0x53b   :  { %v960_v5 = vmul.f32 1.442695, %v954_v7 }
 0x53c   :  { %v7557_v23 = vunpack.c.l.b16 %v1140_v52 }
 0x53d   :  { %6084 = vpow2.f32 %v960_v5 }
 0x53e   :  { %6086 = vpow2.f32 %v1118_v14 }
 0x53f   :  { %v6083_v13 = vpop.eup %6082 }
 0x540   :  { %v1137_v15 = vmul.f32 %v6083_v13, %v7521_v20  ;;  %v951_v1 = vpop.xlane.xlu2 %950 }
 0x541   :  { %v955_v17 = vsub.f32 %v7499_v3, %v951_v1 }
 0x542   :  { %v1141_v18 = vpack.c.bf16 %v1137_v15, %v1137_v15 }
 0x543   :  { %v6085_v21 = vpop.eup %6084  ;;  %v962_v22 = vmul.f32 1.442695, %v955_v17 }
 0x544   :  { %v7559_v63 = vunpack.c.l.b16 %v1141_v18  ;;  %v970_v9 = vsel %vm786_vm1, %v6085_v21, 0.0  ;;  %v7564_v20 = vpop.eup %6086 }
 0x545   :  { %6088 = vpow2.f32 %v962_v22  ;;  %971 = vadd.xlane.f32.xlu0 %v970_v9  ;;  %v1129_v30 = vsel %vm786_vm1, %v7564_v20, 0.0 }
 0x546   :  { %v1148_v16 = vpack.c.b16 %v7559_v63, %v7557_v23 }
 0x548   :  { %v1104_v24 = vpop.xlane.xlu2 %1103 }
 0x549   :  { %v1110_v3 = vsub.f32 %v7501_v6, %v1104_v24  ;;  %v7572_v6 = vpop.xlane.xlu1 %1274 }
 0x54b   :  { %v6089_v25 = vpop.eup %6088  ;;  %v1116_v26 = vmul.f32 1.442695, %v1110_v3  ;;  %v1027_v27 = vpop.permute.xlu0 %1026 }
 0x54c   :  { %v1032_v28 = vsel %vm843_vm2, %v1027_v27, 0  ;;  %v973_v29 = vsel %vm786_vm1, %v6089_v25, 0.0 }
 0x54d   :  { %6090 = vpow2.f32 %v1116_v26  ;;  %974 = vadd.xlane.f32.xlu2 %v973_v29  ;;  %1130 = vadd.xlane.f32.xlu0 %v1129_v30 }
 0x54e   :  { %1041 = vmatpush.bf16.msra.mxu1 %v1032_v28  ;;  %6092 = vpow2.f32 %v1262_v32 }
 0x54f   :  { %6094 = vpow2.f32 %v1266_v37 }
 0x553   :  { %v6091_v34 = vpop.eup %6090 }
 0x554   :  { %v1126_v35 = vsel %vm786_vm1, %v6091_v34, 0.0  ;;  %v6093_v47 = vpop.eup %6092 }
 0x555   :  { %1127 = vadd.xlane.f32.xlu1 %v1126_v35  ;;  %v1270_v48 = vsel %vm786_vm1, %v6093_v47, 0.0  ;;  %v7587_v54 = vpop.eup %6094 }
 0x556   :  { %v1276_v50 = vsel %vm786_vm1, %v7587_v54, 0.0 }
 0x55d   :  { %v1013_v36 = vpop.f32.mrf.mxu0 }
 0x560   :  { %v1177_v38 = vpop.permute.xlu1 %1176 }
 0x561   :  { %v1182_v39 = vsel %vm843_vm2, %v1177_v38, 0  ;;  %1299 = vrot.lane.b32.xlu0 %v7486_v58, %s7046_s29 }
 0x562   :  { %1191 = vmatpush.bf16.msrb.mxu1 %v1182_v39 }
 0x565   :  { %1149 = vrot.lane.b32.xlu2 %v7486_v58, %s7025_s25  ;;  %v1015_v42 = vpop.f32.mrf.mxu0 }
 0x566   :  { %v5999_v43 = vpack.i.bf16 %v1015_v42, %v1013_v36 }
 0x569   :  { %6000 = vrot.lane.b32.xlu0 %v5999_v43, %s7046_s29 }
 0x56e   :  { %1326 = vrot.lane.b32.xlu1 %v7538_v40, %s7046_s29 }
 0x576   :  { %v1257_v46 = vpop.xlane.xlu0 %1256 }
 0x577   :  { %v1261_v58 = vsub.f32 %v7547_v59, %v1257_v46 }
 0x579   :  { %v1268_v51 = vmul.f32 1.442695, %v1261_v58 }
 0x57b   :  { %6096 = vpow2.f32 %v1268_v51 }
 0x580   :  { %v7607_v44 = vpop.f32.mrf.mxu1 }
 0x581   :  { %v6097_v19 = vpop.eup %6096 }
 0x582   :  { %v1279_v11 = vsel %vm786_vm1, %v6097_v19, 0.0 }
 0x588   :  { %v7609_v32 = vpop.f32.mrf.mxu1 }
 0x58e   :  { %1271 = vadd.xlane.f32.xlu2 %v1270_v48 }
 0x596   :  { %1277 = vadd.xlane.f32.xlu2 %v1276_v50 }
 0x59e   :  { %1280 = vadd.xlane.f32.xlu2 %v1279_v11 }
 0x5b8   :  { %v972_v40 = vpop.xlane.xlu0 %971 }
 0x5b9   :  { %6098 = vrcp.f32 %v972_v40 }
 0x5bf   :  { %v6099_v53 = vpop.eup %6098 }
 0x5c0   :  { %v975_v55 = vpop.xlane.xlu2 %974  ;;  %v982_v57 = vmul.f32 %v6099_v53, %v6085_v21  ;;  %v1131_v60 = vpop.xlane.xlu0 %1130 }
 0x5c1   :  { %6100 = vrcp.f32 %v975_v55 }
 0x5c2   :  { %v986_v61 = vpack.c.bf16 %v982_v57, %v982_v57 }
 0x5c4   :  { %v1020_v8 = vunpack.c.l.b16 %v986_v61  ;;  %v5739_v61 = vld [vmem:[#allocation13 + $0x28] sm:$0xff] }
 0x5c7   :  { %v6101_v59 = vpop.eup %6100 }
 0x5c8   :  { %v983_v62 = vmul.f32 %v6101_v59, %v6089_v25  ;;  %v1128_v0 = vpop.xlane.xlu1 %1127  ;;  %v1150_v2 = vpop.permute.xlu2 %1149  ;;  %v5741_v59 = vld [vmem:[#allocation13 + $0x38] sm:$0xff] }
 0x5c9   :  { %6102 = vrcp.f32 %v1128_v0  ;;  %v1155_v41 = vsel %vm843_vm2, %v1150_v2, 0  ;;  %1463 = vmatpush.bf16.msra.mxu2 %v5741_v59  ;;  %v5737_v0 = vld [vmem:[#allocation13 + $0x18] sm:$0xff]  ;;  %v5736_v2 = vld [vmem:[#allocation13 + $0x10] sm:$0xff] }
 0x5ca   :  { %v987_v4 = vpack.c.bf16 %v983_v62, %v983_v62  ;;  %1164 = vmatpush.bf16.msra.mxu0 %v1155_v41  ;;  %6104 = vrcp.f32 %v1131_v60  ;;  %v5740_v60 = vld [vmem:[#allocation13 + $0x30] sm:$0xff]  ;;  %v5738_v62 = vld [vmem:[#allocation13 + $0x20] sm:$0xff]  ;;  %v5735_v41 = vld [vmem:[#allocation13 + $0x8] sm:$0xff] }
 0x5cb   :  { %6106 = vrcp.f32 %v7572_v6 }
 0x5cc   :  { %v1021_v7 = vunpack.c.l.b16 %v987_v4  ;;  %v5734_v4 = vld [vmem:[#allocation13] sm:$0xff] }
 0x5cd   :  { %4936 = vmatmul.msk.bf16.vlgmr.msra.gmra.mxu0 %vm786_vm1, %v1148_v16  ;;  %1464 = vmatpush.bf16.msra.mxu2 %v5740_v60 }
 0x5ce   :  { %v1022_v10 = vpack.c.b16 %v1021_v7, %v1020_v8 }
 0x5cf   :  { %v6103_v5 = vpop.eup %6102 }
 0x5d0   :  { %4933 = vmatmul.msk.bf16.vlgmr.msra.gmra.mxu1 %vm786_vm1, %v1022_v10  ;;  %v6105_v12 = vpop.eup %6104  ;;  %v1138_v13 = vmul.f32 %v6103_v5, %v6091_v34 }
 0x5d1   :  { %v1139_v52 = vmul.f32 %v6105_v12, %v7564_v20  ;;  %v6107_v16 = vpop.eup %6106  ;;  %1465 = vmatpush.bf16.msra.mxu2 %v5739_v61 }
 0x5d2   :  { %v1142_v1 = vpack.c.bf16 %v1138_v13, %v1138_v13  ;;  %v1287_v24 = vmul.f32 %v6107_v16, %v7530_v33 }
 0x5d3   :  { %v1300_v14 = vpop.permute.xlu0 %1299  ;;  %v1143_v17 = vpack.c.bf16 %v1139_v52, %v1139_v52 }
 0x5d4   :  { %v1305_v15 = vsel %vm843_vm2, %v1300_v14, 0  ;;  %v1173_v18 = vunpack.c.l.b16 %v1142_v1  ;;  %v1291_v3 = vpack.c.bf16 %v1287_v24, %v1287_v24 }
 0x5d5   :  { %1314 = vmatpush.bf16.msrb.mxu0 %v1305_v15  ;;  %v1174_v21 = vunpack.c.l.b16 %v1143_v17  ;;  %1466 = vmatpush.bf16.msra.mxu2 %v5738_v62 }
 0x5d6   :  { %v1297_v28 = vunpack.c.l.b16 %v1291_v3 }
 0x5d7   :  { %v1175_v22 = vpack.c.b16 %v1174_v21, %v1173_v18 }
 0x5d9   :  { %1467 = vmatpush.bf16.msra.mxu2 %v5737_v0 }
 0x5db   :  { %v6001_v8 = vpop.permute.xlu0 %6000 }
 0x5dc   :  { %v6003_v10 = vunpack.i.h.bf16 %v6001_v8  ;;  %v6002_v5 = vunpack.i.l.bf16 %v6001_v8 }
 0x5dd   :  { %1468 = vmatpush.bf16.msra.mxu2 %v5736_v2 }
 0x5de   :  { %v1397_v52 = vsel %vm740_vm0, %v7493_v49, %v6003_v10  ;;  %v1396_v15 = vsel %vm740_vm0, %v7482_v56, %v6002_v5 }
 0x5e0   :  { %v1327_v23 = vpop.permute.xlu1 %1326  ;;  %4937 = vmatmul.msk.bf16.vlgmr.msrb.gmra.mxu1 %vm786_vm1, %v1175_v22 }
 0x5e1   :  { %v1332_v63 = vsel %vm843_vm2, %v1327_v23, 0  ;;  %1469 = vmatpush.bf16.msra.mxu2 %v5735_v41 }
 0x5e2   :  { %1341 = vmatpush.bf16.msra.mxu1 %v1332_v63 }
 0x5e5   :  { %1470 = vmatpush.bf16.msra.mxu2 %v5734_v4 }
 0x601   :  { %v1272_v9 = vpop.xlane.xlu2 %1271 }
 0x602   :  { %6108 = vrcp.f32 %v1272_v9 }
 0x608   :  { %v6109_v20 = vpop.eup %6108 }
 0x609   :  { %v1286_v25 = vmul.f32 %v6109_v20, %v6093_v47  ;;  %v1278_v26 = vpop.xlane.xlu2 %1277 }
 0x60a   :  { %6110 = vrcp.f32 %v1278_v26 }
 0x60b   :  { %v1290_v27 = vpack.c.bf16 %v1286_v25, %v1286_v25 }
 0x60d   :  { %v1296_v29 = vunpack.c.l.b16 %v1290_v27 }
 0x60f   :  { %v1298_v30 = vpack.c.b16 %v1297_v28, %v1296_v29 }
 0x610   :  { %v6111_v34 = vpop.eup %6110 }
 0x611   :  { %v1281_v31 = vpop.xlane.xlu2 %1280  ;;  %4940 = vmatmul.msk.bf16.vlgmr.msrb.gmra.mxu0 %vm786_vm1, %v1298_v30  ;;  %v1288_v35 = vmul.f32 %v6111_v34, %v7587_v54 }
 0x612   :  { %6112 = vrcp.f32 %v1281_v31 }
 0x613   :  { %v1292_v36 = vpack.c.bf16 %v1288_v35, %v1288_v35 }
 0x615   :  { %v1323_v39 = vunpack.c.l.b16 %v1292_v36 }
 0x618   :  { %v6113_v6 = vpop.eup %6112 }
 0x619   :  { %v1289_v38 = vmul.f32 %v6113_v6, %v6097_v19  ;;  %v6030_v6 = vld [vmem:[#allocation14] ss:$0 sm:$0xff] }
 0x61b   :  { %v1293_v33 = vpack.c.bf16 %v1289_v38, %v1289_v38 }
 0x61d   :  { %v1324_v42 = vunpack.c.l.b16 %v1293_v33  ;;  %v6420_v33 = vld [vmem:[#allocation2] sm:$0xff] }
 0x61f   :  { %v1325_v43 = vpack.c.b16 %v1324_v42, %v1323_v39 }
 0x621   :  { %4941 = vmatmul.msk.bf16.vlgmr.msra.gmra.mxu1 %vm786_vm1, %v1325_v43 }
 0x64a   :  { %v1166_v45 = vpop.f32.mrf.mxu0 }
 0x64d   :  { %v1043_v37 = vpop.f32.mrf.mxu1 }
 0x652   :  { %v1168_v46 = vpop.f32.mrf.mxu0 }
 0x653   :  { %v6004_v47 = vpack.i.bf16 %v1168_v46, %v1166_v45  ;;  %v6422_v46 = vld [vmem:[#allocation2 + $0x10] sm:$0xff] }
 0x655   :  { %6005 = vrot.lane.b32.xlu2 %v6004_v47, %s7025_s25  ;;  %v1045_v58 = vpop.f32.mrf.mxu1 }
 0x656   :  { %v6014_v48 = vpack.i.bf16 %v1045_v58, %v1043_v37 }
 0x658   :  { %6015 = vrot.lane.b32.xlu0 %v6014_v48, %s7046_s29 }
 0x65d   :  { %v1193_v51 = vpop.f32.mrf.mxu1 }
 0x665   :  { %v1195_v50 = vpop.f32.mrf.mxu1 }
 0x666   :  { %v6019_v55 = vpack.i.bf16 %v1195_v50, %v1193_v51  ;;  %v6423_v51 = vld [vmem:[#allocation2 + $0x18] sm:$0xff]  ;;  %v7047_v50 = vmov 128.0  }
 0x667   :  { %6114 = vrcp.f32 %v7047_v50 }
 0x68e   :  { %v1316_v54 = vpop.f32.mrf.mxu0 }
 0x696   :  { %v1318_v19 = vpop.f32.mrf.mxu0 }
 0x697   :  { %v6009_v11 = vpack.i.bf16 %v1318_v19, %v1316_v54  ;;  %v6115_v19 = vpop.eup %6114 }
 0x698   :  { %vm1501_vm5 = vweird.f32 %v6115_v19 }
 0x699   :  { %6010 = vrot.lane.b32.xlu1 %v6009_v11, %s7045_s1  ;;  %v1497_v11 = vmul.f32 128.0, %v6115_v19 }
 0x69e   :  { %v1343_v40 = vpop.f32.mrf.mxu1 }
 0x6a1   :  { %6020 = vrot.lane.b32.xlu1 %v6019_v55, %s7025_s25 }
 0x6a6   :  { %v1345_v53 = vpop.f32.mrf.mxu1 }
 0x6a7   :  { %v6024_v57 = vpack.i.bf16 %v1345_v53, %v1343_v40  ;;  %v1498_v40 = vsub.f32 1.0, %v1497_v11 }
 0x6a9   :  { %6025 = vrot.lane.b32.xlu0 %v6024_v57, %s7045_s1  ;;  %v1499_v55 = vmul.f32 %v6115_v19, %v1498_v40 }
 0x6ab   :  { %v1500_v53 = vadd.f32 %v6115_v19, %v1499_v55 }
 0x6ad   :  { %v7632_v57 = vsel %vm1501_vm5, %v6115_v19, %v1500_v53 }
 0x6af   :  { %v6006_v7 = vpop.permute.xlu2 %6005 }
 0x6b0   :  { %v6008_v12 = vunpack.i.h.bf16 %v6006_v7  ;;  %v6007_v13 = vunpack.i.l.bf16 %v6006_v7 }
 0x6b2   :  { %v1401_v18 = vsel %vm1400_vm3, %v1396_v15, %v6007_v13  ;;  %v1402_v21 = vsel %vm1400_vm3, %v1397_v52, %v6008_v12 }
 0x6ca   :  { %v6016_v9 = vpop.permute.xlu0 %6015 }
 0x6cb   :  { %v6018_v24 = vunpack.i.h.bf16 %v6016_v9  ;;  %v6017_v20 = vunpack.i.l.bf16 %v6016_v9 }
 0x6cd   :  { %v1399_v56 = vsel %vm740_vm0, %v7609_v32, %v6018_v24  ;;  %v1398_v26 = vsel %vm740_vm0, %v7607_v44, %v6017_v20  ;;  %v6421_v44 = vld [vmem:[#allocation2 + $0x8] sm:$0xff] }
 0x70b   :  { %v6011_v14 = vpop.permute.xlu1 %6010 }
 0x70c   :  { %v6013_v1 = vunpack.i.h.bf16 %v6011_v14  ;;  %v6012_v17 = vunpack.i.l.bf16 %v6011_v14 }
 0x70e   :  { %v1406_v22 = vsel %vm1405_vm4, %v1401_v18, %v6012_v17  ;;  %v1407_v23 = vsel %vm1405_vm4, %v1402_v21, %v6013_v1 }
 0x70f   :  { %v1410_v63 = vpack.c.bf16 %v1407_v23, %v1406_v22 }
 0x711   :  { %1471 = vmatmul.bf16.vlgmr.msra.gmra.mxu2 %v1410_v63 }
 0x713   :  { %v6021_v16 = vpop.permute.xlu1 %6020 }
 0x714   :  { %v6023_v49 = vunpack.i.h.bf16 %v6021_v16  ;;  %v6022_v3 = vunpack.i.l.bf16 %v6021_v16 }
 0x716   :  { %v1403_v29 = vsel %vm1400_vm3, %v1398_v26, %v6022_v3  ;;  %v1404_v30 = vsel %vm1400_vm3, %v1399_v56, %v6023_v49 }
 0x71b   :  { %v6026_v25 = vpop.permute.xlu0 %6025 }
 0x71c   :  { %v6028_v27 = vunpack.i.h.bf16 %v6026_v25  ;;  %v6027_v28 = vunpack.i.l.bf16 %v6026_v25 }
 0x71e   :  { %v1408_v31 = vsel %vm1405_vm4, %v1403_v29, %v6027_v28  ;;  %v1409_v34 = vsel %vm1405_vm4, %v1404_v30, %v6028_v27  ;;  %v6031_v27 = vld [vmem:[#allocation16] ss:$0 sm:$0xff] }
 0x71f   :  { %v1411_v35 = vpack.c.bf16 %v1409_v34, %v1408_v31  ;;  %v6032_v31 = vld [vmem:[#allocation17] ss:$0 sm:$0xff] }
 0x721   :  { %1476 = vmatmul.bf16.gmra.mxu2 %v1411_v35 }
 0x794   :  { %v1472_v36 = vpop.f32.mrf.mxu2 }
 0x795   :  { %v1473_v38 = vadd.f32 %v6030_v6, %v1472_v36 }
 0x797   :  { %v1482_v39 = vadd.f32 %v6420_v33, %v1473_v38 }
 0x799   :  { %1488 = vadd.xlane.f32.xlu1 %v1482_v39 }
 0x79c   :  { %v1474_v42 = vpop.f32.mrf.mxu2 }
 0x79d   :  { %v1475_v43 = vadd.f32 %v6030_v6, %v1474_v42 }
 0x79f   :  { %v1483_v32 = vadd.f32 %v6421_v44, %v1475_v43 }
 0x7a1   :  { %1490 = vadd.xlane.f32.xlu0 %v1483_v32 }
 0x7a4   :  { %v1477_v45 = vpop.f32.mrf.mxu2 }
 0x7a5   :  { %v1478_v37 = vadd.f32 %v6030_v6, %v1477_v45 }
 0x7a7   :  { %v1484_v47 = vadd.f32 %v6422_v46, %v1478_v37 }
 0x7a9   :  { %1492 = vadd.xlane.f32.xlu2 %v1484_v47 }
 0x7ac   :  { %v1479_v58 = vpop.f32.mrf.mxu2 }
 0x7ad   :  { %v1480_v48 = vadd.f32 %v6030_v6, %v1479_v58 }
 0x7af   :  { %v1485_v54 = vadd.f32 %v6423_v51, %v1480_v48 }
 0x7b1   :  { %1494 = vadd.xlane.f32.xlu1 %v1485_v54 }
 0x80c   :  { %v1489_v59 = vpop.xlane.xlu1 %1488 }
 0x80d   :  { %v1503_v60 = vmul.f32 %v7632_v57, %v1489_v59 }
 0x80f   :  { %v1507_v61 = vsub.f32 %v1482_v39, %v1503_v60 }
 0x811   :  { %v1511_v62 = vmul.f32 %v1507_v61, %v1507_v61 }
 0x813   :  { %1515 = vadd.xlane.f32.xlu0 %v1511_v62 }
 0x814   :  { %v1491_v0 = vpop.xlane.xlu0 %1490 }
 0x815   :  { %v1504_v2 = vmul.f32 %v7632_v57, %v1491_v0 }
 0x817   :  { %v1508_v41 = vsub.f32 %v1483_v32, %v1504_v2 }
 0x819   :  { %v1512_v4 = vmul.f32 %v1508_v41, %v1508_v41 }
 0x81b   :  { %1517 = vadd.xlane.f32.xlu2 %v1512_v4 }
 0x81c   :  { %v1493_v8 = vpop.xlane.xlu2 %1492 }
 0x81d   :  { %v1505_v7 = vmul.f32 %v7632_v57, %v1493_v8 }
 0x81f   :  { %v7637_v10 = vsub.f32 %v1484_v47, %v1505_v7 }
 0x821   :  { %v1513_v5 = vmul.f32 %v7637_v10, %v7637_v10 }
 0x823   :  { %1519 = vadd.xlane.f32.xlu1 %v1513_v5 }
 0x824   :  { %v1495_v12 = vpop.xlane.xlu1 %1494 }
 0x825   :  { %v1506_v13 = vmul.f32 %v7632_v57, %v1495_v12 }
 0x827   :  { %v7642_v14 = vsub.f32 %v1485_v54, %v1506_v13 }
 0x829   :  { %v1514_v52 = vmul.f32 %v7642_v14, %v7642_v14 }
 0x82b   :  { %1521 = vadd.xlane.f32.xlu0 %v1514_v52 }
 0x886   :  { %v1516_v15 = vpop.xlane.xlu0 %1515 }
 0x887   :  { %v1523_v1 = vmul.f32 %v1516_v15, %v7632_v57 }
 0x889   :  { %v1527_v17 = vadd.f32 1e-05, %v1523_v1 }
 0x88b   :  { %6116 = vrsqrt.f32 %v1527_v17  ;;  %vm1537_vm7 = vweird.f32 %v1527_v17 }
 0x88e   :  { %v1518_v18 = vpop.xlane.xlu2 %1517 }
 0x88f   :  { %v1524_v21 = vmul.f32 %v1518_v18, %v7632_v57 }
 0x891   :  { %v6117_v22 = vpop.eup %6116  ;;  %v1528_v23 = vadd.f32 1e-05, %v1524_v21 }
 0x892   :  { %v1532_v63 = vmul.f32 %v6117_v22, %v1527_v17  ;;  %vm1538_vm6 = vweird.f32 %v6117_v22 }
 0x893   :  { %6118 = vrsqrt.f32 %v1528_v23  ;;  %vm1539_vm8 = vmor %vm1537_vm7, %vm1538_vm6  ;;  %vm1547_vm10 = vweird.f32 %v1528_v23 }
 0x894   :  { %v1533_v9 = vmul.f32 %v6117_v22, %v1532_v63  ;;  %v5088_v63 = vld [vmem:[#allocation22 + $0xe0] sm:$0xf] }
 0x896   :  { %v1534_v16 = vmul.f32 0.5, %v1533_v9  ;;  %v1520_v24 = vpop.xlane.xlu1 %1519  ;;  %v5772_v9 = vld [vmem:[#allocation22 + $0xec] sm:$0xf0] }
 0x897   :  { %v1525_v20 = vmul.f32 %v1520_v24, %v7632_v57  ;;  %v5089_v24 = vor.u32 %v5772_v9, %v5088_v63 }
 0x898   :  { %v1535_v49 = vsub.f32 1.5, %v1534_v16  ;;  %v5770_v16 = vld [vmem:[#allocation22 + $0xe4] sm:$0xf] }
 0x899   :  { %v6119_v3 = vpop.eup %6118  ;;  %v1529_v25 = vadd.f32 1e-05, %v1525_v20  ;;  %v5090_v20 = vld [vmem:[#allocation22 + $0xf0] sm:$0xf0]  ;;  %1954 = vmatpush.bf16.msra.mxu3 %v5089_v24  ;;  %v5034_v24 = vld [vmem:[#allocation22 + $0x78] sm:$0xf0] }
 0x89a   :  { %v1536_v56 = vmul.f32 %v6117_v22, %v1535_v49  ;;  %v1542_v26 = vmul.f32 %v6119_v3, %v1528_v23  ;;  %vm1548_vm9 = vweird.f32 %v6119_v3  ;;  %v5096_v49 = vld [vmem:[#allocation22 + $0xe8] sm:$0xf] }
 0x89b   :  { %6120 = vrsqrt.f32 %v1529_v25  ;;  %vm1549_vm11 = vmor %vm1547_vm10, %vm1548_vm9  ;;  %vm1557_vm13 = vweird.f32 %v1529_v25 }
 0x89c   :  { %v1540_v28 = vsel %vm1539_vm8, %v6117_v22, %v1536_v56  ;;  %v1543_v29 = vmul.f32 %v6119_v3, %v1542_v26  ;;  %v5771_v26 = vld [vmem:[#allocation22 + $0xec] sm:$0xf] }
 0x89d   :  { %v1571_v30 = vmul.f32 %v1540_v28, %v1507_v61 }
 0x89e   :  { %v1544_v34 = vmul.f32 0.5, %v1543_v29  ;;  %v1522_v35 = vpop.xlane.xlu0 %1521  ;;  %v5072_v29 = vld [vmem:[#allocation22 + $0xc0] sm:$0xf] }
 0x89f   :  { %v1526_v6 = vmul.f32 %v1522_v35, %v7632_v57  ;;  %v1578_v36 = vmul.f32 %v6031_v27, %v1571_v30  ;;  %v5768_v30 = vld [vmem:[#allocation22 + $0xcc] sm:$0xf0]  ;;  %v5074_v35 = vld [vmem:[#allocation22 + $0xd0] sm:$0xf0] }
 0x8a0   :  { %v1545_v38 = vsub.f32 1.5, %v1544_v34  ;;  %v5073_v34 = vor.u32 %v5768_v30, %v5072_v29 }
 0x8a1   :  { %v6121_v33 = vpop.eup %6120  ;;  %v1530_v39 = vadd.f32 1e-05, %v1526_v6  ;;  %v7650_v42 = vadd.f32 %v6032_v31, %v1578_v36  ;;  %v5080_v6 = vld [vmem:[#allocation22 + $0xc8] sm:$0xf]  ;;  %v5769_v36 = vld [vmem:[#allocation22 + $0xd4] sm:$0xf0] }
 0x8a2   :  { %v1546_v43 = vmul.f32 %v6119_v3, %v1545_v38  ;;  %v1552_v44 = vmul.f32 %v6121_v33, %v1529_v25  ;;  %vm1558_vm12 = vweird.f32 %v6121_v33  ;;  %v5093_v25 = vor.u32 %v5770_v16, %v5090_v20  ;;  %1955 = vmatpush.bf16.msra.mxu3 %v5073_v34  ;;  %v5755_v16 = vld [vmem:[#allocation22 + $0x6c] sm:$0xf]  ;;  %v5018_v34 = vld [vmem:[#allocation22 + $0x58] sm:$0xf0] }
 0x8a3   :  { %6122 = vrsqrt.f32 %v1530_v39  ;;  %1689 = vadd.xlane.f32.xlu2 %v7650_v42  ;;  %vm1559_vm14 = vmor %vm1557_vm13, %vm1558_vm12  ;;  %vm1567_vm1 = vweird.f32 %v1530_v39  ;;  %v5037_v20 = vor.u32 %v5755_v16, %v5034_v24 }
 0x8a4   :  { %v1550_v32 = vsel %vm1549_vm11, %v6119_v3, %v1546_v43  ;;  %v1553_v45 = vmul.f32 %v6121_v33, %v1552_v44  ;;  %v5773_v3 = vld [vmem:[#allocation22 + $0xf4] sm:$0xf0]  ;;  %1973 = vmatpush.bf16.msra.mxu0 %v5093_v25  ;;  %v5082_v43 = vld [vmem:[#allocation22 + $0xd8] sm:$0xf0]  ;;  %v5750_v25 = vld [vmem:[#allocation22 + $0x44] sm:$0xf] }
 0x8a5   :  { %v1572_v37 = vmul.f32 %v1550_v32, %v1508_v41  ;;  %v5097_v56 = vor.u32 %v5773_v3, %v5096_v49  ;;  %v5056_v32 = vld [vmem:[#allocation22 + $0xa0] sm:$0xf]  ;;  %v5752_v3 = vld [vmem:[#allocation22 + $0x4c] sm:$0xf0] }
 0x8a6   :  { %v1554_v46 = vmul.f32 0.5, %v1553_v45  ;;  %v5764_v45 = vld [vmem:[#allocation22 + $0xac] sm:$0xf0]  ;;  %v5008_v49 = vld [vmem:[#allocation22 + $0x40] sm:$0xf] }
 0x8a7   :  { %v1579_v47 = vmul.f32 %v6031_v27, %v1572_v37  ;;  %1992 = vmatpush.bf16.msrb.mxu1 %v5097_v56  ;;  %v5762_v37 = vld [vmem:[#allocation22 + $0xa4] sm:$0xf]  ;;  %v5009_v56 = vor.u32 %v5752_v3, %v5008_v49 }
 0x8a8   :  { %v1555_v58 = vsub.f32 1.5, %v1554_v46  ;;  %v5057_v46 = vor.u32 %v5764_v45, %v5056_v32 }
 0x8a9   :  { %v6123_v48 = vpop.eup %6122  ;;  %v7653_v51 = vadd.f32 %v6032_v31, %v1579_v47  ;;  %v5058_v47 = vld [vmem:[#allocation22 + $0xb0] sm:$0xf0] }
 0x8aa   :  { %v1556_v54 = vmul.f32 %v6121_v33, %v1555_v58  ;;  %v1562_v50 = vmul.f32 %v6123_v48, %v1530_v39  ;;  %vm1568_vm15 = vweird.f32 %v6123_v48  ;;  %v5767_v39 = vld [vmem:[#allocation22 + $0xcc] sm:$0xf]  ;;  %v5064_v58 = vld [vmem:[#allocation22 + $0xa8] sm:$0xf]  ;;  %1956 = vmatpush.bf16.msra.mxu3 %v5057_v46 }
 0x8ab   :  { %1691 = vadd.xlane.f32.xlu1 %v7653_v51  ;;  %vm1569_vm2 = vmor %vm1567_vm1, %vm1568_vm15  ;;  %v5085_v44 = vor.u32 %v5767_v39, %v5082_v43  ;;  %v4994_v39 = vld [vmem:[#allocation22 + $0x30] sm:$0xf0]  ;;  %v5000_v43 = vld [vmem:[#allocation22 + $0x28] sm:$0xf] }
 0x8ac   :  { %v1560_v19 = vsel %vm1559_vm14, %v6121_v33, %v1556_v54  ;;  %v1563_v11 = vmul.f32 %v6123_v48, %v1562_v50  ;;  %v5081_v33 = vor.u32 %v5769_v36, %v5080_v6  ;;  %v5061_v54 = vor.u32 %v5762_v37, %v5058_v47  ;;  %v4992_v6 = vld [vmem:[#allocation22 + $0x20] sm:$0xf]  ;;  %v5748_v36 = vld [vmem:[#allocation22 + $0x2c] sm:$0xf0]  ;;  %v5747_v46 = vld [vmem:[#allocation22 + $0x2c] sm:$0xf] }
 0x8ad   :  { %v1573_v40 = vmul.f32 %v1560_v19, %v7637_v10  ;;  %v5763_v19 = vld [vmem:[#allocation22 + $0xac] sm:$0xf]  ;;  %v5002_v47 = vld [vmem:[#allocation22 + $0x38] sm:$0xf0] }
 0x8ae   :  { %v1564_v55 = vmul.f32 0.5, %v1563_v11  ;;  %1993 = vmatpush.bf16.msrb.mxu1 %v5081_v33  ;;  %v5066_v11 = vld [vmem:[#allocation22 + $0xb8] sm:$0xf0]  ;;  %v4993_v33 = vor.u32 %v5748_v36, %v4992_v6 }
 0x8af   :  { %v1580_v53 = vmul.f32 %v6031_v27, %v1573_v40  ;;  %v5069_v40 = vor.u32 %v5763_v19, %v5066_v11  ;;  %v5742_v19 = vld [vmem:[#allocation22 + $0x4] sm:$0xf] }
 0x8b0   :  { %v1565_v59 = vsub.f32 1.5, %v1564_v55  ;;  %v5040_v55 = vld [vmem:[#allocation22 + $0x80] sm:$0xf] }
 0x8b1   :  { %v7657_v60 = vadd.f32 %v6032_v31, %v1580_v53  ;;  %v5760_v53 = vld [vmem:[#allocation22 + $0x8c] sm:$0xf0] }
 0x8b2   :  { %v1566_v61 = vmul.f32 %v6123_v48, %v1565_v59  ;;  %v5758_v59 = vld [vmem:[#allocation22 + $0x84] sm:$0xf] }
 0x8b3   :  { %1693 = vadd.xlane.f32.xlu0 %v7657_v60 }
 0x8b4   :  { %v1570_v62 = vsel %vm1569_vm2, %v6123_v48, %v1566_v61  ;;  %v5765_v48 = vld [vmem:[#allocation22 + $0xb4] sm:$0xf0]  ;;  %v5041_v61 = vor.u32 %v5760_v53, %v5040_v55  ;;  %v4978_v55 = vld [vmem:[#allocation22 + $0x10] sm:$0xf0]  ;;  %v4984_v53 = vld [vmem:[#allocation22 + $0x8] sm:$0xf] }
 0x8b5   :  { %v1574_v0 = vmul.f32 %v1570_v62, %v7642_v14  ;;  %v5065_v50 = vor.u32 %v5765_v48, %v5064_v58  ;;  %v5042_v62 = vld [vmem:[#allocation22 + $0x90] sm:$0xf0]  ;;  %v5005_v48 = vor.u32 %v5747_v46, %v5002_v47 }
 0x8b6   :  { %1957 = vmatpush.bf16.msra.mxu3 %v5041_v61  ;;  %v5745_v61 = vld [vmem:[#allocation22 + $0x14] sm:$0xf0] }
 0x8b7   :  { %v1581_v2 = vmul.f32 %v6031_v27, %v1574_v0  ;;  %v5098_v27 = vld [vmem:[#allocation22 + $0xf8] sm:$0xf0]  ;;  %1994 = vmatpush.bf16.msrb.mxu1 %v5065_v50  ;;  %v5048_v0 = vld [vmem:[#allocation22 + $0x88] sm:$0xf]  ;;  %v5744_v50 = vld [vmem:[#allocation22 + $0xc] sm:$0xf0] }
 0x8b8   :  { %v5101_v28 = vor.u32 %v5771_v26, %v5098_v27  ;;  %v5010_v26 = vld [vmem:[#allocation22 + $0x50] sm:$0xf0]  ;;  %v5016_v27 = vld [vmem:[#allocation22 + $0x48] sm:$0xf] }
 0x8b9   :  { %v7661_v41 = vadd.f32 %v6032_v31, %v1581_v2  ;;  %v5766_v31 = vld [vmem:[#allocation22 + $0xc4] sm:$0xf]  ;;  %v5761_v2 = vld [vmem:[#allocation22 + $0x94] sm:$0xf0]  ;;  %v5013_v29 = vor.u32 %v5750_v25, %v5010_v26 }
 0x8ba   :  { %2011 = vmatpush.bf16.msrb.mxu2 %v5101_v28  ;;  %v5077_v38 = vor.u32 %v5766_v31, %v5074_v35  ;;  %v5753_v28 = vld [vmem:[#allocation22 + $0x54] sm:$0xf0]  ;;  %v5751_v31 = vld [vmem:[#allocation22 + $0x4c] sm:$0xf] }
 0x8bb   :  { %1695 = vadd.xlane.f32.xlu2 %v7661_v41  ;;  %v5017_v30 = vor.u32 %v5753_v28, %v5016_v27  ;;  %v5021_v35 = vor.u32 %v5751_v31, %v5018_v34 }
 0x8bc   :  { %1974 = vmatpush.bf16.msra.mxu0 %v5077_v38  ;;  %v5746_v38 = vld [vmem:[#allocation22 + $0x24] sm:$0xf] }
 0x8bd   :  { %v4997_v45 = vor.u32 %v5746_v38, %v4994_v39  ;;  %v6034_v38 = vld [vmem:[#allocation20] ss:$0 sm:$0xff] }
 0x8be   :  { %2012 = vmatpush.bf16.msrb.mxu2 %v5085_v44  ;;  %v5749_v44 = vld [vmem:[#allocation22 + $0x34] sm:$0xf0] }
 0x8bf   :  { %v5001_v37 = vor.u32 %v5749_v44, %v5000_v43 }
 0x8c0   :  { %1975 = vmatpush.bf16.msra.mxu0 %v5061_v54  ;;  %v4976_v54 = vld [vmem:[#allocation22] sm:$0xf] }
 0x8c2   :  { %2013 = vmatpush.bf16.msrb.mxu2 %v5069_v40  ;;  %v4977_v40 = vor.u32 %v5744_v50, %v4976_v54 }
 0x916   :  { %v1690_v4 = vpop.xlane.xlu2 %1689 }
 0x917   :  { %v1697_v8 = vmul.f32 %v1690_v4, %v7632_v57  ;;  %v5045_v4 = vor.u32 %v5758_v59, %v5042_v62  ;;  %v4981_v59 = vor.u32 %v5742_v19, %v4978_v55  ;;  %v5743_v62 = vld [vmem:[#allocation22 + $0xc] sm:$0xf] }
 0x919   :  { %v7666_v7 = vsub.f32 %v7650_v42, %v1697_v8  ;;  %v5049_v8 = vor.u32 %v5761_v2, %v5048_v0  ;;  %1976 = vmatpush.bf16.msra.mxu0 %v5045_v4  ;;  %v4986_v0 = vld [vmem:[#allocation22 + $0x18] sm:$0xf0]  ;;  %v4985_v2 = vor.u32 %v5745_v61, %v4984_v53 }
 0x91a   :  { %v4989_v4 = vor.u32 %v5743_v62, %v4986_v0  ;;  %v5789_v62 = vld [vmem:[#allocation23 + $0x78] sm:$0xff] }
 0x91b   :  { %v1705_v10 = vmul.f32 %v7666_v7, %v7666_v7  ;;  %1995 = vmatpush.bf16.msrb.mxu1 %v5049_v8  ;;  %v5797_v0 = vld [vmem:[#allocation23 + $0xb8] sm:$0xff] }
 0x91d   :  { %1709 = vadd.xlane.f32.xlu1 %v1705_v10  ;;  %v5759_v10 = vld [vmem:[#allocation22 + $0x8c] sm:$0xf] }
 0x91e   :  { %v1692_v5 = vpop.xlane.xlu1 %1691 }
 0x91f   :  { %v1698_v12 = vmul.f32 %v1692_v5, %v7632_v57  ;;  %v5050_v5 = vld [vmem:[#allocation22 + $0x98] sm:$0xf0] }
 0x921   :  { %v7672_v13 = vsub.f32 %v7653_v51, %v1698_v12  ;;  %v5053_v12 = vor.u32 %v5759_v10, %v5050_v5 }
 0x923   :  { %v1706_v14 = vmul.f32 %v7672_v13, %v7672_v13  ;;  %2014 = vmatpush.bf16.msrb.mxu2 %v5053_v12 }
 0x925   :  { %1711 = vadd.xlane.f32.xlu0 %v1706_v14  ;;  %v5024_v14 = vld [vmem:[#allocation22 + $0x60] sm:$0xf] }
 0x926   :  { %v1694_v52 = vpop.xlane.xlu0 %1693 }
 0x927   :  { %v1699_v15 = vmul.f32 %v1694_v52, %v7632_v57  ;;  %v5756_v52 = vld [vmem:[#allocation22 + $0x6c] sm:$0xf0]  ;;  %2015 = vmatpush.bf16.msrb.mxu2 %v5037_v20 }
 0x929   :  { %v7678_v1 = vsub.f32 %v7657_v60, %v1699_v15  ;;  %v5754_v15 = vld [vmem:[#allocation22 + $0x64] sm:$0xf] }
 0x92b   :  { %v1707_v17 = vmul.f32 %v7678_v1, %v7678_v1  ;;  %2016 = vmatpush.bf16.msrb.mxu2 %v5021_v35 }
 0x92d   :  { %1713 = vadd.xlane.f32.xlu2 %v1707_v17  ;;  %v5025_v17 = vor.u32 %v5756_v52, %v5024_v14 }
 0x92e   :  { %v1696_v18 = vpop.xlane.xlu2 %1695 }
 0x92f   :  { %v1700_v21 = vmul.f32 %v1696_v18, %v7632_v57  ;;  %v5026_v18 = vld [vmem:[#allocation22 + $0x70] sm:$0xf0]  ;;  %1958 = vmatpush.bf16.msra.mxu3 %v5025_v17  ;;  %2017 = vmatpush.bf16.msrb.mxu2 %v5005_v48 }
 0x930   :  { %v5029_v63 = vor.u32 %v5754_v15, %v5026_v18 }
 0x931   :  { %v7684_v22 = vsub.f32 %v7661_v41, %v1700_v21  ;;  %v5032_v21 = vld [vmem:[#allocation22 + $0x68] sm:$0xf] }
 0x932   :  { %1977 = vmatpush.bf16.msra.mxu0 %v5029_v63 }
 0x933   :  { %v1708_v23 = vmul.f32 %v7684_v22, %v7684_v22  ;;  %1959 = vmatpush.bf16.msra.mxu3 %v5009_v56  ;;  %2018 = vmatpush.bf16.msrb.mxu2 %v4989_v4  ;;  %v5781_v4 = vld [vmem:[#allocation23 + $0x38] sm:$0xff] }
 0x935   :  { %1715 = vadd.xlane.f32.xlu1 %v1708_v23  ;;  %v5757_v23 = vld [vmem:[#allocation22 + $0x74] sm:$0xf0] }
 0x936   :  { %v5033_v9 = vor.u32 %v5757_v23, %v5032_v21  ;;  %1978 = vmatpush.bf16.msra.mxu0 %v5013_v29  ;;  %v6033_v29 = vld [vmem:[#allocation19] ss:$0 sm:$0xff] }
 0x937   :  { %1960 = vmatpush.bf16.msra.mxu3 %v4993_v33 }
 0x938   :  { %1996 = vmatpush.bf16.msrb.mxu1 %v5033_v9 }
 0x93a   :  { %1979 = vmatpush.bf16.msra.mxu0 %v4997_v45 }
 0x93b   :  { %1961 = vmatpush.bf16.msra.mxu3 %v4977_v40 }
 0x93c   :  { %1997 = vmatpush.bf16.msrb.mxu1 %v5017_v30 }
 0x93e   :  { %1980 = vmatpush.bf16.msra.mxu0 %v4981_v59 }
 0x93f   :  { %2393 = vmatpush.bf16.msrb.mxu3 %v5781_v4 }
 0x940   :  { %1998 = vmatpush.bf16.msrb.mxu1 %v5001_v37 }
 0x942   :  { %2412 = vmatpush.bf16.msrb.mxu0 %v5789_v62 }
 0x944   :  { %1999 = vmatpush.bf16.msrb.mxu1 %v4985_v2  ;;  %v5796_v2 = vld [vmem:[#allocation23 + $0xb0] sm:$0xff] }
 0x948   :  { %2431 = vmatpush.bf16.msra.mxu1 %v5797_v0 }
 0x94c   :  { %2432 = vmatpush.bf16.msra.mxu1 %v5796_v2 }
 0x990   :  { %v1710_v32 = vpop.xlane.xlu1 %1709 }
 0x991   :  { %v1717_v58 = vmul.f32 %v1710_v32, %v7632_v57 }
 0x993   :  { %v1721_v11 = vadd.f32 1e-05, %v1717_v58 }
 0x995   :  { %6124 = vrsqrt.f32 %v1721_v11  ;;  %vm1731_vm6 = vweird.f32 %v1721_v11 }
 0x998   :  { %v1712_v8 = vpop.xlane.xlu0 %1711 }
 0x999   :  { %v1718_v10 = vmul.f32 %v1712_v8, %v7632_v57  ;;  %v5787_v8 = vld [vmem:[#allocation23 + $0x68] sm:$0xff] }
 0x99b   :  { %v6125_v5 = vpop.eup %6124  ;;  %v1722_v12 = vadd.f32 1e-05, %v1718_v10  ;;  %v5795_v10 = vld [vmem:[#allocation23 + $0xa8] sm:$0xff] }
 0x99c   :  { %v1726_v14 = vmul.f32 %v6125_v5, %v1721_v11  ;;  %vm1732_vm5 = vweird.f32 %v6125_v5  ;;  %2433 = vmatpush.bf16.msra.mxu1 %v5795_v10  ;;  %v5775_v10 = vld [vmem:[#allocation23 + $0x8] sm:$0xff] }
 0x99d   :  { %6126 = vrsqrt.f32 %v1722_v12  ;;  %vm1733_vm7 = vmor %vm1731_vm6, %vm1732_vm5  ;;  %vm1741_vm9 = vweird.f32 %v1722_v12 }
 0x99e   :  { %v1727_v52 = vmul.f32 %v6125_v5, %v1726_v14  ;;  %v5786_v14 = vld [vmem:[#allocation23 + $0x60] sm:$0xff] }
 0x9a0   :  { %v1728_v15 = vmul.f32 0.5, %v1727_v52  ;;  %v1714_v17 = vpop.xlane.xlu2 %1713  ;;  %v5794_v52 = vld [vmem:[#allocation23 + $0xa0] sm:$0xff] }
 0x9a1   :  { %v1719_v18 = vmul.f32 %v1714_v17, %v7632_v57  ;;  %2434 = vmatpush.bf16.msra.mxu1 %v5794_v52  ;;  %v5779_v17 = vld [vmem:[#allocation23 + $0x28] sm:$0xff] }
 0x9a2   :  { %v1729_v21 = vsub.f32 1.5, %v1728_v15  ;;  %v1623_v15 = vld [vmem:[%s8438_s22] sm:$0xf] }
 0x9a3   :  { %v6127_v23 = vpop.eup %6126  ;;  %v1723_v63 = vadd.f32 1e-05, %v1719_v18  ;;  %v5803_v18 = vld [vmem:[#allocation23 + $0xe8] sm:$0xff] }
 0x9a4   :  { %v1730_v9 = vmul.f32 %v6125_v5, %v1729_v21  ;;  %v1736_v16 = vmul.f32 %v6127_v23, %v1722_v12  ;;  %vm1742_vm8 = vweird.f32 %v6127_v23  ;;  %v5804_v12 = vld [vmem:[#allocation23 + $0xf0] sm:$0xff]  ;;  %v7697_v21 = vperm.slane %v1623_v15, 1 }
 0x9a5   :  { %6128 = vrsqrt.f32 %v1723_v63  ;;  %vm1743_vm10 = vmor %vm1741_vm9, %vm1742_vm8  ;;  %vm1751_vm12 = vweird.f32 %v1723_v63 }
 0x9a6   :  { %v1737_v24 = vmul.f32 %v6127_v23, %v1736_v16  ;;  %v1734_v20 = vsel %vm1733_vm7, %v6125_v5, %v1730_v9  ;;  %v5780_v5 = vld [vmem:[#allocation23 + $0x30] sm:$0xff] }
 0x9a7   :  { %v1765_v27 = vmul.f32 %v1734_v20, %v7666_v7  ;;  %2394 = vmatpush.bf16.msrb.mxu3 %v5780_v5  ;;  %v5793_v20 = vld [vmem:[#allocation23 + $0x98] sm:$0xff]  ;;  %v5799_v5 = vld [vmem:[#allocation23 + $0xc8] sm:$0xff] }
 0x9a8   :  { %v1738_v49 = vmul.f32 0.5, %v1737_v24  ;;  %v1716_v3 = vpop.xlane.xlu1 %1715  ;;  %v5785_v24 = vld [vmem:[#allocation23 + $0x58] sm:$0xff]  ;;  %2435 = vmatpush.bf16.msra.mxu1 %v5793_v20 }
 0x9a9   :  { %v1720_v25 = vmul.f32 %v1716_v3, %v7632_v57  ;;  %v1772_v36 = vmul.f32 %v6033_v29, %v1765_v27 }
 0x9aa   :  { %v1739_v56 = vsub.f32 1.5, %v1738_v49 }
 0x9ab   :  { %v6129_v26 = vpop.eup %6128  ;;  %v1724_v28 = vadd.f32 1e-05, %v1720_v25  ;;  %v1779_v32 = vadd.f32 %v6034_v38, %v1772_v36  ;;  %2395 = vmatpush.bf16.msrb.mxu3 %v5779_v17  ;;  %v7708_v25 = vperm.slane %v1623_v15, 0 }
 0x9ac   :  { %v1740_v30 = vmul.f32 %v6127_v23, %v1739_v56  ;;  %v1746_v31 = vmul.f32 %v6129_v26, %v1723_v63  ;;  %vm1752_vm11 = vweird.f32 %v6129_v26  ;;  %v5778_v56 = vld [vmem:[#allocation23 + $0x20] sm:$0xff] }
 0x9ad   :  { %6130 = vrsqrt.f32 %v1724_v28  ;;  %vm1753_vm13 = vmor %vm1751_vm12, %vm1752_vm11  ;;  %vm1761_vm15 = vweird.f32 %v1724_v28 }
 0x9ae   :  { %v1744_v34 = vsel %vm1743_vm10, %v6127_v23, %v1740_v30  ;;  %v1747_v35 = vmul.f32 %v6129_v26, %v1746_v31  ;;  %v7699_v23 = vperm.slane %v1623_v15, 2  ;;  %v5784_v30 = vld [vmem:[#allocation23 + $0x50] sm:$0xff] }
 0x9af   :  { %v1766_v6 = vmul.f32 %v1744_v34, %v7672_v13  ;;  %2396 = vmatpush.bf16.msrb.mxu3 %v5778_v56  ;;  %v5792_v31 = vld [vmem:[#allocation23 + $0x90] sm:$0xff] }
 0x9b0   :  { %v1748_v33 = vmul.f32 0.5, %v1747_v35  ;;  %2436 = vmatpush.bf16.msra.mxu1 %v5792_v31 }
 0x9b1   :  { %v1773_v39 = vmul.f32 %v6033_v29, %v1766_v6 }
 0x9b2   :  { %v1749_v43 = vsub.f32 1.5, %v1748_v33  ;;  %v5777_v33 = vld [vmem:[#allocation23 + $0x18] sm:$0xff] }
 0x9b3   :  { %v6131_v44 = vpop.eup %6130  ;;  %v1780_v45 = vadd.f32 %v6034_v38, %v1773_v39  ;;  %v5801_v39 = vld [vmem:[#allocation23 + $0xd8] sm:$0xff]  ;;  %2397 = vmatpush.bf16.msrb.mxu3 %v5777_v33 }
 0x9b4   :  { %v1750_v7 = vmul.f32 %v6129_v26, %v1749_v43  ;;  %v1756_v37 = vmul.f32 %v6131_v44, %v1724_v28  ;;  %vm1762_vm14 = vweird.f32 %v6131_v44  ;;  %v7711_v28 = vperm.slane %v1623_v15, 3 }
 0x9b5   :  { %v1783_v46 = vpack.c.bf16 %v1780_v45, %v1779_v32  ;;  %vm1763_vm1 = vmor %vm1761_vm15, %vm1762_vm14 }
 0x9b6   :  { %v1757_v47 = vmul.f32 %v6131_v44, %v1756_v37  ;;  %v1754_v58 = vsel %vm1753_vm13, %v6129_v26, %v1750_v7  ;;  %v5802_v26 = vld [vmem:[#allocation23 + $0xe0] sm:$0xff] }
 0x9b7   :  { %1962 = vmatmul.bf16.vlgmr.msra.gmra.mxu3 %v1783_v46  ;;  %1981 = vmatmul.bf16.vlgmr.msra.gmra.mxu0 %v1783_v46  ;;  %v1767_v54 = vmul.f32 %v1754_v58, %v7678_v1  ;;  %v5788_v1 = vld [vmem:[#allocation23 + $0x70] sm:$0xff] }
 0x9b8   :  { %v1758_v48 = vmul.f32 0.5, %v1757_v47  ;;  %2000 = vmatmul.bf16.vlgmr.msrb.gmra.mxu1 %v1783_v46  ;;  %2019 = vmatmul.bf16.vlgmr.msrb.gmra.mxu2 %v1783_v46  ;;  %v5783_v46 = vld [vmem:[#allocation23 + $0x48] sm:$0xff] }
 0x9b9   :  { %v1774_v40 = vmul.f32 %v6033_v29, %v1767_v54  ;;  %2413 = vmatpush.bf16.msrb.mxu0 %v5788_v1  ;;  %v5791_v47 = vld [vmem:[#allocation23 + $0x88] sm:$0xff] }
 0x9ba   :  { %v1759_v13 = vsub.f32 1.5, %v1758_v48  ;;  %2437 = vmatpush.bf16.msra.mxu1 %v5791_v47 }
 0x9bb   :  { %v1781_v53 = vadd.f32 %v6034_v38, %v1774_v40 }
 0x9bc   :  { %v1760_v50 = vmul.f32 %v6131_v44, %v1759_v13 }
 0x9bd   :  { %2414 = vmatpush.bf16.msrb.mxu0 %v5787_v8 }
 0x9be   :  { %v1764_v19 = vsel %vm1763_vm1, %v6131_v44, %v1760_v50  ;;  %v5776_v50 = vld [vmem:[#allocation23 + $0x10] sm:$0xff] }
 0x9bf   :  { %v1768_v11 = vmul.f32 %v1764_v19, %v7684_v22  ;;  %v5805_v22 = vld [vmem:[#allocation23 + $0xf8] sm:$0xff]  ;;  %v5800_v19 = vld [vmem:[#allocation23 + $0xd0] sm:$0xff]  ;;  %2398 = vmatpush.bf16.msrb.mxu3 %v5776_v50 }
 0x9c0   :  { %2450 = vmatpush.bf16.msra.mxu2 %v5805_v22 }
 0x9c1   :  { %v1775_v55 = vmul.f32 %v6033_v29, %v1768_v11  ;;  %2415 = vmatpush.bf16.msrb.mxu0 %v5786_v14 }
 0x9c3   :  { %v1782_v59 = vadd.f32 %v6034_v38, %v1775_v55  ;;  %2399 = vmatpush.bf16.msrb.mxu3 %v5775_v10 }
 0x9c4   :  { %2451 = vmatpush.bf16.msra.mxu2 %v5804_v12 }
 0x9c5   :  { %v1784_v61 = vpack.c.bf16 %v1782_v59, %v1781_v53  ;;  %2416 = vmatpush.bf16.msrb.mxu0 %v5785_v24  ;;  %v5782_v59 = vld [vmem:[#allocation23 + $0x40] sm:$0xff] }
 0x9c7   :  { %1967 = vmatmul.bf16.gmra.mxu3 %v1784_v61  ;;  %1986 = vmatmul.bf16.gmra.mxu0 %v1784_v61 }
 0x9c8   :  { %2005 = vmatmul.bf16.gmra.mxu1 %v1784_v61  ;;  %2024 = vmatmul.bf16.gmra.mxu2 %v1784_v61  ;;  %v5790_v61 = vld [vmem:[#allocation23 + $0x80] sm:$0xff] }
 0x9c9   :  { %2452 = vmatpush.bf16.msra.mxu2 %v5803_v18  ;;  %2417 = vmatpush.bf16.msrb.mxu0 %v5784_v30 }
 0x9ca   :  { %2438 = vmatpush.bf16.msra.mxu1 %v5790_v61 }
 0x9cd   :  { %2453 = vmatpush.bf16.msra.mxu2 %v5802_v26  ;;  %2418 = vmatpush.bf16.msrb.mxu0 %v5783_v46  ;;  %v5774_v26 = vld [vmem:[#allocation23] sm:$0xff] }
 0x9ce   :  { %2400 = vmatpush.bf16.msrb.mxu3 %v5774_v26 }
 0x9d1   :  { %2454 = vmatpush.bf16.msra.mxu2 %v5801_v39  ;;  %2419 = vmatpush.bf16.msrb.mxu0 %v5782_v59 }
 0x9d5   :  { %2455 = vmatpush.bf16.msra.mxu2 %v5800_v19 }
 0x9d9   :  { %2456 = vmatpush.bf16.msra.mxu2 %v5799_v5 }
 0xa34   :  { %v1982_v63 = vpop.f32.mrf.mxu0 }
 0xa35   :  { %v7702_v9 = vadd.f32 %v1982_v63, %v7697_v21  ;;  %v2001_v16 = vpop.f32.mrf.mxu1 }
 0xa36   :  { %v7705_v49 = vadd.f32 %v2001_v16, %v7699_v23 }
 0xa37   :  { %v2031_v3 = vand.u32 2147483647, %v7702_v9  ;;  %vm2127_vm2 = vcmp.ge.f32.partialorder %v7702_v9, 0.0 }
 0xa38   :  { %v2032_v27 = vand.u32 2147483647, %v7705_v49  ;;  %vm2128_vm5 = vcmp.ge.f32.partialorder %v7705_v49, 0.0 }
 0xa39   :  { %v2047_v29 = vsub.f32 0.0, %v2031_v3 }
 0xa3a   :  { %v2048_v34 = vsub.f32 0.0, %v2032_v27  ;;  %v1963_v35 = vpop.f32.mrf.mxu3  ;;  %v5798_v27 = vld [vmem:[#allocation23 + $0xc0] sm:$0xff] }
 0xa3b   :  { %v2064_v6 = vmul.f32 1.442695, %v2047_v29  ;;  %v7714_v36 = vadd.f32 %v1963_v35, %v7708_v25  ;;  %v2020_v38 = vpop.f32.mrf.mxu2  ;;  %2457 = vmatpush.bf16.msra.mxu2 %v5798_v27 }
 0xa3c   :  { %v2066_v43 = vmul.f32 1.442695, %v2048_v34  ;;  %v7717_v44 = vadd.f32 %v2020_v38, %v7711_v28  ;;  %v1984_v32 = vpop.f32.mrf.mxu0 }
 0xa3d   :  { %6132 = vpow2.f32 %v2064_v6  ;;  %v2030_v45 = vand.u32 2147483647, %v7714_v36  ;;  %v7721_v7 = vadd.f32 %v1984_v32, %v7697_v21  ;;  %v2003_v37 = vpop.f32.mrf.mxu1  ;;  %vm2126_vm6 = vcmp.ge.f32.partialorder %v7714_v36, 0.0 }
 0xa3e   :  { %6134 = vpow2.f32 %v2066_v43  ;;  %v2033_v58 = vand.u32 2147483647, %v7717_v44  ;;  %v7725_v48 = vadd.f32 %v2003_v37, %v7699_v23  ;;  %vm2129_vm8 = vcmp.ge.f32.partialorder %v7717_v44, 0.0 }
 0xa3f   :  { %v2046_v13 = vsub.f32 0.0, %v2030_v45  ;;  %v2035_v54 = vand.u32 2147483647, %v7721_v7  ;;  %vm2131_vm7 = vcmp.ge.f32.partialorder %v7721_v7, 0.0 }
 0xa40   :  { %v2049_v11 = vsub.f32 0.0, %v2033_v58  ;;  %v2036_v40 = vand.u32 2147483647, %v7725_v48  ;;  %vm2132_vm9 = vcmp.ge.f32.partialorder %v7725_v48, 0.0 }
 0xa41   :  { %v2062_v55 = vmul.f32 1.442695, %v2046_v13  ;;  %v2051_v53 = vsub.f32 0.0, %v2035_v54 }
 0xa42   :  { %v2068_v62 = vmul.f32 1.442695, %v2049_v11  ;;  %v2052_v0 = vsub.f32 0.0, %v2036_v40  ;;  %v1965_v1 = vpop.f32.mrf.mxu3 }
 0xa43   :  { %v6133_v2 = vpop.eup %6132  ;;  %6136 = vpow2.f32 %v2062_v55  ;;  %v2072_v4 = vmul.f32 1.442695, %v2051_v53  ;;  %v7730_v22 = vadd.f32 %v1965_v1, %v7708_v25  ;;  %v2022_v8 = vpop.f32.mrf.mxu2 }
 0xa44   :  { %v7732_v12 = vpop.eup %6134  ;;  %v2095_v14 = vadd.f32 1.0, %v6133_v2  ;;  %6138 = vpow2.f32 %v2068_v62  ;;  %v2074_v52 = vmul.f32 1.442695, %v2052_v0  ;;  %v7735_v15 = vadd.f32 %v2022_v8, %v7711_v28  ;;  %v1987_v17 = vpop.f32.mrf.mxu0 }
 0xa45   :  { %v2096_v18 = vadd.f32 1.0, %v7732_v12  ;;  %6140 = vpow2.f32 %v2072_v4  ;;  %v2034_v63 = vand.u32 2147483647, %v7730_v22  ;;  %v2006_v16 = vpop.f32.mrf.mxu1  ;;  %v7741_v20 = vadd.f32 %v1987_v17, %v7697_v21 }
 0xa46   :  { %6142 = vrcp.f32 %v2095_v14  ;;  %v2037_v24 = vand.u32 2147483647, %v7735_v15  ;;  %v7744_v56 = vadd.f32 %v2006_v16, %v7699_v23  ;;  %vm2130_vm10 = vcmp.ge.f32.partialorder %v7730_v22, 0.0 }
 0xa47   :  { %v2050_v3 = vsub.f32 0.0, %v2034_v63  ;;  %6144 = vpow2.f32 %v2074_v52  ;;  %v2039_v30 = vand.u32 2147483647, %v7741_v20  ;;  %vm2133_vm11 = vcmp.ge.f32.partialorder %v7735_v15, 0.0 }
 0xa48   :  { %v2053_v29 = vsub.f32 0.0, %v2037_v24  ;;  %6146 = vrcp.f32 %v2096_v18  ;;  %v2040_v35 = vand.u32 2147483647, %v7744_v56  ;;  %vm2135_vm12 = vcmp.ge.f32.partialorder %v7741_v20, 0.0 }
 0xa49   :  { %v7747_v31 = vpop.eup %6136  ;;  %v2070_v34 = vmul.f32 1.442695, %v2050_v3  ;;  %v2055_v39 = vsub.f32 0.0, %v2039_v30  ;;  %vm2136_vm14 = vcmp.ge.f32.partialorder %v7744_v56, 0.0 }
 0xa4a   :  { %v7750_v6 = vpop.eup %6138  ;;  %v2094_v38 = vadd.f32 1.0, %v7747_v31  ;;  %v2076_v33 = vmul.f32 1.442695, %v2053_v29  ;;  %v1968_v43 = vpop.f32.mrf.mxu3  ;;  %v2056_v37 = vsub.f32 0.0, %v2040_v35 }
 0xa4b   :  { %v6141_v32 = vpop.eup %6140  ;;  %v2097_v45 = vadd.f32 1.0, %v7750_v6  ;;  %6148 = vpow2.f32 %v2070_v34  ;;  %v7755_v46 = vadd.f32 %v1968_v43, %v7708_v25  ;;  %v2025_v47 = vpop.f32.mrf.mxu2  ;;  %v2080_v54 = vmul.f32 1.442695, %v2055_v39 }
 0xa4c   :  { %v6143_v58 = vpop.eup %6142  ;;  %6150 = vrcp.f32 %v2094_v38  ;;  %v2099_v13 = vadd.f32 1.0, %v6141_v32  ;;  %v7758_v50 = vadd.f32 %v2025_v47, %v7711_v28  ;;  %v2082_v61 = vmul.f32 1.442695, %v2056_v37  ;;  %v1989_v0 = vpop.f32.mrf.mxu0 }
 0xa4d   :  { %v2143_v19 = vmul.f32 %v6143_v58, %v6133_v2  ;;  %6152 = vrcp.f32 %v2097_v45  ;;  %v2038_v11 = vand.u32 2147483647, %v7755_v46  ;;  %v6145_v40 = vpop.eup %6144  ;;  %v2008_v1 = vpop.f32.mrf.mxu1  ;;  %v7765_v17 = vadd.f32 %v1989_v0, %v7697_v21 }
 0xa4e   :  { %6154 = vrcp.f32 %v2099_v13  ;;  %v2041_v55 = vand.u32 2147483647, %v7758_v50  ;;  %v6147_v53 = vpop.eup %6146  ;;  %v2100_v59 = vadd.f32 1.0, %v6145_v40  ;;  %v7772_v63 = vadd.f32 %v2008_v1, %v7699_v23 }
 0xa4f   :  { %6156 = vpow2.f32 %v2076_v33  ;;  %v2054_v62 = vsub.f32 0.0, %v2038_v11  ;;  %v2159_v8 = vsel %vm2127_vm2, %v6143_v58, %v2143_v19  ;;  %v2144_v14 = vmul.f32 %v6147_v53, %v7732_v12 }
 0xa50   :  { %6158 = vpow2.f32 %v2080_v54  ;;  %v2057_v10 = vsub.f32 0.0, %v2041_v55  ;;  %v2175_v24 = vmul.f32 %v2159_v8, %v7702_v9  ;;  %v2043_v12 = vand.u32 2147483647, %v7765_v17 }
 0xa51   :  { %v6149_v4 = vpop.eup %6148  ;;  %6160 = vrcp.f32 %v2100_v59  ;;  %v2078_v2 = vmul.f32 1.442695, %v2054_v62  ;;  %v2044_v29 = vand.u32 2147483647, %v7772_v63  ;;  %v2160_v23 = vsel %vm2128_vm5, %v6147_v53, %v2144_v14 }
 0xa52   :  { %v6151_v5 = vpop.eup %6150  ;;  %v2098_v52 = vadd.f32 1.0, %v6149_v4  ;;  %6162 = vpow2.f32 %v2082_v61  ;;  %v1970_v21 = vpop.f32.mrf.mxu3  ;;  %v2084_v27 = vmul.f32 1.442695, %v2057_v10  ;;  %v2059_v35 = vsub.f32 0.0, %v2043_v12 }
 0xa53   :  { %v7767_v18 = vpop.eup %6152  ;;  %v2142_v34 = vmul.f32 %v6151_v5, %v7747_v31  ;;  %v2060_v43 = vsub.f32 0.0, %v2044_v29  ;;  %v2176_v58 = vmul.f32 %v2160_v23, %v7705_v49  ;;  %v2027_v54 = vpop.f32.mrf.mxu2  ;;  %vm2139_vm13 = vcmp.ge.f32.partialorder %v7765_v17, 0.0 }
 0xa54   :  { %v6155_v16 = vpop.eup %6154  ;;  %6164 = vrcp.f32 %v2098_v52  ;;  %v2088_v47 = vmul.f32 1.442695, %v2059_v35  ;;  %v2145_v11 = vmul.f32 %v7767_v18, %v7750_v6  ;;  %v7806_v6 = vadd.f32 %v2027_v54, %v7711_v28 }
 0xa55   :  { %v6157_v3 = vpop.eup %6156  ;;  %v2147_v26 = vmul.f32 %v6155_v16, %v6141_v32  ;;  %6166 = vpow2.f32 %v2078_v2  ;;  %v7788_v32 = vadd.f32 %v1970_v21, %v7708_v25  ;;  %v2090_v13 = vmul.f32 1.442695, %v2060_v43 }
 0xa56   :  { %v7778_v30 = vpop.eup %6158  ;;  %v2101_v9 = vadd.f32 1.0, %v6157_v3  ;;  %v2045_v10 = vand.u32 2147483647, %v7806_v6  ;;  %v2161_v28 = vsel %vm2129_vm8, %v7767_v18, %v2145_v11  ;;  %vm2140_vm15 = vcmp.ge.f32.partialorder %v7772_v63, 0.0 }
 0xa57   :  { %v6161_v38 = vpop.eup %6160  ;;  %v2163_v33 = vsel %vm2131_vm7, %v6155_v16, %v2147_v26  ;;  %v2103_v39 = vadd.f32 1.0, %v7778_v30  ;;  %v2042_v59 = vand.u32 2147483647, %v7788_v32  ;;  %v2177_v26 = vmul.f32 %v2161_v28, %v7717_v44  ;;  %v6035_v28 = vld [vmem:[%s8439_s27] ss:$0 sm:$0xff] }
 0xa58   :  { %v2179_v45 = vmul.f32 %v2163_v33, %v7721_v7  ;;  %v2148_v37 = vmul.f32 %v6161_v38, %v6145_v40  ;;  %6168 = vrcp.f32 %v2101_v9  ;;  %v7791_v31 = vpop.eup %6162  ;;  %v2158_v40 = vsel %vm2126_vm6, %v6151_v5, %v2142_v34 }
 0xa59   :  { %6170 = vpow2.f32 %v2084_v27  ;;  %v2104_v61 = vadd.f32 1.0, %v7791_v31  ;;  %v2058_v1 = vsub.f32 0.0, %v2042_v59  ;;  %v2174_v2 = vmul.f32 %v2158_v40, %v7714_v36 }
 0xa5a   :  { %v6165_v19 = vpop.eup %6164  ;;  %v2191_v25 = vpack.c.bf16 %v2179_v45, %v2175_v24  ;;  %v2164_v55 = vsel %vm2132_vm9, %v6161_v38, %v2148_v37  ;;  %6172 = vpow2.f32 %v2088_v47  ;;  %v2061_v36 = vsub.f32 0.0, %v2045_v10 }
 0xa5b   :  { %v7797_v7 = vpop.eup %6166  ;;  %v2180_v53 = vmul.f32 %v2164_v55, %v7725_v48  ;;  %v2146_v49 = vmul.f32 %v6165_v19, %v6149_v4  ;;  %6174 = vrcp.f32 %v2103_v39  ;;  %v2086_v52 = vmul.f32 1.442695, %v2058_v1 }
 0xa5c   :  { %2420 = vmatmul.bf16.vlgmr.msrb.gmra.mxu0 %v2191_v25  ;;  %6176 = vpow2.f32 %v2090_v13  ;;  %v2102_v4 = vadd.f32 1.0, %v7797_v7  ;;  %v2092_v29 = vmul.f32 1.442695, %v2061_v36  ;;  %vm2134_vm1 = vcmp.ge.f32.partialorder %v7755_v46, 0.0 }
 0xa5d   :  { %v2192_v62 = vpack.c.bf16 %v2180_v53, %v2176_v58  ;;  %v2162_v0 = vsel %vm2130_vm10, %v6165_v19, %v2146_v49  ;;  %6178 = vrcp.f32 %v2104_v61  ;;  %vm2138_vm2 = vcmp.ge.f32.partialorder %v7788_v32, 0.0 }
 0xa5e   :  { %v6169_v8 = vpop.eup %6168  ;;  %v2178_v48 = vmul.f32 %v2162_v0, %v7730_v22  ;;  %6180 = vpow2.f32 %v2086_v52  ;;  %vm2137_vm5 = vcmp.ge.f32.partialorder %v7758_v50, 0.0  ;;  %vm2141_vm6 = vcmp.ge.f32.partialorder %v7806_v6, 0.0 }
 0xa5f   :  { %v6171_v5 = vpop.eup %6170  ;;  %v2149_v14 = vmul.f32 %v6169_v8, %v6157_v3  ;;  %2439 = vmatmul.bf16.vlgmr.msra.gmra.mxu1 %v2192_v62  ;;  %6182 = vrcp.f32 %v2102_v4 }
 0xa60   :  { %v6173_v16 = vpop.eup %6172  ;;  %v2190_v24 = vpack.c.bf16 %v2178_v48, %v2174_v2  ;;  %v2105_v3 = vadd.f32 1.0, %v6171_v5 }
 0xa61   :  { %v2165_v12 = vsel %vm2133_vm11, %v6169_v8, %v2149_v14  ;;  %v2107_v22 = vadd.f32 1.0, %v6173_v16  ;;  %v6175_v21 = vpop.eup %6174 }
 0xa62   :  { %v2181_v27 = vmul.f32 %v2165_v12, %v7735_v15  ;;  %2401 = vmatmul.bf16.vlgmr.msrb.gmra.mxu3 %v2190_v24  ;;  %v6177_v18 = vpop.eup %6176  ;;  %v2151_v9 = vmul.f32 %v6175_v21, %v7778_v30 }
 0xa63   :  { %6184 = vrcp.f32 %v2107_v22  ;;  %v2108_v34 = vadd.f32 1.0, %v6177_v18  ;;  %v6179_v35 = vpop.eup %6178 }
 0xa64   :  { %v2193_v23 = vpack.c.bf16 %v2181_v27, %v2177_v26  ;;  %6186 = vpow2.f32 %v2092_v29  ;;  %v6181_v38 = vpop.eup %6180  ;;  %v2167_v39 = vsel %vm2135_vm12, %v6175_v21, %v2151_v9  ;;  %v2152_v43 = vmul.f32 %v6179_v35, %v7791_v31 }
 0xa65   :  { %6188 = vrcp.f32 %v2108_v34  ;;  %v6183_v33 = vpop.eup %6182  ;;  %v2106_v44 = vadd.f32 1.0, %v6181_v38  ;;  %v2183_v13 = vmul.f32 %v2167_v39, %v7741_v20 }
 0xa66   :  { %2458 = vmatmul.bf16.vlgmr.msra.gmra.mxu2 %v2193_v23  ;;  %6190 = vrcp.f32 %v2105_v3  ;;  %v2150_v54 = vmul.f32 %v6183_v33, %v7797_v7  ;;  %v2168_v31 = vsel %vm2136_vm14, %v6179_v35, %v2152_v43 }
 0xa67   :  { %6192 = vrcp.f32 %v2106_v44  ;;  %v2184_v49 = vmul.f32 %v2168_v31, %v7744_v56 }
 0xa68   :  { %v2166_v61 = vsel %vm2134_vm1, %v6183_v33, %v2150_v54 }
 0xa69   :  { %v6185_v15 = vpop.eup %6184  ;;  %v2182_v1 = vmul.f32 %v2166_v61, %v7755_v46 }
 0xa6a   :  { %v6187_v45 = vpop.eup %6186  ;;  %v2155_v37 = vmul.f32 %v6185_v15, %v6173_v16 }
 0xa6b   :  { %v2109_v47 = vadd.f32 1.0, %v6187_v45  ;;  %v6189_v30 = vpop.eup %6188 }
 0xa6c   :  { %v2171_v58 = vsel %vm2139_vm13, %v6185_v15, %v2155_v37  ;;  %v6191_v19 = vpop.eup %6190  ;;  %v2156_v25 = vmul.f32 %v6189_v30, %v6177_v18 }
 0xa6d   :  { %6194 = vrcp.f32 %v2109_v47  ;;  %v2187_v11 = vmul.f32 %v2171_v58, %v7765_v17  ;;  %v6193_v53 = vpop.eup %6192  ;;  %v2153_v20 = vmul.f32 %v6191_v19, %v6171_v5 }
 0xa6e   :  { %v2172_v40 = vsel %vm2140_vm15, %v6189_v30, %v2156_v25  ;;  %v2154_v7 = vmul.f32 %v6193_v53, %v6181_v38 }
 0xa6f   :  { %v2195_v55 = vpack.c.bf16 %v2187_v11, %v2183_v13  ;;  %v2188_v59 = vmul.f32 %v2172_v40, %v7772_v63  ;;  %v2169_v2 = vsel %vm2137_vm5, %v6191_v19, %v2153_v20 }
 0xa70   :  { %v2170_v0 = vsel %vm2138_vm2, %v6193_v53, %v2154_v7  ;;  %v2185_v4 = vmul.f32 %v2169_v2, %v7758_v50 }
 0xa71   :  { %2425 = vmatmul.bf16.gmra.mxu0 %v2195_v55  ;;  %v2196_v17 = vpack.c.bf16 %v2188_v59, %v2184_v49  ;;  %v2186_v8 = vmul.f32 %v2170_v0, %v7788_v32 }
 0xa73   :  { %v6195_v62 = vpop.eup %6194  ;;  %2444 = vmatmul.bf16.gmra.mxu1 %v2196_v17  ;;  %v2194_v63 = vpack.c.bf16 %v2186_v8, %v2182_v1 }
 0xa74   :  { %v2157_v56 = vmul.f32 %v6195_v62, %v6187_v45 }
 0xa75   :  { %2406 = vmatmul.bf16.gmra.mxu3 %v2194_v63 }
 0xa76   :  { %v2173_v48 = vsel %vm2141_vm6, %v6195_v62, %v2157_v56 }
 0xa77   :  { %v2189_v10 = vmul.f32 %v2173_v48, %v7806_v6 }
 0xa79   :  { %v2197_v5 = vpack.c.bf16 %v2189_v10, %v2185_v4  ;;  %v5316_v10 = vld [vmem:[#allocation25 + $0xa8] sm:$0xf] }
 0xa7b   :  { %2463 = vmatmul.bf16.gmra.mxu2 %v2197_v5  ;;  %v5828_v5 = vld [vmem:[#allocation25 + $0xb0] sm:$0xf0] }
 0xad9   :  { %v2421_v14 = vpop.f32.mrf.mxu0 }
 0xadc   :  { %v2440_v46 = vpop.f32.mrf.mxu1 }
 0xae1   :  { %v2423_v27 = vpop.f32.mrf.mxu0 }
 0xae4   :  { %v2442_v29 = vpop.f32.mrf.mxu1 }
 0xae5   :  { %v2402_v52 = vpop.f32.mrf.mxu3 }
 0xae6   :  { %v2403_v16 = vadd.f32 %v6035_v28, %v2402_v52  ;;  %v5318_v52 = vld [vmem:[#allocation25 + $0xb4] sm:$0xf0] }
 0xae8   :  { %v2422_v24 = vadd.f32 %v2421_v14, %v2403_v16  ;;  %v5317_v14 = vor.u32 %v5828_v5, %v5316_v10  ;;  %v5324_v16 = vld [vmem:[#allocation25 + $0xb0] sm:$0xf]  ;;  %v5812_v10 = vld [vmem:[#allocation25 + $0x34] sm:$0xf]  ;;  %v5258_v5 = vld [vmem:[#allocation25 + $0x3c] sm:$0xf0] }
 0xae9   :  { %v2459_v32 = vpop.f32.mrf.mxu2 }
 0xaea   :  { %v2441_v36 = vadd.f32 %v2440_v46, %v2422_v24  ;;  %v5829_v46 = vld [vmem:[#allocation25 + $0xb8] sm:$0xf0]  ;;  %2760 = vmatpush.bf16.msra.mxu3 %v5317_v14  ;;  %v5261_v14 = vor.u32 %v5812_v10, %v5258_v5 }
 0xaec   :  { %v2460_v12 = vadd.f32 %v2459_v32, %v2441_v36  ;;  %v5325_v32 = vor.u32 %v5829_v46, %v5324_v16  ;;  %v5304_v36 = vld [vmem:[#allocation25 + $0x90] sm:$0xf]  ;;  %v5244_v46 = vld [vmem:[#allocation25 + $0x18] sm:$0xf] }
 0xaed   :  { %v2404_v22 = vpop.f32.mrf.mxu3 }
 0xaee   :  { %v2469_v21 = vmul.f32 0.5, %v2460_v12  ;;  %v2405_v26 = vadd.f32 %v6035_v28, %v2404_v22  ;;  %v2426_v35 = vpop.f32.mrf.mxu0  ;;  %2798 = vmatpush.bf16.msrb.mxu1 %v5325_v32  ;;  %v5825_v12 = vld [vmem:[#allocation25 + $0x98] sm:$0xf0]  ;;  %v5824_v22 = vld [vmem:[#allocation25 + $0x94] sm:$0xf] }
 0xaef   :  { %v5809_v32 = vld [vmem:[#allocation25 + $0x1c] sm:$0xf] }
 0xaf0   :  { %v7839_v50 = vadd.f32 %v2469_v21, %v7650_v42  ;;  %v2424_v6 = vadd.f32 %v2423_v27, %v2405_v26  ;;  %v2445_v44 = vpop.f32.mrf.mxu1  ;;  %v5305_v21 = vor.u32 %v5825_v12, %v5304_v36  ;;  %v5306_v26 = vld [vmem:[#allocation25 + $0x9c] sm:$0xf0]  ;;  %v5312_v27 = vld [vmem:[#allocation25 + $0x98] sm:$0xf] }
 0xaf1   :  { %v2461_v3 = vpop.f32.mrf.mxu2 }
 0xaf2   :  { %v2443_v18 = vadd.f32 %v2442_v29, %v2424_v6  ;;  %2479 = vadd.xlane.f32.xlu0 %v7839_v50  ;;  %v5826_v6 = vld [vmem:[#allocation25 + $0xa0] sm:$0xf0]  ;;  %v5309_v29 = vor.u32 %v5824_v22, %v5306_v26  ;;  %2761 = vmatpush.bf16.msra.mxu3 %v5305_v21  ;;  %v5246_v22 = vld [vmem:[#allocation25 + $0x24] sm:$0xf0]  ;;  %v5252_v21 = vld [vmem:[#allocation25 + $0x20] sm:$0xf] }
 0xaf3   :  { %v5811_v26 = vld [vmem:[#allocation25 + $0x28] sm:$0xf0] }
 0xaf4   :  { %v2462_v23 = vadd.f32 %v2461_v3, %v2443_v18  ;;  %v5313_v18 = vor.u32 %v5826_v6, %v5312_v27  ;;  %v5292_v3 = vld [vmem:[#allocation25 + $0x78] sm:$0xf]  ;;  %v5249_v6 = vor.u32 %v5809_v32, %v5246_v22 }
 0xaf6   :  { %v2470_v34 = vmul.f32 0.5, %v2462_v23  ;;  %v2428_v58 = vpop.f32.mrf.mxu0  ;;  %2799 = vmatpush.bf16.msrb.mxu1 %v5313_v18  ;;  %v5822_v23 = vld [vmem:[#allocation25 + $0x80] sm:$0xf0] }
 0xaf8   :  { %v7843_v9 = vadd.f32 %v2470_v34, %v7653_v51  ;;  %v2407_v38 = vpop.f32.mrf.mxu3  ;;  %v2447_v19 = vpop.f32.mrf.mxu1  ;;  %v5821_v34 = vld [vmem:[#allocation25 + $0x7c] sm:$0xf] }
 0xaf9   :  { %v2408_v33 = vadd.f32 %v6035_v28, %v2407_v38  ;;  %v5294_v38 = vld [vmem:[#allocation25 + $0x84] sm:$0xf0] }
 0xafa   :  { %2481 = vadd.xlane.f32.xlu2 %v7843_v9 }
 0xafb   :  { %v2427_v15 = vadd.f32 %v2426_v35, %v2408_v33  ;;  %v5293_v35 = vor.u32 %v5822_v23, %v5292_v3  ;;  %v5300_v33 = vld [vmem:[#allocation25 + $0x80] sm:$0xf] }
 0xafc   :  { %v5232_v23 = vld [vmem:[#allocation25] sm:$0xf] }
 0xafd   :  { %v2446_v43 = vadd.f32 %v2445_v44, %v2427_v15  ;;  %v5823_v44 = vld [vmem:[#allocation25 + $0x88] sm:$0xf0]  ;;  %v5297_v15 = vor.u32 %v5821_v34, %v5294_v38  ;;  %2762 = vmatpush.bf16.msra.mxu3 %v5293_v35 }
 0xafe   :  { %v2464_v39 = vpop.f32.mrf.mxu2  ;;  %v5807_v34 = vld [vmem:[#allocation25 + $0x8] sm:$0xf0] }
 0xaff   :  { %v2465_v45 = vadd.f32 %v2464_v39, %v2446_v43  ;;  %v5301_v39 = vor.u32 %v5823_v44, %v5300_v33  ;;  %v5280_v43 = vld [vmem:[#allocation25 + $0x60] sm:$0xf]  ;;  %v5233_v38 = vor.u32 %v5807_v34, %v5232_v23  ;;  %v5806_v33 = vld [vmem:[#allocation25 + $0x4] sm:$0xf]  ;;  %v5234_v44 = vld [vmem:[#allocation25 + $0xc] sm:$0xf0] }
 0xb00   :  { %v2409_v37 = vpop.f32.mrf.mxu3 }
 0xb01   :  { %v2471_v47 = vmul.f32 0.5, %v2465_v45  ;;  %v2410_v30 = vadd.f32 %v6035_v28, %v2409_v37  ;;  %v5827_v28 = vld [vmem:[#allocation25 + $0xac] sm:$0xf]  ;;  %2800 = vmatpush.bf16.msrb.mxu1 %v5301_v39  ;;  %v5818_v37 = vld [vmem:[#allocation25 + $0x64] sm:$0xf]  ;;  %v5237_v39 = vor.u32 %v5806_v33, %v5234_v44 }
 0xb02   :  { %v5321_v24 = vor.u32 %v5827_v28, %v5318_v52  ;;  %v5819_v45 = vld [vmem:[#allocation25 + $0x68] sm:$0xf0]  ;;  %v5264_v28 = vld [vmem:[#allocation25 + $0x38] sm:$0xf]  ;;  %v5814_v52 = vld [vmem:[#allocation25 + $0x40] sm:$0xf0] }
 0xb03   :  { %v7847_v13 = vadd.f32 %v2471_v47, %v7657_v60  ;;  %v2429_v54 = vadd.f32 %v2428_v58, %v2410_v30  ;;  %v5281_v47 = vor.u32 %v5819_v45, %v5280_v43  ;;  %v5282_v30 = vld [vmem:[#allocation25 + $0x6c] sm:$0xf0]  ;;  %v5288_v58 = vld [vmem:[#allocation25 + $0x68] sm:$0xf]  ;;  %v5265_v16 = vor.u32 %v5814_v52, %v5264_v28  ;;  %v5808_v43 = vld [vmem:[#allocation25 + $0x10] sm:$0xf0] }
 0xb04   :  { %2779 = vmatpush.bf16.msra.mxu0 %v5321_v24  ;;  %v5810_v24 = vld [vmem:[#allocation25 + $0x20] sm:$0xf0] }
 0xb05   :  { %v2448_v11 = vadd.f32 %v2447_v19, %v2429_v54  ;;  %2483 = vadd.xlane.f32.xlu1 %v7847_v13  ;;  %v5820_v54 = vld [vmem:[#allocation25 + $0x70] sm:$0xf0]  ;;  %v5285_v19 = vor.u32 %v5818_v37, %v5282_v30  ;;  %2763 = vmatpush.bf16.msra.mxu3 %v5281_v47  ;;  %v5245_v12 = vor.u32 %v5810_v24, %v5244_v46  ;;  %v7889_v44 = vld [vmem:[%s8442_s9] sm:$0x7] }
 0xb06   :  { %v2466_v25 = vpop.f32.mrf.mxu2 }
 0xb07   :  { %v2467_v31 = vadd.f32 %v2466_v25, %v2448_v11  ;;  %v5289_v11 = vor.u32 %v5820_v54, %v5288_v58  ;;  %v5268_v25 = vld [vmem:[#allocation25 + $0x48] sm:$0xf] }
 0xb08   :  { %2780 = vmatpush.bf16.msra.mxu0 %v5309_v29  ;;  %v5253_v29 = vor.u32 %v5811_v26, %v5252_v21 }
 0xb09   :  { %v2472_v55 = vmul.f32 0.5, %v2467_v31  ;;  %2801 = vmatpush.bf16.msrb.mxu1 %v5289_v11  ;;  %v5816_v31 = vld [vmem:[#allocation25 + $0x50] sm:$0xf0] }
 0xb0b   :  { %v7851_v40 = vadd.f32 %v2472_v55, %v7661_v41  ;;  %v5815_v55 = vld [vmem:[#allocation25 + $0x4c] sm:$0xf] }
 0xb0c   :  { %2781 = vmatpush.bf16.msra.mxu0 %v5297_v15  ;;  %v5240_v15 = vld [vmem:[#allocation25 + $0x8] sm:$0xf] }
 0xb0d   :  { %2485 = vadd.xlane.f32.xlu0 %v7851_v40  ;;  %v5241_v37 = vor.u32 %v5808_v43, %v5240_v15 }
 0xb10   :  { %2782 = vmatpush.bf16.msra.mxu0 %v5285_v19 }
 0xb65   :  { %v2480_v53 = vpop.xlane.xlu0 %2479 }
 0xb66   :  { %v2487_v49 = vmul.f32 %v2480_v53, %v7632_v57 }
 0xb68   :  { %v7856_v59 = vsub.f32 %v7839_v50, %v2487_v49  ;;  %v5269_v49 = vor.u32 %v5816_v31, %v5268_v25 }
 0xb6a   :  { %v2495_v20 = vmul.f32 %v7856_v59, %v7856_v59  ;;  %2764 = vmatpush.bf16.msra.mxu3 %v5269_v49 }
 0xb6c   :  { %2499 = vadd.xlane.f32.xlu2 %v2495_v20  ;;  %v5270_v20 = vld [vmem:[#allocation25 + $0x54] sm:$0xf0] }
 0xb6d   :  { %v2482_v7 = vpop.xlane.xlu2 %2481 }
 0xb6e   :  { %v2488_v61 = vmul.f32 %v2482_v7, %v7632_v57  ;;  %v5276_v7 = vld [vmem:[#allocation25 + $0x50] sm:$0xf] }
 0xb70   :  { %v7862_v17 = vsub.f32 %v7843_v9, %v2488_v61  ;;  %v5817_v61 = vld [vmem:[#allocation25 + $0x58] sm:$0xf0] }
 0xb72   :  { %v2496_v62 = vmul.f32 %v7862_v17, %v7862_v17 }
 0xb74   :  { %2501 = vadd.xlane.f32.xlu1 %v2496_v62 }
 0xb78   :  { %v2484_v0 = vpop.xlane.xlu1 %2483 }
 0xb79   :  { %v2489_v1 = vmul.f32 %v2484_v0, %v7632_v57  ;;  %v5273_v0 = vor.u32 %v5815_v55, %v5270_v20 }
 0xb7b   :  { %v7868_v8 = vsub.f32 %v7847_v13, %v2489_v1  ;;  %v5277_v1 = vor.u32 %v5817_v61, %v5276_v7  ;;  %2783 = vmatpush.bf16.msra.mxu0 %v5273_v0  ;;  %v6036_v61 = vld [vmem:[%s8440_s7] ss:$0 sm:$0xff] }
 0xb7d   :  { %v2497_v56 = vmul.f32 %v7868_v8, %v7868_v8  ;;  %2802 = vmatpush.bf16.msrb.mxu1 %v5277_v1 }
 0xb7f   :  { %2503 = vadd.xlane.f32.xlu0 %v2497_v56  ;;  %2784 = vmatpush.bf16.msra.mxu0 %v5261_v14 }
 0xb80   :  { %v2486_v2 = vpop.xlane.xlu0 %2485 }
 0xb81   :  { %v2490_v63 = vmul.f32 %v2486_v2, %v7632_v57  ;;  %v5256_v2 = vld [vmem:[#allocation25 + $0x30] sm:$0xf]  ;;  %2803 = vmatpush.bf16.msrb.mxu1 %v5265_v16 }
 0xb83   :  { %v7874_v48 = vsub.f32 %v7851_v40, %v2490_v63  ;;  %v5813_v63 = vld [vmem:[#allocation25 + $0x38] sm:$0xf0]  ;;  %2785 = vmatpush.bf16.msra.mxu0 %v5249_v6 }
 0xb85   :  { %v2498_v4 = vmul.f32 %v7874_v48, %v7874_v48  ;;  %2804 = vmatpush.bf16.msrb.mxu1 %v5253_v29 }
 0xb87   :  { %2505 = vadd.xlane.f32.xlu2 %v2498_v4  ;;  %v5257_v4 = vor.u32 %v5813_v63, %v5256_v2  ;;  %2786 = vmatpush.bf16.msra.mxu0 %v5237_v39  ;;  %v2626_v39 = vperm.slane %v7889_v44, 0 }
 0xb89   :  { %2765 = vmatpush.bf16.msra.mxu3 %v5257_v4  ;;  %2805 = vmatpush.bf16.msrb.mxu1 %v5241_v37  ;;  %v6037_v4 = vld [vmem:[%s8441_s10] ss:$0 sm:$0xff] }
 0xb8d   :  { %2766 = vmatpush.bf16.msra.mxu3 %v5245_v12 }
 0xb91   :  { %2767 = vmatpush.bf16.msra.mxu3 %v5233_v38 }
 0xbdf   :  { %v2500_v53 = vpop.xlane.xlu2 %2499 }
 0xbe0   :  { %v2507_v62 = vmul.f32 %v2500_v53, %v7632_v57 }
 0xbe2   :  { %v2511_v56 = vadd.f32 1e-05, %v2507_v62 }
 0xbe4   :  { %6196 = vrsqrt.f32 %v2511_v56  ;;  %vm2521_vm8 = vweird.f32 %v2511_v56 }
 0xbe7   :  { %v2502_v36 = vpop.xlane.xlu1 %2501 }
 0xbe8   :  { %v2508_v27 = vmul.f32 %v2502_v36, %v7632_v57 }
 0xbea   :  { %v6197_v18 = vpop.eup %6196  ;;  %v2512_v3 = vadd.f32 1e-05, %v2508_v27 }
 0xbeb   :  { %v2516_v35 = vmul.f32 %v6197_v18, %v2511_v56  ;;  %vm2522_vm7 = vweird.f32 %v6197_v18 }
 0xbec   :  { %6198 = vrsqrt.f32 %v2512_v3  ;;  %vm2523_vm9 = vmor %vm2521_vm8, %vm2522_vm7  ;;  %vm2531_vm11 = vweird.f32 %v2512_v3 }
 0xbed   :  { %v2517_v45 = vmul.f32 %v6197_v18, %v2516_v35 }
 0xbef   :  { %v2518_v47 = vmul.f32 0.5, %v2517_v45 }
 0xbf1   :  { %v2519_v30 = vsub.f32 1.5, %v2518_v47 }
 0xbf2   :  { %v6199_v58 = vpop.eup %6198  ;;  %v2504_v25 = vpop.xlane.xlu0 %2503 }
 0xbf3   :  { %v2520_v54 = vmul.f32 %v6197_v18, %v2519_v30  ;;  %v2526_v19 = vmul.f32 %v6199_v58, %v2512_v3  ;;  %v2509_v31 = vmul.f32 %v2504_v25, %v7632_v57  ;;  %vm2532_vm10 = vweird.f32 %v6199_v58 }
 0xbf4   :  { %vm2533_vm12 = vmor %vm2531_vm11, %vm2532_vm10 }
 0xbf5   :  { %v2527_v11 = vmul.f32 %v6199_v58, %v2526_v19  ;;  %v2524_v55 = vsel %vm2523_vm9, %v6197_v18, %v2520_v54  ;;  %v2513_v49 = vadd.f32 1e-05, %v2509_v31 }
 0xbf6   :  { %v2555_v7 = vmul.f32 %v2524_v55, %v7856_v59 }
 0xbf7   :  { %v2528_v53 = vmul.f32 0.5, %v2527_v11  ;;  %6200 = vrsqrt.f32 %v2513_v49  ;;  %vm2541_vm14 = vweird.f32 %v2513_v49 }
 0xbf8   :  { %v2562_v63 = vmul.f32 %v6036_v61, %v2555_v7 }
 0xbf9   :  { %v2529_v20 = vsub.f32 1.5, %v2528_v53 }
 0xbfa   :  { %v2506_v1 = vpop.xlane.xlu2 %2505  ;;  %v2569_v52 = vadd.f32 %v6037_v4, %v2562_v63 }
 0xbfb   :  { %v2530_v62 = vmul.f32 %v6199_v58, %v2529_v20  ;;  %v2510_v2 = vmul.f32 %v2506_v1, %v7632_v57 }
 0xbfd   :  { %v2534_v0 = vsel %vm2533_vm12, %v6199_v58, %v2530_v62  ;;  %v6201_v10 = vpop.eup %6200  ;;  %v2514_v5 = vadd.f32 1e-05, %v2510_v2 }
 0xbfe   :  { %v2556_v56 = vmul.f32 %v2534_v0, %v7862_v17  ;;  %v2536_v14 = vmul.f32 %v6201_v10, %v2513_v49  ;;  %vm2542_vm13 = vweird.f32 %v6201_v10 }
 0xbff   :  { %6202 = vrsqrt.f32 %v2514_v5  ;;  %vm2543_vm15 = vmor %vm2541_vm14, %vm2542_vm13  ;;  %vm2551_vm2 = vweird.f32 %v2514_v5 }
 0xc00   :  { %v2563_v28 = vmul.f32 %v6036_v61, %v2556_v56  ;;  %v2537_v16 = vmul.f32 %v6201_v10, %v2536_v14 }
 0xc02   :  { %v2570_v59 = vadd.f32 %v6037_v4, %v2563_v28  ;;  %v2538_v24 = vmul.f32 0.5, %v2537_v16 }
 0xc04   :  { %v2623_v46 = vpack.c.bf16 %v2570_v59, %v2569_v52  ;;  %v2539_v32 = vsub.f32 1.5, %v2538_v24 }
 0xc05   :  { %v6203_v36 = vpop.eup %6202 }
 0xc06   :  { %2768 = vmatmul.bf16.vlgmr.msra.gmra.mxu3 %v2623_v46  ;;  %2787 = vmatmul.bf16.vlgmr.msra.gmra.mxu0 %v2623_v46  ;;  %v2540_v17 = vmul.f32 %v6201_v10, %v2539_v32  ;;  %v2546_v12 = vmul.f32 %v6203_v36, %v2514_v5  ;;  %vm2552_vm1 = vweird.f32 %v6203_v36 }
 0xc07   :  { %2806 = vmatmul.bf16.vlgmr.msrb.gmra.mxu1 %v2623_v46  ;;  %vm2553_vm5 = vmor %vm2551_vm2, %vm2552_vm1 }
 0xc08   :  { %v2547_v22 = vmul.f32 %v6203_v36, %v2546_v12  ;;  %v2544_v21 = vsel %vm2543_vm15, %v6201_v10, %v2540_v17 }
 0xc09   :  { %v2557_v6 = vmul.f32 %v2544_v21, %v7868_v8  ;;  %v2627_v8 = vperm.slane %v7889_v44, 1 }
 0xc0a   :  { %v2548_v26 = vmul.f32 0.5, %v2547_v22 }
 0xc0b   :  { %v2564_v23 = vmul.f32 %v6036_v61, %v2557_v6 }
 0xc0c   :  { %v2549_v27 = vsub.f32 1.5, %v2548_v26 }
 0xc0d   :  { %v2571_v35 = vadd.f32 %v6037_v4, %v2564_v23 }
 0xc0e   :  { %v2550_v29 = vmul.f32 %v6203_v36, %v2549_v27 }
 0xc10   :  { %v2554_v18 = vsel %vm2553_vm5, %v6203_v36, %v2550_v29 }
 0xc11   :  { %v2558_v3 = vmul.f32 %v2554_v18, %v7874_v48 }
 0xc13   :  { %v2565_v34 = vmul.f32 %v6036_v61, %v2558_v3 }
 0xc15   :  { %v2572_v38 = vadd.f32 %v6037_v4, %v2565_v34 }
 0xc17   :  { %v2624_v33 = vpack.c.bf16 %v2572_v38, %v2571_v35 }
 0xc19   :  { %2773 = vmatmul.bf16.gmra.mxu3 %v2624_v33  ;;  %2792 = vmatmul.bf16.gmra.mxu0 %v2624_v33 }
 0xc1a   :  { %2811 = vmatmul.bf16.gmra.mxu1 %v2624_v33 }
 0xc83   :  { %v2788_v15 = vpop.f32.mrf.mxu0 }
 0xc84   :  { %v2789_v37 = vadd.f32 %v2788_v15, %v2627_v8 }
 0xc89   :  { %v2769_v43 = vpop.f32.mrf.mxu3 }
 0xc8a   :  { %v2770_v45 = vadd.f32 %v2769_v43, %v2626_v39 }
 0xc8b   :  { %v2790_v30 = vpop.f32.mrf.mxu0 }
 0xc8c   :  { %v2817_v47 = vmul.f32 0.17677669, %v2770_v45  ;;  %v2791_v11 = vadd.f32 %v2790_v30, %v2627_v8 }
 0xc8e   :  { %v2821_v48 = vmul.f32 %v2817_v47, %v2789_v37 }
 0xc90   :  { %2973 = vrot.lane.b32.xlu2 %v2821_v48, %s7046_s29  ;;  %2867 = vrot.lane.b32.xlu1 %v2821_v48, %s7045_s1  ;;  %v2823_v58 = vsel %vm740_vm0, %v2821_v48, 0.0 }
 0xc91   :  { %v2771_v54 = vpop.f32.mrf.mxu3  ;;  %2824 = vadd.xlane.f32.xlu0 %v2823_v58 }
 0xc92   :  { %v2772_v19 = vadd.f32 %v2771_v54, %v2626_v39 }
 0xc94   :  { %v2818_v25 = vmul.f32 0.17677669, %v2772_v19 }
 0xc96   :  { %v2822_v31 = vmul.f32 %v2818_v25, %v2791_v11  ;;  %v2793_v55 = vpop.f32.mrf.mxu0 }
 0xc97   :  { %v2794_v53 = vadd.f32 %v2793_v55, %v2627_v8 }
 0xc98   :  { %2923 = vrot.lane.b32.xlu2 %v2822_v31, %s7025_s25  ;;  %2921 = vrot.lane.b32.xlu1 %v2821_v48, %s7025_s25  ;;  %v2826_v14 = vsel %vm740_vm0, %v2822_v31, 0.0 }
 0xc99   :  { %v2829_v49 = vmul.f32 %v2817_v47, %v2794_v53 }
 0xc9b   :  { %v2831_v18 = vsel %vm740_vm0, %v2829_v49, 0.0 }
 0xc9c   :  { %v2774_v20 = vpop.f32.mrf.mxu3 }
 0xc9d   :  { %v2775_v7 = vadd.f32 %v2774_v20, %v2626_v39 }
 0xc9e   :  { %v2795_v61 = vpop.f32.mrf.mxu0 }
 0xc9f   :  { %v2819_v62 = vmul.f32 0.17677669, %v2775_v7  ;;  %v2796_v0 = vadd.f32 %v2795_v61, %v2627_v8 }
 0xca1   :  { %v3031_v1 = vmul.f32 %v2819_v62, %v2789_v37  ;;  %v3039_v56 = vmul.f32 %v2819_v62, %v2794_v53  ;;  %v2830_v2 = vmul.f32 %v2818_v25, %v2796_v0 }
 0xca3   :  { %v2834_v6 = vsel %vm740_vm0, %v2830_v2, 0.0  ;;  %v3041_v29 = vsel %vm740_vm0, %v3039_v56, 0.0  ;;  %v3033_v3 = vsel %vm740_vm0, %v3031_v1, 0.0 }
 0xca4   :  { %v2776_v63 = vpop.f32.mrf.mxu3 }
 0xca5   :  { %2869 = vrot.lane.b32.xlu0 %v2822_v31, %s7045_s1  ;;  %v2777_v4 = vadd.f32 %v2776_v63, %v2626_v39 }
 0xca7   :  { %v2820_v10 = vmul.f32 0.17677669, %v2777_v4 }
 0xca9   :  { %v7899_v5 = vmul.f32 %v2820_v10, %v2791_v11  ;;  %v7901_v28 = vmul.f32 %v2820_v10, %v2796_v0 }
 0xcab   :  { %v3036_v48 = vsel %vm740_vm0, %v7899_v5, 0.0  ;;  %v3044_v19 = vsel %vm740_vm0, %v7901_v28, 0.0 }
 0xcad   :  { %2975 = vrot.lane.b32.xlu0 %v2822_v31, %s7046_s29 }
 0xcc2   :  { %2827 = vadd.xlane.f32.xlu1 %v2826_v14 }
 0xcea   :  { %v2974_v52 = vpop.permute.xlu2 %2973 }
 0xceb   :  { %v2979_v59 = vsel %vm740_vm0, %v2974_v52, 0.0 }
 0xcec   :  { %2980 = vadd.xlane.f32.xlu0 %v2979_v59 }
 0xcf2   :  { %v2924_v16 = vpop.permute.xlu2 %2923 }
 0xcf3   :  { %v2930_v46 = vsel %vm740_vm0, %v2924_v16, 0.0 }
 0xcf4   :  { %2931 = vadd.xlane.f32.xlu0 %v2930_v46 }
 0xd02   :  { %v2868_v24 = vpop.permute.xlu1 %2867 }
 0xd03   :  { %v2873_v32 = vsel %vm740_vm0, %v2868_v24, 0.0 }
 0xd04   :  { %2874 = vadd.xlane.f32.xlu1 %v2873_v32  ;;  %v7910_v12 = vpop.xlane.xlu0 %2824  ;;  %v2807_v32 = vpop.f32.mrf.mxu1 }
 0xd08   :  { %2933 = vrot.lane.b32.xlu0 %v2829_v49, %s7025_s25 }
 0xd0a   :  { %v2922_v36 = vpop.permute.xlu1 %2921 }
 0xd0b   :  { %v2927_v17 = vsel %vm740_vm0, %v2922_v36, 0.0 }
 0xd0c   :  { %2928 = vadd.xlane.f32.xlu2 %v2927_v17 }
 0xd10   :  { %2883 = vrot.lane.b32.xlu0 %v2830_v2, %s7045_s1 }
 0xd17   :  { %v2870_v22 = vpop.permute.xlu0 %2869 }
 0xd18   :  { %3077 = vrot.lane.b32.xlu0 %v3031_v1, %s7045_s1  ;;  %v2876_v21 = vsel %vm740_vm0, %v2870_v22, 0.0 }
 0xd19   :  { %2877 = vadd.xlane.f32.xlu2 %v2876_v21 }
 0xd1f   :  { %v2976_v26 = vpop.permute.xlu0 %2975 }
 0xd20   :  { %3143 = vrot.lane.b32.xlu0 %v3039_v56, %s7025_s25  ;;  %v2982_v27 = vsel %vm740_vm0, %v2976_v26, 0.0 }
 0xd21   :  { %2983 = vadd.xlane.f32.xlu1 %v2982_v27 }
 0xd31   :  { %2881 = vrot.lane.b32.xlu2 %v2829_v49, %s7045_s1 }
 0xd35   :  { %v7950_v39 = vpop.xlane.xlu1 %2827 }
 0xd3a   :  { %2985 = vrot.lane.b32.xlu1 %v2829_v49, %s7046_s29 }
 0xd42   :  { %2935 = vrot.lane.b32.xlu1 %v2830_v2, %s7025_s25 }
 0xd4a   :  { %2835 = vadd.xlane.f32.xlu0 %v2834_v6  ;;  %3131 = vrot.lane.b32.xlu1 %v3031_v1, %s7025_s25 }
 0xd52   :  { %3042 = vadd.xlane.f32.xlu0 %v3041_v29  ;;  %3195 = vrot.lane.b32.xlu1 %v3039_v56, %s7046_s29  ;;  %v7978_v29 = vpop.f32.mrf.mxu1 }
 0xd5a   :  { %2832 = vadd.xlane.f32.xlu2 %v2831_v18 }
 0xd5f   :  { %v7941_v35 = vpop.xlane.xlu0 %2980 }
 0xd66   :  { %3093 = vrot.lane.b32.xlu0 %v7901_v28, %s7045_s1 }
 0xd67   :  { %v7946_v15 = vpop.xlane.xlu0 %2931 }
 0xd6e   :  { %3185 = vrot.lane.b32.xlu0 %v7899_v5, %s7046_s29 }
 0xd72   :  { %2987 = vrot.lane.b32.xlu2 %v2830_v2, %s7046_s29 }
 0xd77   :  { %v7952_v43 = vpop.xlane.xlu1 %2874 }
 0xd7a   :  { %3091 = vrot.lane.b32.xlu2 %v3039_v56, %s7045_s1  ;;  %v2934_v8 = vpop.permute.xlu0 %2933 }
 0xd7b   :  { %v2939_v53 = vsel %vm740_vm0, %v2934_v8, 0.0  ;;  %v2812_v8 = vpop.f32.mrf.mxu1 }
 0xd7c   :  { %3034 = vadd.xlane.f32.xlu1 %v3033_v3 }
 0xd7f   :  { %v7933_v23 = vpop.xlane.xlu2 %2928 }
 0xd82   :  { %3183 = vrot.lane.b32.xlu2 %v3031_v1, %s7046_s29  ;;  %v2884_v45 = vpop.permute.xlu0 %2883 }
 0xd83   :  { %v2890_v62 = vsel %vm740_vm0, %v2884_v45, 0.0 }
 0xd8a   :  { %3133 = vrot.lane.b32.xlu2 %v7899_v5, %s7025_s25  ;;  %v3078_v47 = vpop.permute.xlu0 %3077 }
 0xd8b   :  { %v3083_v49 = vsel %vm740_vm0, %v3078_v47, 0.0 }
 0xd8c   :  { %v7937_v34 = vpop.xlane.xlu2 %2877 }
 0xd92   :  { %3197 = vrot.lane.b32.xlu2 %v7901_v28, %s7046_s29  ;;  %v3144_v54 = vpop.permute.xlu0 %3143 }
 0xd93   :  { %v3149_v0 = vsel %vm740_vm0, %v3144_v54, 0.0 }
 0xd94   :  { %v2882_v38 = vpop.permute.xlu2 %2881  ;;  %v7954_v37 = vpop.xlane.xlu1 %2983 }
 0xd95   :  { %3079 = vrot.lane.b32.xlu1 %v7899_v5, %s7045_s1  ;;  %v2887_v33 = vsel %vm740_vm0, %v2882_v38, 0.0 }
 0xd98   :  { %2888 = vadd.xlane.f32.xlu0 %v2887_v33  ;;  %v7981_v33 = vperm.slane %v7889_v44, 2 }
 0xd9a   :  { %v7984_v47 = vadd.f32 %v2807_v32, %v7981_v33 }
 0xd9d   :  { %3145 = vrot.lane.b32.xlu1 %v7901_v28, %s7025_s25  ;;  %s8443_s25 = sld [smem:[#allocation57_spill]] }
 0xdac   :  { %v2986_v30 = vpop.permute.xlu1 %2985 }
 0xdad   :  { %v2991_v58 = vsel %vm740_vm0, %v2986_v30, 0.0 }
 0xdb4   :  { %v2936_v11 = vpop.permute.xlu1 %2935 }
 0xdb5   :  { %v2942_v25 = vsel %vm740_vm0, %v2936_v11, 0.0 }
 0xdbb   :  { %3037 = vadd.xlane.f32.xlu2 %v3036_v48  ;;  %v7987_v48 = vadd.f32 %v2812_v8, %v7981_v33 }
 0xdbc   :  { %v3132_v1 = vpop.permute.xlu1 %3131 }
 0xdbd   :  { %v7962_v31 = vpop.xlane.xlu0 %2835  ;;  %v3137_v63 = vsel %vm740_vm0, %v3132_v1, 0.0 }
 0xdc3   :  { %2992 = vadd.xlane.f32.xlu2 %v2991_v58 }
 0xdc4   :  { %v3196_v14 = vpop.permute.xlu1 %3195 }
 0xdc5   :  { %v3043_v20 = vpop.xlane.xlu0 %3042 }
 0xdc7   :  { %3045 = vadd.xlane.f32.xlu1 %v3044_v19 }
 0xdcb   :  { %2943 = vadd.xlane.f32.xlu2 %v2942_v25 }
 0xdcd   :  { %v7964_v55 = vpop.xlane.xlu2 %2832 }
 0xdcf   :  { %2940 = vadd.xlane.f32.xlu1 %v2939_v53 }
 0xdd3   :  { %3084 = vadd.xlane.f32.xlu2 %v3083_v49 }
 0xdd5   :  { %v2988_v7 = vpop.permute.xlu2 %2987 }
 0xdd6   :  { %v2994_v61 = vsel %vm740_vm0, %v2988_v7, 0.0 }
 0xdd7   :  { %2995 = vadd.xlane.f32.xlu0 %v2994_v61  ;;  %2891 = vadd.xlane.f32.xlu1 %v2890_v62  ;;  %v2838_v61 = vmax.f32 %v7950_v39, %v7962_v31  ;;  %v2837_v62 = vmax.f32 %v7910_v12, %v7964_v55 }
 0xdd8   :  { %v3094_v56 = vpop.permute.xlu0 %3093 }
 0xdd9   :  { %v3100_v10 = vsel %vm740_vm0, %v3094_v56, 0.0  ;;  %v2840_v1 = vsub.f32 %v7950_v39, %v2838_v61  ;;  %v2846_v56 = vsub.f32 %v7962_v31, %v2838_v61 }
 0xddb   :  { %3150 = vadd.xlane.f32.xlu2 %v3149_v0 }
 0xddd   :  { %v3092_v2 = vpop.permute.xlu2 %3091 }
 0xdde   :  { %v3097_v4 = vsel %vm740_vm0, %v3092_v2, 0.0 }
 0xddf   :  { %3138 = vadd.xlane.f32.xlu0 %v3137_v63  ;;  %3098 = vadd.xlane.f32.xlu1 %v3097_v4  ;;  %v2839_v63 = vsub.f32 %v7910_v12, %v2837_v62  ;;  %v5837_v4 = vld [vmem:[#allocation26 + $0x38] sm:$0xff] }
 0xde0   :  { %v3186_v52 = vpop.permute.xlu0 %3185  ;;  %3294 = vmatpush.bf16.msrb.mxu2 %v5837_v4  ;;  %v5832_v4 = vld [vmem:[#allocation26 + $0x10] sm:$0xff] }
 0xde1   :  { %v3192_v59 = vsel %vm740_vm0, %v3186_v52, 0.0 }
 0xde3   :  { %3101 = vadd.xlane.f32.xlu2 %v3100_v10  ;;  %v2845_v10 = vsub.f32 %v7964_v55, %v2837_v62 }
 0xde5   :  { %v3184_v5 = vpop.permute.xlu2 %3183  ;;  %v2847_v39 = vmul.f32 1.442695, %v2845_v10 }
 0xde6   :  { %v3189_v28 = vsel %vm740_vm0, %v3184_v5, 0.0 }
 0xde7   :  { %3190 = vadd.xlane.f32.xlu1 %v3189_v28  ;;  %v2843_v28 = vmul.f32 1.442695, %v2840_v1 }
 0xdeb   :  { %3193 = vadd.xlane.f32.xlu2 %v3192_v59  ;;  %v2841_v59 = vmul.f32 1.442695, %v2839_v63 }
 0xded   :  { %v3134_v16 = vpop.permute.xlu2 %3133 }
 0xdee   :  { %v3140_v46 = vsel %vm740_vm0, %v3134_v16, 0.0 }
 0xdef   :  { %v3035_v24 = vpop.xlane.xlu1 %3034  ;;  %3141 = vadd.xlane.f32.xlu1 %v3140_v46  ;;  %v5836_v46 = vld [vmem:[#allocation26 + $0x30] sm:$0xff] }
 0xdf0   :  { %v3047_v36 = vmax.f32 %v3035_v24, %v3043_v20  ;;  %3295 = vmatpush.bf16.msrb.mxu2 %v5836_v46 }
 0xdf2   :  { %v3049_v17 = vsub.f32 %v3035_v24, %v3047_v36  ;;  %v3055_v22 = vsub.f32 %v3043_v20, %v3047_v36  ;;  %v3201_v20 = vsel %vm740_vm0, %v3196_v14, 0.0  ;;  %v2849_v14 = vmul.f32 1.442695, %v2846_v56 }
 0xdf4   :  { %v3051_v21 = vmul.f32 1.442695, %v3049_v17  ;;  %v3057_v26 = vmul.f32 1.442695, %v3055_v22  ;;  %v5835_v22 = vld [vmem:[#allocation26 + $0x28] sm:$0xff] }
 0xdf5   :  { %v3198_v27 = vpop.permute.xlu2 %3197  ;;  %3296 = vmatpush.bf16.msrb.mxu2 %v5835_v22 }
 0xdf6   :  { %6204 = vpow2.f32 %v3051_v21  ;;  %v3204_v6 = vsel %vm740_vm0, %v3198_v27, 0.0 }
 0xdf7   :  { %6206 = vpow2.f32 %v3057_v26  ;;  %3205 = vadd.xlane.f32.xlu1 %v3204_v6 }
 0xdfc   :  { %v6205_v18 = vpop.eup %6204 }
 0xdfd   :  { %v6207_v3 = vpop.eup %6206 }
 0xdfe   :  { %v3061_v38 = vadd.f32 %v6207_v3, %v6205_v18 }
 0xe00   :  { %6208 = vrcp.f32 %v3061_v38 }
 0xe01   :  { %6210 = vpow2.f32 %v2843_v28 }
 0xe02   :  { %6212 = vpow2.f32 %v2849_v14 }
 0xe03   :  { %6214 = vpow2.f32 %v2841_v59 }
 0xe04   :  { %6216 = vpow2.f32 %v2847_v39 }
 0xe06   :  { %v6209_v45 = vpop.eup %6208 }
 0xe07   :  { %v3065_v30 = vmul.f32 %v6209_v45, %v6205_v18  ;;  %v3069_v58 = vmul.f32 %v6209_v45, %v6207_v3  ;;  %v3080_v54 = vpop.permute.xlu1 %3079  ;;  %v8009_v3 = vpop.eup %6210  ;;  %v5834_v45 = vld [vmem:[#allocation26 + $0x20] sm:$0xff] }
 0xe08   :  { %v3086_v19 = vsel %vm740_vm0, %v3080_v54, 0.0  ;;  %3297 = vmatpush.bf16.msrb.mxu2 %v5834_v45 }
 0xe09   :  { %v3067_v11 = vmul.f32 %v3065_v30, %v7984_v47  ;;  %3087 = vadd.xlane.f32.xlu0 %v3086_v19  ;;  %v3071_v25 = vmul.f32 %v3069_v58, %v7987_v48  ;;  %v8012_v30 = vpop.eup %6212 }
 0xe0a   :  { %v8014_v19 = vpop.eup %6214 }
 0xe0b   :  { %v7992_v44 = vadd.f32 %v3071_v25, %v3067_v11  ;;  %v2889_v0 = vpop.xlane.xlu0 %2888 }
 0xe0c   :  { %v2893_v2 = vmax.f32 %v7952_v43, %v2889_v0 }
 0xe0e   :  { %v2895_v52 = vsub.f32 %v7952_v43, %v2893_v2  ;;  %v2901_v31 = vsub.f32 %v2889_v0, %v2893_v2 }
 0xe0f   :  { %v3146_v53 = vpop.permute.xlu1 %3145 }
 0xe10   :  { %v3152_v49 = vsel %vm740_vm0, %v3146_v53, 0.0  ;;  %v2897_v12 = vmul.f32 1.442695, %v2895_v52  ;;  %v2903_v26 = vmul.f32 1.442695, %v2901_v31  ;;  %v8017_v53 = vpop.eup %6216 }
 0xe11   :  { %3153 = vadd.xlane.f32.xlu0 %v3152_v49  ;;  %v2851_v14 = vadd.f32 %v8017_v53, %v8014_v19 }
 0xe12   :  { %6218 = vpow2.f32 %v2897_v12  ;;  %v5831_v12 = vld [vmem:[#allocation26 + $0x8] sm:$0xff] }
 0xe18   :  { %v8020_v61 = vpop.eup %6218 }
 0xe19   :  { %3202 = vadd.xlane.f32.xlu0 %v3201_v20 }
 0xe2e   :  { %v3038_v7 = vpop.xlane.xlu2 %3037 }
 0xe36   :  { %v2993_v5 = vpop.xlane.xlu2 %2992 }
 0xe37   :  { %v2997_v16 = vmax.f32 %v7941_v35, %v2993_v5 }
 0xe39   :  { %v2999_v55 = vsub.f32 %v7941_v35, %v2997_v16  ;;  %v3005_v43 = vsub.f32 %v2993_v5, %v2997_v16 }
 0xe3a   :  { %v3046_v24 = vpop.xlane.xlu1 %3045 }
 0xe3b   :  { %v3048_v32 = vmax.f32 %v3038_v7, %v3046_v24  ;;  %v3001_v38 = vmul.f32 1.442695, %v2999_v55  ;;  %v3007_v58 = vmul.f32 1.442695, %v3005_v43 }
 0xe3d   :  { %v3050_v36 = vsub.f32 %v3038_v7, %v3048_v32  ;;  %v3056_v17 = vsub.f32 %v3046_v24, %v3048_v32  ;;  %v5833_v7 = vld [vmem:[#allocation26 + $0x18] sm:$0xff] }
 0xe3e   :  { %v2944_v21 = vpop.xlane.xlu2 %2943  ;;  %3298 = vmatpush.bf16.msrb.mxu2 %v5833_v7 }
 0xe3f   :  { %v3053_v27 = vmul.f32 1.442695, %v3050_v36  ;;  %v3059_v6 = vmul.f32 1.442695, %v3056_v17  ;;  %v2946_v18 = vmax.f32 %v7946_v15, %v2944_v21  ;;  %v2814_v36 = vpop.f32.mrf.mxu1 }
 0xe41   :  { %6220 = vpow2.f32 %v3053_v27  ;;  %v2948_v8 = vsub.f32 %v7946_v15, %v2946_v18  ;;  %v2954_v35 = vsub.f32 %v2944_v21, %v2946_v18 }
 0xe42   :  { %6222 = vpow2.f32 %v3059_v6  ;;  %v2941_v54 = vpop.xlane.xlu1 %2940  ;;  %3299 = vmatpush.bf16.msrb.mxu2 %v5832_v4  ;;  %v8042_v6 = vadd.f32 %v7978_v29, %v7981_v33 }
 0xe43   :  { %6224 = vpow2.f32 %v2903_v26  ;;  %v2951_v11 = vmul.f32 1.442695, %v2948_v8  ;;  %v2945_v25 = vmax.f32 %v7933_v23, %v2941_v54  ;;  %v2957_v49 = vmul.f32 1.442695, %v2954_v35  ;;  %v5830_v26 = vld [vmem:[#allocation26] sm:$0xff] }
 0xe44   :  { %6226 = vpow2.f32 %v3001_v38 }
 0xe45   :  { %v2947_v15 = vsub.f32 %v7933_v23, %v2945_v25  ;;  %v2953_v20 = vsub.f32 %v2941_v54, %v2945_v25  ;;  %6228 = vpow2.f32 %v3007_v58  ;;  %v2852_v23 = vadd.f32 %v8012_v30, %v8009_v3 }
 0xe46   :  { %6230 = vpow2.f32 %v2951_v11  ;;  %3300 = vmatpush.bf16.msrb.mxu2 %v5831_v12  ;;  %v3085_v12 = vpop.xlane.xlu2 %3084 }
 0xe47   :  { %v6221_v62 = vpop.eup %6220  ;;  %v2949_v0 = vmul.f32 1.442695, %v2947_v15  ;;  %v2955_v1 = vmul.f32 1.442695, %v2953_v20  ;;  %6232 = vpow2.f32 %v2957_v49 }
 0xe48   :  { %v6223_v56 = vpop.eup %6222 }
 0xe49   :  { %v8022_v2 = vpop.eup %6224  ;;  %v3062_v63 = vadd.f32 %v6223_v56, %v6221_v62  ;;  %6234 = vpow2.f32 %v2949_v0 }
 0xe4a   :  { %6236 = vpow2.f32 %v2955_v1  ;;  %v2892_v10 = vpop.xlane.xlu1 %2891  ;;  %v2996_v5 = vpop.xlane.xlu0 %2995  ;;  %v2907_v46 = vadd.f32 %v8022_v2, %v8020_v61  ;;  %3301 = vmatpush.bf16.msrb.mxu2 %v5830_v26 }
 0xe4b   :  { %v8026_v28 = vpop.eup %6226  ;;  %6238 = vrcp.f32 %v3062_v63  ;;  %v2894_v52 = vmax.f32 %v7937_v34, %v2892_v10  ;;  %v2998_v59 = vmax.f32 %v7954_v37, %v2996_v5 }
 0xe4c   :  { %v8032_v16 = vpop.eup %6228  ;;  %6240 = vrcp.f32 %v2852_v23 }
 0xe4d   :  { %v8036_v39 = vpop.eup %6230  ;;  %v2896_v24 = vsub.f32 %v7937_v34, %v2894_v52  ;;  %v2902_v31 = vsub.f32 %v2892_v10, %v2894_v52  ;;  %v3000_v32 = vsub.f32 %v7954_v37, %v2998_v59  ;;  %v3006_v17 = vsub.f32 %v2996_v5, %v2998_v59 }
 0xe4e   :  { %v6233_v55 = vpop.eup %6232  ;;  %6242 = vrcp.f32 %v2851_v14  ;;  %v8045_v37 = vadd.f32 %v2814_v36, %v7981_v33  ;;  %v3011_v29 = vadd.f32 %v8032_v16, %v8026_v28 }
 0xe4f   :  { %v6235_v22 = vpop.eup %6234  ;;  %v2899_v43 = vmul.f32 1.442695, %v2896_v24  ;;  %v2905_v21 = vmul.f32 1.442695, %v2902_v31  ;;  %6244 = vrcp.f32 %v2907_v46  ;;  %v3003_v34 = vmul.f32 1.442695, %v3000_v32 }
 0xe50   :  { %v6237_v27 = vpop.eup %6236  ;;  %v3009_v8 = vmul.f32 1.442695, %v3006_v17  ;;  %v2960_v58 = vadd.f32 %v6233_v55, %v8036_v39 }
 0xe51   :  { %v6239_v18 = vpop.eup %6238  ;;  %v2959_v38 = vadd.f32 %v6237_v27, %v6235_v22  ;;  %6246 = vpow2.f32 %v2899_v43 }
 0xe52   :  { %v3066_v35 = vmul.f32 %v6239_v18, %v6221_v62  ;;  %v3070_v45 = vmul.f32 %v6239_v18, %v6223_v56  ;;  %6248 = vpow2.f32 %v2905_v21  ;;  %v6241_v54 = vpop.eup %6240  ;;  %v8058_v46 = vpop.xlane.xlu1 %3098 }
 0xe53   :  { %6250 = vrcp.f32 %v2959_v38  ;;  %v2856_v31 = vmul.f32 %v6241_v54, %v8009_v3  ;;  %v2860_v32 = vmul.f32 %v6241_v54, %v8012_v30 }
 0xe54   :  { %v3072_v11 = vmul.f32 %v3070_v45, %v8045_v37  ;;  %6252 = vpow2.f32 %v3003_v34  ;;  %v3068_v33 = vmul.f32 %v3066_v35, %v8042_v6  ;;  %v6243_v25 = vpop.eup %6242 }
 0xe55   :  { %6254 = vpow2.f32 %v3009_v8  ;;  %v6245_v49 = vpop.eup %6244  ;;  %v2855_v63 = vmul.f32 %v6243_v25, %v8014_v19  ;;  %v2859_v5 = vmul.f32 %v6243_v25, %v8017_v53  ;;  %v2858_v26 = vmul.f32 %v2856_v31, %v8042_v6  ;;  %v3139_v31 = vpop.xlane.xlu0 %3138 }
 0xe56   :  { %6256 = vrcp.f32 %v2960_v58  ;;  %v8052_v15 = vadd.f32 %v3072_v11, %v3068_v33  ;;  %v2911_v4 = vmul.f32 %v6245_v49, %v8020_v61  ;;  %v2915_v23 = vmul.f32 %v6245_v49, %v8022_v2 }
 0xe57   :  { %v6247_v20 = vpop.eup %6246  ;;  %6258 = vrcp.f32 %v3011_v29  ;;  %v2857_v53 = vmul.f32 %v2855_v63, %v7984_v47  ;;  %v2861_v17 = vmul.f32 %v2859_v5, %v7987_v48  ;;  %v3151_v63 = vpop.xlane.xlu2 %3150 }
 0xe58   :  { %v6249_v7 = vpop.eup %6248  ;;  %v2913_v19 = vmul.f32 %v2911_v4, %v7984_v47  ;;  %v2917_v61 = vmul.f32 %v2915_v23, %v7987_v48 }
 0xe59   :  { %v6251_v62 = vpop.eup %6250  ;;  %v2908_v0 = vadd.f32 %v6249_v7, %v6247_v20  ;;  %v2863_v35 = vadd.f32 %v2861_v17, %v2857_v53 }
 0xe5a   :  { %v6253_v1 = vpop.eup %6252  ;;  %v2963_v14 = vmul.f32 %v6251_v62, %v6235_v22  ;;  %v2967_v52 = vmul.f32 %v6251_v62, %v6237_v27  ;;  %v2862_v27 = vmul.f32 %v2860_v32, %v8045_v37  ;;  %v8079_v49 = vpop.xlane.xlu1 %3190  ;;  %v3103_v32 = vmax.f32 %v3085_v12, %v8058_v46 }
 0xe5b   :  { %v6255_v56 = vpop.eup %6254  ;;  %6260 = vrcp.f32 %v2908_v0 }
 0xe5c   :  { %v6257_v10 = vpop.eup %6256  ;;  %v3012_v59 = vadd.f32 %v6255_v56, %v6253_v1  ;;  %v2965_v22 = vmul.f32 %v2963_v14, %v7984_v47  ;;  %v2969_v43 = vmul.f32 %v2967_v52, %v7987_v48  ;;  %v2864_v33 = vadd.f32 %v2862_v27, %v2858_v26 }
 0xe5d   :  { %v6259_v24 = vpop.eup %6258  ;;  %v2964_v2 = vmul.f32 %v6257_v10, %v8036_v39  ;;  %v2968_v36 = vmul.f32 %v6257_v10, %v6233_v55  ;;  %v2919_v55 = vadd.f32 %v2917_v61, %v2913_v19  ;;  %v3155_v19 = vmax.f32 %v3139_v31, %v3151_v63 }
 0xe5e   :  { %6262 = vrcp.f32 %v3012_v59  ;;  %v3015_v30 = vmul.f32 %v6259_v24, %v8026_v28  ;;  %v3019_v21 = vmul.f32 %v6259_v24, %v8032_v16  ;;  %v2971_v45 = vadd.f32 %v2969_v43, %v2965_v22 }
 0xe5f   :  { %v2966_v18 = vmul.f32 %v2964_v2, %v8042_v6  ;;  %v2970_v38 = vmul.f32 %v2968_v36, %v8045_v37  ;;  %v3025_v0 = vsel %vm740_vm0, %v2863_v35, %v2919_v55  ;;  %v3102_v24 = vpop.xlane.xlu2 %3101  ;;  %v3105_v61 = vsub.f32 %v3085_v12, %v3103_v32 }
 0xe60   :  { %v3017_v16 = vmul.f32 %v3015_v30, %v7984_v47  ;;  %v3021_v54 = vmul.f32 %v3019_v21, %v7987_v48  ;;  %v3027_v23 = vsel %vm1400_vm3, %v3025_v0, %v2971_v45  ;;  %v3111_v2 = vsub.f32 %v8058_v46, %v3103_v32 }
 0xe61   :  { %v6261_v3 = vpop.eup %6260  ;;  %v3157_v36 = vsub.f32 %v3139_v31, %v3155_v19  ;;  %v3107_v17 = vmul.f32 1.442695, %v3105_v61  ;;  %v3163_v22 = vsub.f32 %v3151_v63, %v3155_v19 }
 0xe62   :  { %v2912_v34 = vmul.f32 %v6261_v3, %v6247_v20  ;;  %v2916_v39 = vmul.f32 %v6261_v3, %v6249_v7  ;;  %v2972_v20 = vadd.f32 %v2970_v38, %v2966_v18  ;;  %v3023_v10 = vadd.f32 %v3021_v54, %v3017_v16  ;;  %v3142_v59 = vpop.xlane.xlu1 %3141 }
 0xe63   :  { %v3113_v30 = vmul.f32 1.442695, %v3111_v2  ;;  %v3159_v27 = vmul.f32 1.442695, %v3157_v36  ;;  %6264 = vpow2.f32 %v3107_v17  ;;  %v3165_v55 = vmul.f32 1.442695, %v3163_v22 }
 0xe64   :  { %v6263_v8 = vpop.eup %6262  ;;  %v2914_v58 = vmul.f32 %v2912_v34, %v8042_v6  ;;  %v2918_v28 = vmul.f32 %v2916_v39, %v8045_v37 }
 0xe65   :  { %v3016_v29 = vmul.f32 %v6263_v8, %v6253_v1  ;;  %v3020_v11 = vmul.f32 %v6263_v8, %v6255_v56  ;;  %v3029_v56 = vsel %vm1405_vm4, %v3027_v23, %v3023_v10  ;;  %6266 = vpow2.f32 %v3113_v30 }
 0xe66   :  { %v2920_v25 = vadd.f32 %v2918_v28, %v2914_v58  ;;  %6268 = vpow2.f32 %v3159_v27 }
 0xe67   :  { %v3018_v7 = vmul.f32 %v3016_v29, %v8042_v6  ;;  %v3022_v62 = vmul.f32 %v3020_v11, %v8045_v37  ;;  %v3194_v43 = vpop.xlane.xlu2 %3193 }
 0xe68   :  { %v3026_v4 = vsel %vm740_vm0, %v2864_v33, %v2920_v25 }
 0xe69   :  { %v3024_v5 = vadd.f32 %v3022_v62, %v3018_v7  ;;  %v3028_v1 = vsel %vm1400_vm3, %v3026_v4, %v2972_v20  ;;  %v6265_v58 = vpop.eup %6264 }
 0xe6a   :  { %v3206_v53 = vpop.xlane.xlu1 %3205 }
 0xe6b   :  { %v3030_v14 = vsel %vm1405_vm4, %v3028_v1, %v3024_v5  ;;  %v3208_v21 = vmax.f32 %v3194_v43, %v3206_v53  ;;  %v6267_v16 = vpop.eup %6266 }
 0xe6c   :  { %v3241_v52 = vpack.c.bf16 %v3030_v14, %v3029_v56  ;;  %v6269_v11 = vpop.eup %6268  ;;  %v3117_v0 = vadd.f32 %v6267_v16, %v6265_v58 }
 0xe6d   :  { %v3210_v18 = vsub.f32 %v3194_v43, %v3208_v21  ;;  %v3216_v46 = vsub.f32 %v3206_v53, %v3208_v21 }
 0xe6e   :  { %3302 = vmatmul.bf16.vlgmr.msrb.gmra.mxu2 %v3241_v52 }
 0xe6f   :  { %v3213_v35 = vmul.f32 1.442695, %v3210_v18  ;;  %v3219_v28 = vmul.f32 1.442695, %v3216_v46 }
 0xe7c   :  { %v3088_v3 = vpop.xlane.xlu0 %3087 }
 0xe7d   :  { %v3104_v26 = vmax.f32 %v3088_v3, %v3102_v24 }
 0xe7f   :  { %v3106_v34 = vsub.f32 %v3088_v3, %v3104_v26  ;;  %v3112_v39 = vsub.f32 %v3102_v24, %v3104_v26 }
 0xe81   :  { %v3109_v38 = vmul.f32 1.442695, %v3106_v34  ;;  %v3115_v12 = vmul.f32 1.442695, %v3112_v39 }
 0xe83   :  { %6270 = vpow2.f32 %v3109_v38 }
 0xe84   :  { %6272 = vpow2.f32 %v3115_v12  ;;  %v3154_v8 = vpop.xlane.xlu0 %3153 }
 0xe85   :  { %6274 = vpow2.f32 %v3165_v55  ;;  %v3156_v45 = vmax.f32 %v3142_v59, %v3154_v8 }
 0xe86   :  { %6276 = vpow2.f32 %v3213_v35 }
 0xe87   :  { %v3158_v54 = vsub.f32 %v3142_v59, %v3156_v45  ;;  %v3164_v29 = vsub.f32 %v3154_v8, %v3156_v45  ;;  %6278 = vpow2.f32 %v3219_v28 }
 0xe89   :  { %v6271_v33 = vpop.eup %6270  ;;  %v3161_v25 = vmul.f32 1.442695, %v3158_v54  ;;  %v3167_v20 = vmul.f32 1.442695, %v3164_v29 }
 0xe8a   :  { %v6273_v7 = vpop.eup %6272 }
 0xe8b   :  { %v6275_v62 = vpop.eup %6274  ;;  %6280 = vpow2.f32 %v3161_v25  ;;  %v3118_v4 = vadd.f32 %v6273_v7, %v6271_v33 }
 0xe8c   :  { %6282 = vpow2.f32 %v3167_v20  ;;  %v3203_v63 = vpop.xlane.xlu0 %3202  ;;  %v3169_v10 = vadd.f32 %v6275_v62, %v6269_v11  ;;  %v6277_v5 = vpop.eup %6276 }
 0xe8d   :  { %v3207_v23 = vmax.f32 %v8079_v49, %v3203_v63  ;;  %v6279_v14 = vpop.eup %6278  ;;  %6284 = vrcp.f32 %v3117_v0 }
 0xe8e   :  { %6286 = vrcp.f32 %v3118_v4  ;;  %v3222_v32 = vadd.f32 %v6279_v14, %v6277_v5 }
 0xe8f   :  { %v3209_v1 = vsub.f32 %v8079_v49, %v3207_v23  ;;  %v3215_v56 = vsub.f32 %v3203_v63, %v3207_v23  ;;  %6288 = vrcp.f32 %v3169_v10 }
 0xe91   :  { %v6281_v52 = vpop.eup %6280  ;;  %v3211_v59 = vmul.f32 1.442695, %v3209_v1  ;;  %v3217_v24 = vmul.f32 1.442695, %v3215_v56 }
 0xe92   :  { %v6283_v31 = vpop.eup %6282 }
 0xe93   :  { %v3170_v19 = vadd.f32 %v6283_v31, %v6281_v52  ;;  %6290 = vpow2.f32 %v3211_v59  ;;  %v6285_v61 = vpop.eup %6284 }
 0xe94   :  { %6292 = vpow2.f32 %v3217_v24  ;;  %v6287_v2 = vpop.eup %6286  ;;  %v3121_v17 = vmul.f32 %v6285_v61, %v6265_v58  ;;  %v3125_v22 = vmul.f32 %v6285_v61, %v6267_v16 }
 0xe95   :  { %6294 = vrcp.f32 %v3170_v19  ;;  %v6289_v36 = vpop.eup %6288  ;;  %v3122_v43 = vmul.f32 %v6287_v2, %v6271_v33  ;;  %v3126_v3 = vmul.f32 %v6287_v2, %v6273_v7 }
 0xe96   :  { %6296 = vrcp.f32 %v3222_v32  ;;  %v3173_v39 = vmul.f32 %v6289_v36, %v6269_v11  ;;  %v3177_v55 = vmul.f32 %v6289_v36, %v6275_v62  ;;  %v3127_v18 = vmul.f32 %v3125_v22, %v7987_v48 }
 0xe97   :  { %v3124_v38 = vmul.f32 %v3122_v43, %v8042_v6  ;;  %v3123_v12 = vmul.f32 %v3121_v17, %v7984_v47  ;;  %v3128_v46 = vmul.f32 %v3126_v3, %v8045_v37 }
 0xe98   :  { %v3175_v28 = vmul.f32 %v3173_v39, %v7984_v47  ;;  %v3179_v16 = vmul.f32 %v3177_v55, %v7987_v48 }
 0xe99   :  { %v6291_v53 = vpop.eup %6290  ;;  %v3129_v54 = vadd.f32 %v3127_v18, %v3123_v12  ;;  %v3130_v29 = vadd.f32 %v3128_v46, %v3124_v38  ;;  %v5416_v18 = vld [vmem:[#allocation28 + $0x70] sm:$0xf]  ;;  %v5853_v38 = vld [vmem:[#allocation28 + $0x74] sm:$0xf0]  ;;  %v5852_v12 = vld [vmem:[#allocation28 + $0x74] sm:$0xf] }
 0xe9a   :  { %v6293_v49 = vpop.eup %6292  ;;  %v3181_v0 = vadd.f32 %v3179_v16, %v3175_v28  ;;  %v5417_v46 = vor.u32 %v5853_v38, %v5416_v18  ;;  %v5850_v28 = vld [vmem:[#allocation28 + $0x64] sm:$0xf] }
 0xe9b   :  { %v6295_v30 = vpop.eup %6294  ;;  %v3221_v21 = vadd.f32 %v6293_v49, %v6291_v53  ;;  %v3235_v23 = vsel %vm740_vm0, %v7992_v44, %v3129_v54  ;;  %v3236_v10 = vsel %vm740_vm0, %v8052_v15, %v3130_v29  ;;  %v5410_v54 = vld [vmem:[#allocation28 + $0x68] sm:$0xf0] }
 0xe9c   :  { %v3174_v26 = vmul.f32 %v6295_v30, %v6281_v52  ;;  %v3178_v27 = vmul.f32 %v6295_v30, %v6283_v31  ;;  %v6297_v34 = vpop.eup %6296  ;;  %3539 = vmatpush.bf16.msrb.mxu3 %v5417_v46  ;;  %v5413_v29 = vor.u32 %v5850_v28, %v5410_v54 }
 0xe9d   :  { %6298 = vrcp.f32 %v3221_v21  ;;  %v3230_v45 = vmul.f32 %v6297_v34, %v6279_v14  ;;  %v3226_v58 = vmul.f32 %v6297_v34, %v6277_v5  ;;  %v3237_v14 = vsel %vm1400_vm3, %v3235_v23, %v3181_v0  ;;  %v5392_v0 = vld [vmem:[#allocation28 + $0x40] sm:$0xf] }
 0xe9e   :  { %v3176_v8 = vmul.f32 %v3174_v26, %v8042_v6  ;;  %v3180_v35 = vmul.f32 %v3178_v27, %v8045_v37 }
 0xe9f   :  { %v3228_v7 = vmul.f32 %v3226_v58, %v8042_v6  ;;  %v3232_v62 = vmul.f32 %v3230_v45, %v8045_v37  ;;  %v5408_v45 = vld [vmem:[#allocation28 + $0x60] sm:$0xf]  ;;  %v5851_v58 = vld [vmem:[#allocation28 + $0x64] sm:$0xf0] }
 0xea0   :  { %v3182_v33 = vadd.f32 %v3180_v35, %v3176_v8  ;;  %v5418_v8 = vld [vmem:[#allocation28 + $0x78] sm:$0xf0]  ;;  %v5409_v16 = vor.u32 %v5851_v58, %v5408_v45 }
 0xea1   :  { %v3234_v56 = vadd.f32 %v3232_v62, %v3228_v7  ;;  %v5421_v35 = vor.u32 %v5852_v12, %v5418_v8  ;;  %v5402_v7 = vld [vmem:[#allocation28 + $0x58] sm:$0xf0] }
 0xea2   :  { %v3238_v5 = vsel %vm1400_vm3, %v3236_v10, %v3182_v33  ;;  %3540 = vmatpush.bf16.msrb.mxu3 %v5409_v16  ;;  %v5849_v33 = vld [vmem:[#allocation28 + $0x54] sm:$0xf0]  ;;  %v5394_v10 = vld [vmem:[#allocation28 + $0x48] sm:$0xf0] }
 0xea3   :  { %v6299_v11 = vpop.eup %6298  ;;  %v3240_v37 = vsel %vm1405_vm4, %v3238_v5, %v3234_v56  ;;  %3558 = vmatpush.bf16.msrb.mxu0 %v5421_v35  ;;  %v5845_v56 = vld [vmem:[#allocation28 + $0x34] sm:$0xf0] }
 0xea4   :  { %v3229_v25 = vmul.f32 %v6299_v11, %v6293_v49  ;;  %v3225_v20 = vmul.f32 %v6299_v11, %v6291_v53  ;;  %v5400_v11 = vld [vmem:[#allocation28 + $0x50] sm:$0xf] }
 0xea6   :  { %v3227_v63 = vmul.f32 %v3225_v20, %v7984_v47  ;;  %v3231_v4 = vmul.f32 %v3229_v25, %v7987_v48  ;;  %v6038_v47 = vld [vmem:[%s8443_s25] ss:$0 sm:$0xff]  ;;  %v5848_v25 = vld [vmem:[#allocation28 + $0x54] sm:$0xf]  ;;  %v5401_v20 = vor.u32 %v5849_v33, %v5400_v11 }
 0xea7   :  { %3559 = vmatpush.bf16.msrb.mxu0 %v5413_v29  ;;  %v5405_v62 = vor.u32 %v5848_v25, %v5402_v7 }
 0xea8   :  { %v3233_v1 = vadd.f32 %v3231_v4, %v3227_v63  ;;  %3541 = vmatpush.bf16.msrb.mxu3 %v5401_v20  ;;  %v5847_v63 = vld [vmem:[#allocation28 + $0x44] sm:$0xf0]  ;;  %v5846_v4 = vld [vmem:[#allocation28 + $0x44] sm:$0xf]  ;;  %v6039_v20 = vld [vmem:[%s8444_s26] ss:$0 sm:$0xff] }
 0xea9   :  { %v5393_v23 = vor.u32 %v5847_v63, %v5392_v0  ;;  %v5397_v5 = vor.u32 %v5846_v4, %v5394_v10  ;;  %v6040_v63 = vld [vmem:[%s8445_s0] ss:$0 sm:$0xff] }
 0xeaa   :  { %v3239_v6 = vsel %vm1405_vm4, %v3237_v14, %v3233_v1  ;;  %v5384_v1 = vld [vmem:[#allocation28 + $0x30] sm:$0xf]  ;;  %v5844_v14 = vld [vmem:[#allocation28 + $0x34] sm:$0xf] }
 0xeab   :  { %v3242_v52 = vpack.c.bf16 %v3240_v37, %v3239_v6  ;;  %3560 = vmatpush.bf16.msrb.mxu0 %v5405_v62  ;;  %v5385_v6 = vor.u32 %v5845_v56, %v5384_v1  ;;  %v5386_v37 = vld [vmem:[#allocation28 + $0x38] sm:$0xf0] }
 0xeac   :  { %3542 = vmatpush.bf16.msrb.mxu3 %v5393_v23 }
 0xead   :  { %3307 = vmatmul.bf16.gmra.mxu2 %v3242_v52  ;;  %v5389_v52 = vor.u32 %v5844_v14, %v5386_v37 }
 0xeaf   :  { %3561 = vmatpush.bf16.msrb.mxu0 %v5397_v5 }
 0xeb0   :  { %3543 = vmatpush.bf16.msrb.mxu3 %v5385_v6 }
 0xeb3   :  { %3562 = vmatpush.bf16.msrb.mxu0 %v5389_v52 }
 0xef1   :  { %v3303_v48 = vpop.f32.mrf.mxu2 }
 0xef2   :  { %v3304_v59 = vadd.f32 %v6038_v47, %v3303_v48 }
 0xef4   :  { %v8115_v44 = vadd.f32 %v3304_v59, %v7839_v50  ;;  %v5376_v59 = vld [vmem:[#allocation28 + $0x20] sm:$0xf] }
 0xef6   :  { %3358 = vadd.xlane.f32.xlu2 %v8115_v44 }
 0xef9   :  { %v3305_v15 = vpop.f32.mrf.mxu2 }
 0xefa   :  { %v3306_v24 = vadd.f32 %v6038_v47, %v3305_v15  ;;  %v5843_v15 = vld [vmem:[#allocation28 + $0x24] sm:$0xf0] }
 0xefc   :  { %v8119_v31 = vadd.f32 %v3306_v24, %v7843_v9  ;;  %v5842_v24 = vld [vmem:[#allocation28 + $0x24] sm:$0xf] }
 0xefe   :  { %3360 = vadd.xlane.f32.xlu0 %v8119_v31 }
 0xf30   :  { %v3308_v32 = vpop.f32.mrf.mxu2 }
 0xf31   :  { %v3309_v19 = vadd.f32 %v6038_v47, %v3308_v32  ;;  %v5377_v32 = vor.u32 %v5843_v15, %v5376_v59 }
 0xf33   :  { %v8123_v61 = vadd.f32 %v3309_v19, %v7847_v13  ;;  %v5378_v19 = vld [vmem:[#allocation28 + $0x28] sm:$0xf0]  ;;  %3544 = vmatpush.bf16.msrb.mxu3 %v5377_v32 }
 0xf35   :  { %3362 = vadd.xlane.f32.xlu1 %v8123_v61 }
 0xf38   :  { %v3310_v2 = vpop.f32.mrf.mxu2 }
 0xf39   :  { %v3311_v36 = vadd.f32 %v6038_v47, %v3310_v2 }
 0xf3b   :  { %v8127_v50 = vadd.f32 %v3311_v36, %v7851_v40  ;;  %v5381_v36 = vor.u32 %v5842_v24, %v5378_v19 }
 0xf3d   :  { %3364 = vadd.xlane.f32.xlu2 %v8127_v50  ;;  %3563 = vmatpush.bf16.msrb.mxu0 %v5381_v36 }
 0xf69   :  { %v3359_v53 = vpop.xlane.xlu2 %3358 }
 0xf6a   :  { %v3366_v9 = vmul.f32 %v3359_v53, %v7632_v57  ;;  %v5368_v53 = vld [vmem:[#allocation28 + $0x10] sm:$0xf] }
 0xf6c   :  { %v8132_v49 = vsub.f32 %v8115_v44, %v3366_v9  ;;  %v5841_v9 = vld [vmem:[#allocation28 + $0x14] sm:$0xf0] }
 0xf6e   :  { %v3374_v17 = vmul.f32 %v8132_v49, %v8132_v49 }
 0xf70   :  { %3378 = vadd.xlane.f32.xlu0 %v3374_v17  ;;  %v5369_v17 = vor.u32 %v5841_v9, %v5368_v53 }
 0xf71   :  { %v3361_v13 = vpop.xlane.xlu0 %3360 }
 0xf72   :  { %v3367_v22 = vmul.f32 %v3361_v13, %v7632_v57  ;;  %v5840_v13 = vld [vmem:[#allocation28 + $0x14] sm:$0xf]  ;;  %3545 = vmatpush.bf16.msrb.mxu3 %v5369_v17 }
 0xf74   :  { %v8138_v43 = vsub.f32 %v8119_v31, %v3367_v22  ;;  %v5370_v22 = vld [vmem:[#allocation28 + $0x18] sm:$0xf0] }
 0xf76   :  { %v3375_v40 = vmul.f32 %v8138_v43, %v8138_v43 }
 0xf78   :  { %3380 = vadd.xlane.f32.xlu1 %v3375_v40  ;;  %v5373_v40 = vor.u32 %v5840_v13, %v5370_v22 }
 0xf7a   :  { %3564 = vmatpush.bf16.msrb.mxu0 %v5373_v40 }
 0xfa8   :  { %v3363_v3 = vpop.xlane.xlu1 %3362 }
 0xfa9   :  { %v3368_v30 = vmul.f32 %v3363_v3, %v7632_v57  ;;  %v5360_v3 = vld [vmem:[#allocation28] sm:$0xf] }
 0xfab   :  { %v8144_v21 = vsub.f32 %v8123_v61, %v3368_v30  ;;  %v5839_v30 = vld [vmem:[#allocation28 + $0x4] sm:$0xf0] }
 0xfad   :  { %v3376_v26 = vmul.f32 %v8144_v21, %v8144_v21 }
 0xfaf   :  { %3382 = vadd.xlane.f32.xlu2 %v3376_v26  ;;  %v5838_v26 = vld [vmem:[#allocation28 + $0x4] sm:$0xf] }
 0xfb0   :  { %v3365_v27 = vpop.xlane.xlu2 %3364 }
 0xfb1   :  { %v3369_v34 = vmul.f32 %v3365_v27, %v7632_v57  ;;  %v5362_v27 = vld [vmem:[#allocation28 + $0x8] sm:$0xf0] }
 0xfb2   :  { %v5365_v38 = vor.u32 %v5838_v26, %v5362_v27 }
 0xfb3   :  { %v8150_v39 = vsub.f32 %v8127_v50, %v3369_v34 }
 0xfb4   :  { %3565 = vmatpush.bf16.msrb.mxu0 %v5365_v38 }
 0xfb5   :  { %v3377_v55 = vmul.f32 %v8150_v39, %v8150_v39 }
 0xfb7   :  { %3384 = vadd.xlane.f32.xlu0 %v3377_v55  ;;  %v5361_v55 = vor.u32 %v5839_v30, %v5360_v3 }
 0xfb9   :  { %3546 = vmatpush.bf16.msrb.mxu3 %v5361_v55 }
 0xfe3   :  { %v3379_v47 = vpop.xlane.xlu0 %3378 }
 0xfe4   :  { %v3386_v48 = vmul.f32 %v3379_v47, %v7632_v57 }
 0xfe6   :  { %v3390_v2 = vadd.f32 1e-05, %v3386_v48 }
 0xfe8   :  { %6300 = vrsqrt.f32 %v3390_v2  ;;  %vm3400_vm3 = vweird.f32 %v3390_v2 }
 0xfeb   :  { %v3381_v34 = vpop.xlane.xlu1 %3380 }
 0xfec   :  { %v3387_v18 = vmul.f32 %v3381_v34, %v7632_v57 }
 0xfee   :  { %v6301_v12 = vpop.eup %6300  ;;  %v3391_v46 = vadd.f32 1e-05, %v3387_v18  ;;  %v3335_v18 = vld [vmem:[%s8446_s13] sm:$0x3] }
 0xfef   :  { %v3395_v8 = vmul.f32 %v6301_v12, %v3390_v2  ;;  %vm3401_vm0 = vweird.f32 %v6301_v12 }
 0xff0   :  { %6302 = vrsqrt.f32 %v3391_v46  ;;  %vm3402_vm4 = vmor %vm3400_vm3, %vm3401_vm0  ;;  %vm3410_vm7 = vweird.f32 %v3391_v46 }
 0xff1   :  { %v3396_v35 = vmul.f32 %v6301_v12, %v3395_v8 }
 0xff3   :  { %v3397_v45 = vmul.f32 0.5, %v3396_v35 }
 0xff5   :  { %v3398_v58 = vsub.f32 1.5, %v3397_v45 }
 0xff6   :  { %v6303_v28 = vpop.eup %6302 }
 0xff7   :  { %v3399_v16 = vmul.f32 %v6301_v12, %v3398_v58  ;;  %v3405_v54 = vmul.f32 %v6303_v28, %v3391_v46  ;;  %vm3411_vm6 = vweird.f32 %v6303_v28 }
 0xff8   :  { %vm3412_vm8 = vmor %vm3410_vm7, %vm3411_vm6 }
 0xff9   :  { %v3406_v29 = vmul.f32 %v6303_v28, %v3405_v54  ;;  %v3403_v11 = vsel %vm3402_vm4, %v6301_v12, %v3399_v16 }
 0xffa   :  { %v3434_v7 = vmul.f32 %v3403_v11, %v8132_v49 }
 0xffb   :  { %v3407_v33 = vmul.f32 0.5, %v3406_v29 }
 0xffc   :  { %v3441_v4 = vmul.f32 %v6039_v20, %v3434_v7 }
 0xffd   :  { %v3408_v25 = vsub.f32 1.5, %v3407_v33 }
 0xffe   :  { %v3448_v5 = vadd.f32 %v6040_v63, %v3441_v4 }
 0xfff   :  { %v3409_v62 = vmul.f32 %v6303_v28, %v3408_v25 }
0x1001   :  { %v3413_v0 = vsel %vm3412_vm8, %v6303_v28, %v3409_v62 }
0x1002   :  { %v3435_v23 = vmul.f32 %v3413_v0, %v8138_v43 }
0x1004   :  { %v3442_v10 = vmul.f32 %v6039_v20, %v3435_v23 }
0x1006   :  { %v3449_v1 = vadd.f32 %v6040_v63, %v3442_v10 }
0x1008   :  { %v3452_v56 = vpack.c.bf16 %v3449_v1, %v3448_v5 }
0x100a   :  { %3547 = vmatmul.bf16.vlgmr.msrb.gmra.mxu3 %v3452_v56  ;;  %3566 = vmatmul.bf16.vlgmr.msrb.gmra.mxu0 %v3452_v56 }
0x1022   :  { %v3383_v14 = vpop.xlane.xlu2 %3382 }
0x1023   :  { %v3388_v6 = vmul.f32 %v3383_v14, %v7632_v57 }
0x1025   :  { %v3392_v37 = vadd.f32 1e-05, %v3388_v6 }
0x1027   :  { %6304 = vrsqrt.f32 %v3392_v37  ;;  %vm3420_vm10 = vweird.f32 %v3392_v37 }
0x102a   :  { %v3385_v49 = vpop.xlane.xlu0 %3384 }
0x102b   :  { %v3389_v52 = vmul.f32 %v3385_v49, %v7632_v57 }
0x102d   :  { %v6305_v47 = vpop.eup %6304  ;;  %v3393_v48 = vadd.f32 1e-05, %v3389_v52  ;;  %v3455_v52 = vperm.slane %v3335_v18, 0 }
0x102e   :  { %v3415_v59 = vmul.f32 %v6305_v47, %v3392_v37  ;;  %vm3421_vm9 = vweird.f32 %v6305_v47 }
0x102f   :  { %6306 = vrsqrt.f32 %v3393_v48  ;;  %vm3422_vm11 = vmor %vm3420_vm10, %vm3421_vm9  ;;  %vm3430_vm13 = vweird.f32 %v3393_v48 }
0x1030   :  { %v3416_v15 = vmul.f32 %v6305_v47, %v3415_v59  ;;  %v5861_v59 = vld [vmem:[#allocation31 + $0x38] sm:$0xff] }
0x1031   :  { %3746 = vmatpush.bf16.msra.mxu1 %v5861_v59  ;;  %v5855_v59 = vld [vmem:[#allocation31 + $0x8] sm:$0xff] }
0x1032   :  { %v3417_v43 = vmul.f32 0.5, %v3416_v15 }
0x1034   :  { %v3418_v24 = vsub.f32 1.5, %v3417_v43 }
0x1035   :  { %v6307_v32 = vpop.eup %6306 }
0x1036   :  { %v3419_v19 = vmul.f32 %v6305_v47, %v3418_v24  ;;  %v3425_v2 = vmul.f32 %v6307_v32, %v3393_v48  ;;  %vm3431_vm12 = vweird.f32 %v6307_v32 }
0x1037   :  { %vm3432_vm14 = vmor %vm3430_vm13, %vm3431_vm12 }
0x1038   :  { %v3423_v36 = vsel %vm3422_vm11, %v6305_v47, %v3419_v19  ;;  %v3426_v53 = vmul.f32 %v6307_v32, %v3425_v2  ;;  %v3336_v47 = vld [vmem:[#allocation29 + $0x8] sm:$0xff]  ;;  %v3337_v19 = vld [vmem:[#allocation29 + $0x10] sm:$0xff] }
0x1039   :  { %v3436_v9 = vmul.f32 %v3423_v36, %v8144_v21  ;;  %v3456_v21 = vperm.slane %v3335_v18, 1  ;;  %v5860_v2 = vld [vmem:[#allocation31 + $0x30] sm:$0xff] }
0x103a   :  { %v3427_v17 = vmul.f32 0.5, %v3426_v53  ;;  %v3617_v53 = vperm.slane %v3336_v47, 7  ;;  %3747 = vmatpush.bf16.msra.mxu1 %v5860_v2 }
0x103b   :  { %v3443_v13 = vmul.f32 %v6039_v20, %v3436_v9 }
0x103c   :  { %v3428_v22 = vsub.f32 1.5, %v3427_v17 }
0x103d   :  { %v3450_v40 = vadd.f32 %v6040_v63, %v3443_v13  ;;  %v3630_v13 = vperm.slane %v3336_v47, 6 }
0x103e   :  { %v3429_v3 = vmul.f32 %v6307_v32, %v3428_v22 }
0x1040   :  { %v3433_v30 = vsel %vm3432_vm14, %v6307_v32, %v3429_v3 }
0x1041   :  { %v3437_v26 = vmul.f32 %v3433_v30, %v8150_v39  ;;  %v3620_v30 = vperm.slane %v3337_v19, 0 }
0x1043   :  { %v3444_v27 = vmul.f32 %v6039_v20, %v3437_v26 }
0x1045   :  { %v3451_v34 = vadd.f32 %v6040_v63, %v3444_v27  ;;  %v5859_v27 = vld [vmem:[#allocation31 + $0x28] sm:$0xff] }
0x1046   :  { %3748 = vmatpush.bf16.msra.mxu1 %v5859_v27 }
0x1047   :  { %v3453_v55 = vpack.c.bf16 %v3451_v34, %v3450_v40 }
0x1049   :  { %3552 = vmatmul.bf16.gmra.mxu3 %v3453_v55  ;;  %3571 = vmatmul.bf16.gmra.mxu0 %v3453_v55 }
0x1087   :  { %v3567_v38 = vpop.f32.mrf.mxu0 }
0x1088   :  { %v3568_v12 = vadd.f32 %v3567_v38, %v3456_v21 }
0x108a   :  { %v3577_v46 = vand.u32 2147483647, %v3568_v12  ;;  %vm3601_vm15 = vcmp.ge.f32.partialorder %v3568_v12, 0.0  ;;  %v6041_v12 = vld [vmem:[%s8447_s6] ss:$0 sm:$0xff] }
0x108c   :  { %v3581_v35 = vsub.f32 0.0, %v3577_v46 }
0x108d   :  { %v3548_v33 = vpop.f32.mrf.mxu3 }
0x108e   :  { %v3585_v58 = vmul.f32 1.442695, %v3581_v35  ;;  %v3549_v32 = vadd.f32 %v3548_v33, %v3455_v52 }
0x108f   :  { %v3569_v8 = vpop.f32.mrf.mxu0 }
0x1090   :  { %v8165_v45 = vadd.f32 %v3569_v8, %v3456_v21  ;;  %6308 = vpow2.f32 %v3585_v58  ;;  %v5858_v58 = vld [vmem:[#allocation31 + $0x20] sm:$0xff] }
0x1091   :  { %3749 = vmatpush.bf16.msra.mxu1 %v5858_v58 }
0x1092   :  { %v3578_v28 = vand.u32 2147483647, %v8165_v45  ;;  %vm3602_vm2 = vcmp.ge.f32.partialorder %v8165_v45, 0.0 }
0x1094   :  { %v3582_v16 = vsub.f32 0.0, %v3578_v28 }
0x1095   :  { %v3550_v5 = vpop.f32.mrf.mxu3 }
0x1096   :  { %v3587_v39 = vmul.f32 1.442695, %v3582_v16  ;;  %v6309_v29 = vpop.eup %6308  ;;  %v3551_v8 = vadd.f32 %v3550_v5, %v3455_v52 }
0x1097   :  { %v3593_v20 = vadd.f32 1.0, %v6309_v29 }
0x1098   :  { %6310 = vpow2.f32 %v3587_v39 }
0x1099   :  { %6312 = vrcp.f32 %v3593_v20 }
0x109e   :  { %v6311_v63 = vpop.eup %6310 }
0x109f   :  { %v3594_v10 = vadd.f32 1.0, %v6311_v63  ;;  %v6313_v56 = vpop.eup %6312 }
0x10a0   :  { %v3605_v49 = vmul.f32 %v6313_v56, %v6309_v29 }
0x10a2   :  { %v3609_v43 = vsel %vm3601_vm15, %v6313_v56, %v3605_v49 }
0x10a3   :  { %v3613_v17 = vmul.f32 %v3609_v43, %v3549_v32 }
0x10a5   :  { %v3618_v55 = vmul.f32 %v3617_v53, %v3613_v17  ;;  %v3631_v18 = vmul.f32 %v3630_v13, %v3613_v17 }
0x10c6   :  { %v3572_v54 = vpop.f32.mrf.mxu0 }
0x10c7   :  { %v3573_v11 = vadd.f32 %v3572_v54, %v3456_v21  ;;  %v6042_v54 = vld [vmem:[%s8448_s23] ss:$0 sm:$0xff] }
0x10c9   :  { %v3579_v25 = vand.u32 2147483647, %v3573_v11  ;;  %vm3603_vm1 = vcmp.ge.f32.partialorder %v3573_v11, 0.0 }
0x10cb   :  { %v3583_v7 = vsub.f32 0.0, %v3579_v25  ;;  %v6043_v25 = vld [vmem:[%s8449_s24] ss:$0 sm:$0xff] }
0x10cc   :  { %v3553_v48 = vpop.f32.mrf.mxu3 }
0x10cd   :  { %v3589_v62 = vmul.f32 1.442695, %v3583_v7  ;;  %v3554_v3 = vadd.f32 %v3553_v48, %v3455_v52  ;;  %v5857_v7 = vld [vmem:[#allocation31 + $0x18] sm:$0xff] }
0x10ce   :  { %v3574_v0 = vpop.f32.mrf.mxu0  ;;  %3750 = vmatpush.bf16.msra.mxu1 %v5857_v7 }
0x10cf   :  { %6314 = vpow2.f32 %v3589_v62  ;;  %v8168_v4 = vadd.f32 %v3574_v0, %v3456_v21 }
0x10d0   :  { %6316 = vrcp.f32 %v3594_v10 }
0x10d1   :  { %v3580_v23 = vand.u32 2147483647, %v8168_v4  ;;  %vm3604_vm5 = vcmp.ge.f32.partialorder %v8168_v4, 0.0 }
0x10d3   :  { %v3584_v1 = vsub.f32 0.0, %v3580_v23 }
0x10d4   :  { %v3555_v35 = vpop.f32.mrf.mxu3 }
0x10d5   :  { %v6315_v14 = vpop.eup %6314  ;;  %v3591_v6 = vmul.f32 1.442695, %v3584_v1  ;;  %v3556_v45 = vadd.f32 %v3555_v35, %v3455_v52 }
0x10d6   :  { %v3595_v37 = vadd.f32 1.0, %v6315_v14  ;;  %v6317_v15 = vpop.eup %6316 }
0x10d7   :  { %6318 = vpow2.f32 %v3591_v6  ;;  %v3606_v22 = vmul.f32 %v6317_v15, %v6311_v63 }
0x10d8   :  { %6320 = vrcp.f32 %v3595_v37 }
0x10d9   :  { %v3610_v38 = vsel %vm3602_vm2, %v6317_v15, %v3606_v22 }
0x10da   :  { %v3614_v29 = vmul.f32 %v3610_v38, %v3551_v8 }
0x10dc   :  { %v3619_v23 = vmul.f32 %v3617_v53, %v3614_v29  ;;  %v3632_v10 = vmul.f32 %v3630_v13, %v3614_v29 }
0x10dd   :  { %v6319_v24 = vpop.eup %6318 }
0x10de   :  { %v6321_v36 = vpop.eup %6320  ;;  %v3596_v9 = vadd.f32 1.0, %v6319_v24 }
0x10df   :  { %v3607_v40 = vmul.f32 %v6321_v36, %v6315_v14  ;;  %v5856_v14 = vld [vmem:[#allocation31 + $0x10] sm:$0xff] }
0x10e0   :  { %6322 = vrcp.f32 %v3596_v9  ;;  %3751 = vmatpush.bf16.msra.mxu1 %v5856_v14 }
0x10e1   :  { %v3611_v26 = vsel %vm3603_vm1, %v6321_v36, %v3607_v40  ;;  %v5854_v36 = vld [vmem:[#allocation31] sm:$0xff] }
0x10e2   :  { %v3615_v34 = vmul.f32 %v3611_v26, %v3554_v3 }
0x10e4   :  { %v3621_v21 = vmul.f32 %v3620_v30, %v3615_v34  ;;  %v3633_v46 = vmul.f32 %v3617_v53, %v3615_v34  ;;  %3752 = vmatpush.bf16.msra.mxu1 %v5855_v59 }
0x10e6   :  { %v6323_v28 = vpop.eup %6322  ;;  %v3623_v16 = vadd.f32 %v3621_v21, %v3618_v55  ;;  %v3635_v39 = vadd.f32 %v3633_v46, %v3631_v18 }
0x10e7   :  { %v3608_v11 = vmul.f32 %v6323_v28, %v6319_v24 }
0x10e8   :  { %v3628_v33 = vadd.f32 %v6041_v12, %v3623_v16  ;;  %v3637_v62 = vadd.f32 %v6041_v12, %v3635_v39  ;;  %3753 = vmatpush.bf16.msra.mxu1 %v5854_v36 }
0x10e9   :  { %v3612_v20 = vsel %vm3604_vm5, %v6323_v28, %v3608_v11 }
0x10ea   :  { %v3642_v0 = vmul.f32 %v6042_v54, %v3628_v33  ;;  %v3616_v63 = vmul.f32 %v3612_v20, %v3556_v45  ;;  %v3644_v6 = vmul.f32 %v6042_v54, %v3637_v62 }
0x10ec   :  { %v3649_v5 = vadd.f32 %v6043_v25, %v3642_v0  ;;  %v3622_v1 = vmul.f32 %v3620_v30, %v3616_v63  ;;  %v3634_v56 = vmul.f32 %v3617_v53, %v3616_v63  ;;  %v3651_v32 = vadd.f32 %v6043_v25, %v3644_v6 }
0x10ee   :  { %v3653_v37 = vand.u32 2147483647, %v3649_v5  ;;  %v3624_v49 = vadd.f32 %v3622_v1, %v3619_v23  ;;  %v3636_v47 = vadd.f32 %v3634_v56, %v3632_v10  ;;  %v3655_v9 = vand.u32 2147483647, %v3651_v32  ;;  %v6044_v10 = vld [vmem:[%s8450_s11] ss:$0 sm:$0xff] }
0x10ef   :  { %vm3677_vm0 = vcmp.ge.f32.partialorder %v3649_v5, 0.0  ;;  %vm3679_vm6 = vcmp.ge.f32.partialorder %v3651_v32, 0.0 }
0x10f0   :  { %v3657_v48 = vsub.f32 0.0, %v3653_v37  ;;  %v3629_v4 = vadd.f32 %v6041_v12, %v3624_v49  ;;  %v3638_v52 = vadd.f32 %v6041_v12, %v3636_v47  ;;  %v3659_v30 = vsub.f32 0.0, %v3655_v9 }
0x10f2   :  { %v3661_v15 = vmul.f32 1.442695, %v3657_v48  ;;  %v3643_v43 = vmul.f32 %v6042_v54, %v3629_v4  ;;  %v3645_v24 = vmul.f32 %v6042_v54, %v3638_v52  ;;  %v3665_v34 = vmul.f32 1.442695, %v3659_v30  ;;  %v5890_v30 = vld [vmem:[#allocation32 + $0xe4] sm:$0xf] }
0x10f4   :  { %6324 = vpow2.f32 %v3661_v15  ;;  %v3650_v19 = vadd.f32 %v6043_v25, %v3643_v43  ;;  %v3652_v2 = vadd.f32 %v6043_v25, %v3645_v24 }
0x10f6   :  { %v3654_v53 = vand.u32 2147483647, %v3650_v19  ;;  %v3656_v17 = vand.u32 2147483647, %v3652_v2  ;;  %vm3678_vm3 = vcmp.ge.f32.partialorder %v3650_v19, 0.0  ;;  %vm3680_vm4 = vcmp.ge.f32.partialorder %v3652_v2, 0.0 }
0x10f8   :  { %v3658_v13 = vsub.f32 0.0, %v3654_v53  ;;  %v3660_v22 = vsub.f32 0.0, %v3656_v17 }
0x10fa   :  { %v6325_v40 = vpop.eup %6324  ;;  %v3663_v3 = vmul.f32 1.442695, %v3658_v13  ;;  %v3667_v27 = vmul.f32 1.442695, %v3660_v22 }
0x10fb   :  { %v3669_v26 = vadd.f32 1.0, %v6325_v40 }
0x10fc   :  { %6326 = vpow2.f32 %v3663_v3  ;;  %v5892_v3 = vld [vmem:[#allocation32 + $0xec] sm:$0xf0] }
0x10fd   :  { %6328 = vrcp.f32 %v3669_v26 }
0x10fe   :  { %6330 = vpow2.f32 %v3667_v27  ;;  %v5570_v27 = vld [vmem:[#allocation32 + $0xf0] sm:$0xf0] }
0x10ff   :  { %6332 = vpow2.f32 %v3665_v34  ;;  %v5576_v34 = vld [vmem:[#allocation32 + $0xe8] sm:$0xf] }
0x1102   :  { %v6327_v55 = vpop.eup %6326 }
0x1103   :  { %v3670_v18 = vadd.f32 1.0, %v6327_v55  ;;  %v6329_v38 = vpop.eup %6328 }
0x1104   :  { %v6331_v21 = vpop.eup %6330  ;;  %v3681_v46 = vmul.f32 %v6329_v38, %v6325_v40  ;;  %v5568_v40 = vld [vmem:[#allocation32 + $0xe0] sm:$0xf] }
0x1105   :  { %6334 = vrcp.f32 %v3670_v18  ;;  %v6333_v12 = vpop.eup %6332  ;;  %v3672_v8 = vadd.f32 1.0, %v6331_v21  ;;  %v5569_v26 = vor.u32 %v5892_v3, %v5568_v40  ;;  %v5573_v18 = vor.u32 %v5890_v30, %v5570_v27  ;;  %v5506_v3 = vld [vmem:[#allocation32 + $0x70] sm:$0xf0]  ;;  %v5512_v30 = vld [vmem:[#allocation32 + $0x68] sm:$0xf] }
0x1106   :  { %v3671_v58 = vadd.f32 1.0, %v6333_v12  ;;  %v3685_v16 = vsel %vm3677_vm0, %v6329_v38, %v3681_v46 }
0x1107   :  { %6336 = vrcp.f32 %v3672_v8  ;;  %v3689_v54 = vmul.f32 %v3685_v16, %v3649_v5  ;;  %4134 = vmatpush.bf16.msra.mxu2 %v5569_v26  ;;  %4153 = vmatpush.bf16.msra.mxu3 %v5573_v18  ;;  %v5552_v8 = vld [vmem:[#allocation32 + $0xc0] sm:$0xf]  ;;  %v5554_v16 = vld [vmem:[#allocation32 + $0xd0] sm:$0xf0]  ;;  %v5877_v26 = vld [vmem:[#allocation32 + $0x74] sm:$0xf0] }
0x1108   :  { %6338 = vrcp.f32 %v3671_v58  ;;  %v5886_v58 = vld [vmem:[#allocation32 + $0xc4] sm:$0xf]  ;;  %v5875_v18 = vld [vmem:[#allocation32 + $0x6c] sm:$0xf] }
0x110b   :  { %v6335_v35 = vpop.eup %6334 }
0x110c   :  { %v3682_v28 = vmul.f32 %v6335_v35, %v6327_v55  ;;  %v5893_v55 = vld [vmem:[#allocation32 + $0xf4] sm:$0xf0] }
0x110d   :  { %v6337_v33 = vpop.eup %6336  ;;  %v5577_v38 = vor.u32 %v5893_v55, %v5576_v34  ;;  %v5513_v55 = vor.u32 %v5877_v26, %v5512_v30 }
0x110e   :  { %v3686_v39 = vsel %vm3678_vm3, %v6335_v35, %v3682_v28  ;;  %v6339_v25 = vpop.eup %6338  ;;  %v3684_v45 = vmul.f32 %v6337_v33, %v6331_v21  ;;  %v5891_v21 = vld [vmem:[#allocation32 + $0xec] sm:$0xf]  ;;  %v5888_v35 = vld [vmem:[#allocation32 + $0xcc] sm:$0xf0] }
0x110f   :  { %v3690_v29 = vmul.f32 %v3686_v39, %v3650_v19  ;;  %v3683_v20 = vmul.f32 %v6339_v25, %v6333_v12  ;;  %v5578_v12 = vld [vmem:[#allocation32 + $0xf8] sm:$0xf0]  ;;  %4172 = vmatpush.bf16.msra.mxu0 %v5577_v38  ;;  %v5553_v28 = vor.u32 %v5888_v35, %v5552_v8  ;;  %v5560_v39 = vld [vmem:[#allocation32 + $0xc8] sm:$0xf]  ;;  %v5872_v8 = vld [vmem:[#allocation32 + $0x4c] sm:$0xf0] }
0x1110   :  { %v3688_v7 = vsel %vm3680_vm4, %v6337_v33, %v3684_v45  ;;  %v5581_v46 = vor.u32 %v5891_v21, %v5578_v12  ;;  %v5887_v33 = vld [vmem:[#allocation32 + $0xcc] sm:$0xf]  ;;  %v5514_v38 = vld [vmem:[#allocation32 + $0x78] sm:$0xf0]  ;;  %v5870_v35 = vld [vmem:[#allocation32 + $0x44] sm:$0xf] }
0x1111   :  { %v3693_v11 = vpack.c.bf16 %v3690_v29, %v3689_v54  ;;  %v3687_v62 = vsel %vm3679_vm6, %v6339_v25, %v3683_v20  ;;  %v3692_v0 = vmul.f32 %v3688_v7, %v3652_v2  ;;  %v5889_v54 = vld [vmem:[#allocation32 + $0xd4] sm:$0xf0]  ;;  %v5557_v29 = vor.u32 %v5886_v58, %v5554_v16  ;;  %v5562_v25 = vld [vmem:[#allocation32 + $0xd8] sm:$0xf0]  ;;  %4135 = vmatpush.bf16.msra.mxu2 %v5553_v28  ;;  %v5536_v20 = vld [vmem:[#allocation32 + $0xa0] sm:$0xf] }
0x1112   :  { %v3691_v63 = vmul.f32 %v3687_v62, %v3651_v32  ;;  %4191 = vmatpush.bf16.msrb.mxu1 %v5581_v46  ;;  %v5565_v45 = vor.u32 %v5887_v33, %v5562_v25  ;;  %v5884_v7 = vld [vmem:[#allocation32 + $0xac] sm:$0xf0]  ;;  %v5882_v62 = vld [vmem:[#allocation32 + $0xa4] sm:$0xf]  ;;  %v5517_v12 = vor.u32 %v5875_v18, %v5514_v38  ;;  %v5488_v46 = vld [vmem:[#allocation32 + $0x40] sm:$0xf] }
0x1113   :  { %3754 = vmatmul.bf16.vlgmr.msra.gmra.mxu1 %v3693_v11  ;;  %v5561_v11 = vor.u32 %v5889_v54, %v5560_v39  ;;  %4154 = vmatpush.bf16.msra.mxu3 %v5557_v29  ;;  %v5489_v28 = vor.u32 %v5872_v8, %v5488_v46  ;;  %v5490_v16 = vld [vmem:[#allocation32 + $0x50] sm:$0xf0]  ;;  %v5496_v39 = vld [vmem:[#allocation32 + $0x48] sm:$0xf]  ;;  %v5873_v29 = vld [vmem:[#allocation32 + $0x54] sm:$0xf0] }
0x1114   :  { %v3694_v23 = vpack.c.bf16 %v3692_v0, %v3691_v63  ;;  %v5537_v0 = vor.u32 %v5884_v7, %v5536_v20  ;;  %v5538_v63 = vld [vmem:[#allocation32 + $0xb0] sm:$0xf0]  ;;  %v5493_v54 = vor.u32 %v5870_v35, %v5490_v16  ;;  %v5498_v33 = vld [vmem:[#allocation32 + $0x58] sm:$0xf0]  ;;  %v5497_v25 = vor.u32 %v5873_v29, %v5496_v39  ;;  %v5472_v20 = vld [vmem:[#allocation32 + $0x20] sm:$0xf] }
0x1115   :  { %4173 = vmatpush.bf16.msra.mxu0 %v5561_v11  ;;  %v5871_v11 = vld [vmem:[#allocation32 + $0x4c] sm:$0xf]  ;;  %v5868_v7 = vld [vmem:[#allocation32 + $0x2c] sm:$0xf0]  ;;  %v6045_v29 = vld [vmem:[%s8451_s12] ss:$0 sm:$0xff] }
0x1116   :  { %4192 = vmatpush.bf16.msrb.mxu1 %v5565_v45  ;;  %4136 = vmatpush.bf16.msra.mxu2 %v5537_v0  ;;  %v5501_v45 = vor.u32 %v5871_v11, %v5498_v33  ;;  %v5473_v0 = vor.u32 %v5868_v7, %v5472_v20  ;;  %v6046_v7 = vld [vmem:[%s8452_s3] ss:$0 sm:$0xff] }
0x1123   :  { %3759 = vmatmul.bf16.gmra.mxu1 %v3694_v23  ;;  %v5544_v23 = vld [vmem:[#allocation32 + $0xa8] sm:$0xf] }
0x1190   :  { %v3755_v1 = vpop.f32.mrf.mxu1 }
0x1191   :  { %v3756_v5 = vadd.f32 %v6044_v10, %v3755_v1  ;;  %v5541_v1 = vor.u32 %v5882_v62, %v5538_v63  ;;  %v5866_v62 = vld [vmem:[#allocation32 + $0x24] sm:$0xf]  ;;  %v5474_v63 = vld [vmem:[#allocation32 + $0x30] sm:$0xf0] }
0x1193   :  { %v8178_v56 = vadd.f32 %v3756_v5, %v8115_v44  ;;  %4155 = vmatpush.bf16.msra.mxu3 %v5541_v1 }
0x1195   :  { %3869 = vadd.xlane.f32.xlu1 %v8178_v56 }
0x1198   :  { %v3757_v14 = vpop.f32.mrf.mxu1 }
0x1199   :  { %v3758_v6 = vadd.f32 %v6044_v10, %v3757_v14  ;;  %v5883_v14 = vld [vmem:[#allocation32 + $0xac] sm:$0xf] }
0x119b   :  { %v8182_v37 = vadd.f32 %v3758_v6, %v8119_v31  ;;  %v5546_v6 = vld [vmem:[#allocation32 + $0xb8] sm:$0xf0] }
0x119d   :  { %3871 = vadd.xlane.f32.xlu2 %v8182_v37 }
0x11a0   :  { %v3760_v49 = vpop.f32.mrf.mxu1 }
0x11a1   :  { %v3761_v47 = vadd.f32 %v6044_v10, %v3760_v49  ;;  %v5549_v49 = vor.u32 %v5883_v14, %v5546_v6  ;;  %v5867_v6 = vld [vmem:[#allocation32 + $0x2c] sm:$0xf] }
0x11a3   :  { %v8186_v48 = vadd.f32 %v3761_v47, %v8123_v61  ;;  %v5520_v47 = vld [vmem:[#allocation32 + $0x80] sm:$0xf]  ;;  %4193 = vmatpush.bf16.msrb.mxu1 %v5549_v49  ;;  %v5482_v49 = vld [vmem:[#allocation32 + $0x38] sm:$0xf0] }
0x11a5   :  { %3873 = vadd.xlane.f32.xlu0 %v8186_v48 }
0x11a8   :  { %v3762_v4 = vpop.f32.mrf.mxu1 }
0x11a9   :  { %v3763_v52 = vadd.f32 %v6044_v10, %v3762_v4  ;;  %v5885_v10 = vld [vmem:[#allocation32 + $0xb4] sm:$0xf0]  ;;  %v5880_v4 = vld [vmem:[#allocation32 + $0x8c] sm:$0xf0] }
0x11aa   :  { %v5545_v5 = vor.u32 %v5885_v10, %v5544_v23  ;;  %v5480_v23 = vld [vmem:[#allocation32 + $0x28] sm:$0xf]  ;;  %v5869_v10 = vld [vmem:[#allocation32 + $0x34] sm:$0xf0] }
0x11ab   :  { %v8190_v44 = vadd.f32 %v3763_v52, %v8127_v50  ;;  %v5878_v52 = vld [vmem:[#allocation32 + $0x84] sm:$0xf]  ;;  %v5481_v14 = vor.u32 %v5869_v10, %v5480_v23 }
0x11ac   :  { %4174 = vmatpush.bf16.msra.mxu0 %v5545_v5  ;;  %v5477_v5 = vor.u32 %v5866_v62, %v5474_v63 }
0x11ad   :  { %3875 = vadd.xlane.f32.xlu1 %v8190_v44 }
0x1208   :  { %v3870_v59 = vpop.xlane.xlu1 %3869 }
0x1209   :  { %v3877_v31 = vmul.f32 %v3870_v59, %v7632_v57  ;;  %v5521_v59 = vor.u32 %v5880_v4, %v5520_v47  ;;  %v5485_v4 = vor.u32 %v5867_v6, %v5482_v49 }
0x120b   :  { %v8195_v15 = vsub.f32 %v8178_v56, %v3877_v31  ;;  %v5522_v31 = vld [vmem:[#allocation32 + $0x90] sm:$0xf0]  ;;  %4137 = vmatpush.bf16.msra.mxu2 %v5521_v59  ;;  %v5864_v59 = vld [vmem:[#allocation32 + $0xc] sm:$0xf0] }
0x120d   :  { %v3885_v43 = vmul.f32 %v8195_v15, %v8195_v15 }
0x120f   :  { %3889 = vadd.xlane.f32.xlu2 %v3885_v43  ;;  %v5528_v43 = vld [vmem:[#allocation32 + $0x88] sm:$0xf] }
0x1210   :  { %v3872_v61 = vpop.xlane.xlu2 %3871 }
0x1211   :  { %v3878_v24 = vmul.f32 %v3872_v61, %v7632_v57  ;;  %v5881_v61 = vld [vmem:[#allocation32 + $0x94] sm:$0xf0] }
0x1213   :  { %v8201_v32 = vsub.f32 %v8182_v37, %v3878_v24  ;;  %v5525_v24 = vor.u32 %v5878_v52, %v5522_v31  ;;  %v5456_v52 = vld [vmem:[#allocation32] sm:$0xf]  ;;  %v5862_v31 = vld [vmem:[#allocation32 + $0x4] sm:$0xf] }
0x1215   :  { %v3886_v50 = vmul.f32 %v8201_v32, %v8201_v32  ;;  %4156 = vmatpush.bf16.msra.mxu3 %v5525_v24  ;;  %v5457_v24 = vor.u32 %v5864_v59, %v5456_v52 }
0x1217   :  { %3891 = vadd.xlane.f32.xlu0 %v3886_v50  ;;  %v5529_v50 = vor.u32 %v5881_v61, %v5528_v43 }
0x1218   :  { %v3874_v19 = vpop.xlane.xlu0 %3873 }
0x1219   :  { %v3879_v2 = vmul.f32 %v3874_v19, %v7632_v57  ;;  %v5879_v19 = vld [vmem:[#allocation32 + $0x8c] sm:$0xf]  ;;  %4175 = vmatpush.bf16.msra.mxu0 %v5529_v50  ;;  %v5458_v50 = vld [vmem:[#allocation32 + $0x10] sm:$0xf0] }
0x121b   :  { %v8207_v36 = vsub.f32 %v8186_v48, %v3879_v2  ;;  %v5530_v2 = vld [vmem:[#allocation32 + $0x98] sm:$0xf0] }
0x121d   :  { %v3887_v53 = vmul.f32 %v8207_v36, %v8207_v36  ;;  %4176 = vmatpush.bf16.msra.mxu0 %v5513_v55 }
0x121f   :  { %3893 = vadd.xlane.f32.xlu1 %v3887_v53  ;;  %v5533_v53 = vor.u32 %v5879_v19, %v5530_v2  ;;  %v5464_v19 = vld [vmem:[#allocation32 + $0x8] sm:$0xf] }
0x1220   :  { %v3876_v9 = vpop.xlane.xlu1 %3875 }
0x1221   :  { %v3880_v17 = vmul.f32 %v3876_v9, %v7632_v57  ;;  %v5504_v9 = vld [vmem:[#allocation32 + $0x60] sm:$0xf]  ;;  %4194 = vmatpush.bf16.msrb.mxu1 %v5533_v53  ;;  %4177 = vmatpush.bf16.msra.mxu0 %v5497_v25  ;;  %v5461_v53 = vor.u32 %v5862_v31, %v5458_v50 }
0x1223   :  { %v8213_v13 = vsub.f32 %v8190_v44, %v3880_v17  ;;  %v5876_v17 = vld [vmem:[#allocation32 + $0x6c] sm:$0xf0] }
0x1224   :  { %v5505_v40 = vor.u32 %v5876_v17, %v5504_v9  ;;  %v5865_v9 = vld [vmem:[#allocation32 + $0x14] sm:$0xf0]  ;;  %v5863_v17 = vld [vmem:[#allocation32 + $0xc] sm:$0xf] }
0x1225   :  { %v3888_v22 = vmul.f32 %v8213_v13, %v8213_v13  ;;  %4195 = vmatpush.bf16.msrb.mxu1 %v5517_v12  ;;  %4178 = vmatpush.bf16.msra.mxu0 %v5481_v14 }
0x1226   :  { %4138 = vmatpush.bf16.msra.mxu2 %v5505_v40  ;;  %v5465_v40 = vor.u32 %v5865_v9, %v5464_v19  ;;  %v5917_v9 = vld [vmem:[#allocation34 + $0xb8] sm:$0xff] }
0x1227   :  { %3895 = vadd.xlane.f32.xlu2 %v3888_v22  ;;  %v5874_v22 = vld [vmem:[#allocation32 + $0x64] sm:$0xf] }
0x1228   :  { %v5509_v34 = vor.u32 %v5874_v22, %v5506_v3  ;;  %v5466_v22 = vld [vmem:[#allocation32 + $0x18] sm:$0xf0] }
0x1229   :  { %4196 = vmatpush.bf16.msrb.mxu1 %v5501_v45  ;;  %v5469_v3 = vor.u32 %v5863_v17, %v5466_v22  ;;  %4179 = vmatpush.bf16.msra.mxu0 %v5465_v40  ;;  %v5925_v17 = vld [vmem:[#allocation34 + $0xf8] sm:$0xff]  ;;  %v5924_v22 = vld [vmem:[#allocation34 + $0xf0] sm:$0xff] }
0x122a   :  { %4157 = vmatpush.bf16.msra.mxu3 %v5509_v34  ;;  %4139 = vmatpush.bf16.msra.mxu2 %v5489_v28  ;;  %v5901_v40 = vld [vmem:[#allocation34 + $0x38] sm:$0xff] }
0x122d   :  { %4197 = vmatpush.bf16.msrb.mxu1 %v5485_v4  ;;  %4611 = vmatpush.bf16.msrb.mxu0 %v5917_v9 }
0x122e   :  { %4158 = vmatpush.bf16.msra.mxu3 %v5493_v54  ;;  %4140 = vmatpush.bf16.msra.mxu2 %v5473_v0 }
0x1231   :  { %4198 = vmatpush.bf16.msrb.mxu1 %v5469_v3  ;;  %v5915_v3 = vld [vmem:[#allocation34 + $0xa8] sm:$0xff] }
0x1232   :  { %4159 = vmatpush.bf16.msra.mxu3 %v5477_v5  ;;  %4141 = vmatpush.bf16.msra.mxu2 %v5457_v24 }
0x1235   :  { %4630 = vmatpush.bf16.msra.mxu1 %v5925_v17 }
0x1236   :  { %4160 = vmatpush.bf16.msra.mxu3 %v5461_v53  ;;  %4573 = vmatpush.bf16.msrb.mxu2 %v5901_v40 }
0x1239   :  { %4631 = vmatpush.bf16.msra.mxu1 %v5924_v22  ;;  %v5918_v22 = vld [vmem:[#allocation34 + $0xc0] sm:$0xff] }
0x1282   :  { %v3890_v27 = vpop.xlane.xlu2 %3889 }
0x1283   :  { %v3897_v21 = vmul.f32 %v3890_v27, %v7632_v57 }
0x1285   :  { %v8218_v58 = vadd.f32 1e-05, %v3897_v21 }
0x1287   :  { %6340 = vrsqrt.f32 %v8218_v58  ;;  %vm3911_vm8 = vweird.f32 %v8218_v58 }
0x128a   :  { %v3892_v1 = vpop.xlane.xlu0 %3891 }
0x128b   :  { %v3898_v47 = vmul.f32 %v3892_v1, %v7632_v57 }
0x128d   :  { %v6341_v43 = vpop.eup %6340  ;;  %v3902_v61 = vadd.f32 1e-05, %v3898_v47 }
0x128e   :  { %v3906_v2 = vmul.f32 %v6341_v43, %v8218_v58  ;;  %vm3912_vm7 = vweird.f32 %v6341_v43 }
0x128f   :  { %6342 = vrsqrt.f32 %v3902_v61  ;;  %vm3913_vm9 = vmor %vm3911_vm8, %vm3912_vm7  ;;  %vm3921_vm11 = vweird.f32 %v3902_v61 }
0x1290   :  { %v3907_v30 = vmul.f32 %v6341_v43, %v3906_v2 }
0x1292   :  { %v3908_v26 = vmul.f32 0.5, %v3907_v30  ;;  %v3894_v27 = vpop.xlane.xlu1 %3893  ;;  %v5923_v30 = vld [vmem:[#allocation34 + $0xe8] sm:$0xff] }
0x1293   :  { %v3899_v34 = vmul.f32 %v3894_v27, %v7632_v57  ;;  %4632 = vmatpush.bf16.msra.mxu1 %v5923_v30  ;;  %v5908_v27 = vld [vmem:[#allocation34 + $0x70] sm:$0xff] }
0x1294   :  { %v3909_v55 = vsub.f32 1.5, %v3908_v26  ;;  %v5900_v26 = vld [vmem:[#allocation34 + $0x30] sm:$0xff] }
0x1295   :  { %v6343_v18 = vpop.eup %6342  ;;  %v3903_v38 = vadd.f32 1e-05, %v3899_v34  ;;  %v3803_v34 = vld [vmem:[%s8453_s19] sm:$0xf]  ;;  %4574 = vmatpush.bf16.msrb.mxu2 %v5900_v26 }
0x1296   :  { %v3910_v21 = vmul.f32 %v6341_v43, %v3909_v55  ;;  %v3916_v12 = vmul.f32 %v6343_v18, %v3902_v61  ;;  %vm3922_vm10 = vweird.f32 %v6343_v18  ;;  %v5914_v55 = vld [vmem:[#allocation34 + $0xa0] sm:$0xff] }
0x1297   :  { %6344 = vrsqrt.f32 %v3903_v38  ;;  %vm3923_vm12 = vmor %vm3921_vm11, %vm3922_vm10  ;;  %vm3931_vm14 = vweird.f32 %v3903_v38 }
0x1298   :  { %v3917_v46 = vmul.f32 %v6343_v18, %v3916_v12  ;;  %v3914_v8 = vsel %vm3913_vm9, %v6341_v43, %v3910_v21  ;;  %v8235_v21 = vperm.slane %v3803_v34, 3  ;;  %v5899_v12 = vld [vmem:[#allocation34 + $0x28] sm:$0xff] }
0x1299   :  { %v3945_v11 = vmul.f32 %v3914_v8, %v8195_v15  ;;  %4575 = vmatpush.bf16.msrb.mxu2 %v5899_v12 }
0x129a   :  { %v3918_v35 = vmul.f32 0.5, %v3917_v46  ;;  %v3896_v28 = vpop.xlane.xlu2 %3895  ;;  %v5907_v46 = vld [vmem:[#allocation34 + $0x68] sm:$0xff] }
0x129b   :  { %v3900_v16 = vmul.f32 %v3896_v28, %v7632_v57  ;;  %v3952_v62 = vmul.f32 %v6045_v29, %v3945_v11  ;;  %v5913_v28 = vld [vmem:[#allocation34 + $0x98] sm:$0xff]  ;;  %v8245_v11 = vperm.slane %v3803_v34, 1 }
0x129c   :  { %v3919_v39 = vsub.f32 1.5, %v3918_v35 }
0x129d   :  { %v6345_v54 = vpop.eup %6344  ;;  %v3904_v33 = vadd.f32 1e-05, %v3900_v16  ;;  %v3959_v5 = vadd.f32 %v6046_v7, %v3952_v62  ;;  %v5921_v16 = vld [vmem:[#allocation34 + $0xd8] sm:$0xff] }
0x129e   :  { %v3920_v25 = vmul.f32 %v6343_v18, %v3919_v39  ;;  %v3926_v45 = vmul.f32 %v6345_v54, %v3903_v38  ;;  %vm3932_vm13 = vweird.f32 %v6345_v54  ;;  %v8233_v38 = vperm.slane %v3803_v34, 2 }
0x129f   :  { %6346 = vrsqrt.f32 %v3904_v33  ;;  %vm3933_vm15 = vmor %vm3931_vm14, %vm3932_vm13  ;;  %vm3941_vm2 = vweird.f32 %v3904_v33 }
0x12a0   :  { %v3924_v58 = vsel %vm3923_vm12, %v6343_v18, %v3920_v25  ;;  %v3927_v20 = vmul.f32 %v6345_v54, %v3926_v45  ;;  %v5922_v18 = vld [vmem:[#allocation34 + $0xe0] sm:$0xff] }
0x12a1   :  { %v3946_v0 = vmul.f32 %v3924_v58, %v8201_v32  ;;  %4633 = vmatpush.bf16.msra.mxu1 %v5922_v18  ;;  %v5906_v25 = vld [vmem:[#allocation34 + $0x60] sm:$0xff] }
0x12a2   :  { %v3928_v63 = vmul.f32 0.5, %v3927_v20  ;;  %v5912_v20 = vld [vmem:[#allocation34 + $0x90] sm:$0xff] }
0x12a3   :  { %v3953_v23 = vmul.f32 %v6045_v29, %v3946_v0 }
0x12a4   :  { %v3929_v10 = vsub.f32 1.5, %v3928_v63 }
0x12a5   :  { %v6347_v1 = vpop.eup %6346  ;;  %v3960_v14 = vadd.f32 %v6046_v7, %v3953_v23  ;;  %4634 = vmatpush.bf16.msra.mxu1 %v5921_v16 }
0x12a6   :  { %v3930_v6 = vmul.f32 %v6345_v54, %v3929_v10  ;;  %v3936_v15 = vmul.f32 %v6347_v1, %v3904_v33  ;;  %vm3942_vm1 = vweird.f32 %v6347_v1  ;;  %v5898_v33 = vld [vmem:[#allocation34 + $0x20] sm:$0xff] }
0x12a7   :  { %v3963_v49 = vpack.c.bf16 %v3960_v14, %v3959_v5  ;;  %vm3943_vm5 = vmor %vm3941_vm2, %vm3942_vm1  ;;  %4576 = vmatpush.bf16.msrb.mxu2 %v5898_v33  ;;  %v5897_v5 = vld [vmem:[#allocation34 + $0x18] sm:$0xff] }
0x12a8   :  { %v3937_v47 = vmul.f32 %v6347_v1, %v3936_v15  ;;  %v3934_v4 = vsel %vm3933_vm15, %v6345_v54, %v3930_v6  ;;  %v5905_v14 = vld [vmem:[#allocation34 + $0x58] sm:$0xff] }
0x12a9   :  { %4142 = vmatmul.bf16.vlgmr.msra.gmra.mxu2 %v3963_v49  ;;  %4161 = vmatmul.bf16.vlgmr.msra.gmra.mxu3 %v3963_v49  ;;  %v3947_v59 = vmul.f32 %v3934_v4, %v8207_v36  ;;  %v5916_v36 = vld [vmem:[#allocation34 + $0xb0] sm:$0xff] }
0x12aa   :  { %v3938_v52 = vmul.f32 0.5, %v3937_v47  ;;  %4180 = vmatmul.bf16.vlgmr.msra.gmra.mxu0 %v3963_v49  ;;  %4199 = vmatmul.bf16.vlgmr.msrb.gmra.mxu1 %v3963_v49 }
0x12ab   :  { %v3954_v24 = vmul.f32 %v6045_v29, %v3947_v59  ;;  %4612 = vmatpush.bf16.msrb.mxu0 %v5916_v36  ;;  %4577 = vmatpush.bf16.msrb.mxu2 %v5897_v5  ;;  %v5910_v36 = vld [vmem:[#allocation34 + $0x80] sm:$0xff] }
0x12ac   :  { %v3939_v32 = vsub.f32 1.5, %v3938_v52 }
0x12ad   :  { %v3961_v19 = vadd.f32 %v6046_v7, %v3954_v24 }
0x12ae   :  { %v3940_v31 = vmul.f32 %v6347_v1, %v3939_v32 }
0x12af   :  { %4613 = vmatpush.bf16.msrb.mxu0 %v5915_v3 }
0x12b0   :  { %v3944_v43 = vsel %vm3943_vm5, %v6347_v1, %v3940_v31  ;;  %v5911_v31 = vld [vmem:[#allocation34 + $0x88] sm:$0xff] }
0x12b1   :  { %v3948_v61 = vmul.f32 %v3944_v43, %v8213_v13  ;;  %v5909_v13 = vld [vmem:[#allocation34 + $0x78] sm:$0xff]  ;;  %v5919_v43 = vld [vmem:[#allocation34 + $0xc8] sm:$0xff] }
0x12b2   :  { %4592 = vmatpush.bf16.msrb.mxu3 %v5909_v13 }
0x12b3   :  { %v3955_v50 = vmul.f32 %v6045_v29, %v3948_v61  ;;  %4614 = vmatpush.bf16.msrb.mxu0 %v5914_v55  ;;  %v8243_v29 = vperm.slane %v3803_v34, 0  ;;  %v5895_v34 = vld [vmem:[#allocation34 + $0x8] sm:$0xff] }
0x12b4   :  { %v5903_v55 = vld [vmem:[#allocation34 + $0x48] sm:$0xff] }
0x12b5   :  { %v3962_v2 = vadd.f32 %v6046_v7, %v3955_v50  ;;  %v5920_v7 = vld [vmem:[#allocation34 + $0xd0] sm:$0xff] }
0x12b6   :  { %4593 = vmatpush.bf16.msrb.mxu3 %v5908_v27  ;;  %4635 = vmatpush.bf16.msra.mxu1 %v5920_v7  ;;  %v5896_v50 = vld [vmem:[#allocation34 + $0x10] sm:$0xff] }
0x12b7   :  { %v3964_v53 = vpack.c.bf16 %v3962_v2, %v3961_v19  ;;  %4615 = vmatpush.bf16.msrb.mxu0 %v5913_v28  ;;  %v5904_v19 = vld [vmem:[#allocation34 + $0x50] sm:$0xff]  ;;  %4578 = vmatpush.bf16.msrb.mxu2 %v5896_v50 }
0x12b9   :  { %4147 = vmatmul.bf16.gmra.mxu2 %v3964_v53  ;;  %4166 = vmatmul.bf16.gmra.mxu3 %v3964_v53 }
0x12ba   :  { %4185 = vmatmul.bf16.gmra.mxu0 %v3964_v53  ;;  %4204 = vmatmul.bf16.gmra.mxu1 %v3964_v53 }
0x12bb   :  { %4594 = vmatpush.bf16.msrb.mxu3 %v5907_v46  ;;  %4616 = vmatpush.bf16.msrb.mxu0 %v5912_v20 }
0x12bc   :  { %4636 = vmatpush.bf16.msra.mxu1 %v5919_v43  ;;  %4579 = vmatpush.bf16.msrb.mxu2 %v5895_v34 }
0x12bf   :  { %4595 = vmatpush.bf16.msrb.mxu3 %v5906_v25  ;;  %4617 = vmatpush.bf16.msrb.mxu0 %v5911_v31 }
0x12c0   :  { %4637 = vmatpush.bf16.msra.mxu1 %v5918_v22 }
0x12c3   :  { %4596 = vmatpush.bf16.msrb.mxu3 %v5905_v14  ;;  %4618 = vmatpush.bf16.msrb.mxu0 %v5910_v36 }
0x12c7   :  { %4597 = vmatpush.bf16.msrb.mxu3 %v5904_v19 }
0x12cb   :  { %4598 = vmatpush.bf16.msrb.mxu3 %v5903_v55 }
0x1327   :  { %v4181_v8 = vpop.f32.mrf.mxu0  ;;  %v4200_v35 = vpop.f32.mrf.mxu1 }
0x1328   :  { %v8238_v39 = vadd.f32 %v4181_v8, %v8233_v38  ;;  %v8241_v54 = vadd.f32 %v4200_v35, %v8235_v21 }
0x132a   :  { %v4212_v45 = vand.u32 2147483647, %v8238_v39  ;;  %v4213_v58 = vand.u32 2147483647, %v8241_v54  ;;  %vm4308_vm0 = vcmp.ge.f32.partialorder %v8238_v39, 0.0  ;;  %vm4309_vm3 = vcmp.ge.f32.partialorder %v8241_v54, 0.0 }
0x132c   :  { %v4228_v62 = vsub.f32 0.0, %v4212_v45  ;;  %v4229_v0 = vsub.f32 0.0, %v4213_v58  ;;  %v4143_v63 = vpop.f32.mrf.mxu2  ;;  %v4162_v23 = vpop.f32.mrf.mxu3 }
0x132d   :  { %v8250_v10 = vadd.f32 %v4143_v63, %v8243_v29  ;;  %v8253_v1 = vadd.f32 %v4162_v23, %v8245_v11  ;;  %v5902_v63 = vld [vmem:[#allocation34 + $0x40] sm:$0xff] }
0x132e   :  { %v4246_v6 = vmul.f32 1.442695, %v4228_v62  ;;  %v4248_v15 = vmul.f32 1.442695, %v4229_v0  ;;  %v5894_v0 = vld [vmem:[#allocation34] sm:$0xff]  ;;  %4599 = vmatpush.bf16.msrb.mxu3 %v5902_v63 }
0x132f   :  { %v4210_v49 = vand.u32 2147483647, %v8250_v10  ;;  %v4211_v47 = vand.u32 2147483647, %v8253_v1  ;;  %v4183_v4 = vpop.f32.mrf.mxu0  ;;  %v4202_v52 = vpop.f32.mrf.mxu1  ;;  %4580 = vmatpush.bf16.msrb.mxu2 %v5894_v0  ;;  %vm4306_vm4 = vcmp.ge.f32.partialorder %v8250_v10, 0.0  ;;  %vm4307_vm6 = vcmp.ge.f32.partialorder %v8253_v1, 0.0 }
0x1330   :  { %6348 = vpow2.f32 %v4246_v6  ;;  %v8258_v32 = vadd.f32 %v4183_v4, %v8233_v38  ;;  %v8261_v59 = vadd.f32 %v4202_v52, %v8235_v21 }
0x1331   :  { %6350 = vpow2.f32 %v4248_v15  ;;  %v4226_v61 = vsub.f32 0.0, %v4210_v49  ;;  %v4227_v24 = vsub.f32 0.0, %v4211_v47 }
0x1332   :  { %v4216_v2 = vand.u32 2147483647, %v8258_v32  ;;  %v4217_v53 = vand.u32 2147483647, %v8261_v59  ;;  %vm4312_vm7 = vcmp.ge.f32.partialorder %v8258_v32, 0.0  ;;  %vm4313_vm8 = vcmp.ge.f32.partialorder %v8261_v59, 0.0 }
0x1333   :  { %v4242_v9 = vmul.f32 1.442695, %v4226_v61  ;;  %v4244_v17 = vmul.f32 1.442695, %v4227_v24 }
0x1334   :  { %v4232_v40 = vsub.f32 0.0, %v4216_v2  ;;  %v4233_v13 = vsub.f32 0.0, %v4217_v53  ;;  %v4145_v3 = vpop.f32.mrf.mxu2  ;;  %v4164_v30 = vpop.f32.mrf.mxu3 }
0x1335   :  { %6352 = vpow2.f32 %v4242_v9  ;;  %v8266_v26 = vadd.f32 %v4145_v3, %v8243_v29  ;;  %v8269_v27 = vadd.f32 %v4164_v30, %v8245_v11 }
0x1336   :  { %v6349_v18 = vpop.eup %6348  ;;  %6354 = vpow2.f32 %v4244_v17  ;;  %v4254_v12 = vmul.f32 1.442695, %v4232_v40  ;;  %v4256_v46 = vmul.f32 1.442695, %v4233_v13 }
0x1337   :  { %v6351_v8 = vpop.eup %6350  ;;  %v4276_v35 = vadd.f32 1.0, %v6349_v18  ;;  %v4214_v28 = vand.u32 2147483647, %v8266_v26  ;;  %v4215_v16 = vand.u32 2147483647, %v8269_v27  ;;  %v4186_v33 = vpop.f32.mrf.mxu0  ;;  %vm4310_vm9 = vcmp.ge.f32.partialorder %v8266_v26, 0.0 }
0x1338   :  { %v4205_v25 = vpop.f32.mrf.mxu1  ;;  %v4277_v45 = vadd.f32 1.0, %v6351_v8  ;;  %6356 = vpow2.f32 %v4254_v12  ;;  %v8274_v58 = vadd.f32 %v4186_v33, %v8233_v38  ;;  %vm4311_vm10 = vcmp.ge.f32.partialorder %v8269_v27, 0.0 }
0x1339   :  { %6358 = vrcp.f32 %v4276_v35  ;;  %v4230_v20 = vsub.f32 0.0, %v4214_v28  ;;  %v4231_v7 = vsub.f32 0.0, %v4215_v16  ;;  %v8277_v62 = vadd.f32 %v4205_v25, %v8235_v21 }
0x133a   :  { %6360 = vrcp.f32 %v4277_v45  ;;  %v4220_v23 = vand.u32 2147483647, %v8274_v58  ;;  %vm4316_vm11 = vcmp.ge.f32.partialorder %v8274_v58, 0.0 }
0x133b   :  { %v6353_v5 = vpop.eup %6352  ;;  %6362 = vpow2.f32 %v4256_v46  ;;  %v4250_v14 = vmul.f32 1.442695, %v4230_v20  ;;  %v4221_v6 = vand.u32 2147483647, %v8277_v62  ;;  %v4252_v47 = vmul.f32 1.442695, %v4231_v7 }
0x133c   :  { %v8281_v15 = vpop.eup %6354  ;;  %v4274_v49 = vadd.f32 1.0, %v6353_v5  ;;  %v4236_v4 = vsub.f32 0.0, %v4220_v23  ;;  %v4148_v52 = vpop.f32.mrf.mxu2  ;;  %vm4317_vm13 = vcmp.ge.f32.partialorder %v8277_v62, 0.0 }
0x133d   :  { %v4167_v31 = vpop.f32.mrf.mxu3  ;;  %v4275_v43 = vadd.f32 1.0, %v8281_v15  ;;  %6364 = vpow2.f32 %v4250_v14  ;;  %v4237_v61 = vsub.f32 0.0, %v4221_v6  ;;  %v8285_v24 = vadd.f32 %v4148_v52, %v8243_v29 }
0x133e   :  { %v6357_v50 = vpop.eup %6356  ;;  %6366 = vrcp.f32 %v4274_v49  ;;  %v8288_v19 = vadd.f32 %v4167_v31, %v8245_v11  ;;  %v4262_v9 = vmul.f32 1.442695, %v4236_v4 }
0x133f   :  { %v6359_v2 = vpop.eup %6358  ;;  %6368 = vrcp.f32 %v4275_v43  ;;  %v4280_v53 = vadd.f32 1.0, %v6357_v50  ;;  %v4218_v17 = vand.u32 2147483647, %v8285_v24  ;;  %v4264_v13 = vmul.f32 1.442695, %v4237_v61  ;;  %v4188_v12 = vpop.f32.mrf.mxu0 }
0x1340   :  { %v6361_v36 = vpop.eup %6360  ;;  %6370 = vpow2.f32 %v4252_v47  ;;  %v4219_v22 = vand.u32 2147483647, %v8288_v19  ;;  %v4324_v30 = vmul.f32 %v6359_v2, %v6349_v18  ;;  %v4207_v35 = vpop.f32.mrf.mxu1  ;;  %v8299_v18 = vadd.f32 %v4188_v12, %v8233_v38 }
0x1341   :  { %v6363_v40 = vpop.eup %6362  ;;  %6372 = vrcp.f32 %v4280_v53  ;;  %v4234_v3 = vsub.f32 0.0, %v4218_v17  ;;  %v4325_v34 = vmul.f32 %v6361_v36, %v6351_v8  ;;  %v8306_v63 = vadd.f32 %v4207_v35, %v8235_v21 }
0x1342   :  { %v4281_v55 = vadd.f32 1.0, %v6363_v40  ;;  %6374 = vpow2.f32 %v4262_v9  ;;  %v4235_v25 = vsub.f32 0.0, %v4219_v22  ;;  %v4340_v7 = vsel %vm4308_vm0, %v6359_v2, %v4324_v30 }
0x1343   :  { %v6365_v46 = vpop.eup %6364  ;;  %v4258_v33 = vmul.f32 1.442695, %v4234_v3  ;;  %v4341_v0 = vsel %vm4309_vm3, %v6361_v36, %v4325_v34  ;;  %v4224_v38 = vand.u32 2147483647, %v8299_v18  ;;  %v4356_v43 = vmul.f32 %v4340_v7, %v8238_v39 }
0x1344   :  { %v6367_v28 = vpop.eup %6366  ;;  %6376 = vrcp.f32 %v4281_v55  ;;  %v4278_v16 = vadd.f32 1.0, %v6365_v46  ;;  %v4150_v8 = vpop.f32.mrf.mxu2  ;;  %v4260_v4 = vmul.f32 1.442695, %v4235_v25  ;;  %v4357_v21 = vmul.f32 %v4341_v0, %v8241_v54 }
0x1345   :  { %v6369_v45 = vpop.eup %6368  ;;  %6378 = vpow2.f32 %v4264_v13  ;;  %v4322_v14 = vmul.f32 %v6367_v28, %v6353_v5  ;;  %v4169_v49 = vpop.f32.mrf.mxu3  ;;  %v8311_v52 = vadd.f32 %v4150_v8, %v8243_v29  ;;  %v4240_v5 = vsub.f32 0.0, %v4224_v38 }
0x1346   :  { %v6371_v20 = vpop.eup %6370  ;;  %6380 = vrcp.f32 %v4278_v16  ;;  %v4323_v2 = vmul.f32 %v6369_v45, %v8281_v15  ;;  %v4225_v53 = vand.u32 2147483647, %v8306_v63  ;;  %v8323_v29 = vadd.f32 %v4169_v49, %v8245_v11 }
0x1347   :  { %v6373_v23 = vpop.eup %6372  ;;  %v4279_v6 = vadd.f32 1.0, %v6371_v20  ;;  %6382 = vpow2.f32 %v4258_v33  ;;  %v4338_v39 = vsel %vm4306_vm4, %v6367_v28, %v4322_v14  ;;  %v4270_v36 = vmul.f32 1.442695, %v4240_v5 }
0x1348   :  { %v4328_v47 = vmul.f32 %v6373_v23, %v6357_v50  ;;  %v8313_v31 = vpop.eup %6374  ;;  %v4241_v13 = vsub.f32 0.0, %v4225_v53  ;;  %v4222_v3 = vand.u32 2147483647, %v8311_v52  ;;  %v4354_v12 = vmul.f32 %v4338_v39, %v8250_v10 }
0x1349   :  { %6384 = vrcp.f32 %v4279_v6  ;;  %v4284_v15 = vadd.f32 1.0, %v8313_v31  ;;  %v4223_v8 = vand.u32 2147483647, %v8323_v29  ;;  %vm4320_vm12 = vcmp.ge.f32.partialorder %v8299_v18, 0.0 }
0x134a   :  { %v6377_v61 = vpop.eup %6376  ;;  %v4344_v50 = vsel %vm4312_vm7, %v6373_v23, %v4328_v47  ;;  %6386 = vpow2.f32 %v4260_v4  ;;  %v4272_v35 = vmul.f32 1.442695, %v4241_v13  ;;  %v4238_v25 = vsub.f32 0.0, %v4222_v3 }
0x134b   :  { %v8325_v9 = vpop.eup %6378  ;;  %v4360_v54 = vmul.f32 %v4344_v50, %v8258_v32  ;;  %v4329_v17 = vmul.f32 %v6377_v61, %v6363_v40  ;;  %6388 = vpow2.f32 %v4270_v36  ;;  %v4339_v32 = vsel %vm4307_vm6, %v6369_v45, %v4323_v2 }
0x134c   :  { %v6381_v22 = vpop.eup %6380  ;;  %v4285_v33 = vadd.f32 1.0, %v8325_v9  ;;  %6390 = vrcp.f32 %v4284_v15  ;;  %v4266_v45 = vmul.f32 1.442695, %v4238_v25  ;;  %v4355_v49 = vmul.f32 %v4339_v32, %v8253_v1 }
0x134d   :  { %v4372_v30 = vpack.c.bf16 %v4360_v54, %v4356_v43  ;;  %v4345_v11 = vsel %vm4313_vm8, %v6377_v61, %v4329_v17  ;;  %v4326_v34 = vmul.f32 %v6381_v22, %v6365_v46  ;;  %v6383_v55 = vpop.eup %6382  ;;  %6392 = vpow2.f32 %v4272_v35 }
0x134e   :  { %v4361_v40 = vmul.f32 %v4345_v11, %v8261_v59  ;;  %v4282_v0 = vadd.f32 1.0, %v6383_v55  ;;  %v4239_v59 = vsub.f32 0.0, %v4223_v8  ;;  %6394 = vpow2.f32 %v4266_v45 }
0x134f   :  { %v6385_v28 = vpop.eup %6384  ;;  %v4342_v16 = vsel %vm4310_vm9, %v6381_v22, %v4326_v34  ;;  %4619 = vmatmul.bf16.vlgmr.msrb.gmra.mxu0 %v4372_v30  ;;  %6396 = vrcp.f32 %v4285_v33  ;;  %vm4314_vm14 = vcmp.ge.f32.partialorder %v8285_v24, 0.0  ;;  %vm4321_vm15 = vcmp.ge.f32.partialorder %v8306_v63, 0.0 }
0x1350   :  { %v4373_v46 = vpack.c.bf16 %v4361_v40, %v4357_v21  ;;  %v4358_v7 = vmul.f32 %v4342_v16, %v8266_v26  ;;  %v4327_v10 = vmul.f32 %v6385_v28, %v6371_v20  ;;  %v6387_v23 = vpop.eup %6386  ;;  %v4268_v4 = vmul.f32 1.442695, %v4239_v59 }
0x1351   :  { %v6389_v38 = vpop.eup %6388  ;;  %6398 = vrcp.f32 %v4282_v0  ;;  %v4283_v43 = vadd.f32 1.0, %v6387_v23  ;;  %vm4318_vm1 = vcmp.ge.f32.partialorder %v8311_v52, 0.0  ;;  %vm4315_vm2 = vcmp.ge.f32.partialorder %v8288_v19, 0.0 }
0x1352   :  { %v4370_v14 = vpack.c.bf16 %v4358_v7, %v4354_v12  ;;  %v4343_v6 = vsel %vm4311_vm10, %v6385_v28, %v4327_v10  ;;  %4638 = vmatmul.bf16.vlgmr.msra.gmra.mxu1 %v4373_v46  ;;  %v4288_v26 = vadd.f32 1.0, %v6389_v38  ;;  %v6391_v21 = vpop.eup %6390  ;;  %vm4319_vm5 = vcmp.ge.f32.partialorder %v8323_v29, 0.0 }
0x1353   :  { %v4359_v47 = vmul.f32 %v4343_v6, %v8269_v27  ;;  %v6393_v5 = vpop.eup %6392  ;;  %v4332_v50 = vmul.f32 %v6391_v21, %v8313_v31 }
0x1354   :  { %4581 = vmatmul.bf16.vlgmr.msrb.gmra.mxu2 %v4370_v14  ;;  %6400 = vrcp.f32 %v4288_v26  ;;  %v4289_v61 = vadd.f32 1.0, %v6393_v5  ;;  %v6395_v2 = vpop.eup %6394 }
0x1355   :  { %v4371_v20 = vpack.c.bf16 %v4359_v47, %v4355_v49  ;;  %6402 = vpow2.f32 %v4268_v4  ;;  %v6397_v1 = vpop.eup %6396  ;;  %v4286_v27 = vadd.f32 1.0, %v6395_v2  ;;  %v4348_v17 = vsel %vm4316_vm11, %v6391_v21, %v4332_v50 }
0x1356   :  { %6404 = vrcp.f32 %v4283_v43  ;;  %v4333_v36 = vmul.f32 %v6397_v1, %v8325_v9  ;;  %v4364_v11 = vmul.f32 %v4348_v17, %v8274_v58 }
0x1357   :  { %4600 = vmatmul.bf16.vlgmr.msrb.gmra.mxu3 %v4371_v20  ;;  %6406 = vrcp.f32 %v4289_v61  ;;  %v6399_v53 = vpop.eup %6398 }
0x1358   :  { %6408 = vrcp.f32 %v4286_v27  ;;  %v4330_v3 = vmul.f32 %v6399_v53, %v6383_v55  ;;  %v4349_v12 = vsel %vm4317_vm13, %v6397_v1, %v4333_v36 }
0x1359   :  { %v4365_v33 = vmul.f32 %v4349_v12, %v8277_v62 }
0x135a   :  { %v6401_v39 = vpop.eup %6400  ;;  %v4346_v35 = vsel %vm4314_vm14, %v6399_v53, %v4330_v3 }
0x135b   :  { %v6403_v54 = vpop.eup %6402  ;;  %v4336_v22 = vmul.f32 %v6401_v39, %v6389_v38  ;;  %v4362_v8 = vmul.f32 %v4346_v35, %v8285_v24  ;;  %v6047_v24 = vld [vmem:[%s7242_s4] ss:$0 sm:$0xff]  ;;  %s4767_s4 = sshll.u32 %s7257_s30, 4  ;;  %s4768_s4 = int_to_ptr.hbm [resolvable:$true] %s4767_s4 }
0x135c   :  { %v4287_v15 = vadd.f32 1.0, %v6403_v54  ;;  %v6405_v13 = vpop.eup %6404  ;;  %s6940_s21 = sshra.s32 %s4768_s4, 4  ;;  %s6941_s21 = int_to_ptr.hbm [resolvable:$true] %s6940_s21 }
0x135d   :  { %v4352_v31 = vsel %vm4320_vm12, %v6401_v39, %v4336_v22  ;;  %v6407_v30 = vpop.eup %6406  ;;  %v4331_v28 = vmul.f32 %v6405_v13, %v6387_v23  ;;  %s6942_s28 = scalar_lea.hbm %s6941_s21, 32  ;;  %p6945_p8 = scmp.lt.s32.totalorder %s6941_s21, %s7257_s30 }
0x135e   :  { %v4368_v34 = vmul.f32 %v4352_v31, %v8299_v18  ;;  %6410 = vrcp.f32 %v4287_v15  ;;  %v4337_v32 = vmul.f32 %v6407_v30, %v6393_v5  ;;  %v6409_v40 = vpop.eup %6408  ;;  %p6943_p7 = scmp.ne.s32.totalorder %s6941_s21, %s6942_s28  ;;  %p6946_p9 = scmp.lt.s32.totalorder %s6944_s18, %s6942_s28 }
0x135f   :  { %v4334_v16 = vmul.f32 %v6409_v40, %v6395_v2  ;;  %v4347_v10 = vsel %vm4315_vm2, %v6405_v13, %v4331_v28 }
0x1360   :  { %v4376_v9 = vpack.c.bf16 %v4368_v34, %v4364_v11  ;;  %v4353_v55 = vsel %vm4321_vm15, %v6407_v30, %v4337_v32  ;;  %v4363_v45 = vmul.f32 %v4347_v10, %v8288_v19  ;;  %p6947_p10 = por %p6946_p9, %p6945_p8 }
0x1361   :  { %v4369_v58 = vmul.f32 %v4353_v55, %v8306_v63  ;;  %v4350_v18 = vsel %vm4318_vm1, %v6409_v40, %v4334_v16 }
0x1362   :  { %4624 = vmatmul.bf16.gmra.mxu0 %v4376_v9  ;;  %v4366_v46 = vmul.f32 %v4350_v18, %v8311_v52  ;;  %p6948_p11 = pnand %p6947_p10, %p6943_p7 }
0x1363   :  { %v4377_v7 = vpack.c.bf16 %v4369_v58, %v4365_v33 }
0x1364   :  { %v6411_v25 = vpop.eup %6410  ;;  %v4374_v62 = vpack.c.bf16 %v4366_v46, %v4362_v8 }
0x1365   :  { %v4335_v0 = vmul.f32 %v6411_v25, %v6403_v54  ;;  %4643 = vmatmul.bf16.gmra.mxu1 %v4377_v7 }
0x1366   :  { %4586 = vmatmul.bf16.gmra.mxu2 %v4374_v62 }
0x1367   :  { %v4351_v63 = vsel %vm4319_vm5, %v6411_v25, %v4335_v0 }
0x1368   :  { %v4367_v59 = vmul.f32 %v4351_v63, %v8323_v29 }
0x136a   :  { %v4375_v23 = vpack.c.bf16 %v4367_v59, %v4363_v45 }
0x136c   :  { %4605 = vmatmul.bf16.gmra.mxu3 %v4375_v23 }
0x13cc   :  { %v4620_v38 = vpop.f32.mrf.mxu0 }
0x13cf   :  { %v4639_v47 = vpop.f32.mrf.mxu1 }
0x13d4   :  { %v4622_v29 = vpop.f32.mrf.mxu0 }
0x13d7   :  { %v4582_v14 = vpop.f32.mrf.mxu2  ;;  %v4641_v50 = vpop.f32.mrf.mxu1 }
0x13d8   :  { %v4583_v6 = vadd.f32 %v6047_v24, %v4582_v14 }
0x13da   :  { %v4601_v52 = vpop.f32.mrf.mxu3 }
0x13db   :  { %v4602_v49 = vadd.f32 %v4601_v52, %v4583_v6 }
0x13dd   :  { %v4621_v4 = vadd.f32 %v4620_v38, %v4602_v49 }
0x13df   :  { %v4640_v26 = vadd.f32 %v4639_v47, %v4621_v4  ;;  %v4584_v20 = vpop.f32.mrf.mxu2  ;;  %v4625_v17 = vpop.f32.mrf.mxu0 }
0x13e0   :  { %v4585_v43 = vadd.f32 %v6047_v24, %v4584_v20 }
0x13e1   :  { %v4649_v21 = vmul.f32 0.5, %v4640_v26 }
0x13e2   :  { %v4603_v5 = vpop.f32.mrf.mxu3  ;;  %v4644_v15 = vpop.f32.mrf.mxu1 }
0x13e3   :  { %v4604_v61 = vadd.f32 %v4603_v5, %v4585_v43  ;;  %v4653_v19 = vadd.f32 %v4649_v21, %v8178_v56  ;;  %v6048_v5 = vld [vmem:[%s7247_s8] ss:$0 sm:$0xff]  ;;  %s7048_s8 = smov [#allocation35]  }
0x13e5   :  { %v4623_v2 = vadd.f32 %v4622_v29, %v4604_v61  ;;  %4659 = vadd.xlane.f32.xlu0 %v4653_v19  ;;  %v6049_v29 = vld [vmem:[%s7252_s20] ss:$0 sm:$0xff]  ;;  %s4765_s20 = sshll.u32 %s7048_s8, 4  ;;  %s4766_s20 = int_to_ptr.vmem [resolvable:$true] %s4765_s20 }
0x13e7   :  { %v4642_v1 = vadd.f32 %v4641_v50, %v4623_v2  ;;  %v4627_v32 = vpop.f32.mrf.mxu0 }
0x13e9   :  { %v4650_v27 = vmul.f32 0.5, %v4642_v1  ;;  %v4587_v39 = vpop.f32.mrf.mxu2 }
0x13ea   :  { %v4588_v54 = vadd.f32 %v6047_v24, %v4587_v39 }
0x13eb   :  { %v4654_v53 = vadd.f32 %v4650_v27, %v8182_v37  ;;  %v4646_v37 = vpop.f32.mrf.mxu1 }
0x13ed   :  { %4661 = vadd.xlane.f32.xlu1 %v4654_v53 }
0x13ef   :  { %v4606_v36 = vpop.f32.mrf.mxu3 }
0x13f0   :  { %v4607_v22 = vadd.f32 %v4606_v36, %v4588_v54 }
0x13f1   :  { %v4589_v3 = vpop.f32.mrf.mxu2 }
0x13f2   :  { %v4626_v13 = vadd.f32 %v4625_v17, %v4607_v22  ;;  %v4590_v30 = vadd.f32 %v6047_v24, %v4589_v3 }
0x13f4   :  { %v4645_v31 = vadd.f32 %v4644_v15, %v4626_v13 }
0x13f6   :  { %v4651_v56 = vmul.f32 0.5, %v4645_v31 }
0x13f7   :  { %v4608_v11 = vpop.f32.mrf.mxu3 }
0x13f8   :  { %v4609_v34 = vadd.f32 %v4608_v11, %v4590_v30  ;;  %v4655_v12 = vadd.f32 %v4651_v56, %v8186_v48 }
0x13fa   :  { %v4628_v40 = vadd.f32 %v4627_v32, %v4609_v34  ;;  %4663 = vadd.xlane.f32.xlu2 %v4655_v12 }
0x13fc   :  { %v4647_v9 = vadd.f32 %v4646_v37, %v4628_v40 }
0x13fe   :  { %v4652_v35 = vmul.f32 0.5, %v4647_v9 }
0x1400   :  { %v4656_v28 = vadd.f32 %v4652_v35, %v8190_v44 }
0x1402   :  { %4665 = vadd.xlane.f32.xlu0 %v4656_v28 }
0x1458   :  { %v4660_v55 = vpop.xlane.xlu0 %4659 }
0x1459   :  { %v4667_v16 = vmul.f32 %v4660_v55, %v7632_v57 }
0x145b   :  { %v4671_v33 = vsub.f32 %v4653_v19, %v4667_v16 }
0x145d   :  { %v4675_v58 = vmul.f32 %v4671_v33, %v4671_v33 }
0x145f   :  { %4679 = vadd.xlane.f32.xlu1 %v4675_v58 }
0x1460   :  { %v4662_v18 = vpop.xlane.xlu1 %4661 }
0x1461   :  { %v4668_v25 = vmul.f32 %v4662_v18, %v7632_v57 }
0x1463   :  { %v4672_v8 = vsub.f32 %v4654_v53, %v4668_v25 }
0x1465   :  { %v4676_v48 = vmul.f32 %v4672_v8, %v4672_v8 }
0x1467   :  { %4681 = vadd.xlane.f32.xlu2 %v4676_v48 }
0x146d   :  { %v4664_v46 = vpop.xlane.xlu2 %4663 }
0x146e   :  { %v4669_v7 = vmul.f32 %v4664_v46, %v7632_v57 }
0x1470   :  { %v8373_v10 = vsub.f32 %v4655_v12, %v4669_v7 }
0x1472   :  { %v4677_v44 = vmul.f32 %v8373_v10, %v8373_v10 }
0x1474   :  { %4683 = vadd.xlane.f32.xlu0 %v4677_v44 }
0x1475   :  { %v4666_v0 = vpop.xlane.xlu0 %4665 }
0x1476   :  { %v4670_v62 = vmul.f32 %v4666_v0, %v7632_v57 }
0x1478   :  { %v8378_v63 = vsub.f32 %v4656_v28, %v4670_v62 }
0x147a   :  { %v4678_v45 = vmul.f32 %v8378_v63, %v8378_v63 }
0x147c   :  { %4685 = vadd.xlane.f32.xlu1 %v4678_v45 }
0x14d2   :  { %v4680_v59 = vpop.xlane.xlu1 %4679 }
0x14d3   :  { %v4687_v23 = vmul.f32 %v4680_v59, %v7632_v57 }
0x14d5   :  { %v4691_v24 = vadd.f32 1e-05, %v4687_v23 }
0x14d7   :  { %6412 = vrsqrt.f32 %v4691_v24  ;;  %vm4701_vm3 = vweird.f32 %v4691_v24 }
0x14da   :  { %v4682_v14 = vpop.xlane.xlu2 %4681 }
0x14db   :  { %v4688_v6 = vmul.f32 %v4682_v14, %v7632_v57 }
0x14dd   :  { %v6413_v38 = vpop.eup %6412  ;;  %v4692_v52 = vadd.f32 1e-05, %v4688_v6 }
0x14de   :  { %v4696_v49 = vmul.f32 %v6413_v38, %v4691_v24  ;;  %vm4702_vm0 = vweird.f32 %v6413_v38 }
0x14df   :  { %6414 = vrsqrt.f32 %v4692_v52  ;;  %vm4703_vm4 = vmor %vm4701_vm3, %vm4702_vm0  ;;  %vm4711_vm7 = vweird.f32 %v4692_v52 }
0x14e0   :  { %v4697_v47 = vmul.f32 %v6413_v38, %v4696_v49 }
0x14e2   :  { %v4698_v4 = vmul.f32 0.5, %v4697_v47 }
0x14e4   :  { %v4699_v26 = vsub.f32 1.5, %v4698_v4 }
0x14e5   :  { %v6415_v20 = vpop.eup %6414 }
0x14e6   :  { %v4700_v43 = vmul.f32 %v6413_v38, %v4699_v26  ;;  %v4706_v21 = vmul.f32 %v6415_v20, %v4692_v52  ;;  %vm4712_vm6 = vweird.f32 %v6415_v20 }
0x14e7   :  { %v4684_v50 = vpop.xlane.xlu0 %4683  ;;  %vm4713_vm8 = vmor %vm4711_vm7, %vm4712_vm6 }
0x14e8   :  { %v4704_v61 = vsel %vm4703_vm4, %v6413_v38, %v4700_v43  ;;  %v4707_v19 = vmul.f32 %v6415_v20, %v4706_v21  ;;  %v4689_v27 = vmul.f32 %v4684_v50, %v7632_v57 }
0x14e9   :  { %v4735_v2 = vmul.f32 %v4704_v61, %v4671_v33 }
0x14ea   :  { %v4708_v1 = vmul.f32 0.5, %v4707_v19  ;;  %v4693_v54 = vadd.f32 1e-05, %v4689_v27 }
0x14eb   :  { %v4742_v53 = vmul.f32 %v6048_v5, %v4735_v2 }
0x14ec   :  { %v4709_v39 = vsub.f32 1.5, %v4708_v1  ;;  %6416 = vrsqrt.f32 %v4693_v54  ;;  %vm4721_vm10 = vweird.f32 %v4693_v54 }
0x14ed   :  { %v4749_v17 = vadd.f32 %v6049_v29, %v4742_v53 }
0x14ee   :  { %v4710_v36 = vmul.f32 %v6415_v20, %v4709_v39 }
0x14ef   :  { %v4753_v22 = vadd.f32 %v4749_v17, %v7650_v42  ;;  %v4686_v3 = vpop.xlane.xlu1 %4685 }
0x14f0   :  { %v4714_v15 = vsel %vm4713_vm8, %v6415_v20, %v4710_v36  ;;  %v4690_v31 = vmul.f32 %v4686_v3, %v7632_v57 }
0x14f1   :  { %v4736_v13 = vmul.f32 %v4714_v15, %v4672_v8  ;;  %4757 = vst [vmem:[#allocation35] sm:$0xff] %v4753_v22 }
0x14f2   :  { %v6417_v56 = vpop.eup %6416  ;;  %v4694_v11 = vadd.f32 1e-05, %v4690_v31 }
0x14f3   :  { %v4743_v30 = vmul.f32 %v6048_v5, %v4736_v13  ;;  %v4716_v12 = vmul.f32 %v6417_v56, %v4693_v54  ;;  %vm4722_vm9 = vweird.f32 %v6417_v56 }
0x14f4   :  { %6418 = vrsqrt.f32 %v4694_v11  ;;  %vm4723_vm11 = vmor %vm4721_vm10, %vm4722_vm9  ;;  %vm4731_vm13 = vweird.f32 %v4694_v11 }
0x14f5   :  { %v4750_v34 = vadd.f32 %v6049_v29, %v4743_v30  ;;  %v4717_v32 = vmul.f32 %v6417_v56, %v4716_v12 }
0x14f7   :  { %v4754_v40 = vadd.f32 %v4750_v34, %v7653_v51  ;;  %v4718_v37 = vmul.f32 0.5, %v4717_v32 }
0x14f9   :  { %4758 = vst [vmem:[#allocation35 + $0x8] sm:$0xff] %v4754_v40  ;;  %v4719_v9 = vsub.f32 1.5, %v4718_v37 }
0x14fa   :  { %v6419_v42 = vpop.eup %6418 }
0x14fb   :  { %v4720_v35 = vmul.f32 %v6417_v56, %v4719_v9  ;;  %v4726_v28 = vmul.f32 %v6419_v42, %v4694_v11  ;;  %vm4732_vm12 = vweird.f32 %v6419_v42 }
0x14fc   :  { %vm4733_vm14 = vmor %vm4731_vm13, %vm4732_vm12 }
0x14fd   :  { %v4724_v55 = vsel %vm4723_vm11, %v6417_v56, %v4720_v35  ;;  %v4727_v57 = vmul.f32 %v6419_v42, %v4726_v28 }
0x14fe   :  { %v4737_v16 = vmul.f32 %v4724_v55, %v8373_v10 }
0x14ff   :  { %v4728_v33 = vmul.f32 0.5, %v4727_v57 }
0x1500   :  { %v4744_v58 = vmul.f32 %v6048_v5, %v4737_v16 }
0x1501   :  { %v4729_v18 = vsub.f32 1.5, %v4728_v33 }
0x1502   :  { %v4751_v25 = vadd.f32 %v6049_v29, %v4744_v58 }
0x1503   :  { %v4730_v51 = vmul.f32 %v6419_v42, %v4729_v18 }
0x1504   :  { %v4755_v8 = vadd.f32 %v4751_v25, %v7657_v60 }
0x1505   :  { %v4734_v48 = vsel %vm4733_vm14, %v6419_v42, %v4730_v51 }
0x1506   :  { %v4738_v46 = vmul.f32 %v4734_v48, %v8378_v63  ;;  %4759 = vst [vmem:[#allocation35 + $0x10] sm:$0xff] %v4755_v8 }
0x1508   :  { %v4745_v7 = vmul.f32 %v6048_v5, %v4738_v46 }
0x150a   :  { %v4752_v10 = vadd.f32 %v6049_v29, %v4745_v7 }
0x150c   :  { %v4756_v44 = vadd.f32 %v4752_v10, %v7661_v41 }
0x150e   :  { %4760 = vst [vmem:[#allocation35 + $0x18] sm:$0xff] %v4756_v44 }
0x150f   :  { %6951 = shalt.err (!%p6948_p11)
}
0x1510   :  { %4773 = dma.vmem_to_hbm [thread:$0]  %s4766_s20, 512, %s4768_s4, [#allocation4], %s7017_s15, %s7017_s15, %s7018_s16  }
0x1511   :  { %6974 = dma.done.wait [#allocation4], 512  }
0x1512   :  { %6975 = vsyncadd [#allocation4], 4294966784 }
0x1513   :  { %4778 = vsyncpa [#allocation3], 1 }
0x1514   :  { %4779 = vsyncpa [#allocation6], 1 }
0x1515   :  { %4780 = vsyncpa [#allocation9], 1 }
0x1516   :  { %4781 = vsyncpa [#allocation12], 1 }
0x1517   :  { %4782 = vsyncpa [#allocation15], 1 }
0x1518   :  { %4783 = vsyncpa [#allocation18], 1 }
0x1519   :  { %4784 = vsyncpa [#allocation21], 1 }
0x151a   :  { %4785 = vsyncpa [#allocation24], 1 }
0x151b   :  { %4786 = vsyncpa [#allocation27], 1 }
0x151c   :  { %4787 = vsyncpa [#allocation30], 1 }
0x151d   :  { %4788 = vsyncpa [#allocation33], 1 }
0x151e   :  { %4789 = vsyncpa [#allocation4], 1 }

</bundles_post_ra>
